<compile_context>
chip_gen: v6e
topology: v6e:2x2x1
jax: 0.10.0
libtpu: 0.0.40
codegen_flags: <defaults>
</compile_context>

<pallas_src>
import functools

import jax
import jax.numpy as jnp
from jax.experimental import pallas as pl
from jax.experimental.pallas import tpu as pltpu


# ---------------------------------------------------------------------------
# Host-side helpers (pure JAX, run outside the kernel)
# ---------------------------------------------------------------------------
def _sample_coords(rois, output_size, spatial_scale, sampling_ratio,
                   gamma, sigma, beta, rescale, offset):
    """Continuous sampling coordinates y, x, each of shape (N, Ph*Pw, gh*gw)."""
    Ph, Pw = output_size
    gh = gw = int(sampling_ratio)
    N = rois.shape[0]
    rois = rois.astype(jnp.float32)

    roi_start_w = rois[:, 1] * spatial_scale - 0.5
    roi_start_h = rois[:, 2] * spatial_scale - 0.5
    roi_end_w = rois[:, 3] * spatial_scale - 0.5
    roi_end_h = rois[:, 4] * spatial_scale - 0.5
    roi_w = roi_end_w - roi_start_w
    roi_h = roi_end_h - roi_start_h

    if rescale is not None and rescale.size > 0:
        # TODO(synk): exact rescale/sigma/beta semantics live only in the closed-source
        # CUDA extension; approximated here as scaling the RoI extent about its center.
        f_w = sigma * rescale[:, 0] + beta
        f_h = sigma * rescale[:, 1] + beta
        cx = roi_start_w + 0.5 * roi_w
        cy = roi_start_h + 0.5 * roi_h
        roi_w = roi_w * f_w
        roi_h = roi_h * f_h
        roi_start_w = cx - 0.5 * roi_w
        roi_start_h = cy - 0.5 * roi_h

    bin_w = roi_w / Pw
    bin_h = roi_h / Ph

    if offset is not None and offset.size > 0:
        off_w = gamma * roi_w[:, None, None] * offset[:, 0]   # (N, Ph, Pw)
        off_h = gamma * roi_h[:, None, None] * offset[:, 1]
    else:
        off_w = jnp.zeros((N, Ph, Pw), jnp.float32)
        off_h = jnp.zeros((N, Ph, Pw), jnp.float32)

    ph = jnp.arange(Ph, dtype=jnp.float32)
    pw = jnp.arange(Pw, dtype=jnp.float32)
    iy = jnp.arange(gh, dtype=jnp.float32)
    ix = jnp.arange(gw, dtype=jnp.float32)

    bh = bin_h[:, None, None, None, None]
    bw = bin_w[:, None, None, None, None]
    y = (roi_start_h[:, None, None, None, None]
         + off_h[:, :, :, None, None]
         + ph[None, :, None, None, None] * bh
         + (iy[None, None, None, :, None] + 0.5) * bh / gh)
    x = (roi_start_w[:, None, None, None, None]
         + off_w[:, :, :, None, None]
         + pw[None, None, :, None, None] * bw
         + (ix[None, None, None, None, :] + 0.5) * bw / gw)
    y = jnp.broadcast_to(y, (N, Ph, Pw, gh, gw)).reshape(N, Ph * Pw, gh * gw)
    x = jnp.broadcast_to(x, (N, Ph, Pw, gh, gw)).reshape(N, Ph * Pw, gh * gw)
    return y.astype(jnp.float32), x.astype(jnp.float32)


def _fold_valid_and_clip(y, x, H, W):
    """mmcv bilinear_interpolate boundary handling, folded into the coords.

    Invalid samples (outside [-1, H] x [-1, W]) get the sentinel -10, for which
    the in-kernel tent weight max(0, 1 - |grid - c|) is identically zero.
    """
    valid = (y >= -1.0) & (y <= float(H)) & (x >= -1.0) & (x <= float(W))
    yc = jnp.clip(y, 0.0, float(H - 1))
    xc = jnp.clip(x, 0.0, float(W - 1))
    sentinel = jnp.float32(-10.0)
    return jnp.where(valid, yc, sentinel), jnp.where(valid, xc, sentinel)


def _hw_chunks(HW):
    """Static (offset, size) chunks of the flattened pixel axis."""
    if HW <= 1024:
        return ((0, HW),)
    for c in (1024, 896, 768, 640, 512, 384, 256, 128):
        if HW % c == 0:
            return tuple((i * c, c) for i in range(HW // c))
    return ((0, HW),)


def _group_rois_by_image(batch_idx, coords_all, B, R, P, S2):
    """Pack RoIs of the same image into groups of R (static upper-bound #groups).

    Returns grp_img (G,), coords_g (G, R*P, S2), out_row (N,), G.
    Padded slots get coords = -10 -> zero weights -> zero output rows (dropped).
    """
    N = batch_idx.shape[0]
    G = N // R + B                                       # static upper bound
    order = jnp.argsort(batch_idx)
    b_sorted = batch_idx[order]
    first = jnp.searchsorted(b_sorted, b_sorted, side='left')
    rank = jnp.arange(N, dtype=jnp.int32) - first.astype(jnp.int32)
    counts = jnp.bincount(batch_idx, length=B)
    groups_per_img = (counts + R - 1) // R
    base = jnp.concatenate([jnp.zeros((1,), jnp.int32),
                            jnp.cumsum(groups_per_img)[:-1].astype(jnp.int32)])
    gid = base[b_sorted] + rank // R
    slot = rank % R
    flat_row = (gid * R + slot).astype(jnp.int32)        # row in (G*R, P, ...)

    coords_g = jnp.full((G * R, P, S2), -10.0, jnp.float32)
    coords_g = coords_g.at[flat_row].set(coords_all[order])
    coords_g = coords_g.reshape(G, R * P, S2)
    grp_img = jnp.zeros((G,), jnp.int32).at[gid].set(b_sorted.astype(jnp.int32))
    out_row = jnp.zeros((N,), jnp.int32).at[order].set(flat_row)
    return grp_img, coords_g, out_row, G


# ---------------------------------------------------------------------------
# Pallas kernel
# ---------------------------------------------------------------------------
def _roi_pool_kernel(grp_img_ref, coords_ref, eh_ref, ew_ref, feat_ref, out_ref,
                     *, S, H, W, chunks):
    # grp_img_ref : SMEM (G,) int32 scalar prefetch (used only by the index_maps)
    # coords_ref  : (1, Q, 2*S) f32 packed per-bin sample coords [y | x], already
    #               clamped; invalid/padded samples are -10 (=> zero tent weight)
    # eh_ref      : (H, HW) f32 selector, EH[h, g] = 1 if g // W == h
    # ew_ref      : (W, HW) f32 selector, EW[w, g] = 1 if g %  W == w
    # feat_ref    : (1, HW, C) bf16 feature map of this group's image
    # out_ref     : (1, Q, C) f32
    del grp_img_ref
    coords = coords_ref[0]                               # (Q, 2S)
    Q = coords.shape[0]
    C = out_ref.shape[2]

    h_grid = jax.lax.broadcasted_iota(jnp.int32, (Q, H), 1).astype(jnp.float32)
    w_grid = jax.lax.broadcasted_iota(jnp.int32, (Q, W), 1).astype(jnp.float32)

    # Separable tent weights per sampling point: O(Q*(H+W)) VPU work per sample
    # instead of O(Q*H*W), and no integer div/mod on the pixel grid.
    wys, wxs = [], []
    for s in range(S):
        yc = coords[:, s:s + 1]                          # (Q, 1)
        xc = coords[:, S + s:S + s + 1]                  # (Q, 1)
        wys.append(jnp.maximum(0.0, 1.0 - jnp.abs(h_grid - yc)))   # (Q, H)
        wxs.append(jnp.maximum(0.0, 1.0 - jnp.abs(w_grid - xc)))   # (Q, W)

    acc = jnp.zeros((Q, C), jnp.float32)
    single = len(chunks) == 1
    for c0, csz in chunks:                               # static chunk loop
        if single:
            eh_c = eh_ref[...]
            ew_c = ew_ref[...]
            feat_c = feat_ref[0]
        else:
            eh_c = eh_ref[:, c0:c0 + csz]
            ew_c = ew_ref[:, c0:c0 + csz]
            feat_c = feat_ref[0, c0:c0 + csz, :]
        wsum = None
        for s in range(S):
            # Expand the separable weights onto the flattened pixel grid with two
            # small constant matmuls (the MXU has plenty of slack here); only the
            # product+accumulate touches the full (Q, chunk) grid on the VPU.
            wy_full = jnp.dot(wys[s], eh_c, preferred_element_type=jnp.float32)
            wx_full = jnp.dot(wxs[s], ew_c, preferred_element_type=jnp.float32)
            prod = wy_full * wx_full
            wsum = prod if wsum is None else wsum + prod
        # Bilinear gather + in-bin pooling as one bf16 MXU matmul, f32 accumulate.
        acc = acc + jnp.dot(wsum.astype(feat_c.dtype), feat_c,
                            preferred_element_type=jnp.float32)
    out_ref[0] = (acc * (1.0 / S)).astype(out_ref.dtype)


# ---------------------------------------------------------------------------
# Public wrapper (PyTorch NCHW conventions)
# ---------------------------------------------------------------------------
def general_deform_roi_pool(x, rois, rescale=None, offset=None, output_size=(7, 7),
                            spatial_scale=1.0, sampling_ratio=2, gamma=0.1,
                            sigma=0.5, beta=0.0, rois_per_step=None):
    assert rois.shape[1] == 5, 'RoI must be (idx, x1, y1, x2, y2)!'
    # TODO(synk): sampling_ratio == 0 (per-RoI adaptive sampling grid) not implemented.
    assert int(sampling_ratio) > 0, "only fixed sampling_ratio > 0 is supported"

    B, C, H, W = x.shape
    Ph, Pw = output_size
    N = rois.shape[0]
    S = int(sampling_ratio) ** 2
    P = Ph * Pw
    HW = H * W

    # --- sampling coordinates, validity folded into the coordinates ---
    ys, xs = _sample_coords(rois, output_size, spatial_scale, sampling_ratio,
                            gamma, sigma, beta, rescale, offset)
    ys, xs = _fold_valid_and_clip(ys, xs, H, W)
    coords_all = jnp.concatenate([ys, xs], axis=-1)      # (N, P, 2S), lane-dense pack

    # --- group RoIs by image, R per grid step: fills the MXU (M = R*P) and lets
    #     Pallas skip the per-image feature DMA for consecutive same-image steps ---
    if rois_per_step is None:
        rois_per_step = max(1, min(N, -(-256 // P)))
    R = int(rois_per_step)
    Q = R * P
    batch_idx = rois[:, 0].astype(jnp.int32)
    grp_img, coords_g, out_row, G = _group_rois_by_image(
        batch_idx, coords_all, B, R, P, 2 * S)

    # --- kernel inputs ---
    # Feature map stays bf16 (native MXU operand); accumulation is f32 in-kernel.
    # TODO(synk): for very large H*W the whole-image block should become a windowed
    # manual DMA (memory_space=pl.ANY) of only the RoI's rows; not implemented.
    feat = jnp.transpose(x, (0, 2, 3, 1)).reshape(B, HW, C).astype(jnp.bfloat16)
    g = jnp.arange(HW, dtype=jnp.int32)
    eh = (g[None, :] // W == jnp.arange(H, dtype=jnp.int32)[:, None]).astype(jnp.float32)
    ew = (g[None, :] % W == jnp.arange(W, dtype=jnp.int32)[:, None]).astype(jnp.float32)

    chunks = _hw_chunks(HW)
    max_chunk = max(csz for _, csz in chunks)

    # --- explicit VMEM budget: double-buffered blocks + in-kernel temporaries ---
    est = (2 * HW * C * feat.dtype.itemsize              # feature block
           + 2 * (H + W) * HW * 4                        # EH / EW selectors
           + 2 * Q * 2 * S * 4                           # packed coords
           + 2 * Q * C * 4                               # output block
           + (3 * Q * max_chunk + 2 * Q * C) * 4)        # wsum / wy_full / wx_full / acc
    vmem_limit = int(min(100 << 20, max(32 << 20, 2 * est)))

    kernel = functools.partial(_roi_pool_kernel, S=S, H=H, W=W, chunks=chunks)
    grid_spec = pltpu.PrefetchScalarGridSpec(
        num_scalar_prefetch=1,
        grid=(G,),
        in_specs=[
            pl.BlockSpec((1, Q, 2 * S), lambda n, img: (n, 0, 0)),     # coords
            pl.BlockSpec((H, HW), lambda n, img: (0, 0)),              # EH (constant)
            pl.BlockSpec((W, HW), lambda n, img: (0, 0)),              # EW (constant)
            pl.BlockSpec((1, HW, C), lambda n, img: (img[n], 0, 0)),   # features
        ],
        out_specs=pl.BlockSpec((1, Q, C), lambda n, img: (n, 0, 0)),
    )
    out = pl.pallas_call(
        kernel,
        out_shape=jax.ShapeDtypeStruct((G, Q, C), jnp.float32),
        grid_spec=grid_spec,
        compiler_params=pltpu.CompilerParams(
            dimension_semantics=("parallel",),           # groups are independent
            vmem_limit_bytes=vmem_limit),
    )(grp_img, coords_g, eh, ew, feat)

    out = out.reshape(G * R, P, C)[out_row]              # (N, P, C), original RoI order
    # TODO(synk): the NCHW<->NHWC transposes below are HBM round-trips; accept/emit
    # NHWC from the surrounding model to remove them when integrating.
    return out.reshape(N, Ph, Pw, C).transpose(0, 3, 1, 2).astype(x.dtype)


# ---------------------------------------------------------------------------
# Pure-JAX gather-based reference (mirrors the mmcv CUDA kernel, f32 throughout)
# ---------------------------------------------------------------------------
def _reference(x, rois, rescale, offset, output_size, spatial_scale,
               sampling_ratio, gamma, sigma, beta):
    B, C, H, W = x.shape
    Ph, Pw = output_size
    N = rois.shape[0]
    y, xq = _sample_coords(rois, output_size, spatial_scale, sampling_ratio,
                           gamma, sigma, beta, rescale, offset)
    feat = jnp.transpose(x, (0, 2, 3, 1)).astype(jnp.float32)        # (B, H, W, C)
    b = rois[:, 0].astype(jnp.int32)[:, None, None]                  # (N, 1, 1)

    valid = ((y >= -1.0) & (y <= float(H)) & (xq >= -1.0) & (xq <= float(W)))
    valid = valid.astype(jnp.float32)
    yc = jnp.clip(y, 0.0, float(H - 1))
    xc = jnp.clip(xq, 0.0, float(W - 1))
    y0 = jnp.floor(yc).astype(jnp.int32)
    x0 = jnp.floor(xc).astype(jnp.int32)
    y1 = jnp.minimum(y0 + 1, H - 1)
    x1 = jnp.minimum(x0 + 1, W - 1)
    ly = yc - y0.astype(jnp.float32)
    lx = xc - x0.astype(jnp.float32)
    hy = 1.0 - ly
    hx = 1.0 - lx

    g00 = feat[b, y0, x0]
    g01 = feat[b, y0, x1]
    g10 = feat[b, y1, x0]
    g11 = feat[b, y1, x1]
    val = ((hy * hx)[..., None] * g00 + (hy * lx)[..., None] * g01
           + (ly * hx)[..., None] * g10 + (ly * lx)[..., None] * g11)
    val = val * valid[..., None]
    out = val.mean(axis=2)                                           # (N, P, C)
    return out.reshape(N, Ph, Pw, C).transpose(0, 3, 1, 2)


if __name__ == "__main__":
    key = jax.random.PRNGKey(0)
    k1, k2, k3, k4, k5 = jax.random.split(key, 5)

    B, C, H, W = 2, 32, 16, 16
    N = 8
    output_size = (7, 7)
    spatial_scale = 1.0
    sampling_ratio = 2
    gamma = 0.1
    sigma = 0.5
    beta = 0.0

    x = jax.random.normal(k1, (B, C, H, W), dtype=jnp.float32)
    bidx = jax.random.randint(k2, (N,), 0, B).astype(jnp.float32)
    x1y1 = jax.random.uniform(k3, (N, 2), minval=0.0, maxval=9.0)
    wh = jax.random.uniform(k4, (N, 2), minval=3.0, maxval=7.0)
    rois = jnp.concatenate([bidx[:, None], x1y1, x1y1 + wh], axis=1).astype(jnp.float32)
    offset = 0.2 * jax.random.normal(k5, (N, 2, output_size[0], output_size[1]),
                                     dtype=jnp.float32)
    rescale = None   # matches the module default (rescale=None -> empty tensor)

    out = general_deform_roi_pool(x, rois, rescale, offset, output_size,
                                  spatial_scale, sampling_ratio, gamma, sigma, beta)
    out = jax.block_until_ready(out)
    assert out.shape == (N, C, output_size[0], output_size[1])

    ref = _reference(x, rois, rescale, offset, output_size, spatial_scale,
                     sampling_ratio, gamma, sigma, beta)
    # bf16 feature / weight operands on the MXU -> relaxed tolerance vs f32 reference.
    err = float(jnp.max(jnp.abs(out - ref)))
    assert err < 6e-2, f"max abs err {err}"
    print("KERNEL_OK")
</pallas_src>

<mosaic_0001>
module attributes {stable_mosaic.version = 11 : i64} {
  func.func @_roi_pool_kernel(%arg0: i32, %arg1: memref<3xi32, #tpu.memory_space<smem>>, %arg2: memref<1x294x8xf32, #tpu.memory_space<vmem>>, %arg3: memref<16x256xf32, #tpu.memory_space<vmem>>, %arg4: memref<16x256xf32, #tpu.memory_space<vmem>>, %arg5: memref<1x256x32xbf16, #tpu.memory_space<vmem>>, %arg6: memref<1x294x32xf32, #tpu.memory_space<vmem>>) attributes {dimension_semantics = [#tpu.dimension_semantics<parallel>], iteration_bounds = array<i64: 3>, scalar_prefetch = 1 : i64, scratch_operands = 0 : i64, tpu.core_type = #tpu.core_type<tc>, window_params = [{transform_indices = @transform_0, window_bounds = array<i64: 1, 294, 8>}, {pipeline_mode = #tpu.pipeline_mode<synchronous>, transform_indices = @transform_1, window_bounds = array<i64: 16, 256>}, {pipeline_mode = #tpu.pipeline_mode<synchronous>, transform_indices = @transform_2, window_bounds = array<i64: 16, 256>}, {transform_indices = @transform_3, window_bounds = array<i64: 1, 256, 32>}, {transform_indices = @transform_4, window_bounds = array<i64: 1, 294, 32>}]} {
    %c0 = arith.constant 0 : index
    %c0_0 = arith.constant 0 : index
    %c0_1 = arith.constant 0 : index
    %0 = vector.load %arg2[%c0, %c0_0, %c0_1] : memref<1x294x8xf32, #tpu.memory_space<vmem>>, vector<1x294x8xf32>
    %1 = vector.shape_cast %0 : vector<1x294x8xf32> to vector<294x8xf32>
    %2 = tpu.iota {dimensions = array<i32: 1>} : vector<294x16xi32>
    %3 = arith.sitofp %2 : vector<294x16xi32> to vector<294x16xf32>
    %4 = tpu.iota {dimensions = array<i32: 1>} : vector<294x16xi32>
    %5 = arith.sitofp %4 : vector<294x16xi32> to vector<294x16xf32>
    %6 = vector.extract_strided_slice %1 {offsets = [0, 0], sizes = [294, 1], strides = [1, 1]} : vector<294x8xf32> to vector<294x1xf32>
    %7 = vector.extract_strided_slice %1 {offsets = [0, 4], sizes = [294, 1], strides = [1, 1]} : vector<294x8xf32> to vector<294x1xf32>
    %8 = vector.broadcast %6 : vector<294x1xf32> to vector<294x16xf32>
    %9 = arith.subf %3, %8 : vector<294x16xf32>
    %10 = math.absf %9 : vector<294x16xf32>
    %cst = arith.constant 1.000000e+00 : f32
    %11 = vector.broadcast %cst : f32 to vector<294x16xf32>
    %12 = arith.subf %11, %10 : vector<294x16xf32>
    %cst_2 = arith.constant 0.000000e+00 : f32
    %13 = vector.broadcast %cst_2 : f32 to vector<294x16xf32>
    %14 = arith.maximumf %13, %12 : vector<294x16xf32>
    %15 = vector.broadcast %7 : vector<294x1xf32> to vector<294x16xf32>
    %16 = arith.subf %5, %15 : vector<294x16xf32>
    %17 = math.absf %16 : vector<294x16xf32>
    %cst_3 = arith.constant 1.000000e+00 : f32
    %18 = vector.broadcast %cst_3 : f32 to vector<294x16xf32>
    %19 = arith.subf %18, %17 : vector<294x16xf32>
    %cst_4 = arith.constant 0.000000e+00 : f32
    %20 = vector.broadcast %cst_4 : f32 to vector<294x16xf32>
    %21 = arith.maximumf %20, %19 : vector<294x16xf32>
    %22 = vector.extract_strided_slice %1 {offsets = [0, 1], sizes = [294, 1], strides = [1, 1]} : vector<294x8xf32> to vector<294x1xf32>
    %23 = vector.extract_strided_slice %1 {offsets = [0, 5], sizes = [294, 1], strides = [1, 1]} : vector<294x8xf32> to vector<294x1xf32>
    %24 = vector.broadcast %22 : vector<294x1xf32> to vector<294x16xf32>
    %25 = arith.subf %3, %24 : vector<294x16xf32>
    %26 = math.absf %25 : vector<294x16xf32>
    %cst_5 = arith.constant 1.000000e+00 : f32
    %27 = vector.broadcast %cst_5 : f32 to vector<294x16xf32>
    %28 = arith.subf %27, %26 : vector<294x16xf32>
    %cst_6 = arith.constant 0.000000e+00 : f32
    %29 = vector.broadcast %cst_6 : f32 to vector<294x16xf32>
    %30 = arith.maximumf %29, %28 : vector<294x16xf32>
    %31 = vector.broadcast %23 : vector<294x1xf32> to vector<294x16xf32>
    %32 = arith.subf %5, %31 : vector<294x16xf32>
    %33 = math.absf %32 : vector<294x16xf32>
    %cst_7 = arith.constant 1.000000e+00 : f32
    %34 = vector.broadcast %cst_7 : f32 to vector<294x16xf32>
    %35 = arith.subf %34, %33 : vector<294x16xf32>
    %cst_8 = arith.constant 0.000000e+00 : f32
    %36 = vector.broadcast %cst_8 : f32 to vector<294x16xf32>
    %37 = arith.maximumf %36, %35 : vector<294x16xf32>
    %38 = vector.extract_strided_slice %1 {offsets = [0, 2], sizes = [294, 1], strides = [1, 1]} : vector<294x8xf32> to vector<294x1xf32>
    %39 = vector.extract_strided_slice %1 {offsets = [0, 6], sizes = [294, 1], strides = [1, 1]} : vector<294x8xf32> to vector<294x1xf32>
    %40 = vector.broadcast %38 : vector<294x1xf32> to vector<294x16xf32>
    %41 = arith.subf %3, %40 : vector<294x16xf32>
    %42 = math.absf %41 : vector<294x16xf32>
    %cst_9 = arith.constant 1.000000e+00 : f32
    %43 = vector.broadcast %cst_9 : f32 to vector<294x16xf32>
    %44 = arith.subf %43, %42 : vector<294x16xf32>
    %cst_10 = arith.constant 0.000000e+00 : f32
    %45 = vector.broadcast %cst_10 : f32 to vector<294x16xf32>
    %46 = arith.maximumf %45, %44 : vector<294x16xf32>
    %47 = vector.broadcast %39 : vector<294x1xf32> to vector<294x16xf32>
    %48 = arith.subf %5, %47 : vector<294x16xf32>
    %49 = math.absf %48 : vector<294x16xf32>
    %cst_11 = arith.constant 1.000000e+00 : f32
    %50 = vector.broadcast %cst_11 : f32 to vector<294x16xf32>
    %51 = arith.subf %50, %49 : vector<294x16xf32>
    %cst_12 = arith.constant 0.000000e+00 : f32
    %52 = vector.broadcast %cst_12 : f32 to vector<294x16xf32>
    %53 = arith.maximumf %52, %51 : vector<294x16xf32>
    %54 = vector.extract_strided_slice %1 {offsets = [0, 3], sizes = [294, 1], strides = [1, 1]} : vector<294x8xf32> to vector<294x1xf32>
    %55 = vector.extract_strided_slice %1 {offsets = [0, 7], sizes = [294, 1], strides = [1, 1]} : vector<294x8xf32> to vector<294x1xf32>
    %56 = vector.broadcast %54 : vector<294x1xf32> to vector<294x16xf32>
    %57 = arith.subf %3, %56 : vector<294x16xf32>
    %58 = math.absf %57 : vector<294x16xf32>
    %cst_13 = arith.constant 1.000000e+00 : f32
    %59 = vector.broadcast %cst_13 : f32 to vector<294x16xf32>
    %60 = arith.subf %59, %58 : vector<294x16xf32>
    %cst_14 = arith.constant 0.000000e+00 : f32
    %61 = vector.broadcast %cst_14 : f32 to vector<294x16xf32>
    %62 = arith.maximumf %61, %60 : vector<294x16xf32>
    %63 = vector.broadcast %55 : vector<294x1xf32> to vector<294x16xf32>
    %64 = arith.subf %5, %63 : vector<294x16xf32>
    %65 = math.absf %64 : vector<294x16xf32>
    %cst_15 = arith.constant 1.000000e+00 : f32
    %66 = vector.broadcast %cst_15 : f32 to vector<294x16xf32>
    %67 = arith.subf %66, %65 : vector<294x16xf32>
    %cst_16 = arith.constant 0.000000e+00 : f32
    %68 = vector.broadcast %cst_16 : f32 to vector<294x16xf32>
    %69 = arith.maximumf %68, %67 : vector<294x16xf32>
    %cst_17 = arith.constant 0.000000e+00 : f32
    %70 = vector.broadcast %cst_17 : f32 to vector<294x32xf32>
    %c0_18 = arith.constant 0 : index
    %c0_19 = arith.constant 0 : index
    %71 = vector.load %arg3[%c0_18, %c0_19] : memref<16x256xf32, #tpu.memory_space<vmem>>, vector<16x256xf32>
    %c0_20 = arith.constant 0 : index
    %c0_21 = arith.constant 0 : index
    %72 = vector.load %arg4[%c0_20, %c0_21] : memref<16x256xf32, #tpu.memory_space<vmem>>, vector<16x256xf32>
    %c0_22 = arith.constant 0 : index
    %c0_23 = arith.constant 0 : index
    %c0_24 = arith.constant 0 : index
    %73 = vector.load %arg5[%c0_22, %c0_23, %c0_24] : memref<1x256x32xbf16, #tpu.memory_space<vmem>>, vector<1x256x32xbf16>
    %74 = vector.shape_cast %73 : vector<1x256x32xbf16> to vector<256x32xbf16>
    %cst_25 = arith.constant dense<0.000000e+00> : vector<294x256xf32>
    %75 = tpu.matmul %14, %71, %cst_25 {dimension_numbers = #tpu.dot_dimension_numbers<[1], [0], [0], [1], [0, 0, 1, 1], [], []>} : vector<294x16xf32>, vector<16x256xf32>, vector<294x256xf32> -> vector<294x256xf32>
    %cst_26 = arith.constant dense<0.000000e+00> : vector<294x256xf32>
    %76 = tpu.matmul %21, %72, %cst_26 {dimension_numbers = #tpu.dot_dimension_numbers<[1], [0], [0], [1], [0, 0, 1, 1], [], []>} : vector<294x16xf32>, vector<16x256xf32>, vector<294x256xf32> -> vector<294x256xf32>
    %77 = arith.mulf %75, %76 : vector<294x256xf32>
    %cst_27 = arith.constant dense<0.000000e+00> : vector<294x256xf32>
    %78 = tpu.matmul %30, %71, %cst_27 {dimension_numbers = #tpu.dot_dimension_numbers<[1], [0], [0], [1], [0, 0, 1, 1], [], []>} : vector<294x16xf32>, vector<16x256xf32>, vector<294x256xf32> -> vector<294x256xf32>
    %cst_28 = arith.constant dense<0.000000e+00> : vector<294x256xf32>
    %79 = tpu.matmul %37, %72, %cst_28 {dimension_numbers = #tpu.dot_dimension_numbers<[1], [0], [0], [1], [0, 0, 1, 1], [], []>} : vector<294x16xf32>, vector<16x256xf32>, vector<294x256xf32> -> vector<294x256xf32>
    %80 = arith.mulf %78, %79 : vector<294x256xf32>
    %81 = arith.addf %77, %80 : vector<294x256xf32>
    %cst_29 = arith.constant dense<0.000000e+00> : vector<294x256xf32>
    %82 = tpu.matmul %46, %71, %cst_29 {dimension_numbers = #tpu.dot_dimension_numbers<[1], [0], [0], [1], [0, 0, 1, 1], [], []>} : vector<294x16xf32>, vector<16x256xf32>, vector<294x256xf32> -> vector<294x256xf32>
    %cst_30 = arith.constant dense<0.000000e+00> : vector<294x256xf32>
    %83 = tpu.matmul %53, %72, %cst_30 {dimension_numbers = #tpu.dot_dimension_numbers<[1], [0], [0], [1], [0, 0, 1, 1], [], []>} : vector<294x16xf32>, vector<16x256xf32>, vector<294x256xf32> -> vector<294x256xf32>
    %84 = arith.mulf %82, %83 : vector<294x256xf32>
    %85 = arith.addf %81, %84 : vector<294x256xf32>
    %cst_31 = arith.constant dense<0.000000e+00> : vector<294x256xf32>
    %86 = tpu.matmul %62, %71, %cst_31 {dimension_numbers = #tpu.dot_dimension_numbers<[1], [0], [0], [1], [0, 0, 1, 1], [], []>} : vector<294x16xf32>, vector<16x256xf32>, vector<294x256xf32> -> vector<294x256xf32>
    %cst_32 = arith.constant dense<0.000000e+00> : vector<294x256xf32>
    %87 = tpu.matmul %69, %72, %cst_32 {dimension_numbers = #tpu.dot_dimension_numbers<[1], [0], [0], [1], [0, 0, 1, 1], [], []>} : vector<294x16xf32>, vector<16x256xf32>, vector<294x256xf32> -> vector<294x256xf32>
    %88 = arith.mulf %86, %87 : vector<294x256xf32>
    %89 = arith.addf %85, %88 : vector<294x256xf32>
    %90 = arith.truncf %89 : vector<294x256xf32> to vector<294x256xbf16>
    %cst_33 = arith.constant dense<0.000000e+00> : vector<294x32xf32>
    %91 = tpu.matmul %90, %74, %cst_33 {dimension_numbers = #tpu.dot_dimension_numbers<[1], [0], [0], [1], [0, 0, 1, 1], [], []>} : vector<294x256xbf16>, vector<256x32xbf16>, vector<294x32xf32> -> vector<294x32xf32>
    %92 = arith.addf %70, %91 : vector<294x32xf32>
    %cst_34 = arith.constant 2.500000e-01 : f32
    %93 = vector.broadcast %cst_34 : f32 to vector<294x32xf32>
    %94 = arith.mulf %92, %93 : vector<294x32xf32>
    %c0_35 = arith.constant 0 : index
    %c0_36 = arith.constant 0 : index
    %c0_37 = arith.constant 0 : index
    %95 = vector.load %arg6[%c0_35, %c0_36, %c0_37] : memref<1x294x32xf32, #tpu.memory_space<vmem>>, vector<1x294x32xf32>
    %96 = vector.shape_cast %95 : vector<1x294x32xf32> to vector<294x32xf32>
    %97 = vector.shape_cast %94 : vector<294x32xf32> to vector<1x294x32xf32>
    tpu.vector_store %arg6[%c0_35, %c0_36, %c0_37], %97 {strides = array<i32>} : memref<1x294x32xf32, #tpu.memory_space<vmem>>, vector<1x294x32xf32>,
    return
  }
  func.func @transform_0(%arg0: i32, %arg1: memref<3xi32, #tpu.memory_space<smem>>) -> (i32, i32, i32) {
    %c0_i32 = arith.constant 0 : i32
    %c0_i32_0 = arith.constant 0 : i32
    %c0_i32_1 = arith.constant 0 : i32
    return %arg0, %c0_i32, %c0_i32_0 : i32, i32, i32
  }
  func.func @transform_1(%arg0: i32, %arg1: memref<3xi32, #tpu.memory_space<smem>>) -> (i32, i32) {
    %c0_i32 = arith.constant 0 : i32
    %c0_i32_0 = arith.constant 0 : i32
    %c0_i32_1 = arith.constant 0 : i32
    return %c0_i32, %c0_i32_0 : i32, i32
  }
  func.func @transform_2(%arg0: i32, %arg1: memref<3xi32, #tpu.memory_space<smem>>) -> (i32, i32) {
    %c0_i32 = arith.constant 0 : i32
    %c0_i32_0 = arith.constant 0 : i32
    %c0_i32_1 = arith.constant 0 : i32
    return %c0_i32, %c0_i32_0 : i32, i32
  }
  func.func @transform_3(%arg0: i32, %arg1: memref<3xi32, #tpu.memory_space<smem>>) -> (i32, i32, i32) {
    %0 = arith.index_cast %arg0 : i32 to index
    %1 = memref.load %arg1[%0] : memref<3xi32, #tpu.memory_space<smem>>
    %c0_i32 = arith.constant 0 : i32
    %c0_i32_0 = arith.constant 0 : i32
    %c0_i32_1 = arith.constant 0 : i32
    return %1, %c0_i32, %c0_i32_0 : i32, i32, i32
  }
  func.func @transform_4(%arg0: i32, %arg1: memref<3xi32, #tpu.memory_space<smem>>) -> (i32, i32, i32) {
    %c0_i32 = arith.constant 0 : i32
    %c0_i32_0 = arith.constant 0 : i32
    %c0_i32_1 = arith.constant 0 : i32
    return %arg0, %c0_i32, %c0_i32_0 : i32, i32, i32
  }
}

</mosaic_0001>

<bundles_post_ra>
// kernel: tpu_custom_call.1
= control target key start
LH: loop header
LB: loop body
LE: loop exit
PB: predicated region body
PF: predicated region fallthrough
CT: control target
= control target key end

     0   :  { %s10786_s0 = inlined_call_operand.vmem [shape: s32[3], index: 0, kind: input, shape index: {}]   ;;  %s10787_s1 = inlined_call_operand.vmem [shape: f32[3,294,8], index: 1, kind: input, shape index: {}]   ;;  %s10788_s2 = inlined_call_operand.vmem [shape: f32[16,256], index: 2, kind: input, shape index: {}]   ;;  %s10789_s3 = inlined_call_operand.vmem [shape: f32[16,256], index: 3, kind: input, shape index: {}]   ;;  %s10790_s4 = inlined_call_operand.vmem [shape: bf16[2,256,32], index: 4, kind: input, shape index: {}]   ;;  %s10791_s5 = inlined_call_operand.vmem [shape: f32[3,294,32], index: 5, kind: output, shape index: {}]  }
   0x1   :  { %s10_s20 = sshll.u32 %s10786_s0, 4  ;;  %s11_s20 = int_to_ptr.vmem [resolvable:$true] %s10_s20 }
   0x2   :  { %s7482_s21 = scalar_lea.vmem %s11_s20, 16  ;;  %p7487_p1 = scmp.lt.s32.totalorder %s11_s20, %s11_s20 }
   0x3   :  { %p7483_p0 = scmp.ne.s32.totalorder %s11_s20, %s7482_s21  ;;  %p7488_p2 = scmp.lt.s32.totalorder %s7482_s21, %s7482_s21 }
   0x5   :  { %p7489_p3 = por %p7488_p2, %p7487_p1 }
   0x7   :  { %p7490_p4 = pnand %p7489_p3, %p7483_p0 }
   0x9   :  { %7493 = shalt.err (!%p7490_p4)  }
   0xa   :  { %s7504_s22 = smov [#allocation3]  }
   0xb   :  { %13 = dma.vmem_to_smem %s11_s20, 16, %s7504_s22, [#allocation2] }
   0xc   :  { %7498 = dma.done.wait [#allocation2], 16 }
   0xd   :  { %7499 = vsyncadd [#allocation2], 4294967280 }
   0xe   :  { %15 = sfence }
   0xf   :  { %s7547_s23 = smov 0  }
  0x10 LB: > { %s7553_s0 = sadd.s32 4294967295, %s7502_s23   ;;  %p6886_p5 = scmp.ge.s32.totalorder %s7502_s23, 1  ;;  %s7502_s23 = sphi %s7547_s23, %s21_s23  }
  0x11   : > { %p183_p6 = scmp.lt.s32.totalorder %s7502_s23, 4 }
  0x13   : > { %p184_p7 = pnand %p6886_p5, %p183_p6 }
  0x15   : > { %187 = sbr.rel (%p184_p7) target bundleno = 1385 (0x569), region = 36 }
  0x1a   : > { %p215_p8 = scmp.lt.s32.totalorder %s7553_s0, 2  ;;  %v10792_v0 = vmov 0   ;;  %v10798_v5 = vmov 0.0   ;;  %v7606_v10 = vld [vmem:[%s10788_s2 + $0x18] sm:$0xff]  ;;  %v7611_v11 = vld [vmem:[%s10788_s2 + $0x10] sm:$0xff]  ;;  %v7618_v12 = vld [vmem:[%s10788_s2 + $0x8] sm:$0xff]  ;;  %v270_v45 = vlaneseq }
  0x1b   : > { %7230 = vset.pattern.permute.xlu1 %v10792_v0  ;;  %7229 = vset.pattern.permute.xlu0 %v10792_v0  ;;  %v7632_v15 = vld [vmem:[%s10788_s2] sm:$0xff]  ;;  %v7507_v37 = vmov 4   ;;  %v7754_v44 = vld [vmem:[%s10789_s3 + $0x18] sm:$0xff]  ;;  %vm2718_vm0 = vcmask 130048   ;;  %s10017_s6 = sld [smem:[#allocation3 + %s7553_s0]]  ;;  %vm6776_vm1 = vcmask 261120  }
  0x1c   : > { %s7561_s24 = scalar_select %p215_p8, %s7553_s0, 2  ;;  %2894 = vmatprep.mubr.f32.mxu0 %v10798_v5  ;;  %3002 = vmatprep.mubr.f32.mxu1 %v10798_v5  ;;  %v271_v46 = vand.u32 127, %v270_v45  ;;  %vm6813_vm2 = vcmask 259072  }
  0x1d   : > { %2858 = vmatprep.subr.mxu0 %v7606_v10  ;;  %7206 = vmatprep.subr.mxu1 %v7606_v10 }
  0x1e   : > { %s7210_s25 = smul.u32 296, %s7561_s24  ;;  %2859 = vmatpush1.msra.mxu0 %v7611_v11  ;;  %7208 = vmatpush1.msra.mxu1 %v7611_v11  ;;  %v7764_v47 = vcvt.s32.f32 %v271_v46 }
  0x1f   : > { %2860 = vmatprep.subr.mxu0 %v7618_v12  ;;  %7207 = vmatprep.subr.mxu1 %v7618_v12 }
  0x20   : > { %s7569_s28 = scalar_lea.vmem %s10787_s1, %s7210_s25  ;;  %2861 = vmatpush1.msra.mxu0 %v7632_v15  ;;  %7209 = vmatpush1.msra.mxu1 %v7632_v15  ;;  %s10704_s11 = scalar_lea.vmem %s10791_s5, %s7210_s25 }
  0x21   : > { %v7572_v1 = vld [vmem:[%s7569_s28 + $0x10] sm:$0xff]  ;;  %v7575_v2 = vld [vmem:[%s7569_s28] sm:$0xff]  ;;  %v7580_v3 = vld [vmem:[%s7569_s28 + $0x18] sm:$0xff]  ;;  %3728 = vmatprep.subr.mxu0 %v7606_v10  ;;  %3256 = vmatprep.subr.mxu1 %v7754_v44  ;;  %p221_p9 = scmp.lt.s32.totalorder %s10017_s6, 1 }
  0x22   : > { %285 = vperm.xlu1 %7230, %v7572_v1   ;;  %275 = vperm.xlu0 %7229, %v7575_v2   ;;  %v7583_v4 = vld [vmem:[%s7569_s28 + $0x8] sm:$0xff]  ;;  %v7593_v7 = vld [vmem:[%s7569_s28 + $0x20] sm:$0xff]  ;;  %v7598_v8 = vld [vmem:[%s7569_s28 + $0x38] sm:$0xff] }
  0x23   : > { %v7590_v6 = vld [vmem:[%s7569_s28 + $0x28] sm:$0xff]  ;;  %v7601_v9 = vld [vmem:[%s7569_s28 + $0x30] sm:$0xff]  ;;  %v7624_v14 = vld [vmem:[%s7569_s28 + $0x40] sm:$0xff]  ;;  %s11304_s6 = smov (!%p221_p9, %s10017_s6), 1 }
  0x24   : > { %v7621_v13 = vld [vmem:[%s7569_s28 + $0x48] sm:$0xff]  ;;  %v7640_v16 = vld [vmem:[%s7569_s28 + $0x58] sm:$0xff]  ;;  %v7643_v17 = vld [vmem:[%s7569_s28 + $0x50] sm:$0xff]  ;;  %s7205_s0 = sshll.u32 %s11304_s6, 7 }
  0x25   : > { %v7651_v18 = vld [vmem:[%s7569_s28 + $0x98] sm:$0xff]  ;;  %v7654_v19 = vld [vmem:[%s7569_s28 + $0x90] sm:$0xff]  ;;  %v7659_v20 = vld [vmem:[%s7569_s28 + $0xa8] sm:$0xff]  ;;  %s10062_s9 = scalar_lea.vmem %s10790_s4, %s7205_s0 }
  0x26   : > { %290 = vperm.xlu1 %7230, %v7580_v3   ;;  %280 = vperm.xlu0 %7229, %v7583_v4   ;;  %v7662_v21 = vld [vmem:[%s7569_s28 + $0xa0] sm:$0xff]  ;;  %v7667_v22 = vld [vmem:[%s7569_s28 + $0xb8] sm:$0xff]  ;;  %v255_v23 = vld [vmem:[%s7569_s28 + $0xb0] sm:$0xff] }
  0x27   : > { %v258_v24 = vld [vmem:[%s7569_s28 + $0xc8] sm:$0xff]  ;;  %v7673_v25 = vld [vmem:[%s7569_s28 + $0xc0] sm:$0xff]  ;;  %v7677_v26 = vld [vmem:[%s7569_s28 + $0xd8] sm:$0xff] }
  0x28   : > { %v7680_v27 = vld [vmem:[%s7569_s28 + $0xd0] sm:$0xff]  ;;  %v7685_v28 = vld [vmem:[%s7569_s28 + $0xe8] sm:$0xff]  ;;  %v261_v29 = vld [vmem:[%s7569_s28 + $0xe0] sm:$0xff] }
  0x29   : > { %v264_v30 = vld [vmem:[%s7569_s28 + $0xf8] sm:$0xff]  ;;  %v7691_v31 = vld [vmem:[%s7569_s28 + $0xf0] sm:$0xff]  ;;  %v7695_v32 = vld [vmem:[%s7569_s28 + $0x108] sm:$0xff] }
  0x2a   : > { %300 = vperm.xlu1 %7230, %v7590_v6   ;;  %295 = vperm.xlu0 %7229, %v7593_v7   ;;  %v7698_v33 = vld [vmem:[%s7569_s28 + $0x100] sm:$0xff]  ;;  %v7703_v34 = vld [vmem:[%s7569_s28 + $0x118] sm:$0xff]  ;;  %v7706_v35 = vld [vmem:[%s7569_s28 + $0x110] sm:$0xff] }
  0x2b   : > { %v7711_v36 = vld [vmem:[%s7569_s28 + $0x120] sm:$0x3f]  ;;  %v7731_v39 = vld [vmem:[%s7569_s28 + $0x68] sm:$0xff]  ;;  %v7734_v40 = vld [vmem:[%s7569_s28 + $0x70] sm:$0xff] }
  0x2c   : > { %v7726_v38 = vld [vmem:[%s7569_s28 + $0x60] sm:$0xff]  ;;  %v7739_v41 = vld [vmem:[%s7569_s28 + $0x78] sm:$0xff]  ;;  %v7747_v43 = vld [vmem:[%s7569_s28 + $0x88] sm:$0xff] }
  0x2d   : > { %v7742_v42 = vld [vmem:[%s7569_s28 + $0x80] sm:$0xff] }
  0x2e   : > { %310 = vperm.xlu1 %7230, %v7598_v8   ;;  %305 = vperm.xlu0 %7229, %v7601_v9  }
  0x32   : > { %320 = vperm.xlu1 %7230, %v7621_v13   ;;  %315 = vperm.xlu0 %7229, %v7624_v14  }
  0x36   : > { %330 = vperm.xlu1 %7230, %v7640_v16   ;;  %325 = vperm.xlu0 %7229, %v7643_v17  }
  0x3a   : > { %370 = vperm.xlu1 %7230, %v7651_v18   ;;  %365 = vperm.xlu0 %7229, %v7654_v19  }
  0x3e   : > { %380 = vperm.xlu1 %7230, %v7659_v20   ;;  %375 = vperm.xlu0 %7229, %v7662_v21  }
  0x42   : > { %390 = vperm.xlu1 %7230, %v7667_v22   ;;  %385 = vperm.xlu0 %7229, %v255_v23  }
  0x46   : > { %400 = vperm.xlu1 %7230, %v258_v24   ;;  %395 = vperm.xlu0 %7229, %v7673_v25  }
  0x4a   : > { %410 = vperm.xlu1 %7230, %v7677_v26   ;;  %405 = vperm.xlu0 %7229, %v7680_v27  }
  0x4e   : > { %420 = vperm.xlu1 %7230, %v7685_v28   ;;  %415 = vperm.xlu0 %7229, %v261_v29  }
  0x52   : > { %430 = vperm.xlu1 %7230, %v264_v30   ;;  %425 = vperm.xlu0 %7229, %v7691_v31  }
  0x56   : > { %440 = vperm.xlu1 %7230, %v7695_v32   ;;  %435 = vperm.xlu0 %7229, %v7698_v33  }
  0x5a   : > { %450 = vperm.xlu1 %7230, %v7703_v34   ;;  %445 = vperm.xlu0 %7229, %v7706_v35  }
  0x5e   : > { %7231 = vset.pattern.permute.xlu1 %v7507_v37  ;;  %455 = vperm.xlu0 %7229, %v7711_v36  }
  0x5f   : > { %607 = vperm.xlu1 %7231, %v7575_v2  }
  0x62   : > { %7232 = vset.pattern.permute.xlu0 %v7507_v37 }
  0x63   : > { %615 = vperm.xlu1 %7231, %v7572_v1   ;;  %611 = vperm.xlu0 %7232, %v7583_v4  }
  0x67   : > { %619 = vperm.xlu1 %7231, %v7580_v3   ;;  %623 = vperm.xlu0 %7232, %v7593_v7  }
  0x6b   : > { %627 = vperm.xlu1 %7231, %v7590_v6   ;;  %631 = vperm.xlu0 %7232, %v7601_v9  }
  0x6f   : > { %635 = vperm.xlu1 %7231, %v7598_v8   ;;  %639 = vperm.xlu0 %7232, %v7624_v14  }
  0x73   : > { %643 = vperm.xlu1 %7231, %v7621_v13   ;;  %647 = vperm.xlu0 %7232, %v7643_v17  }
  0x77   : > { %651 = vperm.xlu1 %7231, %v7640_v16   ;;  %655 = vperm.xlu0 %7232, %v7726_v38  }
  0x7b   : > { %659 = vperm.xlu1 %7231, %v7731_v39   ;;  %663 = vperm.xlu0 %7232, %v7734_v40  }
  0x7f   : > { %667 = vperm.xlu1 %7231, %v7739_v41   ;;  %671 = vperm.xlu0 %7232, %v7742_v42  }
  0x83   : > { %675 = vperm.xlu1 %7231, %v7747_v43   ;;  %679 = vperm.xlu0 %7232, %v7654_v19  }
  0x87   : > { %683 = vperm.xlu1 %7231, %v7651_v18   ;;  %687 = vperm.xlu0 %7232, %v7662_v21  }
  0x8b   : > { %691 = vperm.xlu1 %7231, %v7659_v20   ;;  %695 = vperm.xlu0 %7232, %v255_v23  }
  0x8f   : > { %699 = vperm.xlu1 %7231, %v7667_v22   ;;  %703 = vperm.xlu0 %7232, %v7673_v25  }
  0x93   : > { %707 = vperm.xlu1 %7231, %v258_v24   ;;  %711 = vperm.xlu0 %7232, %v7680_v27  }
  0x97   : > { %715 = vperm.xlu1 %7231, %v7677_v26   ;;  %719 = vperm.xlu0 %7232, %v261_v29  }
  0x9b   : > { %723 = vperm.xlu1 %7231, %v7685_v28   ;;  %727 = vperm.xlu0 %7232, %v7691_v31  }
  0x9d   : > { %v286_v48 = vpop.permute.xlu1 %285  ;;  %v276_v49 = vpop.permute.xlu0 %275 }
  0x9e   : > { %v458_v50 = vsub.f32 %v7764_v47, %v276_v49  ;;  %v460_v51 = vsub.f32 %v7764_v47, %v286_v48 }
  0x9f   : > { %7233 = vset.pattern.permute.xlu1 %v10792_v0  ;;  %731 = vperm.xlu0 %7232, %v264_v30  }
  0xa0   : > { %v495_v52 = vand.u32 2147483647, %v458_v50  ;;  %335 = vperm.xlu1 %7233, %v7726_v38   ;;  %v497_v57 = vand.u32 2147483647, %v460_v51 }
  0xa1   : > { %v291_v53 = vpop.permute.xlu1 %290  ;;  %v281_v54 = vpop.permute.xlu0 %280 }
  0xa2   : > { %v532_v55 = vsub.f32 1.0, %v495_v52  ;;  %v459_v56 = vsub.f32 %v7764_v47, %v281_v54  ;;  %v461_v59 = vsub.f32 %v7764_v47, %v291_v53  ;;  %v534_v23 = vsub.f32 1.0, %v497_v57 }
  0xa3   : > { %735 = vperm.xlu0 %7232, %v7698_v33  }
  0xa4   : > { %v569_v58 = vmax.f32 %v532_v55, 0.0  ;;  %v496_v60 = vand.u32 2147483647, %v459_v56  ;;  %340 = vperm.xlu1 %7233, %v7731_v39   ;;  %v498_v24 = vand.u32 2147483647, %v461_v59  ;;  %v571_v46 = vmax.f32 %v534_v23, 0.0 }
  0xa5   : > { %v301_v61 = vpop.permute.xlu1 %300  ;;  %v296_v62 = vpop.permute.xlu0 %295 }
  0xa6   : > { %v533_v63 = vsub.f32 1.0, %v496_v60  ;;  %v462_v18 = vsub.f32 %v7764_v47, %v296_v62  ;;  %6891 = vmatmul.mubr.msk.f32.vlgmr.msra.gmra.mxu0 %vm2718_vm0, %v569_v58  ;;  %v535_v48 = vsub.f32 1.0, %v498_v24  ;;  %v463_v49 = vsub.f32 %v7764_v47, %v301_v61 }
  0xa7   : > { %2900 = vmatprep.mubr.f32.mxu0 %v10798_v5  ;;  %739 = vperm.xlu0 %7232, %v7695_v32  }
  0xa8   : > { %v570_v29 = vmax.f32 %v533_v63, 0.0  ;;  %345 = vperm.xlu1 %7233, %v7734_v40   ;;  %3729 = vmatpush1.msra.mxu0 %v7611_v11  ;;  %v499_v45 = vand.u32 2147483647, %v462_v18  ;;  %v500_v52 = vand.u32 2147483647, %v463_v49  ;;  %v7508_v63 = vmov 5  }
  0xa9   : > { %v311_v30 = vpop.permute.xlu1 %310  ;;  %v306_v37 = vpop.permute.xlu0 %305  ;;  %3730 = vmatprep.subr.mxu0 %v7618_v12 }
  0xaa   : > { %6892 = vmatmul.mubr.msk.f32.gmra.mxu0 %vm2718_vm0, %v570_v29  ;;  %v536_v12 = vsub.f32 1.0, %v499_v45  ;;  %v464_v51 = vsub.f32 %v7764_v47, %v306_v37  ;;  %v465_v56 = vsub.f32 %v7764_v47, %v311_v30  ;;  %v7509_v29 = vmov 1  }
  0xab   : > { %2906 = vmatprep.mubr.f32.mxu0 %v10798_v5  ;;  %743 = vperm.xlu0 %7232, %v7706_v35   ;;  %v572_v35 = vmax.f32 %v535_v48, 0.0 }
  0xac   : > { %350 = vperm.xlu1 %7233, %v7739_v41   ;;  %3731 = vmatpush1.msra.mxu0 %v7632_v15  ;;  %v573_v54 = vmax.f32 %v536_v12, 0.0  ;;  %v501_v55 = vand.u32 2147483647, %v464_v51  ;;  %v502_v23 = vand.u32 2147483647, %v465_v56  ;;  %v7827_v56 = vld [vmem:[%s10789_s3 + $0x10] sm:$0xff] }
  0xad   : > { %v7789_v11 = vpop.permute.xlu1 %320  ;;  %v316_v50 = vpop.permute.xlu0 %315  ;;  %4672 = vmatprep.subr.mxu0 %v7606_v10  ;;  %v537_v10 = vsub.f32 1.0, %v500_v52 }
  0xae   : > { %6893 = vmatmul.mubr.msk.f32.gmra.mxu0 %vm2718_vm0, %v571_v46  ;;  %v538_v59 = vsub.f32 1.0, %v501_v55  ;;  %v466_v60 = vsub.f32 %v7764_v47, %v316_v50  ;;  %v539_v12 = vsub.f32 1.0, %v502_v23  ;;  %v467_v51 = vsub.f32 %v7764_v47, %v7789_v11 }
  0xaf   : > { %2912 = vmatprep.mubr.f32.mxu0 %v10798_v5  ;;  %747 = vperm.xlu0 %7232, %v7703_v34   ;;  %v574_v18 = vmax.f32 %v537_v10, 0.0 }
  0xb0   : > { %355 = vperm.xlu1 %7233, %v7742_v42   ;;  %v575_v46 = vmax.f32 %v538_v59, 0.0  ;;  %v503_v48 = vand.u32 2147483647, %v466_v60  ;;  %v576_v60 = vmax.f32 %v539_v12, 0.0 }
  0xb1   : > { %v7797_v53 = vpop.permute.xlu1 %330  ;;  %v7799_v15 = vpop.permute.xlu0 %325 }
  0xb2   : > { %6894 = vmatmul.mubr.msk.f32.gmra.mxu0 %vm2718_vm0, %v572_v35  ;;  %v468_v11 = vsub.f32 %v7764_v47, %v7799_v15 }
  0xb3   : > { %2918 = vmatprep.mubr.f32.mxu0 %v10798_v5  ;;  %751 = vperm.xlu0 %7232, %v7711_v36  }
  0xb4   : > { %360 = vperm.xlu1 %7233, %v7747_v43  }
  0xb5   : > { %v371_v57 = vpop.permute.xlu1 %370  ;;  %v366_v58 = vpop.permute.xlu0 %365 }
  0xb6   : > { %v477_v61 = vsub.f32 %v7764_v47, %v371_v57  ;;  %v476_v62 = vsub.f32 %v7764_v47, %v366_v58  ;;  %6895 = vmatmul.mubr.msk.f32.gmra.mxu0 %vm2718_vm0, %v573_v54  ;;  %v540_v57 = vsub.f32 1.0, %v503_v48 }
  0xb7   : > { %2924 = vmatprep.mubr.f32.mxu0 %v10798_v5  ;;  %7235 = vset.pattern.permute.xlu0 %v7508_v63 }
  0xb8   : > { %v513_v24 = vand.u32 2147483647, %v476_v62  ;;  %7234 = vset.pattern.permute.xlu1 %v7509_v29  ;;  %1199 = vperm.xlu0 %7235, %v7575_v2   ;;  %v514_v30 = vand.u32 2147483647, %v477_v61  ;;  %v504_v61 = vand.u32 2147483647, %v467_v51 }
  0xb9   : > { %v381_v37 = vpop.permute.xlu1 %380  ;;  %903 = vperm.xlu1 %7234, %v7575_v2   ;;  %v376_v45 = vpop.permute.xlu0 %375 }
  0xba   : > { %v550_v49 = vsub.f32 1.0, %v513_v24  ;;  %6896 = vmatmul.mubr.msk.f32.gmra.mxu0 %vm2718_vm0, %v574_v18  ;;  %v478_v50 = vsub.f32 %v7764_v47, %v376_v45  ;;  %v551_v54 = vsub.f32 1.0, %v514_v30  ;;  %v479_v2 = vsub.f32 %v7764_v47, %v381_v37  ;;  %v7846_v37 = vld [vmem:[%s10789_s3 + $0x8] sm:$0xff] }
  0xbb   : > { %2930 = vmatprep.mubr.f32.mxu0 %v10798_v5  ;;  %v577_v24 = vmax.f32 %v540_v57, 0.0  ;;  %v505_v30 = vand.u32 2147483647, %v468_v11  ;;  %v541_v48 = vsub.f32 1.0, %v504_v61 }
  0xbc   : > { %v587_v35 = vmax.f32 %v550_v49, 0.0  ;;  %v515_v52 = vand.u32 2147483647, %v478_v50  ;;  %7237 = vset.pattern.permute.xlu0 %v7509_v29  ;;  %v588_v62 = vmax.f32 %v551_v54, 0.0  ;;  %v516_v18 = vand.u32 2147483647, %v479_v2 }
  0xbd   : > { %v391_v55 = vpop.permute.xlu1 %390  ;;  %907 = vperm.xlu1 %7234, %v7583_v4   ;;  %v386_v10 = vpop.permute.xlu0 %385  ;;  %911 = vperm.xlu0 %7237, %v7572_v1   ;;  %v469_v49 = vsub.f32 %v7764_v47, %v7797_v53  ;;  %v7863_v53 = vld [vmem:[%s10789_s3] sm:$0xff]  ;;  %v578_v2 = vmax.f32 %v541_v48, 0.0 }
  0xbe   : > { %6897 = vmatmul.mubr.msk.f32.gmra.mxu0 %vm2718_vm0, %v575_v46  ;;  %6909 = vmatmul.mubr.msk.f32.vlgmr.msra.gmra.mxu1 %vm2718_vm0, %v587_v35  ;;  %v552_v58 = vsub.f32 1.0, %v515_v52  ;;  %v480_v59 = vsub.f32 %v7764_v47, %v386_v10  ;;  %v481_v50 = vsub.f32 %v7764_v47, %v391_v55  ;;  %v542_v35 = vsub.f32 1.0, %v505_v30 }
  0xbf   : > { %2936 = vmatprep.mubr.f32.mxu0 %v10798_v5  ;;  %3008 = vmatprep.mubr.f32.mxu1 %v10798_v5  ;;  %v506_v55 = vand.u32 2147483647, %v469_v49 }
  0xc0   : > { %3257 = vmatpush1.msra.mxu1 %v7827_v56  ;;  %v589_v45 = vmax.f32 %v552_v58, 0.0  ;;  %v517_v46 = vand.u32 2147483647, %v480_v59  ;;  %v518_v10 = vand.u32 2147483647, %v481_v50  ;;  %v579_v58 = vmax.f32 %v542_v35, 0.0 }
  0xc1   : > { %v7837_v23 = vpop.permute.xlu1 %400  ;;  %7236 = vset.pattern.permute.xlu1 %v7508_v63  ;;  %v396_v15 = vpop.permute.xlu0 %395  ;;  %7239 = vset.pattern.permute.xlu0 %v7508_v63  ;;  %v543_v61 = vsub.f32 1.0, %v506_v55 }
  0xc2   : > { %1203 = vperm.xlu1 %7236, %v7583_v4   ;;  %6898 = vmatmul.mubr.msk.f32.gmra.mxu0 %vm2718_vm0, %v576_v60  ;;  %v553_v4 = vsub.f32 1.0, %v516_v18  ;;  %v554_v52 = vsub.f32 1.0, %v517_v46  ;;  %v482_v54 = vsub.f32 %v7764_v47, %v396_v15  ;;  %v483_v18 = vsub.f32 %v7764_v47, %v7837_v23 }
  0xc3   : > { %6910 = vmatmul.mubr.msk.f32.gmra.mxu1 %vm2718_vm0, %v588_v62  ;;  %2942 = vmatprep.mubr.f32.mxu0 %v10798_v5  ;;  %v555_v62 = vsub.f32 1.0, %v518_v10 }
  0xc4   : > { %3014 = vmatprep.mubr.f32.mxu1 %v10798_v5  ;;  %1211 = vperm.xlu0 %7239, %v7580_v3   ;;  %v591_v59 = vmax.f32 %v554_v52, 0.0  ;;  %v519_v60 = vand.u32 2147483647, %v482_v54  ;;  %v520_v46 = vand.u32 2147483647, %v483_v18 }
  0xc5   : > { %v7855_v12 = vpop.permute.xlu1 %410  ;;  %v406_v51 = vpop.permute.xlu0 %405  ;;  %3258 = vmatprep.subr.mxu1 %v7846_v37  ;;  %v592_v23 = vmax.f32 %v555_v62, 0.0 }
  0xc6   : > { %1207 = vperm.xlu1 %7236, %v7572_v1   ;;  %6899 = vmatmul.mubr.msk.f32.gmra.mxu0 %vm2718_vm0, %v577_v24  ;;  %v590_v1 = vmax.f32 %v553_v4, 0.0  ;;  %v484_v30 = vsub.f32 %v7764_v47, %v406_v51  ;;  %v557_v51 = vsub.f32 1.0, %v520_v46  ;;  %v485_v35 = vsub.f32 %v7764_v47, %v7855_v12 }
  0xc7   : > { %6911 = vmatmul.mubr.msk.f32.gmra.mxu1 %vm2718_vm0, %v589_v45  ;;  %2948 = vmatprep.mubr.f32.mxu0 %v10798_v5  ;;  %v580_v45 = vmax.f32 %v543_v61, 0.0 }
  0xc8   : > { %3020 = vmatprep.mubr.f32.mxu1 %v10798_v5  ;;  %1223 = vperm.xlu0 %7239, %v7601_v9   ;;  %v521_v50 = vand.u32 2147483647, %v484_v30  ;;  %v522_v12 = vand.u32 2147483647, %v485_v35 }
  0xc9   : > { %v7870_v57 = vpop.permute.xlu1 %420  ;;  %v416_v11 = vpop.permute.xlu0 %415  ;;  %3259 = vmatpush1.msra.mxu1 %v7863_v53 }
  0xca   : > { %7238 = vset.pattern.permute.xlu1 %v7509_v29  ;;  %6900 = vmatmul.mubr.msk.f32.gmra.mxu0 %vm2718_vm0, %v578_v2  ;;  %v558_v2 = vsub.f32 1.0, %v521_v50  ;;  %v486_v55 = vsub.f32 %v7764_v47, %v416_v11  ;;  %v559_v11 = vsub.f32 1.0, %v522_v12 }
  0xcb   : > { %6912 = vmatmul.mubr.msk.f32.gmra.mxu1 %vm2718_vm0, %v590_v1  ;;  %915 = vperm.xlu1 %7238, %v7580_v3   ;;  %v556_v3 = vsub.f32 1.0, %v519_v60 }
  0xcc   : > { %2954 = vmatprep.mubr.f32.mxu0 %v10798_v5  ;;  %3026 = vmatprep.mubr.f32.mxu1 %v10798_v5 }
  0xcd   : > { %v7881_v15 = vpop.permute.xlu1 %430  ;;  %7242 = vset.pattern.permute.xlu0 %v7509_v29  ;;  %v426_v24 = vpop.permute.xlu0 %425  ;;  %4126 = vmatprep.subr.mxu1 %v7754_v44  ;;  %v593_v4 = vmax.f32 %v556_v3, 0.0  ;;  %v596_v3 = vmax.f32 %v559_v11, 0.0 }
  0xce   : > { %6901 = vmatmul.mubr.msk.f32.gmra.mxu0 %vm2718_vm0, %v579_v58  ;;  %923 = vperm.xlu0 %7242, %v7590_v6   ;;  %v595_v58 = vmax.f32 %v558_v2, 0.0  ;;  %v488_v18 = vsub.f32 %v7764_v47, %v426_v24  ;;  %v489_v46 = vsub.f32 %v7764_v47, %v7881_v15 }
  0xcf   : > { %6913 = vmatmul.mubr.msk.f32.gmra.mxu1 %vm2718_vm0, %v591_v59  ;;  %919 = vperm.xlu1 %7238, %v7593_v7   ;;  %v523_v59 = vand.u32 2147483647, %v486_v55 }
  0xd0   : > { %2960 = vmatprep.mubr.f32.mxu0 %v10798_v5  ;;  %3032 = vmatprep.mubr.f32.mxu1 %v10798_v5  ;;  %v526_v15 = vand.u32 2147483647, %v489_v46 }
  0xd1   : > { %v7892_v48 = vpop.permute.xlu1 %440  ;;  %v7894_v49 = vpop.permute.xlu0 %435  ;;  %v560_v62 = vsub.f32 1.0, %v523_v59 }
  0xd2   : > { %6902 = vmatmul.mubr.msk.f32.gmra.mxu0 %vm2718_vm0, %v580_v45  ;;  %935 = vperm.xlu0 %7242, %v7624_v14   ;;  %v490_v35 = vsub.f32 %v7764_v47, %v7894_v49  ;;  %v563_v49 = vsub.f32 1.0, %v526_v15 }
  0xd3   : > { %6914 = vmatmul.mubr.msk.f32.gmra.mxu1 %vm2718_vm0, %v592_v23  ;;  %7240 = vset.pattern.permute.xlu1 %v7508_v63  ;;  %v597_v45 = vmax.f32 %v560_v62, 0.0  ;;  %v525_v23 = vand.u32 2147483647, %v488_v18 }
  0xd4   : > { %1215 = vperm.xlu1 %7240, %v7593_v7   ;;  %3038 = vmatprep.mubr.f32.mxu1 %v10798_v5  ;;  %v594_v7 = vmax.f32 %v557_v51, 0.0  ;;  %v527_v12 = vand.u32 2147483647, %v490_v35  ;;  %v600_v62 = vmax.f32 %v563_v49, 0.0 }
  0xd5   : > { %v7904_v52 = vpop.permute.xlu1 %450  ;;  %v7906_v54 = vpop.permute.xlu0 %445  ;;  %2966 = vmatprep.mubr.f32.mxu0 %v10798_v5  ;;  %v562_v51 = vsub.f32 1.0, %v525_v23 }
  0xd6   : > { %7245 = vset.pattern.permute.xlu0 %v7508_v63  ;;  %v564_v11 = vsub.f32 1.0, %v527_v12 }
  0xd7   : > { %6915 = vmatmul.mubr.msk.f32.gmra.mxu1 %vm2718_vm0, %v593_v4  ;;  %1235 = vperm.xlu0 %7245, %v7621_v13  }
  0xd8   : > { %1219 = vperm.xlu1 %7240, %v7590_v6   ;;  %3044 = vmatprep.mubr.f32.mxu1 %v10798_v5  ;;  %v487_v6 = vsub.f32 %v7764_v47, %v7870_v57 }
  0xd9   : > { %v7915_v1 = vpop.permute.xlu0 %455 }
  0xda   : > { %v7917_v10 = vpop.permute.xlu1 %607  ;;  %v524_v30 = vand.u32 2147483647, %v487_v6  ;;  %v492_v6 = vsub.f32 %v7764_v47, %v7906_v54  ;;  %v493_v54 = vsub.f32 %v7764_v47, %v7904_v52 }
  0xdb   : > { %6916 = vmatmul.mubr.msk.f32.gmra.mxu1 %vm2718_vm0, %v594_v7  ;;  %1247 = vperm.xlu0 %7245, %v7726_v38   ;;  %v599_v7 = vmax.f32 %v562_v51, 0.0  ;;  %v494_v51 = vsub.f32 %v7764_v47, %v7915_v1  ;;  %v754_v1 = vsub.f32 %v7764_v47, %v7917_v10 }
  0xdc   : > { %7241 = vset.pattern.permute.xlu1 %v7509_v29  ;;  %3050 = vmatprep.mubr.f32.mxu1 %v10798_v5  ;;  %v561_v24 = vsub.f32 1.0, %v524_v30  ;;  %v601_v30 = vmax.f32 %v564_v11, 0.0  ;;  %v530_v52 = vand.u32 2147483647, %v493_v54 }
  0xdd   : > { %927 = vperm.xlu1 %7241, %v7601_v9  }
  0xde   : > { %v7926_v60 = vpop.permute.xlu1 %615  ;;  %v7928_v61 = vpop.permute.xlu0 %611  ;;  %v598_v2 = vmax.f32 %v561_v24, 0.0 }
  0xdf   : > { %6917 = vmatmul.mubr.msk.f32.gmra.mxu1 %vm2718_vm0, %v595_v58  ;;  %7248 = vset.pattern.permute.xlu0 %v7509_v29  ;;  %v491_v58 = vsub.f32 %v7764_v47, %v7892_v48  ;;  %v755_v11 = vsub.f32 %v7764_v47, %v7928_v61  ;;  %v756_v61 = vsub.f32 %v7764_v47, %v7926_v60 }
  0xe0   : > { %3056 = vmatprep.mubr.f32.mxu1 %v10798_v5  ;;  %947 = vperm.xlu0 %7248, %v7640_v16  }
  0xe1   : > { %931 = vperm.xlu1 %7241, %v7598_v8   ;;  %v528_v48 = vand.u32 2147483647, %v491_v58  ;;  %v793_v54 = vand.u32 2147483647, %v756_v61 }
  0xe2   : > { %v7936_v9 = vpop.permute.xlu1 %619  ;;  %v7938_v57 = vpop.permute.xlu0 %623 }
  0xe3   : > { %6918 = vmatmul.mubr.msk.f32.gmra.mxu1 %vm2718_vm0, %v596_v3 }
  0xe4   : > { %3062 = vmatprep.mubr.f32.mxu1 %v10798_v5  ;;  %959 = vperm.xlu0 %7248, %v7734_v40  }
  0xe5   : > { %7243 = vset.pattern.permute.xlu1 %v7508_v63 }
  0xe6   : > { %1227 = vperm.xlu1 %7243, %v7598_v8   ;;  %v7947_v4 = vpop.permute.xlu1 %627  ;;  %v7949_v50 = vpop.permute.xlu0 %631 }
  0xe7   : > { %6919 = vmatmul.mubr.msk.f32.gmra.mxu1 %vm2718_vm0, %v597_v45  ;;  %v529_v45 = vand.u32 2147483647, %v492_v6 }
  0xe8   : > { %3068 = vmatprep.mubr.f32.mxu1 %v10798_v5  ;;  %7251 = vset.pattern.permute.xlu0 %v7508_v63 }
  0xe9   : > { %1259 = vperm.xlu0 %7251, %v7739_v41   ;;  %v566_v46 = vsub.f32 1.0, %v529_v45 }
  0xea   : > { %1231 = vperm.xlu1 %7243, %v7624_v14   ;;  %v7958_v8 = vpop.permute.xlu1 %635  ;;  %v7960_v55 = vpop.permute.xlu0 %639 }
  0xeb   : > { %6920 = vmatmul.mubr.msk.f32.gmra.mxu1 %vm2718_vm0, %v598_v2 }
  0xec   : > { %3074 = vmatprep.mubr.f32.mxu1 %v10798_v5 }
  0xed   : > { %1271 = vperm.xlu0 %7251, %v7654_v19  }
  0xee   : > { %7244 = vset.pattern.permute.xlu1 %v7509_v29  ;;  %v7968_v59 = vpop.permute.xlu1 %643  ;;  %v7970_v14 = vpop.permute.xlu0 %647 }
  0xef   : > { %6921 = vmatmul.mubr.msk.f32.gmra.mxu1 %vm2718_vm0, %v599_v7  ;;  %939 = vperm.xlu1 %7244, %v7621_v13   ;;  %v565_v13 = vsub.f32 1.0, %v528_v48  ;;  %v531_v7 = vand.u32 2147483647, %v494_v51  ;;  %v792_v48 = vand.u32 2147483647, %v755_v11 }
  0xf0   : > { %3080 = vmatprep.mubr.f32.mxu1 %v10798_v5 }
  0xf1   : > { %7254 = vset.pattern.permute.xlu0 %v7509_v29  ;;  %v602_v35 = vmax.f32 %v565_v13, 0.0  ;;  %v568_v58 = vsub.f32 1.0, %v531_v7  ;;  %v829_v45 = vsub.f32 1.0, %v792_v48 }
  0xf2   : > { %v7978_v18 = vpop.permute.xlu1 %651  ;;  %v7980_v3 = vpop.permute.xlu0 %655  ;;  %971 = vperm.xlu0 %7254, %v7747_v43  }
  0xf3   : > { %6922 = vmatmul.mubr.msk.f32.gmra.mxu1 %vm2718_vm0, %v600_v62  ;;  %943 = vperm.xlu1 %7244, %v7643_v17   ;;  %v605_v62 = vmax.f32 %v568_v58, 0.0  ;;  %v866_v51 = vmax.f32 %v829_v45, 0.0 }
  0xf4   : > { %3086 = vmatprep.mubr.f32.mxu1 %v10798_v5 }
  0xf6   : > { %v7988_v23 = vpop.permute.xlu1 %659  ;;  %v7990_v24 = vpop.permute.xlu0 %663  ;;  %983 = vperm.xlu0 %7254, %v7662_v21   ;;  %v603_v21 = vmax.f32 %v566_v46, 0.0 }
  0xf7   : > { %6923 = vmatmul.mubr.msk.f32.gmra.mxu1 %vm2718_vm0, %v601_v30  ;;  %7246 = vset.pattern.permute.xlu1 %v7508_v63 }
  0xf8   : > { %1239 = vperm.xlu1 %7246, %v7643_v17   ;;  %3092 = vmatprep.mubr.f32.mxu1 %v10798_v5  ;;  %v567_v17 = vsub.f32 1.0, %v530_v52 }
  0xfa   : > { %v7999_v2 = vpop.permute.xlu1 %667  ;;  %v8001_v15 = vpop.permute.xlu0 %671  ;;  %7257 = vset.pattern.permute.xlu0 %v7508_v63 }
  0xfb   : > { %6924 = vmatmul.mubr.msk.f32.gmra.mxu1 %vm2718_vm0, %v602_v35  ;;  %1283 = vperm.xlu0 %7257, %v7659_v20   ;;  %v791_v20 = vand.u32 2147483647, %v754_v1  ;;  %v758_v35 = vsub.f32 %v7764_v47, %v7938_v57 }
  0xfc   : > { %1243 = vperm.xlu1 %7246, %v7640_v16   ;;  %3098 = vmatprep.mubr.f32.mxu1 %v10798_v5  ;;  %v604_v16 = vmax.f32 %v567_v17, 0.0  ;;  %v760_v17 = vsub.f32 %v7764_v47, %v7949_v50  ;;  %v761_v50 = vsub.f32 %v7764_v47, %v7958_v8 }
  0xfd   : > { %v795_v57 = vand.u32 2147483647, %v758_v35 }
  0xfe   : > { %v8010_v12 = vpop.permute.xlu1 %675  ;;  %v8012_v49 = vpop.permute.xlu0 %679  ;;  %v797_v58 = vand.u32 2147483647, %v760_v17  ;;  %v798_v48 = vand.u32 2147483647, %v761_v50 }
  0xff   : > { %6925 = vmatmul.mubr.msk.f32.gmra.mxu1 %vm2718_vm0, %v603_v21  ;;  %1295 = vperm.xlu0 %7257, %v7673_v25   ;;  %v828_v25 = vsub.f32 1.0, %v791_v20 }
 0x100   : > { %7247 = vset.pattern.permute.xlu1 %v7509_v29  ;;  %3104 = vmatprep.mubr.f32.mxu1 %v10798_v5 }
 0x101   : > { %951 = vperm.xlu1 %7247, %v7726_v38   ;;  %v865_v13 = vmax.f32 %v828_v25, 0.0 }
 0x102   : > { %v8021_v10 = vpop.permute.xlu1 %683  ;;  %v8023_v6 = vpop.permute.xlu0 %687 }
 0x103   : > { %6926 = vmatmul.mubr.msk.f32.gmra.mxu1 %vm2718_vm0, %v604_v16  ;;  %7260 = vset.pattern.permute.xlu0 %v7509_v29  ;;  %v834_v16 = vsub.f32 1.0, %v797_v58  ;;  %v765_v58 = vsub.f32 %v7764_v47, %v7978_v18 }
 0x104   : > { %3110 = vmatprep.mubr.f32.mxu1 %v10798_v5  ;;  %995 = vperm.xlu0 %7260, %v7667_v22   ;;  %v757_v22 = vsub.f32 %v7764_v47, %v7936_v9 }
 0x105   : > { %955 = vperm.xlu1 %7247, %v7731_v39  }
 0x106   : > { %v8032_v38 = vpop.permute.xlu1 %691  ;;  %v8034_v30 = vpop.permute.xlu0 %695  ;;  %v794_v9 = vand.u32 2147483647, %v757_v22  ;;  %v763_v22 = vsub.f32 %v7764_v47, %v7968_v59 }
 0x107   : > { %6927 = vmatmul.mubr.msk.f32.gmra.mxu1 %vm2718_vm0, %v605_v62 }
 0x108   : > { %3292 = vmatprep.mubr.f32.mxu1 %v10798_v5  ;;  %1007 = vperm.xlu0 %7260, %v7680_v27   ;;  %v830_v27 = vsub.f32 1.0, %v793_v54  ;;  %v831_v7 = vsub.f32 1.0, %v794_v9  ;;  %v764_v9 = vsub.f32 %v7764_v47, %v7970_v14 }
 0x109   : > { %7249 = vset.pattern.permute.xlu1 %v7508_v63 }
 0x10a   : > { %1251 = vperm.xlu1 %7249, %v7731_v39   ;;  %v8043_v60 = vpop.permute.xlu1 %699  ;;  %v8045_v46 = vpop.permute.xlu0 %703  ;;  %v867_v21 = vmax.f32 %v830_v27, 0.0  ;;  %v801_v17 = vand.u32 2147483647, %v764_v9 }
 0x10b   : > { %6928 = vmatmul.mubr.msk.f32.vlgmr.msra.gmra.mxu1 %vm2718_vm0, %v865_v13 }
 0x10c   : > { %3298 = vmatprep.mubr.f32.mxu1 %v10798_v5  ;;  %7263 = vset.pattern.permute.xlu0 %v7508_v63 }
 0x10d   : > { %1307 = vperm.xlu0 %7263, %v7677_v26   ;;  %4127 = vmatpush1.msra.mxu1 %v7827_v56  ;;  %v759_v26 = vsub.f32 %v7764_v47, %v7947_v4 }
 0x10e   : > { %1255 = vperm.xlu1 %7249, %v7734_v40   ;;  %v8055_v39 = vpop.permute.xlu1 %707  ;;  %v8057_v52 = vpop.permute.xlu0 %711  ;;  %4128 = vmatprep.subr.mxu1 %v7846_v37  ;;  %v832_v37 = vsub.f32 1.0, %v795_v57 }
 0x10f   : > { %6929 = vmatmul.mubr.msk.f32.gmra.mxu1 %vm2718_vm0, %v866_v51 }
 0x110   : > { %3304 = vmatprep.mubr.f32.mxu1 %v10798_v5  ;;  %4129 = vmatpush1.msra.mxu1 %v7863_v53  ;;  %v868_v53 = vmax.f32 %v831_v7, 0.0  ;;  %v869_v1 = vmax.f32 %v832_v37, 0.0  ;;  %v800_v7 = vand.u32 2147483647, %v763_v22 }
 0x111   : > { %1319 = vperm.xlu0 %7263, %v7691_v31   ;;  %5070 = vmatprep.subr.mxu1 %v7754_v44  ;;  %v796_v31 = vand.u32 2147483647, %v759_v26 }
 0x112   : > { %7250 = vset.pattern.permute.xlu1 %v7509_v29  ;;  %v8068_v40 = vpop.permute.xlu1 %715  ;;  %v8070_v56 = vpop.permute.xlu0 %719 }
 0x113   : > { %6930 = vmatmul.mubr.msk.f32.gmra.mxu1 %vm2718_vm0, %v867_v21  ;;  %963 = vperm.xlu1 %7250, %v7739_v41   ;;  %v833_v41 = vsub.f32 1.0, %v796_v31 }
 0x114   : > { %3310 = vmatprep.mubr.f32.mxu1 %v10798_v5 }
 0x115   : > { %7266 = vset.pattern.permute.xlu0 %v7509_v29  ;;  %v870_v8 = vmax.f32 %v833_v41, 0.0  ;;  %v8130_v41 = vld [vmem:[%s7569_s28 + $0x98] sm:$0xff] }
 0x116   : > { %v8078_v44 = vpop.permute.xlu1 %723  ;;  %v8080_v4 = vpop.permute.xlu0 %727  ;;  %1019 = vperm.xlu0 %7266, %v7685_v28   ;;  %v762_v28 = vsub.f32 %v7764_v47, %v7960_v55 }
 0x117   : > { %6931 = vmatmul.mubr.msk.f32.gmra.mxu1 %vm2718_vm0, %v868_v53  ;;  %967 = vperm.xlu1 %7250, %v7742_v42  }
 0x118   : > { %3316 = vmatprep.mubr.f32.mxu1 %v10798_v5  ;;  %v799_v55 = vand.u32 2147483647, %v762_v28  ;;  %v838_v28 = vsub.f32 1.0, %v801_v17 }
 0x11a   : > { %v8088_v11 = vpop.permute.xlu0 %731  ;;  %1031 = vperm.xlu0 %7266, %v7698_v33   ;;  %v871_v33 = vmax.f32 %v834_v16, 0.0 }
 0x11b   : > { %6932 = vmatmul.mubr.msk.f32.gmra.mxu1 %vm2718_vm0, %v869_v1  ;;  %7252 = vset.pattern.permute.xlu1 %v7508_v63  ;;  %v336_v20 = vpop.permute.xlu1 %335 }
 0x11c   : > { %v470_v62 = vsub.f32 %v7764_v47, %v336_v20  ;;  %1263 = vperm.xlu1 %7252, %v7742_v42   ;;  %3322 = vmatprep.mubr.f32.mxu1 %v10798_v5  ;;  %v835_v42 = vsub.f32 1.0, %v798_v48  ;;  %v766_v20 = vsub.f32 %v7764_v47, %v7980_v3 }
 0x11e   : > { %v507_v25 = vand.u32 2147483647, %v470_v62  ;;  %v8098_v61 = vpop.permute.xlu0 %735  ;;  %1043 = vperm.xlu0 %7266, %v7703_v34   ;;  %v836_v34 = vsub.f32 1.0, %v799_v55  ;;  %v872_v59 = vmax.f32 %v835_v42, 0.0  ;;  %v803_v42 = vand.u32 2147483647, %v766_v20 }
 0x11f   : > { %6933 = vmatmul.mubr.msk.f32.gmra.mxu1 %vm2718_vm0, %v870_v8  ;;  %v341_v45 = vpop.permute.xlu1 %340  ;;  %v10796_v8 = vmov 2  }
 0x120   : > { %v544_v13 = vsub.f32 1.0, %v507_v25  ;;  %v471_v54 = vsub.f32 %v7764_v47, %v341_v45  ;;  %1267 = vperm.xlu1 %7252, %v7747_v43   ;;  %3328 = vmatprep.mubr.f32.mxu1 %v10798_v5 }
 0x122   : > { %v581_v51 = vmax.f32 %v544_v13, 0.0  ;;  %v508_v35 = vand.u32 2147483647, %v471_v54  ;;  %v8107_v27 = vpop.permute.xlu0 %739  ;;  %7270 = vset.pattern.permute.xlu0 %v7508_v63  ;;  %v8149_v13 = vld [vmem:[%s7569_s28 + $0x8] sm:$0xff]  ;;  %v875_v54 = vmax.f32 %v838_v28, 0.0 }
 0x123   : > { %6934 = vmatmul.mubr.msk.f32.gmra.mxu1 %vm2718_vm0, %v871_v33  ;;  %v346_v57 = vpop.permute.xlu1 %345  ;;  %1331 = vperm.xlu0 %7270, %v7695_v32   ;;  %v873_v32 = vmax.f32 %v836_v34, 0.0  ;;  %v802_v33 = vand.u32 2147483647, %v765_v58 }
 0x124   : > { %v545_v43 = vsub.f32 1.0, %v508_v35  ;;  %v472_v21 = vsub.f32 %v7764_v47, %v346_v57  ;;  %7253 = vset.pattern.permute.xlu1 %v7509_v29  ;;  %6903 = vmatmul.mubr.msk.f32.gmra.mxu0 %vm2718_vm0, %v581_v51  ;;  %v767_v51 = vsub.f32 %v7764_v47, %v7988_v23  ;;  %v768_v57 = vsub.f32 %v7764_v47, %v7990_v24 }
 0x125   : > { %975 = vperm.xlu1 %7253, %v7654_v19   ;;  %3334 = vmatprep.mubr.f32.mxu1 %v10798_v5  ;;  %v837_v19 = vsub.f32 1.0, %v800_v7  ;;  %v839_v9 = vsub.f32 1.0, %v802_v33  ;;  %v10794_v23 = vmov 6   ;;  %v840_v7 = vsub.f32 1.0, %v803_v42 }
 0x126   : > { %v582_v14 = vmax.f32 %v545_v43, 0.0  ;;  %v509_v26 = vand.u32 2147483647, %v472_v21  ;;  %2972 = vmatprep.mubr.f32.mxu0 %v10798_v5  ;;  %v8120_v37 = vpop.permute.xlu0 %743  ;;  %v804_v24 = vand.u32 2147483647, %v767_v51 }
 0x127   : > { %6935 = vmatmul.mubr.msk.f32.gmra.mxu1 %vm2718_vm0, %v872_v59  ;;  %v351_v53 = vpop.permute.xlu1 %350  ;;  %1343 = vperm.xlu0 %7270, %v7711_v36   ;;  %v874_v25 = vmax.f32 %v837_v19, 0.0  ;;  %v8162_v59 = vld [vmem:[%s7569_s28 + $0xa0] sm:$0xff]  ;;  %v877_v58 = vmax.f32 %v840_v7, 0.0 }
 0x128   : > { %v546_v31 = vsub.f32 1.0, %v509_v26  ;;  %v473_v1 = vsub.f32 %v7764_v47, %v351_v53  ;;  %6904 = vmatmul.mubr.msk.f32.gmra.mxu0 %vm2718_vm0, %v582_v14  ;;  %3340 = vmatprep.mubr.f32.mxu1 %v10798_v5  ;;  %v8170_v26 = vld [vmem:[%s7569_s28 + $0x10] sm:$0xff]  ;;  %v876_v53 = vmax.f32 %v839_v9, 0.0  ;;  %v841_v28 = vsub.f32 1.0, %v804_v24 }
 0x129   : > { %979 = vperm.xlu1 %7253, %v8130_v41   ;;  %2978 = vmatprep.mubr.f32.mxu0 %v10798_v5 }
 0x12a   : > { %v583_v50 = vmax.f32 %v546_v31, 0.0  ;;  %v510_v16 = vand.u32 2147483647, %v473_v1  ;;  %v8134_v36 = vpop.permute.xlu0 %747  ;;  %v805_v1 = vand.u32 2147483647, %v768_v57 }
 0x12b   : > { %6936 = vmatmul.mubr.msk.f32.gmra.mxu1 %vm2718_vm0, %v873_v32  ;;  %v356_v62 = vpop.permute.xlu1 %355  ;;  %7274 = vset.pattern.permute.xlu0 %v10796_v8 }
 0x12c   : > { %v547_v18 = vsub.f32 1.0, %v510_v16  ;;  %v474_v48 = vsub.f32 %v7764_v47, %v356_v62  ;;  %6905 = vmatmul.mubr.msk.f32.gmra.mxu0 %vm2718_vm0, %v583_v50  ;;  %3346 = vmatprep.mubr.f32.mxu1 %v10798_v5  ;;  %v7371_v16 = vld [vmem:[%s7569_s28 + $0xa8] sm:$0xff] }
 0x12d   : > { %7255 = vset.pattern.permute.xlu1 %v7508_v63  ;;  %2984 = vmatprep.mubr.f32.mxu0 %v10798_v5 }
 0x12e   : > { %v584_v3 = vmax.f32 %v547_v18, 0.0  ;;  %v511_v55 = vand.u32 2147483647, %v474_v48  ;;  %1275 = vperm.xlu1 %7255, %v8130_v41   ;;  %v8146_v45 = vpop.permute.xlu0 %751  ;;  %1499 = vperm.xlu0 %7274, %v8149_v13   ;;  %v769_v18 = vsub.f32 %v7764_v47, %v7999_v2  ;;  %v8195_v2 = vld [vmem:[%s7569_s28 + $0xb0] sm:$0xff] }
 0x12f   : > { %6937 = vmatmul.mubr.msk.f32.gmra.mxu1 %vm2718_vm0, %v874_v25  ;;  %v361_v22 = vpop.permute.xlu1 %360 }
 0x130   : > { %v548_v35 = vsub.f32 1.0, %v511_v55  ;;  %v475_v34 = vsub.f32 %v7764_v47, %v361_v22  ;;  %6906 = vmatmul.mubr.msk.f32.gmra.mxu0 %vm2718_vm0, %v584_v3  ;;  %3352 = vmatprep.mubr.f32.mxu1 %v10798_v5  ;;  %v8188_v3 = vld [vmem:[%s7569_s28 + $0x28] sm:$0xff]  ;;  %v842_v55 = vsub.f32 1.0, %v805_v1 }
 0x131   : > { %2990 = vmatprep.mubr.f32.mxu0 %v10798_v5 }
 0x132   : > { %v585_v43 = vmax.f32 %v548_v35, 0.0  ;;  %v512_v21 = vand.u32 2147483647, %v475_v34  ;;  %1279 = vperm.xlu1 %7255, %v8162_v59   ;;  %7276 = vset.pattern.permute.xlu0 %v10794_v23  ;;  %v878_v35 = vmax.f32 %v841_v28, 0.0  ;;  %v806_v34 = vand.u32 2147483647, %v769_v18 }
 0x133   : > { %6938 = vmatmul.mubr.msk.f32.gmra.mxu1 %vm2718_vm0, %v875_v54  ;;  %v8167_v14 = vpop.permute.xlu0 %1199  ;;  %1799 = vperm.xlu0 %7276, %v8170_v26   ;;  %v770_v54 = vsub.f32 %v7764_v47, %v8001_v15  ;;  %v8233_v28 = vld [vmem:[%s7569_s28 + $0xb8] sm:$0xff] }
 0x134   : > { %v549_v32 = vsub.f32 1.0, %v512_v21  ;;  %v904_v17 = vpop.permute.xlu1 %903  ;;  %6907 = vmatmul.mubr.msk.f32.gmra.mxu0 %vm2718_vm0, %v585_v43  ;;  %3358 = vmatprep.mubr.f32.mxu1 %v10798_v5  ;;  %v8205_v43 = vld [vmem:[%s7569_s28 + $0x20] sm:$0xff]  ;;  %v879_v21 = vmax.f32 %v842_v55, 0.0 }
 0x135   : > { %v1050_v31 = vsub.f32 %v7764_v47, %v904_v17  ;;  %2996 = vmatprep.mubr.f32.mxu0 %v10798_v5  ;;  %v807_v7 = vand.u32 2147483647, %v770_v54  ;;  %v843_v17 = vsub.f32 1.0, %v806_v34  ;;  %v8246_v55 = vld [vmem:[%s7569_s28 + $0x40] sm:$0xff] }
 0x136   : > { %v586_v19 = vmax.f32 %v549_v32, 0.0  ;;  %7256 = vset.pattern.permute.xlu1 %v7509_v29  ;;  %v7381_v34 = vld [vmem:[%s10788_s2] sm:$0xff] }
 0x137   : > { %v1087_v50 = vand.u32 2147483647, %v1050_v31  ;;  %6939 = vmatmul.mubr.msk.f32.gmra.mxu1 %vm2718_vm0, %v876_v53  ;;  %987 = vperm.xlu1 %7256, %v7371_v16   ;;  %v771_v53 = vsub.f32 %v7764_v47, %v8010_v12  ;;  %v7376_v12 = vld [vmem:[%s10788_s2 + $0x10] sm:$0xff] }
 0x138   : > { %v908_v20 = vpop.permute.xlu1 %907  ;;  %6908 = vmatmul.mubr.msk.f32.gmra.mxu0 %vm2718_vm0, %v586_v19  ;;  %3364 = vmatprep.mubr.f32.mxu1 %v10798_v5  ;;  %v912_v62 = vpop.permute.xlu0 %911  ;;  %v8221_v19 = vld [vmem:[%s7569_s28 + $0x38] sm:$0xff] }
 0x139   : > { %v1124_v48 = vsub.f32 1.0, %v1087_v50  ;;  %v1051_v25 = vsub.f32 %v7764_v47, %v908_v20  ;;  %3764 = vmatprep.mubr.f32.mxu0 %v10798_v5  ;;  %v1052_v33 = vsub.f32 %v7764_v47, %v912_v62  ;;  %1811 = vperm.xlu0 %7276, %v8188_v3   ;;  %v772_v50 = vsub.f32 %v7764_v47, %v8012_v49  ;;  %v7378_v49 = vld [vmem:[%s10788_s2 + $0x8] sm:$0xff] }
 0x13a   : > { %v880_v20 = vmax.f32 %v843_v17, 0.0  ;;  %v808_v62 = vand.u32 2147483647, %v771_v53  ;;  %v7383_v53 = vld [vmem:[%s7569_s28 + $0x58] sm:$0xff] }
 0x13b   : > { %v1161_v42 = vmax.f32 %v1124_v48, 0.0  ;;  %v1088_v22 = vand.u32 2147483647, %v1051_v25  ;;  %6940 = vmatmul.mubr.msk.f32.gmra.mxu1 %vm2718_vm0, %v877_v58  ;;  %991 = vperm.xlu1 %7256, %v8195_v2   ;;  %v1089_v51 = vand.u32 2147483647, %v1052_v33  ;;  %v844_v58 = vsub.f32 1.0, %v807_v7 }
 0x13c   : > { %3370 = vmatprep.mubr.f32.mxu1 %v10798_v5  ;;  %v809_v25 = vand.u32 2147483647, %v772_v50  ;;  %v845_v54 = vsub.f32 1.0, %v808_v62  ;;  %v774_v7 = vsub.f32 %v7764_v47, %v8023_v6  ;;  %v8268_v62 = vld [vmem:[%s7569_s28 + $0xc8] sm:$0xff] }
 0x13d   : > { %v1125_v9 = vsub.f32 1.0, %v1088_v22  ;;  %v8199_v57 = vpop.permute.xlu1 %1203  ;;  %6965 = vmatmul.mubr.msk.f32.vlgmr.msra.gmra.mxu0 %vm2718_vm0, %v1161_v42  ;;  %v1126_v15 = vsub.f32 1.0, %v1089_v51  ;;  %7279 = vset.pattern.permute.xlu0 %v10796_v8  ;;  %v881_v48 = vmax.f32 %v844_v58, 0.0  ;;  %v773_v42 = vsub.f32 %v7764_v47, %v8021_v10  ;;  %v7380_v51 = vld [vmem:[%s7569_s28 + $0xc0] sm:$0xff] }
 0x13e   : > { %3770 = vmatprep.mubr.f32.mxu0 %v10798_v5  ;;  %1511 = vperm.xlu0 %7279, %v8205_v43   ;;  %v846_v10 = vsub.f32 1.0, %v809_v25  ;;  %v882_v58 = vmax.f32 %v845_v54, 0.0 }
 0x13f   : > { %v1162_v24 = vmax.f32 %v1125_v9, 0.0  ;;  %6941 = vmatmul.mubr.msk.f32.gmra.mxu1 %vm2718_vm0, %v878_v35  ;;  %7258 = vset.pattern.permute.xlu1 %v7508_v63  ;;  %v8210_v32 = vpop.permute.xlu0 %1211  ;;  %v1163_v1 = vmax.f32 %v1126_v15, 0.0  ;;  %v810_v50 = vand.u32 2147483647, %v773_v42 }
 0x140   : > { %1287 = vperm.xlu1 %7258, %v8195_v2   ;;  %3376 = vmatprep.mubr.f32.mxu1 %v10798_v5  ;;  %v883_v6 = vmax.f32 %v846_v10, 0.0 }
 0x141   : > { %v8216_v31 = vpop.permute.xlu1 %1207  ;;  %6966 = vmatmul.mubr.msk.f32.gmra.mxu0 %vm2718_vm0, %v1162_v24  ;;  %v847_v54 = vsub.f32 1.0, %v810_v50 }
 0x142   : > { %3776 = vmatprep.mubr.f32.mxu0 %v10798_v5  ;;  %1523 = vperm.xlu0 %7279, %v8221_v19  }
 0x143   : > { %6942 = vmatmul.mubr.msk.f32.gmra.mxu1 %vm2718_vm0, %v879_v21  ;;  %v8227_v16 = vpop.permute.xlu0 %1223  ;;  %4673 = vmatpush1.msra.mxu0 %v7376_v12  ;;  %v7382_v21 = vld [vmem:[%s10788_s2 + $0x18] sm:$0xff] }
 0x144   : > { %1291 = vperm.xlu1 %7258, %v8233_v28   ;;  %3382 = vmatprep.mubr.f32.mxu1 %v10798_v5 }
 0x145   : > { %6967 = vmatmul.mubr.msk.f32.gmra.mxu0 %vm2718_vm0, %v1163_v1  ;;  %4674 = vmatprep.subr.mxu0 %v7378_v49  ;;  %v811_v49 = vand.u32 2147483647, %v774_v7  ;;  %v7387_v7 = vld [vmem:[%s7569_s28 + $0x68] sm:$0xff] }
 0x146   : > { %v916_v18 = vpop.permute.xlu1 %915  ;;  %3782 = vmatprep.mubr.f32.mxu0 %v10798_v5  ;;  %7282 = vset.pattern.permute.xlu0 %v10794_v23 }
 0x147   : > { %v1053_v33 = vsub.f32 %v7764_v47, %v916_v18  ;;  %6943 = vmatmul.mubr.msk.f32.gmra.mxu1 %vm2718_vm0, %v880_v20  ;;  %1823 = vperm.xlu0 %7282, %v8246_v55  }
 0x148   : > { %7259 = vset.pattern.permute.xlu1 %v7509_v29  ;;  %3388 = vmatprep.mubr.f32.mxu1 %v10798_v5 }
 0x149   : > { %v1090_v22 = vand.u32 2147483647, %v1053_v33  ;;  %999 = vperm.xlu1 %7259, %v7380_v51   ;;  %v924_v35 = vpop.permute.xlu0 %923  ;;  %4675 = vmatpush1.msra.mxu0 %v7381_v34  ;;  %v775_v33 = vsub.f32 %v7764_v47, %v8032_v38  ;;  %v848_v51 = vsub.f32 1.0, %v811_v49  ;;  %v776_v38 = vsub.f32 %v7764_v47, %v8034_v30  ;;  %v7388_v49 = vld [vmem:[%s7569_s28 + $0xd8] sm:$0xff] }
 0x14a   : > { %v920_v9 = vpop.permute.xlu1 %919  ;;  %v1055_v15 = vsub.f32 %v7764_v47, %v924_v35  ;;  %5616 = vmatprep.subr.mxu0 %v7382_v21  ;;  %v8295_v21 = vld [vmem:[%s7569_s28 + $0xd0] sm:$0xff] }
 0x14b   : > { %v1127_v24 = vsub.f32 1.0, %v1090_v22  ;;  %v1054_v17 = vsub.f32 %v7764_v47, %v920_v9  ;;  %6944 = vmatmul.mubr.msk.f32.gmra.mxu1 %vm2718_vm0, %v881_v48  ;;  %1835 = vperm.xlu0 %7282, %v7383_v53   ;;  %v8283_v22 = vld [vmem:[%s7569_s28 + $0x50] sm:$0xff]  ;;  %v812_v9 = vand.u32 2147483647, %v775_v33  ;;  %v885_v30 = vmax.f32 %v848_v51, 0.0 }
 0x14c   : > { %3394 = vmatprep.mubr.f32.mxu1 %v10798_v5  ;;  %v1092_v1 = vand.u32 2147483647, %v1055_v15  ;;  %v884_v15 = vmax.f32 %v847_v54, 0.0  ;;  %v7389_v33 = vld [vmem:[%s7569_s28 + $0x70] sm:$0xff] }
 0x14d   : > { %v1164_v12 = vmax.f32 %v1127_v24, 0.0  ;;  %v1091_v20 = vand.u32 2147483647, %v1054_v17  ;;  %1003 = vperm.xlu1 %7259, %v8268_v62   ;;  %v936_v10 = vpop.permute.xlu0 %935  ;;  %v813_v24 = vand.u32 2147483647, %v776_v38  ;;  %v849_v17 = vsub.f32 1.0, %v812_v9 }
 0x14e   : > { %v1129_v25 = vsub.f32 1.0, %v1092_v1  ;;  %v777_v1 = vsub.f32 %v7764_v47, %v8043_v60  ;;  %v1058_v50 = vsub.f32 %v7764_v47, %v936_v10  ;;  %v8320_v10 = vld [vmem:[%s7569_s28 + $0xe0] sm:$0xff] }
 0x14f   : > { %v1128_v18 = vsub.f32 1.0, %v1091_v20  ;;  %6945 = vmatmul.mubr.msk.f32.gmra.mxu1 %vm2718_vm0, %v882_v58  ;;  %v8272_v48 = vpop.permute.xlu1 %1215  ;;  %6968 = vmatmul.mubr.msk.f32.gmra.mxu0 %vm2718_vm0, %v1164_v12  ;;  %v850_v12 = vsub.f32 1.0, %v813_v24  ;;  %v778_v20 = vsub.f32 %v7764_v47, %v8045_v46  ;;  %v779_v24 = vsub.f32 %v7764_v47, %v8055_v39 }
 0x150   : > { %3400 = vmatprep.mubr.f32.mxu1 %v10798_v5  ;;  %3788 = vmatprep.mubr.f32.mxu0 %v10798_v5  ;;  %v1166_v34 = vmax.f32 %v1129_v25, 0.0  ;;  %v814_v54 = vand.u32 2147483647, %v777_v1  ;;  %v1095_v46 = vand.u32 2147483647, %v1058_v50 }
 0x151   : > { %v1165_v42 = vmax.f32 %v1128_v18, 0.0  ;;  %7261 = vset.pattern.permute.xlu1 %v7508_v63  ;;  %7285 = vset.pattern.permute.xlu0 %v10796_v8  ;;  %v886_v18 = vmax.f32 %v849_v17, 0.0  ;;  %v887_v38 = vmax.f32 %v850_v12, 0.0 }
 0x152   : > { %1299 = vperm.xlu1 %7261, %v8268_v62   ;;  %1535 = vperm.xlu0 %7285, %v8283_v22   ;;  %v8314_v25 = vpop.permute.xlu0 %1235  ;;  %v1132_v1 = vsub.f32 1.0, %v1095_v46  ;;  %v781_v46 = vsub.f32 %v7764_v47, %v8068_v40 }
 0x153   : > { %6946 = vmatmul.mubr.msk.f32.gmra.mxu1 %vm2718_vm0, %v883_v6  ;;  %v8289_v35 = vpop.permute.xlu1 %1219  ;;  %6969 = vmatmul.mubr.msk.f32.gmra.mxu0 %vm2718_vm0, %v1165_v42 }
 0x154   : > { %3406 = vmatprep.mubr.f32.mxu1 %v10798_v5  ;;  %3794 = vmatprep.mubr.f32.mxu0 %v10798_v5 }
 0x156   : > { %1303 = vperm.xlu1 %7261, %v8295_v21   ;;  %1547 = vperm.xlu0 %7285, %v7387_v7   ;;  %v7391_v7 = vld [vmem:[%s7569_s28 + $0x88] sm:$0xff]  ;;  %v8333_v50 = vpop.permute.xlu0 %1247 }
 0x157   : > { %6947 = vmatmul.mubr.msk.f32.gmra.mxu1 %vm2718_vm0, %v884_v15  ;;  %6970 = vmatmul.mubr.msk.f32.gmra.mxu0 %vm2718_vm0, %v1166_v34  ;;  %v815_v34 = vand.u32 2147483647, %v778_v20 }
 0x158   : > { %v928_v53 = vpop.permute.xlu1 %927  ;;  %3412 = vmatprep.mubr.f32.mxu1 %v10798_v5  ;;  %3800 = vmatprep.mubr.f32.mxu0 %v10798_v5 }
 0x159   : > { %v1056_v58 = vsub.f32 %v7764_v47, %v928_v53  ;;  %v852_v12 = vsub.f32 1.0, %v815_v34 }
 0x15a   : > { %7262 = vset.pattern.permute.xlu1 %v7509_v29  ;;  %7288 = vset.pattern.permute.xlu0 %v10794_v23 }
 0x15b   : > { %v1093_v6 = vand.u32 2147483647, %v1056_v58  ;;  %6948 = vmatmul.mubr.msk.f32.gmra.mxu1 %vm2718_vm0, %v885_v30  ;;  %1011 = vperm.xlu1 %7262, %v7388_v49   ;;  %v851_v30 = vsub.f32 1.0, %v814_v54  ;;  %v780_v58 = vsub.f32 %v7764_v47, %v8057_v52  ;;  %v1169_v52 = vmax.f32 %v1132_v1, 0.0  ;;  %v8347_v54 = vld [vmem:[%s7569_s28 + $0xe8] sm:$0xff] }
 0x15c   : > { %v932_v60 = vpop.permute.xlu1 %931  ;;  %3418 = vmatprep.mubr.f32.mxu1 %v10798_v5  ;;  %1847 = vperm.xlu0 %7288, %v7389_v33   ;;  %v889_v33 = vmax.f32 %v852_v12, 0.0 }
 0x15d   : > { %v1130_v42 = vsub.f32 1.0, %v1093_v6  ;;  %v1057_v51 = vsub.f32 %v7764_v47, %v932_v60  ;;  %v888_v39 = vmax.f32 %v851_v30, 0.0  ;;  %v816_v6 = vand.u32 2147483647, %v779_v24  ;;  %v7392_v60 = vld [vmem:[%s7569_s28 + $0x80] sm:$0xff] }
 0x15e   : > { %v818_v30 = vand.u32 2147483647, %v781_v46 }
 0x15f   : > { %v1167_v9 = vmax.f32 %v1130_v42, 0.0  ;;  %v1094_v15 = vand.u32 2147483647, %v1057_v51  ;;  %6949 = vmatmul.mubr.msk.f32.gmra.mxu1 %vm2718_vm0, %v886_v18  ;;  %1015 = vperm.xlu1 %7262, %v8320_v10   ;;  %v817_v18 = vand.u32 2147483647, %v780_v58  ;;  %v948_v42 = vpop.permute.xlu0 %947  ;;  %v853_v51 = vsub.f32 1.0, %v816_v6 }
 0x160   : > { %3424 = vmatprep.mubr.f32.mxu1 %v10798_v5  ;;  %1859 = vperm.xlu0 %7288, %v7391_v7   ;;  %v1061_v7 = vsub.f32 %v7764_v47, %v948_v42  ;;  %v783_v6 = vsub.f32 %v7764_v47, %v8078_v44  ;;  %v784_v42 = vsub.f32 %v7764_v47, %v8080_v4 }
 0x161   : > { %v1131_v17 = vsub.f32 1.0, %v1094_v15  ;;  %v8327_v53 = vpop.permute.xlu1 %1227  ;;  %6971 = vmatmul.mubr.msk.f32.gmra.mxu0 %vm2718_vm0, %v1167_v9  ;;  %v782_v9 = vsub.f32 %v7764_v47, %v8070_v56  ;;  %v890_v40 = vmax.f32 %v853_v51, 0.0 }
 0x162   : > { %3806 = vmatprep.mubr.f32.mxu0 %v10798_v5 }
 0x163   : > { %v1168_v20 = vmax.f32 %v1131_v17, 0.0  ;;  %6950 = vmatmul.mubr.msk.f32.gmra.mxu1 %vm2718_vm0, %v887_v38  ;;  %7264 = vset.pattern.permute.xlu1 %v7508_v63  ;;  %v854_v38 = vsub.f32 1.0, %v817_v18  ;;  %v7394_v17 = vld [vmem:[%s7569_s28 + $0xf0] sm:$0xff]  ;;  %v819_v56 = vand.u32 2147483647, %v782_v9 }
 0x164   : > { %1311 = vperm.xlu1 %7264, %v8320_v10   ;;  %3430 = vmatprep.mubr.f32.mxu1 %v10798_v5  ;;  %v821_v9 = vand.u32 2147483647, %v784_v42 }
 0x165   : > { %v8339_v49 = vpop.permute.xlu1 %1231  ;;  %6972 = vmatmul.mubr.msk.f32.gmra.mxu0 %vm2718_vm0, %v1168_v20  ;;  %7291 = vset.pattern.permute.xlu0 %v10796_v8  ;;  %v1098_v20 = vand.u32 2147483647, %v1061_v7 }
 0x166   : > { %3812 = vmatprep.mubr.f32.mxu0 %v10798_v5  ;;  %1559 = vperm.xlu0 %7291, %v7392_v60   ;;  %v8372_v60 = vld [vmem:[%s7569_s28 + $0xf8] sm:$0xff] }
 0x167   : > { %6951 = vmatmul.mubr.msk.f32.gmra.mxu1 %vm2718_vm0, %v888_v39  ;;  %v855_v39 = vsub.f32 1.0, %v818_v30  ;;  %v1135_v46 = vsub.f32 1.0, %v1098_v20 }
 0x168   : > { %1315 = vperm.xlu1 %7264, %v8347_v54   ;;  %3436 = vmatprep.mubr.f32.mxu1 %v10798_v5 }
 0x169   : > { %6973 = vmatmul.mubr.msk.f32.gmra.mxu0 %vm2718_vm0, %v1169_v52  ;;  %v892_v44 = vmax.f32 %v855_v39, 0.0 }
 0x16a   : > { %v940_v34 = vpop.permute.xlu1 %939  ;;  %3818 = vmatprep.mubr.f32.mxu0 %v10798_v5  ;;  %1571 = vperm.xlu0 %7291, %v8130_v41   ;;  %v891_v41 = vmax.f32 %v854_v38, 0.0  ;;  %v820_v38 = vand.u32 2147483647, %v783_v6 }
 0x16b   : > { %v1059_v15 = vsub.f32 %v7764_v47, %v940_v34  ;;  %6952 = vmatmul.mubr.msk.f32.gmra.mxu1 %vm2718_vm0, %v889_v33  ;;  %v856_v33 = vsub.f32 1.0, %v819_v56 }
 0x16c   : > { %7265 = vset.pattern.permute.xlu1 %v7509_v29  ;;  %3442 = vmatprep.mubr.f32.mxu1 %v10798_v5  ;;  %v857_v30 = vsub.f32 1.0, %v820_v38 }
 0x16d   : > { %v1096_v24 = vand.u32 2147483647, %v1059_v15  ;;  %1023 = vperm.xlu1 %7265, %v7394_v17   ;;  %v893_v4 = vmax.f32 %v856_v33, 0.0  ;;  %v785_v15 = vsub.f32 %v7764_v47, %v8088_v11  ;;  %v858_v11 = vsub.f32 1.0, %v821_v9 }
 0x16e   : > { %v944_v1 = vpop.permute.xlu1 %943  ;;  %7294 = vset.pattern.permute.xlu0 %v10794_v23  ;;  %v894_v56 = vmax.f32 %v857_v30, 0.0  ;;  %v787_v33 = vsub.f32 %v7764_v47, %v8107_v27  ;;  %v788_v30 = vsub.f32 %v7764_v47, %v8120_v37 }
 0x16f   : > { %v1133_v58 = vsub.f32 1.0, %v1096_v24  ;;  %v1060_v12 = vsub.f32 %v7764_v47, %v944_v1  ;;  %6953 = vmatmul.mubr.msk.f32.gmra.mxu1 %vm2718_vm0, %v890_v40  ;;  %1871 = vperm.xlu0 %7294, %v8162_v59   ;;  %v1172_v40 = vmax.f32 %v1135_v46, 0.0  ;;  %v960_v24 = vpop.permute.xlu0 %959  ;;  %v822_v17 = vand.u32 2147483647, %v785_v15 }
 0x170   : > { %3448 = vmatprep.mubr.f32.mxu1 %v10798_v5  ;;  %v824_v27 = vand.u32 2147483647, %v787_v33  ;;  %v8465_v33 = vld [vmem:[%s7569_s28 + $0x118] sm:$0xff] }
 0x171   : > { %v1170_v52 = vmax.f32 %v1133_v58, 0.0  ;;  %v1097_v18 = vand.u32 2147483647, %v1060_v12  ;;  %1027 = vperm.xlu1 %7265, %v8372_v60   ;;  %v859_v20 = vsub.f32 1.0, %v822_v17 }
 0x173   : > { %v1134_v51 = vsub.f32 1.0, %v1097_v18  ;;  %6954 = vmatmul.mubr.msk.f32.gmra.mxu1 %vm2718_vm0, %v891_v41  ;;  %v8378_v59 = vpop.permute.xlu1 %1239  ;;  %6974 = vmatmul.mubr.msk.f32.gmra.mxu0 %vm2718_vm0, %v1170_v52  ;;  %v786_v41 = vsub.f32 %v7764_v47, %v8098_v61  ;;  %v895_v61 = vmax.f32 %v858_v11, 0.0  ;;  %v7397_v52 = vld [vmem:[%s7569_s28 + $0x108] sm:$0xff]  ;;  %v896_v38 = vmax.f32 %v859_v20, 0.0 }
 0x174   : > { %3454 = vmatprep.mubr.f32.mxu1 %v10798_v5  ;;  %3824 = vmatprep.mubr.f32.mxu0 %v10798_v5  ;;  %v825_v20 = vand.u32 2147483647, %v788_v30 }
 0x175   : > { %v1171_v34 = vmax.f32 %v1134_v51, 0.0  ;;  %7267 = vset.pattern.permute.xlu1 %v7508_v63  ;;  %1883 = vperm.xlu0 %7294, %v8233_v28   ;;  %v8396_v28 = vld [vmem:[%s7569_s28 + $0x100] sm:$0xff]  ;;  %v823_v39 = vand.u32 2147483647, %v786_v41 }
 0x176   : > { %1323 = vperm.xlu1 %7267, %v8372_v60  }
 0x177   : > { %6955 = vmatmul.mubr.msk.f32.gmra.mxu1 %vm2718_vm0, %v892_v44  ;;  %v8389_v7 = vpop.permute.xlu1 %1243  ;;  %6975 = vmatmul.mubr.msk.f32.gmra.mxu0 %vm2718_vm0, %v1171_v34  ;;  %v8420_v44 = vpop.permute.xlu0 %1259  ;;  %v860_v34 = vsub.f32 1.0, %v823_v39 }
 0x178   : > { %3460 = vmatprep.mubr.f32.mxu1 %v10798_v5  ;;  %3830 = vmatprep.mubr.f32.mxu0 %v10798_v5 }
 0x179   : > { %7297 = vset.pattern.permute.xlu0 %v10796_v8 }
 0x17a   : > { %1327 = vperm.xlu1 %7267, %v8396_v28   ;;  %1583 = vperm.xlu0 %7297, %v8195_v2   ;;  %v1064_v2 = vsub.f32 %v7764_v47, %v960_v24 }
 0x17b   : > { %6956 = vmatmul.mubr.msk.f32.gmra.mxu1 %vm2718_vm0, %v893_v4  ;;  %6976 = vmatmul.mubr.msk.f32.gmra.mxu0 %vm2718_vm0, %v1172_v40  ;;  %v8427_v40 = vld [vmem:[%s7569_s28 + $0x110] sm:$0xff]  ;;  %v8446_v37 = vpop.permute.xlu0 %1271 }
 0x17c   : > { %v952_v1 = vpop.permute.xlu1 %951  ;;  %3466 = vmatprep.mubr.f32.mxu1 %v10798_v5  ;;  %3836 = vmatprep.mubr.f32.mxu0 %v10798_v5 }
 0x17d   : > { %v1062_v58 = vsub.f32 %v7764_v47, %v952_v1  ;;  %v8439_v1 = vpop.f32.mrf.mxu0 }
 0x17e   : > { %7268 = vset.pattern.permute.xlu1 %v7509_v29  ;;  %v8409_v12 = vpop.f32.mrf.mxu1  ;;  %1595 = vperm.xlu0 %7297, %v8268_v62   ;;  %v1101_v62 = vand.u32 2147483647, %v1064_v2 }
 0x17f   : > { %10804 = vst [vmem:[#allocation5_spill] sm:$0xff] %v8409_v12  ;;  %v1099_v6 = vand.u32 2147483647, %v1062_v58  ;;  %6957 = vmatmul.mubr.msk.f32.gmra.mxu1 %vm2718_vm0, %v894_v56  ;;  %1035 = vperm.xlu1 %7268, %v7397_v52   ;;  %v897_v56 = vmax.f32 %v860_v34, 0.0 }
 0x180   : > { %v956_v18 = vpop.permute.xlu1 %955  ;;  %3472 = vmatprep.mubr.f32.mxu1 %v10798_v5  ;;  %v8418_v46 = vpop.f32.mrf.mxu1  ;;  %v1138_v41 = vsub.f32 1.0, %v1101_v62 }
 0x181   : > { %v1136_v42 = vsub.f32 1.0, %v1099_v6  ;;  %v1063_v51 = vsub.f32 %v7764_v47, %v956_v18  ;;  %10805 = vst [vmem:[#allocation6_spill] sm:$0xff] %v8418_v46  ;;  %v10836_v46 = vmov 2  }
 0x182   : > { %7300 = vset.pattern.permute.xlu0 %v10794_v23  ;;  %v1175_v52 = vmax.f32 %v1138_v41, 0.0 }
 0x183   : > { %v1173_v4 = vmax.f32 %v1136_v42, 0.0  ;;  %v1100_v9 = vand.u32 2147483647, %v1063_v51  ;;  %v8423_v15 = vpop.f32.mrf.mxu1  ;;  %6958 = vmatmul.mubr.msk.f32.gmra.mxu1 %vm2718_vm0, %v895_v61  ;;  %1039 = vperm.xlu1 %7268, %v8427_v40   ;;  %v861_v61 = vsub.f32 1.0, %v824_v27  ;;  %v862_v51 = vsub.f32 1.0, %v825_v20 }
 0x184   : > { %10806 = vst [vmem:[#allocation7_spill] sm:$0xff] %v8423_v15  ;;  %3478 = vmatprep.mubr.f32.mxu1 %v10798_v5  ;;  %1895 = vperm.xlu0 %7300, %v8295_v21   ;;  %v789_v21 = vsub.f32 %v7764_v47, %v8134_v36 }
 0x185   : > { %v1137_v24 = vsub.f32 1.0, %v1100_v9  ;;  %v8434_v11 = vpop.f32.mrf.mxu1  ;;  %v8436_v17 = vpop.permute.xlu1 %1251  ;;  %6977 = vmatmul.mubr.msk.f32.gmra.mxu0 %vm2718_vm0, %v1173_v4  ;;  %v898_v42 = vmax.f32 %v861_v61, 0.0  ;;  %v1346_v9 = vsub.f32 %v7764_v47, %v8167_v14  ;;  %v899_v41 = vmax.f32 %v862_v51, 0.0 }
 0x186   : > { %10807 = vst [vmem:[#allocation8_spill] sm:$0xff] %v8434_v11  ;;  %3842 = vmatprep.mubr.f32.mxu0 %v10798_v5  ;;  %v826_v18 = vand.u32 2147483647, %v789_v21  ;;  %v7400_v21 = vld [vmem:[%s7569_s28 + $0x120] sm:$0x3f] }
 0x187   : > { %v1174_v58 = vmax.f32 %v1137_v24, 0.0  ;;  %v8442_v2 = vpop.f32.mrf.mxu1  ;;  %6959 = vmatmul.mubr.msk.f32.gmra.mxu1 %vm2718_vm0, %v896_v38  ;;  %7269 = vset.pattern.permute.xlu1 %v7508_v63  ;;  %v8458_v63 = vpop.f32.mrf.mxu0  ;;  %v1383_v20 = vand.u32 2147483647, %v1346_v9 }
 0x188   : > { %10808 = vst [vmem:[#allocation9_spill] sm:$0xff] %v8442_v2  ;;  %1335 = vperm.xlu1 %7269, %v8427_v40   ;;  %3484 = vmatprep.mubr.f32.mxu1 %v10798_v5  ;;  %v972_v38 = vpop.permute.xlu0 %971  ;;  %v863_v30 = vsub.f32 1.0, %v826_v18 }
 0x189   : > { %v8452_v39 = vpop.f32.mrf.mxu1  ;;  %v8454_v6 = vpop.permute.xlu1 %1255  ;;  %6978 = vmatmul.mubr.msk.f32.gmra.mxu0 %vm2718_vm0, %v1174_v58  ;;  %1907 = vperm.xlu0 %7300, %v8347_v54   ;;  %v790_v54 = vsub.f32 %v7764_v47, %v8146_v45  ;;  %v1067_v24 = vsub.f32 %v7764_v47, %v972_v38  ;;  %v1347_v38 = vsub.f32 %v7764_v47, %v8199_v57 }
 0x18a   : > { %10809 = vst [vmem:[#allocation10_spill] sm:$0xff] %v8452_v39  ;;  %3848 = vmatprep.mubr.f32.mxu0 %v10798_v5  ;;  %v8475_v34 = vpop.f32.mrf.mxu0 }
 0x18b   : > { %v8461_v36 = vpop.f32.mrf.mxu1  ;;  %6960 = vmatmul.mubr.msk.f32.gmra.mxu1 %vm2718_vm0, %v897_v56  ;;  %v827_v56 = vand.u32 2147483647, %v790_v54  ;;  %v1104_v51 = vand.u32 2147483647, %v1067_v24 }
 0x18c   : > { %10810 = vst [vmem:[#allocation11_spill] sm:$0xff] %v8461_v36  ;;  %1339 = vperm.xlu1 %7269, %v8465_v33   ;;  %3490 = vmatprep.mubr.f32.mxu1 %v10798_v5  ;;  %v8491_v14 = vpop.f32.mrf.mxu0 }
 0x18d   : > { %v8471_v62 = vpop.f32.mrf.mxu1  ;;  %6979 = vmatmul.mubr.msk.f32.gmra.mxu0 %vm2718_vm0, %v1175_v52  ;;  %7303 = vset.pattern.permute.xlu0 %v10796_v8  ;;  %v864_v54 = vsub.f32 1.0, %v827_v56  ;;  %v1348_v56 = vsub.f32 %v7764_v47, %v8216_v31  ;;  %v1349_v31 = vsub.f32 %v7764_v47, %v8210_v32 }
 0x18e   : > { %10811 = vst [vmem:[#allocation12_spill] sm:$0xff] %v8471_v62  ;;  %v964_v4 = vpop.permute.xlu1 %963  ;;  %3854 = vmatprep.mubr.f32.mxu0 %v10798_v5  ;;  %1607 = vperm.xlu0 %7303, %v8320_v10   ;;  %v8504_v9 = vpop.f32.mrf.mxu0 }
 0x18f   : > { %v1065_v45 = vsub.f32 %v7764_v47, %v964_v4  ;;  %v8482_v27 = vpop.f32.mrf.mxu1  ;;  %6961 = vmatmul.mubr.msk.f32.gmra.mxu1 %vm2718_vm0, %v898_v42  ;;  %v900_v42 = vmax.f32 %v863_v30, 0.0  ;;  %v1420_v30 = vsub.f32 1.0, %v1383_v20 }
 0x190   : > { %10812 = vst [vmem:[#allocation13_spill] sm:$0xff] %v8482_v27  ;;  %7271 = vset.pattern.permute.xlu1 %v7509_v29  ;;  %3496 = vmatprep.mubr.f32.mxu1 %v10798_v5 }
 0x191   : > { %v1102_v58 = vand.u32 2147483647, %v1065_v45  ;;  %v8488_v10 = vpop.f32.mrf.mxu1  ;;  %1047 = vperm.xlu1 %7271, %v7400_v21   ;;  %v1141_v21 = vsub.f32 1.0, %v1104_v51 }
 0x192   : > { %10813 = vst [vmem:[#allocation14_spill] sm:$0xff] %v8488_v10  ;;  %v968_v61 = vpop.permute.xlu1 %967  ;;  %1619 = vperm.xlu0 %7303, %v8372_v60  }
 0x193   : > { %v1139_v52 = vsub.f32 1.0, %v1102_v58  ;;  %v1066_v29 = vsub.f32 %v7764_v47, %v968_v61  ;;  %v8495_v18 = vpop.f32.mrf.mxu1  ;;  %6962 = vmatmul.mubr.msk.f32.gmra.mxu1 %vm2718_vm0, %v899_v41  ;;  %v8507_v58 = vld [vmem:[%s7569_s28] sm:$0xff]  ;;  %v901_v61 = vmax.f32 %v864_v54, 0.0  ;;  %v1385_v54 = vand.u32 2147483647, %v1348_v56 }
 0x194   : > { %10814 = vst [vmem:[#allocation15_spill] sm:$0xff] %v8495_v18  ;;  %3502 = vmatprep.mubr.f32.mxu1 %v10798_v5 }
 0x195   : > { %v1176_v4 = vmax.f32 %v1139_v52, 0.0  ;;  %v1103_v45 = vand.u32 2147483647, %v1066_v29  ;;  %v8501_v60 = vpop.f32.mrf.mxu1  ;;  %7272 = vset.pattern.permute.xlu1 %v10796_v8  ;;  %v8523_v29 = vpop.f32.mrf.mxu0  ;;  %v1422_v56 = vsub.f32 1.0, %v1385_v54 }
 0x196   : > { %10815 = vst [vmem:[#allocation16_spill] sm:$0xff] %v8501_v60  ;;  %1495 = vperm.xlu1 %7272, %v8507_v58   ;;  %1631 = vperm.xlu0 %7303, %v8427_v40   ;;  %v1384_v40 = vand.u32 2147483647, %v1347_v38  ;;  %v1178_v38 = vmax.f32 %v1141_v21, 0.0  ;;  %v1350_v21 = vsub.f32 %v7764_v47, %v8272_v48 }
 0x197   : > { %v1140_v24 = vsub.f32 1.0, %v1103_v45  ;;  %v8511_v41 = vpop.f32.mrf.mxu1  ;;  %6963 = vmatmul.mubr.msk.f32.gmra.mxu1 %vm2718_vm0, %v900_v42  ;;  %v8514_v57 = vpop.permute.xlu1 %1263  ;;  %6980 = vmatmul.mubr.msk.f32.gmra.mxu0 %vm2718_vm0, %v1176_v4  ;;  %v1457_v42 = vmax.f32 %v1420_v30, 0.0 }
 0x198   : > { %10816 = vst [vmem:[#allocation17_spill] sm:$0xff] %v8511_v41  ;;  %3508 = vmatprep.mubr.f32.mxu1 %v10798_v5  ;;  %3860 = vmatprep.mubr.f32.mxu0 %v10798_v5  ;;  %v1421_v45 = vsub.f32 1.0, %v1384_v40  ;;  %v8541_v32 = vpop.f32.mrf.mxu0  ;;  %v984_v30 = vpop.permute.xlu0 %983 }
 0x199   : > { %v1177_v20 = vmax.f32 %v1140_v24, 0.0  ;;  %v8521_v52 = vpop.f32.mrf.mxu1 }
 0x19a   : > { %10817 = vst [vmem:[#allocation18_spill] sm:$0xff] %v8521_v52  ;;  %7273 = vset.pattern.permute.xlu1 %v10794_v23  ;;  %7307 = vset.pattern.permute.xlu0 %v10794_v23  ;;  %v8559_v48 = vpop.f32.mrf.mxu0 }
 0x19b   : > { %v8529_v4 = vpop.f32.mrf.mxu1  ;;  %6964 = vmatmul.mubr.msk.f32.gmra.mxu1 %vm2718_vm0, %v901_v61  ;;  %1791 = vperm.xlu1 %7273, %v8507_v58   ;;  %v8533_v51 = vpop.permute.xlu1 %1267  ;;  %v1386_v61 = vand.u32 2147483647, %v1349_v31  ;;  %v7403_v31 = vld [vmem:[%s10789_s3 + $0x8] sm:$0xff] }
 0x19c   : > { %10818 = vst [vmem:[#allocation19_spill] sm:$0xff] %v8529_v4  ;;  %6981 = vmatmul.mubr.msk.f32.gmra.mxu0 %vm2718_vm0, %v1177_v20  ;;  %4162 = vmatprep.mubr.f32.mxu1 %v10798_v5  ;;  %v1363_v4 = vsub.f32 %v7764_v47, %v8533_v51 }
 0x19d   : > { %v8537_v24 = vpop.f32.mrf.mxu1  ;;  %3866 = vmatprep.mubr.f32.mxu0 %v10798_v5  ;;  %1919 = vperm.xlu0 %7307, %v8396_v28   ;;  %v1458_v28 = vmax.f32 %v1421_v45, 0.0  ;;  %v1423_v54 = vsub.f32 1.0, %v1386_v61 }
 0x19e   : > { %10819 = vst [vmem:[#allocation20_spill] sm:$0xff] %v8537_v24  ;;  %v1400_v18 = vand.u32 2147483647, %v1363_v4 }
 0x19f   : > { %v8543_v0 = vpop.f32.mrf.mxu1  ;;  %7002 = vmatmul.mubr.msk.f32.vlgmr.msra.gmra.mxu1 %vm2718_vm0, %v1457_v42  ;;  %1795 = vperm.xlu1 %7273, %v8149_v13   ;;  %v1070_v42 = vsub.f32 %v7764_v47, %v984_v30  ;;  %v7402_v13 = vld [vmem:[%s10789_s3 + $0x10] sm:$0xff]  ;;  %v1459_v30 = vmax.f32 %v1422_v56, 0.0  ;;  %v7404_v56 = vld [vmem:[%s10789_s3] sm:$0xff] }
 0x1a0   : > { %10820 = vst [vmem:[#allocation21_spill] sm:$0xff] %v8543_v0  ;;  %v976_v40 = vpop.permute.xlu1 %975  ;;  %4168 = vmatprep.mubr.f32.mxu1 %v10798_v5  ;;  %6982 = vmatmul.mubr.msk.f32.gmra.mxu0 %vm2718_vm0, %v1178_v38 }
 0x1a1   : > { %v1068_v20 = vsub.f32 %v7764_v47, %v976_v40  ;;  %v8552_v23 = vpop.f32.mrf.mxu1  ;;  %3872 = vmatprep.mubr.f32.mxu0 %v10798_v5  ;;  %5071 = vmatpush1.msra.mxu1 %v7402_v13  ;;  %v1387_v40 = vand.u32 2147483647, %v1350_v21  ;;  %v1460_v21 = vmax.f32 %v1423_v54, 0.0 }
 0x1a2   : > { %10821 = vst [vmem:[#allocation22_spill] sm:$0xff] %v8552_v23  ;;  %5072 = vmatprep.subr.mxu1 %v7403_v31  ;;  %1931 = vperm.xlu0 %7307, %v8465_v33   ;;  %v1351_v31 = vsub.f32 %v7764_v47, %v8289_v35  ;;  %v7405_v35 = vld [vmem:[%s10789_s3 + $0x18] sm:$0xff] }
 0x1a3   : > { %v1105_v38 = vand.u32 2147483647, %v1068_v20  ;;  %v8565_v45 = vpop.f32.mrf.mxu1  ;;  %7003 = vmatmul.mubr.msk.f32.gmra.mxu1 %vm2718_vm0, %v1458_v28  ;;  %7275 = vset.pattern.permute.xlu1 %v10796_v8  ;;  %v1107_v20 = vand.u32 2147483647, %v1070_v42  ;;  %v8576_v28 = vpop.permute.xlu0 %1283 }
 0x1a4   : > { %10822 = vst [vmem:[#allocation23_spill] sm:$0xff] %v8565_v45  ;;  %1503 = vperm.xlu1 %7275, %v8170_v26   ;;  %v980_v13 = vpop.permute.xlu1 %979  ;;  %4174 = vmatprep.mubr.f32.mxu1 %v10798_v5  ;;  %v8581_v26 = vpop.f32.mrf.mxu0  ;;  %v8592_v5 = vld [vmem:[%s7569_s28 + $0x18] sm:$0xff]  ;;  %v1388_v24 = vand.u32 2147483647, %v1351_v31  ;;  %v1353_v31 = vsub.f32 %v7764_v47, %v8327_v53 }
 0x1a5   : > { %v1142_v23 = vsub.f32 1.0, %v1105_v38  ;;  %v1069_v33 = vsub.f32 %v7764_v47, %v980_v13  ;;  %v8574_v61 = vpop.f32.mrf.mxu1  ;;  %5073 = vmatpush1.msra.mxu1 %v7404_v56  ;;  %v1352_v38 = vsub.f32 %v7764_v47, %v8227_v16  ;;  %v10825_v56 = vmov 0.0  }
 0x1a6   : > { %10823 = vst [vmem:[#allocation24_spill] sm:$0xff] %v8574_v61  ;;  %6014 = vmatprep.subr.mxu1 %v7405_v35  ;;  %v1424_v61 = vsub.f32 1.0, %v1387_v40  ;;  %v8601_v16 = vpop.f32.mrf.mxu0 }
 0x1a7   : > { %v1179_v13 = vmax.f32 %v1142_v23, 0.0  ;;  %v1106_v42 = vand.u32 2147483647, %v1069_v33  ;;  %v8588_v8 = vpop.f32.mrf.mxu1  ;;  %7004 = vmatmul.mubr.msk.f32.gmra.mxu1 %vm2718_vm0, %v1459_v30  ;;  %v1144_v23 = vsub.f32 1.0, %v1107_v20  ;;  %v1389_v30 = vand.u32 2147483647, %v1352_v38  ;;  %v8607_v40 = vpop.permute.xlu0 %1295 }
 0x1a8   : > { %10824 = vst [vmem:[#allocation25_spill] sm:$0xff] %v8588_v8  ;;  %1507 = vperm.xlu1 %7275, %v8592_v5   ;;  %4180 = vmatprep.mubr.f32.mxu1 %v10825_v56  ;;  %v1461_v20 = vmax.f32 %v1424_v61, 0.0  ;;  %v8619_v38 = vpop.f32.mrf.mxu0  ;;  %v1390_v61 = vand.u32 2147483647, %v1353_v31  ;;  %v1355_v31 = vsub.f32 %v7764_v47, %v8314_v25 }
 0x1a9   : > { %v1143_v52 = vsub.f32 1.0, %v1106_v42  ;;  %v8596_v35 = vpop.f32.mrf.mxu1  ;;  %v8598_v54 = vpop.permute.xlu1 %1275  ;;  %6983 = vmatmul.mubr.msk.f32.gmra.mxu0 %vm2718_vm0, %v1179_v13  ;;  %v10828_v42 = vmov 6   ;;  %v1425_v13 = vsub.f32 1.0, %v1388_v24  ;;  %10830 = vst [vmem:[#allocation29_spill] sm:$0xff] %v8619_v38  ;;  %v1426_v53 = vsub.f32 1.0, %v1389_v30 }
 0x1aa   : > { %10826 = vst [vmem:[#allocation26_spill] sm:$0xff] %v8596_v35  ;;  %3878 = vmatprep.mubr.f32.mxu0 %v10825_v56  ;;  %v1365_v12 = vsub.f32 %v7764_v47, %v8598_v54 }
 0x1ab   : > { %v1180_v33 = vmax.f32 %v1143_v52, 0.0  ;;  %v8604_v60 = vpop.f32.mrf.mxu1  ;;  %7005 = vmatmul.mubr.msk.f32.gmra.mxu1 %vm2718_vm0, %v1460_v21  ;;  %v1181_v21 = vmax.f32 %v1144_v23, 0.0  ;;  %v1462_v24 = vmax.f32 %v1425_v13, 0.0  ;;  %v996_v23 = vpop.permute.xlu0 %995 }
 0x1ac   : > { %10827 = vst [vmem:[#allocation27_spill] sm:$0xff] %v8604_v60  ;;  %7277 = vset.pattern.permute.xlu1 %v10828_v42  ;;  %4186 = vmatprep.mubr.f32.mxu1 %v10825_v56 }
 0x1ad   : > { %v8613_v35 = vpop.f32.mrf.mxu1  ;;  %1803 = vperm.xlu1 %7277, %v8592_v5   ;;  %v8616_v52 = vpop.permute.xlu1 %1279  ;;  %6984 = vmatmul.mubr.msk.f32.gmra.mxu0 %vm2718_vm0, %v1180_v33 }
 0x1ae   : > { %10829 = vst [vmem:[#allocation28_spill] sm:$0xff] %v8613_v35  ;;  %3884 = vmatprep.mubr.f32.mxu0 %v10825_v56  ;;  %v1354_v35 = vsub.f32 %v7764_v47, %v8339_v49  ;;  %v8632_v33 = vpop.f32.mrf.mxu0  ;;  %v1427_v49 = vsub.f32 1.0, %v1390_v61 }
 0x1af   : > { %v8622_v10 = vpop.f32.mrf.mxu1  ;;  %7006 = vmatmul.mubr.msk.f32.gmra.mxu1 %vm2718_vm0, %v1461_v20  ;;  %10833 = vst [vmem:[#allocation32_spill] sm:$0xff] %v8632_v33  ;;  %v1463_v20 = vmax.f32 %v1426_v53, 0.0  ;;  %v8961_v33 = vld [vmem:[%s7569_s28 + $0x90] sm:$0xff] }
 0x1b0   : > { %10831 = vst [vmem:[#allocation30_spill] sm:$0xff] %v8622_v10  ;;  %4192 = vmatprep.mubr.f32.mxu1 %v10825_v56  ;;  %v8646_v53 = vpop.f32.mrf.mxu0 }
 0x1b1   : > { %v8628_v62 = vpop.f32.mrf.mxu1  ;;  %1807 = vperm.xlu1 %7277, %v8205_v43   ;;  %6985 = vmatmul.mubr.msk.f32.gmra.mxu0 %vm2718_vm0, %v1181_v21  ;;  %v1073_v43 = vsub.f32 %v7764_v47, %v996_v23  ;;  %v1391_v21 = vand.u32 2147483647, %v1354_v35  ;;  %10837 = vst [vmem:[#allocation35_spill] sm:$0xff] %v8646_v53  ;;  %v1464_v35 = vmax.f32 %v1427_v49, 0.0 }
 0x1b2   : > { %10832 = vst [vmem:[#allocation31_spill] sm:$0xff] %v8628_v62  ;;  %v988_v30 = vpop.permute.xlu1 %987  ;;  %3890 = vmatprep.mubr.f32.mxu0 %v10825_v56 }
 0x1b3   : > { %v1071_v13 = vsub.f32 %v7764_v47, %v988_v30  ;;  %v8638_v39 = vpop.f32.mrf.mxu1  ;;  %7007 = vmatmul.mubr.msk.f32.gmra.mxu1 %vm2718_vm0, %v1462_v24  ;;  %v1392_v30 = vand.u32 2147483647, %v1355_v31  ;;  %v1110_v23 = vand.u32 2147483647, %v1073_v43  ;;  %v8658_v31 = vpop.f32.mrf.mxu0 }
 0x1b4   : > { %10834 = vst [vmem:[#allocation33_spill] sm:$0xff] %v8638_v39  ;;  %4198 = vmatprep.mubr.f32.mxu1 %v10825_v56  ;;  %10840 = vst [vmem:[#allocation38_spill] sm:$0xff] %v8658_v31 }
 0x1b5   : > { %v1108_v62 = vand.u32 2147483647, %v1071_v13  ;;  %v8643_v11 = vpop.f32.mrf.mxu1  ;;  %7278 = vset.pattern.permute.xlu1 %v10836_v46  ;;  %v1428_v13 = vsub.f32 1.0, %v1391_v21 }
 0x1b6   : > { %10835 = vst [vmem:[#allocation34_spill] sm:$0xff] %v8643_v11  ;;  %1515 = vperm.xlu1 %7278, %v8188_v3   ;;  %v992_v25 = vpop.permute.xlu1 %991  ;;  %v1356_v11 = vsub.f32 %v7764_v47, %v8378_v59  ;;  %v1357_v59 = vsub.f32 %v7764_v47, %v8389_v7 }
 0x1b7   : > { %v1145_v39 = vsub.f32 1.0, %v1108_v62  ;;  %v1072_v61 = vsub.f32 %v7764_v47, %v992_v25  ;;  %v8650_v24 = vpop.f32.mrf.mxu1  ;;  %7008 = vmatmul.mubr.msk.f32.gmra.mxu1 %vm2718_vm0, %v1463_v20  ;;  %v8661_v62 = vld [vmem:[%s7569_s28 + $0x30] sm:$0xff]  ;;  %v1429_v25 = vsub.f32 1.0, %v1392_v30  ;;  %v1465_v21 = vmax.f32 %v1428_v13, 0.0 }
 0x1b8   : > { %10838 = vst [vmem:[#allocation36_spill] sm:$0xff] %v8650_v24  ;;  %4204 = vmatprep.mubr.f32.mxu1 %v10825_v56 }
 0x1b9   : > { %v1182_v10 = vmax.f32 %v1145_v39, 0.0  ;;  %v1109_v3 = vand.u32 2147483647, %v1072_v61  ;;  %v8656_v60 = vpop.f32.mrf.mxu1  ;;  %v1147_v39 = vsub.f32 1.0, %v1110_v23  ;;  %v1393_v61 = vand.u32 2147483647, %v1356_v11 }
 0x1ba   : > { %10839 = vst [vmem:[#allocation37_spill] sm:$0xff] %v8656_v60  ;;  %1519 = vperm.xlu1 %7278, %v8661_v62   ;;  %v8676_v60 = vpop.f32.mrf.mxu0  ;;  %v1394_v11 = vand.u32 2147483647, %v1357_v59 }
 0x1bb   : > { %v1146_v20 = vsub.f32 1.0, %v1109_v3  ;;  %v8664_v49 = vpop.f32.mrf.mxu1  ;;  %7009 = vmatmul.mubr.msk.f32.gmra.mxu1 %vm2718_vm0, %v1464_v35  ;;  %v8667_v43 = vpop.permute.xlu1 %1287  ;;  %6986 = vmatmul.mubr.msk.f32.gmra.mxu0 %vm2718_vm0, %v1182_v10  ;;  %10843 = vst [vmem:[#allocation41_spill] sm:$0xff] %v8676_v60  ;;  %v1466_v35 = vmax.f32 %v1429_v25, 0.0  ;;  %v1358_v10 = vsub.f32 %v7764_v47, %v8333_v50  ;;  %v1184_v23 = vmax.f32 %v1147_v39, 0.0 }
 0x1bc   : > { %10841 = vst [vmem:[#allocation39_spill] sm:$0xff] %v8664_v49  ;;  %4210 = vmatprep.mubr.f32.mxu1 %v10825_v56  ;;  %3896 = vmatprep.mubr.f32.mxu0 %v10825_v56  ;;  %v1430_v13 = vsub.f32 1.0, %v1393_v61  ;;  %v1008_v50 = vpop.permute.xlu0 %1007  ;;  %v8692_v25 = vpop.f32.mrf.mxu0  ;;  %v1431_v59 = vsub.f32 1.0, %v1394_v11 }
 0x1bd   : > { %v1183_v30 = vmax.f32 %v1146_v20, 0.0  ;;  %v8674_v3 = vpop.f32.mrf.mxu1  ;;  %10846 = vst [vmem:[#allocation44_spill] sm:$0xff] %v8692_v25  ;;  %v1076_v39 = vsub.f32 %v7764_v47, %v1008_v50 }
 0x1be   : > { %10842 = vst [vmem:[#allocation40_spill] sm:$0xff] %v8674_v3  ;;  %7280 = vset.pattern.permute.xlu1 %v10828_v42  ;;  %v1395_v3 = vand.u32 2147483647, %v1358_v10  ;;  %v1467_v61 = vmax.f32 %v1430_v13, 0.0 }
 0x1bf   : > { %v8681_v49 = vpop.f32.mrf.mxu1  ;;  %7010 = vmatmul.mubr.msk.f32.gmra.mxu1 %vm2718_vm0, %v1465_v21  ;;  %1815 = vperm.xlu1 %7280, %v8661_v62   ;;  %v8685_v7 = vpop.permute.xlu1 %1291  ;;  %v1113_v13 = vand.u32 2147483647, %v1076_v39 }
 0x1c0   : > { %10844 = vst [vmem:[#allocation42_spill] sm:$0xff] %v8681_v49  ;;  %6987 = vmatmul.mubr.msk.f32.gmra.mxu0 %vm2718_vm0, %v1183_v30  ;;  %4216 = vmatprep.mubr.f32.mxu1 %v10825_v56 }
 0x1c1   : > { %v8689_v20 = vpop.f32.mrf.mxu1  ;;  %3902 = vmatprep.mubr.f32.mxu0 %v10825_v56 }
 0x1c2   : > { %10845 = vst [vmem:[#allocation43_spill] sm:$0xff] %v8689_v20  ;;  %v1359_v20 = vsub.f32 %v7764_v47, %v8436_v17 }
 0x1c3   : > { %v8694_v21 = vpop.f32.mrf.mxu1  ;;  %7011 = vmatmul.mubr.msk.f32.gmra.mxu1 %vm2718_vm0, %v1466_v35  ;;  %1819 = vperm.xlu1 %7280, %v8221_v19   ;;  %v8707_v35 = vpop.f32.mrf.mxu0  ;;  %v1432_v19 = vsub.f32 1.0, %v1395_v3 }
 0x1c4   : > { %10847 = vst [vmem:[#allocation45_spill] sm:$0xff] %v8694_v21  ;;  %v1000_v30 = vpop.permute.xlu1 %999  ;;  %4222 = vmatprep.mubr.f32.mxu1 %v10825_v56  ;;  %6988 = vmatmul.mubr.msk.f32.gmra.mxu0 %vm2718_vm0, %v1184_v23  ;;  %10849 = vst [vmem:[#allocation47_spill] sm:$0xff] %v8707_v35  ;;  %v1468_v23 = vmax.f32 %v1431_v59, 0.0  ;;  %v1396_v50 = vand.u32 2147483647, %v1359_v20 }
 0x1c5   : > { %v1074_v10 = vsub.f32 %v7764_v47, %v1000_v30  ;;  %v8704_v49 = vpop.f32.mrf.mxu1  ;;  %3908 = vmatprep.mubr.f32.mxu0 %v10825_v56  ;;  %v1360_v30 = vsub.f32 %v7764_v47, %v8454_v6  ;;  %v1469_v59 = vmax.f32 %v1432_v19, 0.0  ;;  %v8730_v6 = vld [vmem:[%s7569_s28 + $0x48] sm:$0xff] }
 0x1c6   : > { %10848 = vst [vmem:[#allocation46_spill] sm:$0xff] %v8704_v49  ;;  %v1433_v20 = vsub.f32 1.0, %v1396_v50 }
 0x1c7   : > { %v1111_v11 = vand.u32 2147483647, %v1074_v10  ;;  %v8709_v21 = vpop.f32.mrf.mxu1  ;;  %7012 = vmatmul.mubr.msk.f32.gmra.mxu1 %vm2718_vm0, %v1467_v61  ;;  %7281 = vset.pattern.permute.xlu1 %v10836_v46  ;;  %v8720_v61 = vpop.permute.xlu0 %1307 }
 0x1c8   : > { %10850 = vst [vmem:[#allocation48_spill] sm:$0xff] %v8709_v21  ;;  %1527 = vperm.xlu1 %7281, %v8246_v55   ;;  %v1004_v17 = vpop.permute.xlu1 %1003  ;;  %4228 = vmatprep.mubr.f32.mxu1 %v10825_v56  ;;  %v8722_v21 = vpop.f32.mrf.mxu0  ;;  %v1361_v55 = vsub.f32 %v7764_v47, %v8420_v44  ;;  %v1150_v44 = vsub.f32 1.0, %v1113_v13 }
 0x1c9   : > { %v1148_v3 = vsub.f32 1.0, %v1111_v11  ;;  %v1075_v10 = vsub.f32 %v7764_v47, %v1004_v17  ;;  %v8718_v49 = vpop.f32.mrf.mxu1  ;;  %10852 = vst [vmem:[#allocation50_spill] sm:$0xff] %v8722_v21  ;;  %v1397_v11 = vand.u32 2147483647, %v1360_v30 }
 0x1ca   : > { %10851 = vst [vmem:[#allocation49_spill] sm:$0xff] %v8718_v49 }
 0x1cb   : > { %v1185_v24 = vmax.f32 %v1148_v3, 0.0  ;;  %v1112_v8 = vand.u32 2147483647, %v1075_v10  ;;  %v8726_v39 = vpop.f32.mrf.mxu1  ;;  %7013 = vmatmul.mubr.msk.f32.gmra.mxu1 %vm2718_vm0, %v1468_v23  ;;  %v8739_v3 = vpop.f32.mrf.mxu0  ;;  %v1398_v23 = vand.u32 2147483647, %v1361_v55  ;;  %v1434_v13 = vsub.f32 1.0, %v1397_v11 }
 0x1cc   : > { %1531 = vperm.xlu1 %7281, %v8730_v6   ;;  %4234 = vmatprep.mubr.f32.mxu1 %v10825_v56  ;;  %10853 = vst [vmem:[#allocation51_spill] sm:$0xff] %v8739_v3  ;;  %v8745_v50 = vpop.permute.xlu0 %1319 }
 0x1cd   : > { %v1149_v17 = vsub.f32 1.0, %v1112_v8  ;;  %v8734_v49 = vpop.f32.mrf.mxu1  ;;  %v8736_v19 = vpop.permute.xlu1 %1299  ;;  %6989 = vmatmul.mubr.msk.f32.gmra.mxu0 %vm2718_vm0, %v1185_v24  ;;  %v1362_v8 = vsub.f32 %v7764_v47, %v8514_v57  ;;  %v1470_v24 = vmax.f32 %v1433_v20, 0.0  ;;  %v1435_v57 = vsub.f32 1.0, %v1398_v23 }
 0x1ce   : > { %3914 = vmatprep.mubr.f32.mxu0 %v10825_v56  ;;  %v1471_v11 = vmax.f32 %v1434_v13, 0.0 }
 0x1cf   : > { %v1186_v10 = vmax.f32 %v1149_v17, 0.0  ;;  %v8742_v45 = vpop.f32.mrf.mxu1  ;;  %7014 = vmatmul.mubr.msk.f32.gmra.mxu1 %vm2718_vm0, %v1469_v59  ;;  %v1187_v59 = vmax.f32 %v1150_v44, 0.0  ;;  %v8757_v17 = vpop.f32.mrf.mxu0  ;;  %v1399_v20 = vand.u32 2147483647, %v1362_v8  ;;  %v1472_v8 = vmax.f32 %v1435_v57, 0.0 }
 0x1d0   : > { %7283 = vset.pattern.permute.xlu1 %v10828_v42  ;;  %4240 = vmatprep.mubr.f32.mxu1 %v10825_v56  ;;  %10854 = vst [vmem:[#allocation52_spill] sm:$0xff] %v8757_v17  ;;  %v1020_v44 = vpop.permute.xlu0 %1019 }
 0x1d1   : > { %v8751_v30 = vpop.f32.mrf.mxu1  ;;  %1827 = vperm.xlu1 %7283, %v8730_v6   ;;  %v8754_v55 = vpop.permute.xlu1 %1303  ;;  %6990 = vmatmul.mubr.msk.f32.gmra.mxu0 %vm2718_vm0, %v1186_v10 }
 0x1d2   : > { %3920 = vmatprep.mubr.f32.mxu0 %v10825_v56  ;;  %v8770_v10 = vpop.f32.mrf.mxu0 }
 0x1d3   : > { %v8760_v0 = vpop.f32.mrf.mxu1  ;;  %7015 = vmatmul.mubr.msk.f32.gmra.mxu1 %vm2718_vm0, %v1470_v24  ;;  %10855 = vst [vmem:[#allocation53_spill] sm:$0xff] %v8770_v10  ;;  %v1364_v24 = vsub.f32 %v7764_v47, %v8446_v37  ;;  %v7409_v37 = vld [vmem:[%s7569_s28 + $0x58] sm:$0xff] }
 0x1d4   : > { %4246 = vmatprep.mubr.f32.mxu1 %v10825_v56  ;;  %v8784_v57 = vpop.f32.mrf.mxu0 }
 0x1d5   : > { %v8766_v41 = vpop.f32.mrf.mxu1  ;;  %1831 = vperm.xlu1 %7283, %v8283_v22   ;;  %6991 = vmatmul.mubr.msk.f32.gmra.mxu0 %vm2718_vm0, %v1187_v59  ;;  %v1436_v22 = vsub.f32 1.0, %v1399_v20  ;;  %v1079_v59 = vsub.f32 %v7764_v47, %v1020_v44  ;;  %10856 = vst [vmem:[#allocation54_spill] sm:$0xff] %v8784_v57  ;;  %v1401_v2 = vand.u32 2147483647, %v1364_v24 }
 0x1d6   : > { %v1012_v23 = vpop.permute.xlu1 %1011  ;;  %3926 = vmatprep.mubr.f32.mxu0 %v10825_v56  ;;  %v8796_v24 = vpop.f32.mrf.mxu0 }
 0x1d7   : > { %v1077_v13 = vsub.f32 %v7764_v47, %v1012_v23  ;;  %v8776_v51 = vpop.f32.mrf.mxu1  ;;  %7016 = vmatmul.mubr.msk.f32.gmra.mxu1 %vm2718_vm0, %v1471_v11  ;;  %v1473_v4 = vmax.f32 %v1436_v22, 0.0  ;;  %v1116_v44 = vand.u32 2147483647, %v1079_v59  ;;  %10857 = vst [vmem:[#allocation55_spill] sm:$0xff] %v8796_v24 }
 0x1d8   : > { %4252 = vmatprep.mubr.f32.mxu1 %v10825_v56  ;;  %v8814_v24 = vpop.f32.mrf.mxu0 }
 0x1d9   : > { %v1114_v27 = vand.u32 2147483647, %v1077_v13  ;;  %v8781_v36 = vpop.f32.mrf.mxu1  ;;  %7284 = vset.pattern.permute.xlu1 %v10836_v46  ;;  %v1437_v13 = vsub.f32 1.0, %v1400_v18  ;;  %v1153_v54 = vsub.f32 1.0, %v1116_v44  ;;  %10860 = vst [vmem:[#allocation58_spill] sm:$0xff] %v8814_v24 }
 0x1da   : > { %1539 = vperm.xlu1 %7284, %v7409_v37   ;;  %v1016_v23 = vpop.permute.xlu1 %1015 }
 0x1db   : > { %v1151_v15 = vsub.f32 1.0, %v1114_v27  ;;  %v1078_v20 = vsub.f32 %v7764_v47, %v1016_v23  ;;  %v8788_v11 = vpop.f32.mrf.mxu1  ;;  %7017 = vmatmul.mubr.msk.f32.gmra.mxu1 %vm2718_vm0, %v1472_v8  ;;  %v8799_v27 = vld [vmem:[%s7569_s28 + $0x60] sm:$0xff]  ;;  %v1438_v23 = vsub.f32 1.0, %v1401_v2  ;;  %v1474_v59 = vmax.f32 %v1437_v13, 0.0 }
 0x1dc   : > { %4258 = vmatprep.mubr.f32.mxu1 %v10825_v56  ;;  %v1190_v13 = vmax.f32 %v1153_v54, 0.0 }
 0x1dd   : > { %v1188_v57 = vmax.f32 %v1151_v15, 0.0  ;;  %v1115_v37 = vand.u32 2147483647, %v1078_v20  ;;  %v8794_v10 = vpop.f32.mrf.mxu1  ;;  %v1366_v15 = vsub.f32 %v7764_v47, %v8616_v52  ;;  %v1402_v20 = vand.u32 2147483647, %v1365_v12 }
 0x1de   : > { %1543 = vperm.xlu1 %7284, %v8799_v27  }
 0x1df   : > { %v1152_v8 = vsub.f32 1.0, %v1115_v37  ;;  %v8802_v22 = vpop.f32.mrf.mxu1  ;;  %7018 = vmatmul.mubr.msk.f32.gmra.mxu1 %vm2718_vm0, %v1473_v4  ;;  %v8805_v18 = vpop.permute.xlu1 %1311  ;;  %6992 = vmatmul.mubr.msk.f32.gmra.mxu0 %vm2718_vm0, %v1188_v57  ;;  %v1475_v4 = vmax.f32 %v1438_v23, 0.0  ;;  %v1367_v57 = vsub.f32 %v7764_v47, %v8576_v28  ;;  %v1403_v12 = vand.u32 2147483647, %v1366_v15  ;;  %v8838_v15 = vld [vmem:[%s7569_s28 + $0x68] sm:$0xff] }
 0x1e0   : > { %10858 = vst [vmem:[#allocation56_spill] sm:$0xff] %v8802_v22  ;;  %4264 = vmatprep.mubr.f32.mxu1 %v10825_v56  ;;  %3932 = vmatprep.mubr.f32.mxu0 %v10825_v56  ;;  %v1439_v23 = vsub.f32 1.0, %v1402_v20  ;;  %v1032_v28 = vpop.permute.xlu0 %1031 }
 0x1e1   : > { %v1189_v2 = vmax.f32 %v1152_v8, 0.0  ;;  %v8812_v37 = vpop.f32.mrf.mxu1  ;;  %v1404_v24 = vand.u32 2147483647, %v1367_v57  ;;  %v1440_v54 = vsub.f32 1.0, %v1403_v12  ;;  %v1082_v20 = vsub.f32 %v7764_v47, %v1032_v28 }
 0x1e2   : > { %10859 = vst [vmem:[#allocation57_spill] sm:$0xff] %v8812_v37  ;;  %7286 = vset.pattern.permute.xlu1 %v10828_v42  ;;  %v1476_v57 = vmax.f32 %v1439_v23, 0.0  ;;  %v7412_v23 = vld [vmem:[%s7569_s28 + $0x70] sm:$0xff] }
 0x1e3   : > { %v8819_v17 = vpop.f32.mrf.mxu1  ;;  %7019 = vmatmul.mubr.msk.f32.gmra.mxu1 %vm2718_vm0, %v1474_v59  ;;  %1839 = vperm.xlu1 %7286, %v8799_v27   ;;  %v8823_v52 = vpop.permute.xlu1 %1315  ;;  %v1441_v25 = vsub.f32 1.0, %v1404_v24  ;;  %v1369_v24 = vsub.f32 %v7764_v47, %v8685_v7 }
 0x1e4   : > { %10861 = vst [vmem:[#allocation59_spill] sm:$0xff] %v8819_v17  ;;  %6993 = vmatmul.mubr.msk.f32.gmra.mxu0 %vm2718_vm0, %v1189_v2  ;;  %v8826_v44 = vpop.f32.mrf.mxu0  ;;  %4270 = vmatprep.mubr.f32.mxu1 %v10825_v56 }
 0x1e5   : > { %v8829_v8 = vpop.f32.mrf.mxu1  ;;  %3938 = vmatprep.mubr.f32.mxu0 %v10825_v56 }
 0x1e6   : > { %10862 = vst [vmem:[#allocation60_spill] sm:$0xff] %v8829_v8  ;;  %v8832_v59 = vpop.f32.mrf.mxu0 }
 0x1e7   : > { %10863 = vst [vmem:[#allocation61_spill] sm:$0xff] %v8832_v59  ;;  %v8834_v3 = vpop.f32.mrf.mxu1  ;;  %7020 = vmatmul.mubr.msk.f32.gmra.mxu1 %vm2718_vm0, %v1475_v4  ;;  %1843 = vperm.xlu1 %7286, %v8838_v15   ;;  %v1368_v59 = vsub.f32 %v7764_v47, %v8667_v43 }
 0x1e8   : > { %10864 = vst [vmem:[#allocation62_spill] sm:$0xff] %v8834_v3  ;;  %v1024_v2 = vpop.permute.xlu1 %1023  ;;  %v8841_v21 = vpop.f32.mrf.mxu0  ;;  %4276 = vmatprep.mubr.f32.mxu1 %v10825_v56  ;;  %6994 = vmatmul.mubr.msk.f32.gmra.mxu0 %vm2718_vm0, %v1190_v13  ;;  %v1477_v13 = vmax.f32 %v1440_v54, 0.0  ;;  %v1478_v54 = vmax.f32 %v1441_v25, 0.0 }
 0x1e9   : > { %v1080_v4 = vsub.f32 %v7764_v47, %v1024_v2  ;;  %v8849_v35 = vpop.f32.mrf.mxu1  ;;  %3944 = vmatprep.mubr.f32.mxu0 %v10825_v56  ;;  %v1119_v2 = vand.u32 2147483647, %v1082_v20  ;;  %v1406_v20 = vand.u32 2147483647, %v1369_v24 }
 0x1ea   : > { %10865 = vst [vmem:[#allocation63_spill] sm:$0xff] %v8849_v35  ;;  %v8852_v12 = vpop.f32.mrf.mxu0  ;;  %v1405_v35 = vand.u32 2147483647, %v1368_v59  ;;  %v8875_v59 = vld [vmem:[%s7569_s28 + $0x78] sm:$0xff] }
 0x1eb   : > { %10866 = vst [vmem:[#allocation64_spill] sm:$0xff] %v8852_v12  ;;  %v1117_v3 = vand.u32 2147483647, %v1080_v4  ;;  %v8854_v60 = vpop.f32.mrf.mxu1  ;;  %7021 = vmatmul.mubr.msk.f32.gmra.mxu1 %vm2718_vm0, %v1476_v57  ;;  %7287 = vset.pattern.permute.xlu1 %v10836_v46 }
 0x1ec   : > { %10867 = vst [vmem:[#allocation65_spill] sm:$0xff] %v8854_v60  ;;  %1551 = vperm.xlu1 %7287, %v7412_v23   ;;  %v1028_v43 = vpop.permute.xlu1 %1027  ;;  %v8859_v28 = vpop.f32.mrf.mxu0  ;;  %4282 = vmatprep.mubr.f32.mxu1 %v10825_v56  ;;  %v1370_v23 = vsub.f32 %v7764_v47, %v8607_v40 }
 0x1ed   : > { %v1154_v4 = vsub.f32 1.0, %v1117_v3  ;;  %v1081_v12 = vsub.f32 %v7764_v47, %v1028_v43  ;;  %v8865_v57 = vpop.f32.mrf.mxu1  ;;  %v1442_v3 = vsub.f32 1.0, %v1405_v35 }
 0x1ee   : > { %10868 = vst [vmem:[#allocation66_spill] sm:$0xff] %v8865_v57  ;;  %v8867_v60 = vpop.f32.mrf.mxu0 }
 0x1ef   : > { %10869 = vst [vmem:[#allocation67_spill] sm:$0xff] %v8867_v60  ;;  %v1191_v8 = vmax.f32 %v1154_v4, 0.0  ;;  %v1118_v31 = vand.u32 2147483647, %v1081_v12  ;;  %v8871_v17 = vpop.f32.mrf.mxu1  ;;  %7022 = vmatmul.mubr.msk.f32.gmra.mxu1 %vm2718_vm0, %v1477_v13  ;;  %v1156_v12 = vsub.f32 1.0, %v1119_v2  ;;  %v1443_v2 = vsub.f32 1.0, %v1406_v20 }
 0x1f0   : > { %10870 = vst [vmem:[#allocation68_spill] sm:$0xff] %v8871_v17  ;;  %1555 = vperm.xlu1 %7287, %v8875_v59   ;;  %v8878_v7 = vpop.f32.mrf.mxu0  ;;  %4288 = vmatprep.mubr.f32.mxu1 %v10825_v56  ;;  %v1407_v13 = vand.u32 2147483647, %v1370_v23 }
 0x1f1   : > { %v1155_v25 = vsub.f32 1.0, %v1118_v31  ;;  %v8881_v43 = vpop.f32.mrf.mxu1  ;;  %v8883_v40 = vpop.permute.xlu1 %1323  ;;  %6995 = vmatmul.mubr.msk.f32.gmra.mxu0 %vm2718_vm0, %v1191_v8  ;;  %v1371_v31 = vsub.f32 %v7764_v47, %v8736_v19  ;;  %v1479_v8 = vmax.f32 %v1442_v3, 0.0 }
 0x1f2   : > { %10871 = vst [vmem:[#allocation69_spill] sm:$0xff] %v8881_v43  ;;  %v8886_v4 = vpop.f32.mrf.mxu0  ;;  %3950 = vmatprep.mubr.f32.mxu0 %v10825_v56  ;;  %v1444_v19 = vsub.f32 1.0, %v1407_v13  ;;  %v1044_v13 = vpop.permute.xlu0 %1043 }
 0x1f3   : > { %10872 = vst [vmem:[#allocation70_spill] sm:$0xff] %v8886_v4  ;;  %v1192_v60 = vmax.f32 %v1155_v25, 0.0  ;;  %v8889_v17 = vpop.f32.mrf.mxu1  ;;  %7023 = vmatmul.mubr.msk.f32.gmra.mxu1 %vm2718_vm0, %v1478_v54  ;;  %v1193_v54 = vmax.f32 %v1156_v12, 0.0  ;;  %v1408_v3 = vand.u32 2147483647, %v1371_v31 }
 0x1f4   : > { %10873 = vst [vmem:[#allocation71_spill] sm:$0xff] %v8889_v17  ;;  %7289 = vset.pattern.permute.xlu1 %v10828_v42  ;;  %v8895_v35 = vpop.f32.mrf.mxu0  ;;  %4294 = vmatprep.mubr.f32.mxu1 %v10825_v56  ;;  %v1480_v17 = vmax.f32 %v1443_v2, 0.0  ;;  %v1481_v2 = vmax.f32 %v1444_v19, 0.0  ;;  %v7415_v19 = vld [vmem:[%s7569_s28 + $0x88] sm:$0xff] }
 0x1f5   : > { %v8898_v24 = vpop.f32.mrf.mxu1  ;;  %1851 = vperm.xlu1 %7289, %v8875_v59   ;;  %v8901_v23 = vpop.permute.xlu1 %1327  ;;  %6996 = vmatmul.mubr.msk.f32.gmra.mxu0 %vm2718_vm0, %v1192_v60  ;;  %v1372_v60 = vsub.f32 %v7764_v47, %v8754_v55  ;;  %v1373_v55 = vsub.f32 %v7764_v47, %v8720_v61 }
 0x1f6   : > { %10874 = vst [vmem:[#allocation72_spill] sm:$0xff] %v8898_v24  ;;  %v8904_v25 = vpop.f32.mrf.mxu0  ;;  %3956 = vmatprep.mubr.f32.mxu0 %v10825_v56  ;;  %v10800_v24 = vmov 3  }
 0x1f7   : > { %10875 = vst [vmem:[#allocation73_spill] sm:$0xff] %v8904_v25  ;;  %v8907_v4 = vpop.f32.mrf.mxu1  ;;  %7024 = vmatmul.mubr.msk.f32.gmra.mxu1 %vm2718_vm0, %v1479_v8  ;;  %7310 = vset.pattern.permute.xlu0 %v10800_v24  ;;  %v8919_v25 = vld [vmem:[%s7569_s28 + $0x80] sm:$0xff]  ;;  %v1409_v43 = vand.u32 2147483647, %v1372_v60 }
 0x1f8   : > { %10876 = vst [vmem:[#allocation74_spill] sm:$0xff] %v8907_v4  ;;  %v8910_v20 = vpop.f32.mrf.mxu0  ;;  %4300 = vmatprep.mubr.f32.mxu1 %v10825_v56  ;;  %2087 = vperm.xlu0 %7310, %v8507_v58   ;;  %v1445_v4 = vsub.f32 1.0, %v1408_v3  ;;  %v8942_v3 = vpop.permute.xlu0 %1331 }
 0x1f9   : > { %v8916_v12 = vpop.f32.mrf.mxu1  ;;  %1855 = vperm.xlu1 %7289, %v8919_v25   ;;  %6997 = vmatmul.mubr.msk.f32.gmra.mxu0 %vm2718_vm0, %v1193_v54 }
 0x1fa   : > { %10877 = vst [vmem:[#allocation75_spill] sm:$0xff] %v8916_v12  ;;  %v1036_v31 = vpop.permute.xlu1 %1035  ;;  %v8923_v8 = vpop.f32.mrf.mxu0  ;;  %3962 = vmatprep.mubr.f32.mxu0 %v10825_v56 }
 0x1fb   : > { %10878 = vst [vmem:[#allocation76_spill] sm:$0xff] %v8923_v8  ;;  %v1083_v24 = vsub.f32 %v7764_v47, %v1036_v31  ;;  %v3366_v12 = vpop.f32.mrf.mxu1  ;;  %7025 = vmatmul.mubr.msk.f32.gmra.mxu1 %vm2718_vm0, %v1480_v17  ;;  %v1085_v8 = vsub.f32 %v7764_v47, %v1044_v13 }
 0x1fc   : > { %v8932_v54 = vmul.f32 %v3366_v12, %v8826_v44  ;;  %4306 = vmatprep.mubr.f32.mxu1 %v10825_v56  ;;  %v10802_v44 = vmov 7   ;;  %v1410_v12 = vand.u32 2147483647, %v1373_v55 }
 0x1fd   : > { %v1120_v57 = vand.u32 2147483647, %v1083_v24  ;;  %v8936_v58 = vpop.f32.mrf.mxu1  ;;  %7290 = vset.pattern.permute.xlu1 %v10836_v46  ;;  %v8939_v61 = vpop.f32.mrf.mxu0  ;;  %7313 = vset.pattern.permute.xlu0 %v10802_v44  ;;  %v1122_v53 = vand.u32 2147483647, %v1085_v8  ;;  %v1446_v44 = vsub.f32 1.0, %v1409_v43 }
 0x1fe   : > { %10879 = vst [vmem:[#allocation77_spill] sm:$0xff] %v8932_v54  ;;  %10880 = vst [vmem:[#allocation78_spill] sm:$0xff] %v8936_v58  ;;  %1563 = vperm.xlu1 %7290, %v7415_v19   ;;  %v1040_v17 = vpop.permute.xlu1 %1039  ;;  %v7416_v58 = vld [vmem:[%s7569_s28 + $0x8] sm:$0xff]  ;;  %v1482_v54 = vmax.f32 %v1445_v4, 0.0  ;;  %v1447_v4 = vsub.f32 1.0, %v1410_v12  ;;  %v8975_v12 = vpop.permute.xlu0 %1343 }
 0x1ff   : > { %v1157_v31 = vsub.f32 1.0, %v1120_v57  ;;  %v1084_v60 = vsub.f32 %v7764_v47, %v1040_v17  ;;  %v3372_v24 = vpop.f32.mrf.mxu1  ;;  %7026 = vmatmul.mubr.msk.f32.gmra.mxu1 %vm2718_vm0, %v1481_v2  ;;  %v8947_v13 = vpop.f32.mrf.mxu0  ;;  %2387 = vperm.xlu0 %7313, %v7416_v58   ;;  %v1374_v57 = vsub.f32 %v7764_v47, %v8805_v18 }
 0x200   : > { %v8951_v19 = vmul.f32 %v3372_v24, %v8841_v21  ;;  %4312 = vmatprep.mubr.f32.mxu1 %v10825_v56 }
 0x201   : > { %v1194_v55 = vmax.f32 %v1157_v31, 0.0  ;;  %v1121_v17 = vand.u32 2147483647, %v1084_v60  ;;  %v8956_v37 = vpop.f32.mrf.mxu1  ;;  %v8958_v2 = vpop.f32.mrf.mxu0  ;;  %v1159_v31 = vsub.f32 1.0, %v1122_v53  ;;  %v1483_v60 = vmax.f32 %v1446_v44, 0.0 }
 0x202   : > { %10881 = vst [vmem:[#allocation79_spill] sm:$0xff] %v8951_v19  ;;  %10882 = vst [vmem:[#allocation80_spill] sm:$0xff] %v8956_v37  ;;  %1567 = vperm.xlu1 %7290, %v8961_v33   ;;  %v1411_v24 = vand.u32 2147483647, %v1374_v57  ;;  %v1376_v53 = vsub.f32 %v7764_v47, %v8745_v50  ;;  %v10887_v50 = vmov 3  }
 0x203   : > { %v1158_v21 = vsub.f32 1.0, %v1121_v17  ;;  %v3378_v58 = vpop.f32.mrf.mxu1  ;;  %7027 = vmatmul.mubr.msk.f32.gmra.mxu1 %vm2718_vm0, %v1482_v54  ;;  %v8965_v43 = vpop.permute.xlu1 %1335  ;;  %6998 = vmatmul.mubr.msk.f32.gmra.mxu0 %vm2718_vm0, %v1194_v55  ;;  %v1375_v54 = vsub.f32 %v7764_v47, %v8823_v52  ;;  %v7418_v55 = vld [vmem:[%s7569_s28 + $0x20] sm:$0xff]  ;;  %v1196_v57 = vmax.f32 %v1159_v31, 0.0 }
 0x204   : > { %v8969_v18 = vmul.f32 %v3378_v58, %v8859_v28  ;;  %v8971_v8 = vpop.f32.mrf.mxu0  ;;  %4318 = vmatprep.mubr.f32.mxu1 %v10825_v56  ;;  %3968 = vmatprep.mubr.f32.mxu0 %v10825_v56  ;;  %v1484_v58 = vmax.f32 %v1447_v4, 0.0  ;;  %v1448_v4 = vsub.f32 1.0, %v1411_v24 }
 0x205   : > { %v1195_v17 = vmax.f32 %v1158_v21, 0.0  ;;  %v8979_v37 = vpop.f32.mrf.mxu1  ;;  %2399 = vperm.xlu0 %7313, %v7418_v55   ;;  %v1412_v21 = vand.u32 2147483647, %v1375_v54 }
 0x206   : > { %10883 = vst [vmem:[#allocation81_spill] sm:$0xff] %v8969_v18  ;;  %10884 = vst [vmem:[#allocation82_spill] sm:$0xff] %v8979_v37  ;;  %7292 = vset.pattern.permute.xlu1 %v10828_v42  ;;  %v8983_v28 = vpop.f32.mrf.mxu0  ;;  %v1413_v37 = vand.u32 2147483647, %v1376_v53 }
 0x207   : > { %v3384_v18 = vpop.f32.mrf.mxu1  ;;  %7028 = vmatmul.mubr.msk.f32.gmra.mxu1 %vm2718_vm0, %v1483_v60  ;;  %1863 = vperm.xlu1 %7292, %v8961_v33   ;;  %v8989_v52 = vpop.permute.xlu1 %1339  ;;  %v1449_v54 = vsub.f32 1.0, %v1412_v21 }
 0x208   : > { %v8992_v44 = vmul.f32 %v3384_v18, %v8878_v7  ;;  %6999 = vmatmul.mubr.msk.f32.gmra.mxu0 %vm2718_vm0, %v1195_v17  ;;  %4324 = vmatprep.mubr.f32.mxu1 %v10825_v56  ;;  %v1500_v60 = vpop.permute.xlu0 %1499  ;;  %v9003_v7 = vld [vmem:[%s7569_s28 + $0x98] sm:$0xff]  ;;  %v9006_v18 = vpop.f32.mrf.mxu0  ;;  %v1377_v17 = vsub.f32 %v7764_v47, %v8883_v40 }
 0x209   : > { %v8996_v55 = vpop.f32.mrf.mxu1  ;;  %3974 = vmatprep.mubr.f32.mxu0 %v10825_v56  ;;  %7316 = vset.pattern.permute.xlu0 %v10887_v50 }
 0x20a   : > { %10885 = vst [vmem:[#allocation83_spill] sm:$0xff] %v8992_v44  ;;  %10886 = vst [vmem:[#allocation84_spill] sm:$0xff] %v8996_v55  ;;  %2099 = vperm.xlu0 %7316, %v8592_v5   ;;  %v1485_v5 = vmax.f32 %v1448_v4, 0.0  ;;  %v7420_v4 = vld [vmem:[%s7569_s28 + $0xa0] sm:$0xff] }
 0x20b   : > { %v3390_v19 = vpop.f32.mrf.mxu1  ;;  %7029 = vmatmul.mubr.msk.f32.gmra.mxu1 %vm2718_vm0, %v1484_v58  ;;  %1867 = vperm.xlu1 %7292, %v9003_v7  }
 0x20c   : > { %v9009_v31 = vmul.f32 %v3390_v19, %v8895_v35  ;;  %v1048_v24 = vpop.permute.xlu1 %1047  ;;  %4330 = vmatprep.mubr.f32.mxu1 %v10825_v56  ;;  %7000 = vmatmul.mubr.msk.f32.gmra.mxu0 %vm2718_vm0, %v1196_v57  ;;  %v1643_v35 = vsub.f32 %v7764_v47, %v1500_v60  ;;  %v1450_v19 = vsub.f32 1.0, %v1413_v37  ;;  %v9030_v21 = vpop.permute.xlu0 %1799  ;;  %v1414_v37 = vand.u32 2147483647, %v1377_v17 }
 0x20d   : > { %v1086_v58 = vsub.f32 %v7764_v47, %v1048_v24  ;;  %v9016_v53 = vpop.f32.mrf.mxu1  ;;  %3980 = vmatprep.mubr.f32.mxu0 %v10825_v56  ;;  %v1378_v60 = vsub.f32 %v7764_v47, %v8901_v23  ;;  %v1379_v23 = vsub.f32 %v7764_v47, %v8942_v3 }
 0x20e   : > { %10888 = vst [vmem:[#allocation85_spill] sm:$0xff] %v9009_v31  ;;  %10889 = vst [vmem:[#allocation86_spill] sm:$0xff] %v9016_v53  ;;  %2111 = vperm.xlu0 %7316, %v8661_v62   ;;  %v1486_v62 = vmax.f32 %v1449_v54, 0.0  ;;  %v10892_v53 = vmov 7  }
 0x20f   : > { %v1123_v55 = vand.u32 2147483647, %v1086_v58  ;;  %v3396_v31 = vpop.f32.mrf.mxu1  ;;  %7030 = vmatmul.mubr.msk.f32.gmra.mxu1 %vm2718_vm0, %v1485_v5  ;;  %7293 = vset.pattern.permute.xlu1 %v10836_v46  ;;  %v9023_v57 = vpop.f32.mrf.mxu0 }
 0x210   : > { %v9026_v40 = vmul.f32 %v3396_v31, %v8910_v20  ;;  %1575 = vperm.xlu1 %7293, %v7420_v4   ;;  %4336 = vmatprep.mubr.f32.mxu1 %v10825_v56  ;;  %v1680_v4 = vand.u32 2147483647, %v1643_v35  ;;  %v1451_v35 = vsub.f32 1.0, %v1414_v37  ;;  %v7423_v37 = vld [vmem:[%s7569_s28 + $0x50] sm:$0xff] }
 0x211   : > { %v1160_v24 = vsub.f32 1.0, %v1123_v55  ;;  %v9034_v5 = vpop.f32.mrf.mxu1  ;;  %v1496_v58 = vpop.permute.xlu1 %1495  ;;  %v7421_v55 = vld [vmem:[%s7569_s28 + $0x38] sm:$0xff] }
 0x212   : > { %10890 = vst [vmem:[#allocation87_spill] sm:$0xff] %v9026_v40  ;;  %10891 = vst [vmem:[#allocation88_spill] sm:$0xff] %v9034_v5  ;;  %v1642_v20 = vsub.f32 %v7764_v47, %v1496_v58  ;;  %v9037_v31 = vpop.f32.mrf.mxu0  ;;  %7319 = vset.pattern.permute.xlu0 %v10892_v53  ;;  %v1487_v40 = vmax.f32 %v1450_v19, 0.0  ;;  %v9049_v58 = vld [vmem:[%s7569_s28 + $0xa8] sm:$0xff]  ;;  %v1415_v19 = vand.u32 2147483647, %v1378_v60 }
 0x213   : > { %v1197_v44 = vmax.f32 %v1160_v24, 0.0  ;;  %v9040_v22 = vpop.f32.mrf.mxu1  ;;  %7031 = vmatmul.mubr.msk.f32.gmra.mxu1 %vm2718_vm0, %v1486_v62  ;;  %2411 = vperm.xlu0 %7319, %v7421_v55   ;;  %v9059_v55 = vpop.permute.xlu0 %1811  ;;  %v1416_v5 = vand.u32 2147483647, %v1379_v23 }
 0x214   : > { %10893 = vst [vmem:[#allocation89_spill] sm:$0xff] %v9040_v22  ;;  %v1679_v54 = vand.u32 2147483647, %v1642_v20  ;;  %v9046_v17 = vpop.f32.mrf.mxu0  ;;  %1579 = vperm.xlu1 %7293, %v9049_v58   ;;  %4342 = vmatprep.mubr.f32.mxu1 %v10825_v56  ;;  %v1717_v20 = vsub.f32 1.0, %v1680_v4  ;;  %v1380_v4 = vsub.f32 %v7764_v47, %v8965_v43 }
 0x215   : > { %v9053_v24 = vpop.f32.mrf.mxu1  ;;  %7001 = vmatmul.mubr.msk.f32.gmra.mxu0 %vm2718_vm0, %v1197_v44  ;;  %v1488_v44 = vmax.f32 %v1451_v35, 0.0 }
 0x216   : > { %10894 = vst [vmem:[#allocation90_spill] sm:$0xff] %v9053_v24  ;;  %v1716_v62 = vsub.f32 1.0, %v1679_v54  ;;  %v9056_v3 = vpop.permute.xlu1 %1791  ;;  %4708 = vmatprep.mubr.f32.mxu0 %v10825_v56  ;;  %v9061_v22 = vpop.f32.mrf.mxu0  ;;  %v1452_v54 = vsub.f32 1.0, %v1415_v19  ;;  %v1417_v19 = vand.u32 2147483647, %v1380_v4 }
 0x217   : > { %v9063_v38 = vpop.f32.mrf.mxu1  ;;  %7032 = vmatmul.mubr.msk.f32.gmra.mxu1 %vm2718_vm0, %v1487_v40  ;;  %2423 = vperm.xlu0 %7319, %v7423_v37   ;;  %v1453_v37 = vsub.f32 1.0, %v1416_v5  ;;  %v1512_v43 = vpop.permute.xlu0 %1511 }
 0x218   : > { %10895 = vst [vmem:[#allocation91_spill] sm:$0xff] %v9063_v38  ;;  %v1753_v60 = vmax.f32 %v1716_v62, 0.0  ;;  %7295 = vset.pattern.permute.xlu1 %v10828_v42  ;;  %4348 = vmatprep.mubr.f32.mxu1 %v10825_v56  ;;  %v9074_v23 = vpop.f32.mrf.mxu0  ;;  %v1754_v62 = vmax.f32 %v1717_v20, 0.0  ;;  %v1489_v35 = vmax.f32 %v1452_v54, 0.0  ;;  %v9090_v20 = vld [vmem:[%s7569_s28 + $0xb0] sm:$0xff] }
 0x219   : > { %v9071_v24 = vpop.f32.mrf.mxu1  ;;  %1875 = vperm.xlu1 %7295, %v9049_v58   ;;  %10897 = vst [vmem:[#allocation93_spill] sm:$0xff] %v9074_v23 }
 0x21a   : > { %10896 = vst [vmem:[#allocation92_spill] sm:$0xff] %v9071_v24  ;;  %v9076_v40 = vpop.permute.xlu1 %1795  ;;  %7039 = vmatmul.mubr.msk.f32.vlgmr.msra.gmra.mxu0 %vm2718_vm0, %v1753_v60  ;;  %v1381_v24 = vsub.f32 %v7764_v47, %v8989_v52  ;;  %v9093_v5 = vpop.f32.mrf.mxu0  ;;  %v1490_v60 = vmax.f32 %v1453_v37, 0.0 }
 0x21b   : > { %v9079_v38 = vpop.f32.mrf.mxu1  ;;  %7033 = vmatmul.mubr.msk.f32.gmra.mxu1 %vm2718_vm0, %v1488_v44  ;;  %4714 = vmatprep.mubr.f32.mxu0 %v10825_v56  ;;  %10900 = vst [vmem:[#allocation96_spill] sm:$0xff] %v9093_v5  ;;  %v1382_v44 = vsub.f32 %v7764_v47, %v8975_v12  ;;  %v1454_v12 = vsub.f32 1.0, %v1417_v19  ;;  %v7428_v19 = vld [vmem:[%s10788_s2] sm:$0xff] }
 0x21c   : > { %10898 = vst [vmem:[#allocation94_spill] sm:$0xff] %v9079_v38  ;;  %4354 = vmatprep.mubr.f32.mxu1 %v10825_v56  ;;  %7322 = vset.pattern.permute.xlu0 %v10887_v50  ;;  %v1418_v37 = vand.u32 2147483647, %v1381_v24 }
 0x21d   : > { %v9087_v23 = vpop.f32.mrf.mxu1  ;;  %1879 = vperm.xlu1 %7295, %v9090_v20   ;;  %2123 = vperm.xlu0 %7322, %v8730_v6   ;;  %v1646_v6 = vsub.f32 %v7764_v47, %v1512_v43  ;;  %v7427_v43 = vld [vmem:[%s10788_s2 + $0x8] sm:$0xff]  ;;  %v1419_v38 = vand.u32 2147483647, %v1382_v44  ;;  %v10905_v44 = vmov 0  }
 0x21e   : > { %10899 = vst [vmem:[#allocation95_spill] sm:$0xff] %v9087_v23  ;;  %7040 = vmatmul.mubr.msk.f32.gmra.mxu0 %vm2718_vm0, %v1754_v62  ;;  %v7425_v62 = vld [vmem:[%s10788_s2 + $0x10] sm:$0xff] }
 0x21f   : > { %v9099_v54 = vpop.f32.mrf.mxu1  ;;  %7034 = vmatmul.mubr.msk.f32.gmra.mxu1 %vm2718_vm0, %v1489_v35  ;;  %v1504_v52 = vpop.permute.xlu1 %1503  ;;  %4720 = vmatprep.mubr.f32.mxu0 %v10825_v56 }
 0x220   : > { %10901 = vst [vmem:[#allocation97_spill] sm:$0xff] %v9099_v54  ;;  %v1644_v4 = vsub.f32 %v7764_v47, %v1504_v52  ;;  %4360 = vmatprep.mubr.f32.mxu1 %v10825_v56  ;;  %5617 = vmatpush1.msra.mxu0 %v7425_v62  ;;  %v7426_v54 = vld [vmem:[%s7569_s28 + $0xb8] sm:$0xff] }
 0x221   : > { %v9109_v23 = vpop.f32.mrf.mxu1  ;;  %7296 = vset.pattern.permute.xlu1 %v10836_v46  ;;  %v9112_v35 = vpop.f32.mrf.mxu0  ;;  %2135 = vperm.xlu0 %7322, %v8799_v27  }
 0x222   : > { %10902 = vst [vmem:[#allocation98_spill] sm:$0xff] %v9109_v23  ;;  %10903 = vst [vmem:[#allocation99_spill] sm:$0xff] %v9112_v35  ;;  %v1681_v52 = vand.u32 2147483647, %v1644_v4  ;;  %1587 = vperm.xlu1 %7296, %v7426_v54   ;;  %5618 = vmatprep.subr.mxu0 %v7427_v43  ;;  %v1683_v43 = vand.u32 2147483647, %v1646_v6 }
 0x223   : > { %v9119_v62 = vpop.f32.mrf.mxu1  ;;  %7035 = vmatmul.mubr.msk.f32.gmra.mxu1 %vm2718_vm0, %v1490_v60  ;;  %v1508_v24 = vpop.permute.xlu1 %1507  ;;  %5619 = vmatpush1.msra.mxu0 %v7428_v19  ;;  %v1491_v23 = vmax.f32 %v1454_v12, 0.0  ;;  %v1938_v60 = vsub.f32 %v7764_v47, %v9056_v3  ;;  %v1456_v6 = vsub.f32 1.0, %v1419_v38 }
 0x224   : > { %10904 = vst [vmem:[#allocation100_spill] sm:$0xff] %v9119_v62  ;;  %v1718_v27 = vsub.f32 1.0, %v1681_v52  ;;  %v1645_v54 = vsub.f32 %v7764_v47, %v1508_v24  ;;  %v9126_v4 = vpop.f32.mrf.mxu0  ;;  %4366 = vmatprep.mubr.f32.mxu1 %v10825_v56  ;;  %6555 = vmatprep.subr.bf16.mxu0 %v10905_v44  ;;  %v1455_v62 = vsub.f32 1.0, %v1418_v37  ;;  %v9138_v24 = vld [vmem:[%s7569_s28 + $0xc0] sm:$0xff]  ;;  %v1939_v44 = vsub.f32 %v7764_v47, %v9076_v40 }
 0x225   : > { %v9132_v35 = vpop.f32.mrf.mxu1  ;;  %7325 = vset.pattern.permute.xlu0 %v10892_v53 }
 0x226   : > { %10906 = vst [vmem:[#allocation101_spill] sm:$0xff] %v9132_v35  ;;  %v1755_v19 = vmax.f32 %v1718_v27, 0.0  ;;  %v1682_v52 = vand.u32 2147483647, %v1645_v54  ;;  %v9135_v5 = vpop.f32.mrf.mxu0  ;;  %1591 = vperm.xlu1 %7296, %v9138_v24   ;;  %2435 = vperm.xlu0 %7325, %v8838_v15   ;;  %v1720_v27 = vsub.f32 1.0, %v1683_v43  ;;  %v1492_v54 = vmax.f32 %v1455_v62, 0.0 }
 0x227   : > { %10907 = vst [vmem:[#allocation102_spill] sm:$0xff] %v9135_v5  ;;  %v9142_v12 = vpop.f32.mrf.mxu1  ;;  %7036 = vmatmul.mubr.msk.f32.gmra.mxu1 %vm2718_vm0, %v1491_v23  ;;  %v1975_v35 = vand.u32 2147483647, %v1938_v60  ;;  %v1493_v23 = vmax.f32 %v1456_v6, 0.0  ;;  %v1940_v43 = vsub.f32 %v7764_v47, %v9030_v21  ;;  %v1524_v21 = vpop.permute.xlu0 %1523 }
 0x228   : > { %10908 = vst [vmem:[#allocation103_spill] sm:$0xff] %v9142_v12  ;;  %v1719_v3 = vsub.f32 1.0, %v1682_v52  ;;  %v1804_v37 = vpop.permute.xlu1 %1803  ;;  %7041 = vmatmul.mubr.msk.f32.gmra.mxu0 %vm2718_vm0, %v1755_v19  ;;  %4372 = vmatprep.mubr.f32.mxu1 %v10825_v56  ;;  %v9149_v5 = vpop.f32.mrf.mxu0  ;;  %v1757_v19 = vmax.f32 %v1720_v27, 0.0  ;;  %v1976_v52 = vand.u32 2147483647, %v1939_v44 }
 0x229   : > { %v9151_v15 = vpop.f32.mrf.mxu1  ;;  %4726 = vmatprep.mubr.f32.mxu0 %v10825_v56  ;;  %v1941_v27 = vsub.f32 %v7764_v47, %v1804_v37 }
 0x22a   : > { %10909 = vst [vmem:[#allocation104_spill] sm:$0xff] %v9151_v15  ;;  %v1756_v38 = vmax.f32 %v1719_v3, 0.0  ;;  %7298 = vset.pattern.permute.xlu1 %v10828_v42  ;;  %2447 = vperm.xlu0 %7325, %v8919_v25   ;;  %v9162_v40 = vpop.f32.mrf.mxu0  ;;  %v2012_v25 = vsub.f32 1.0, %v1975_v35  ;;  %v1977_v3 = vand.u32 2147483647, %v1940_v43  ;;  %v9174_v15 = vld [vmem:[%s7569_s28 + $0xc8] sm:$0xff] }
 0x22b   : > { %v9158_v62 = vpop.f32.mrf.mxu1  ;;  %7037 = vmatmul.mubr.msk.f32.gmra.mxu1 %vm2718_vm0, %v1492_v54  ;;  %1887 = vperm.xlu1 %7298, %v9138_v24   ;;  %v2013_v44 = vsub.f32 1.0, %v1976_v52  ;;  %v9196_v52 = vpop.permute.xlu0 %1823 }
 0x22c   : > { %10910 = vst [vmem:[#allocation105_spill] sm:$0xff] %v9158_v62  ;;  %v1808_v60 = vpop.permute.xlu1 %1807  ;;  %7042 = vmatmul.mubr.msk.f32.gmra.mxu0 %vm2718_vm0, %v1756_v38  ;;  %4378 = vmatprep.mubr.f32.mxu1 %v10825_v56  ;;  %v9177_v38 = vpop.f32.mrf.mxu0  ;;  %v2049_v35 = vmax.f32 %v2012_v25, 0.0  ;;  %v2014_v62 = vsub.f32 1.0, %v1977_v3  ;;  %v7431_v25 = vld [vmem:[%s7569_s28 + $0xd0] sm:$0xff] }
 0x22d   : > { %v9166_v6 = vpop.f32.mrf.mxu1  ;;  %4732 = vmatprep.mubr.f32.mxu0 %v10825_v56 }
 0x22e   : > { %10911 = vst [vmem:[#allocation106_spill] sm:$0xff] %v9166_v6  ;;  %7328 = vset.pattern.permute.xlu0 %v10887_v50 }
 0x22f   : > { %v9170_v54 = vpop.f32.mrf.mxu1  ;;  %7038 = vmatmul.mubr.msk.f32.gmra.mxu1 %vm2718_vm0, %v1493_v23  ;;  %1891 = vperm.xlu1 %7298, %v9174_v15  }
 0x230   : > { %10912 = vst [vmem:[#allocation107_spill] sm:$0xff] %v9170_v54  ;;  %5106 = vmatprep.mubr.f32.mxu1 %v10825_v56  ;;  %7043 = vmatmul.mubr.msk.f32.gmra.mxu0 %vm2718_vm0, %v1757_v19  ;;  %v1649_v54 = vsub.f32 %v7764_v47, %v1524_v21  ;;  %v1942_v21 = vsub.f32 %v7764_v47, %v1808_v60  ;;  %v7433_v60 = vld [vmem:[%s10789_s3 + $0x8] sm:$0xff] }
 0x231   : > { %v9182_v43 = vpop.f32.mrf.mxu1  ;;  %v1516_v6 = vpop.permute.xlu1 %1515  ;;  %4738 = vmatprep.mubr.f32.mxu0 %v10825_v56  ;;  %2147 = vperm.xlu0 %7328, %v8875_v59   ;;  %v2050_v59 = vmax.f32 %v2013_v44, 0.0 }
 0x232   : > { %10913 = vst [vmem:[#allocation108_spill] sm:$0xff] %v9182_v43  ;;  %v1647_v23 = vsub.f32 %v7764_v47, %v1516_v6  ;;  %v1978_v6 = vand.u32 2147483647, %v1941_v27  ;;  %v1686_v44 = vand.u32 2147483647, %v1649_v54  ;;  %v2051_v27 = vmax.f32 %v2014_v62, 0.0 }
 0x233   : > { %v9188_v12 = vpop.f32.mrf.mxu1  ;;  %7076 = vmatmul.mubr.msk.f32.vlgmr.msra.gmra.mxu1 %vm2718_vm0, %v2049_v35  ;;  %7299 = vset.pattern.permute.xlu1 %v10836_v46  ;;  %v9192_v19 = vpop.f32.mrf.mxu0  ;;  %v7432_v35 = vld [vmem:[%s10789_s3 + $0x10] sm:$0xff] }
 0x234   : > { %10914 = vst [vmem:[#allocation109_spill] sm:$0xff] %v9188_v12  ;;  %10915 = vst [vmem:[#allocation110_spill] sm:$0xff] %v9192_v19  ;;  %v1684_v37 = vand.u32 2147483647, %v1647_v23  ;;  %1599 = vperm.xlu1 %7299, %v7431_v25   ;;  %5112 = vmatprep.mubr.f32.mxu1 %v10825_v56  ;;  %v2015_v54 = vsub.f32 1.0, %v1978_v6 }
 0x235   : > { %v9199_v3 = vpop.f32.mrf.mxu1  ;;  %v1520_v43 = vpop.permute.xlu1 %1519  ;;  %6015 = vmatpush1.msra.mxu1 %v7432_v35  ;;  %2159 = vperm.xlu0 %7328, %v8961_v33  }
 0x236   : > { %10916 = vst [vmem:[#allocation111_spill] sm:$0xff] %v9199_v3  ;;  %v1721_v23 = vsub.f32 1.0, %v1684_v37  ;;  %v1648_v25 = vsub.f32 %v7764_v47, %v1520_v43  ;;  %v9206_v12 = vpop.f32.mrf.mxu0  ;;  %6016 = vmatprep.subr.mxu1 %v7433_v60  ;;  %v1943_v3 = vsub.f32 %v7764_v47, %v9059_v55  ;;  %v9219_v43 = vld [vmem:[%s7569_s28 + $0xd8] sm:$0xff]  ;;  %v1979_v60 = vand.u32 2147483647, %v1942_v21  ;;  %v7435_v55 = vld [vmem:[%s10789_s3] sm:$0xff] }
 0x237   : > { %v9213_v19 = vpop.f32.mrf.mxu1  ;;  %7077 = vmatmul.mubr.msk.f32.gmra.mxu1 %vm2718_vm0, %v2050_v59 }
 0x238   : > { %10917 = vst [vmem:[#allocation112_spill] sm:$0xff] %v9213_v19  ;;  %v1758_v33 = vmax.f32 %v1721_v23, 0.0  ;;  %v1685_v37 = vand.u32 2147483647, %v1648_v25  ;;  %v9216_v35 = vpop.f32.mrf.mxu0  ;;  %1603 = vperm.xlu1 %7299, %v9219_v43   ;;  %5118 = vmatprep.mubr.f32.mxu1 %v10825_v56  ;;  %v1723_v25 = vsub.f32 1.0, %v1686_v44  ;;  %v9230_v19 = vpop.permute.xlu0 %1835  ;;  %v2016_v44 = vsub.f32 1.0, %v1979_v60 }
 0x239   : > { %10918 = vst [vmem:[#allocation113_spill] sm:$0xff] %v9216_v35  ;;  %v9223_v62 = vpop.f32.mrf.mxu1  ;;  %7331 = vset.pattern.permute.xlu0 %v10892_v53  ;;  %6017 = vmatpush1.msra.mxu1 %v7435_v55  ;;  %v1980_v6 = vand.u32 2147483647, %v1943_v3 }
 0x23a   : > { %10919 = vst [vmem:[#allocation114_spill] sm:$0xff] %v9223_v62  ;;  %v1722_v59 = vsub.f32 1.0, %v1685_v37  ;;  %v1816_v23 = vpop.permute.xlu1 %1815  ;;  %7044 = vmatmul.mubr.msk.f32.gmra.mxu0 %vm2718_vm0, %v1758_v33  ;;  %2459 = vperm.xlu0 %7331, %v9003_v7   ;;  %v9233_v21 = vpop.f32.mrf.mxu0  ;;  %v2052_v33 = vmax.f32 %v2015_v54, 0.0  ;;  %v2053_v60 = vmax.f32 %v2016_v44, 0.0  ;;  %v1946_v44 = vsub.f32 %v7764_v47, %v9196_v52  ;;  %v7437_v52 = vld [vmem:[%s7569_s28 + $0xe8] sm:$0xff] }
 0x23b   : > { %10920 = vst [vmem:[#allocation115_spill] sm:$0xff] %v9233_v21  ;;  %v9235_v62 = vpop.f32.mrf.mxu1  ;;  %7078 = vmatmul.mubr.msk.f32.gmra.mxu1 %vm2718_vm0, %v2051_v27  ;;  %4744 = vmatprep.mubr.f32.mxu0 %v10825_v56  ;;  %v1944_v37 = vsub.f32 %v7764_v47, %v1816_v23  ;;  %v1760_v27 = vmax.f32 %v1723_v25, 0.0 }
 0x23c   : > { %10921 = vst [vmem:[#allocation116_spill] sm:$0xff] %v9235_v62  ;;  %v1759_v35 = vmax.f32 %v1722_v59, 0.0  ;;  %7301 = vset.pattern.permute.xlu1 %v10828_v42  ;;  %5124 = vmatprep.mubr.f32.mxu1 %v10825_v56  ;;  %v9245_v7 = vpop.f32.mrf.mxu0  ;;  %v2017_v59 = vsub.f32 1.0, %v1980_v6  ;;  %v1536_v54 = vpop.permute.xlu0 %1535 }
 0x23d   : > { %v9242_v55 = vpop.f32.mrf.mxu1  ;;  %1899 = vperm.xlu1 %7301, %v9219_v43   ;;  %10923 = vst [vmem:[#allocation118_spill] sm:$0xff] %v9245_v7  ;;  %v1981_v23 = vand.u32 2147483647, %v1944_v37 }
 0x23e   : > { %10922 = vst [vmem:[#allocation117_spill] sm:$0xff] %v9242_v55  ;;  %v1820_v3 = vpop.permute.xlu1 %1819  ;;  %7045 = vmatmul.mubr.msk.f32.gmra.mxu0 %vm2718_vm0, %v1759_v35  ;;  %2471 = vperm.xlu0 %7331, %v9090_v20   ;;  %v9258_v35 = vld [vmem:[%s7569_s28 + $0xe0] sm:$0xff]  ;;  %v9261_v20 = vpop.f32.mrf.mxu0  ;;  %v2054_v25 = vmax.f32 %v2017_v59, 0.0 }
 0x23f   : > { %v9249_v62 = vpop.f32.mrf.mxu1  ;;  %7079 = vmatmul.mubr.msk.f32.gmra.mxu1 %vm2718_vm0, %v2052_v33  ;;  %4750 = vmatprep.mubr.f32.mxu0 %v10825_v56  ;;  %v1945_v55 = vsub.f32 %v7764_v47, %v1820_v3  ;;  %10926 = vst [vmem:[#allocation121_spill] sm:$0xff] %v9261_v20  ;;  %v1652_v3 = vsub.f32 %v7764_v47, %v1536_v54  ;;  %v1983_v54 = vand.u32 2147483647, %v1946_v44 }
 0x240   : > { %10924 = vst [vmem:[#allocation119_spill] sm:$0xff] %v9249_v62  ;;  %5130 = vmatprep.mubr.f32.mxu1 %v10825_v56 }
 0x241   : > { %v9255_v7 = vpop.f32.mrf.mxu1  ;;  %1903 = vperm.xlu1 %7301, %v9258_v35   ;;  %v1982_v59 = vand.u32 2147483647, %v1945_v55 }
 0x242   : > { %10925 = vst [vmem:[#allocation120_spill] sm:$0xff] %v9255_v7  ;;  %7046 = vmatmul.mubr.msk.f32.gmra.mxu0 %vm2718_vm0, %v1760_v27  ;;  %7334 = vset.pattern.permute.xlu0 %v10887_v50  ;;  %v2018_v27 = vsub.f32 1.0, %v1981_v23  ;;  %v1689_v23 = vand.u32 2147483647, %v1652_v3 }
 0x243   : > { %v9265_v6 = vpop.f32.mrf.mxu1  ;;  %7080 = vmatmul.mubr.msk.f32.gmra.mxu1 %vm2718_vm0, %v2053_v60  ;;  %v1528_v33 = vpop.permute.xlu1 %1527  ;;  %4756 = vmatprep.mubr.f32.mxu0 %v10825_v56 }
 0x244   : > { %10927 = vst [vmem:[#allocation122_spill] sm:$0xff] %v9265_v6  ;;  %v1650_v37 = vsub.f32 %v7764_v47, %v1528_v33  ;;  %5136 = vmatprep.mubr.f32.mxu1 %v10825_v56  ;;  %2171 = vperm.xlu0 %7334, %v9049_v58  }
 0x245   : > { %v9275_v20 = vpop.f32.mrf.mxu1  ;;  %7302 = vset.pattern.permute.xlu1 %v10836_v46  ;;  %v9278_v60 = vpop.f32.mrf.mxu0 }
 0x246   : > { %10928 = vst [vmem:[#allocation123_spill] sm:$0xff] %v9275_v20  ;;  %10929 = vst [vmem:[#allocation124_spill] sm:$0xff] %v9278_v60  ;;  %v1687_v7 = vand.u32 2147483647, %v1650_v37  ;;  %1611 = vperm.xlu1 %7302, %v7437_v52   ;;  %v2055_v37 = vmax.f32 %v2018_v27, 0.0  ;;  %v2019_v20 = vsub.f32 1.0, %v1982_v59 }
 0x247   : > { %v9281_v6 = vpop.f32.mrf.mxu1  ;;  %7081 = vmatmul.mubr.msk.f32.gmra.mxu1 %vm2718_vm0, %v2054_v25  ;;  %v1532_v33 = vpop.permute.xlu1 %1531  ;;  %v9294_v25 = vld [vmem:[%s7569_s28 + $0xf0] sm:$0xff] }
 0x248   : > { %10930 = vst [vmem:[#allocation125_spill] sm:$0xff] %v9281_v6  ;;  %v1724_v62 = vsub.f32 1.0, %v1687_v7  ;;  %v1651_v58 = vsub.f32 %v7764_v47, %v1532_v33  ;;  %v9285_v55 = vpop.f32.mrf.mxu0  ;;  %5142 = vmatprep.mubr.f32.mxu1 %v10825_v56  ;;  %2183 = vperm.xlu0 %7334, %v9138_v24   ;;  %v2020_v7 = vsub.f32 1.0, %v1983_v54  ;;  %v1726_v24 = vsub.f32 1.0, %v1689_v23 }
 0x249   : > { %10931 = vst [vmem:[#allocation126_spill] sm:$0xff] %v9285_v55  ;;  %v9289_v52 = vpop.f32.mrf.mxu1 }
 0x24a   : > { %10932 = vst [vmem:[#allocation127_spill] sm:$0xff] %v9289_v52  ;;  %v1761_v6 = vmax.f32 %v1724_v62, 0.0  ;;  %v1688_v60 = vand.u32 2147483647, %v1651_v58  ;;  %v9291_v21 = vpop.f32.mrf.mxu0  ;;  %1615 = vperm.xlu1 %7302, %v9294_v25   ;;  %v2056_v62 = vmax.f32 %v2019_v20, 0.0  ;;  %v1949_v20 = vsub.f32 %v7764_v47, %v9230_v19  ;;  %v1548_v19 = vpop.permute.xlu0 %1547 }
 0x24b   : > { %v9297_v44 = vpop.f32.mrf.mxu1  ;;  %7082 = vmatmul.mubr.msk.f32.gmra.mxu1 %vm2718_vm0, %v2055_v37 }
 0x24c   : > { %v1725_v3 = vsub.f32 1.0, %v1688_v60  ;;  %v1828_v33 = vpop.permute.xlu1 %1827  ;;  %7047 = vmatmul.mubr.msk.f32.gmra.mxu0 %vm2718_vm0, %v1761_v6  ;;  %5148 = vmatprep.mubr.f32.mxu1 %v10825_v56  ;;  %v9302_v27 = vpop.f32.mrf.mxu0  ;;  %v2057_v6 = vmax.f32 %v2020_v7, 0.0 }
 0x24d   : > { %10933 = vst [vmem:[#allocation128_spill] sm:$0xff] %v9302_v27  ;;  %v1947_v59 = vsub.f32 %v7764_v47, %v1828_v33  ;;  %v9305_v58 = vpop.f32.mrf.mxu1  ;;  %4762 = vmatprep.mubr.f32.mxu0 %v10825_v56  ;;  %7337 = vset.pattern.permute.xlu0 %v10892_v53  ;;  %v1986_v27 = vand.u32 2147483647, %v1949_v20 }
 0x24e   : > { %10934 = vst [vmem:[#allocation129_spill] sm:$0xff] %v9305_v58  ;;  %v1762_v54 = vmax.f32 %v1725_v3, 0.0  ;;  %7304 = vset.pattern.permute.xlu1 %v10828_v42  ;;  %2483 = vperm.xlu0 %7337, %v9174_v15   ;;  %v9317_v37 = vpop.f32.mrf.mxu0  ;;  %v1763_v15 = vmax.f32 %v1726_v24, 0.0  ;;  %v1848_v52 = vpop.permute.xlu0 %1847 }
 0x24f   : > { %v1984_v60 = vand.u32 2147483647, %v1947_v59  ;;  %v9313_v23 = vpop.f32.mrf.mxu1  ;;  %7083 = vmatmul.mubr.msk.f32.gmra.mxu1 %vm2718_vm0, %v2056_v62  ;;  %1911 = vperm.xlu1 %7304, %v9294_v25  }
 0x250   : > { %10935 = vst [vmem:[#allocation130_spill] sm:$0xff] %v9313_v23  ;;  %v1832_v33 = vpop.permute.xlu1 %1831  ;;  %7048 = vmatmul.mubr.msk.f32.gmra.mxu0 %vm2718_vm0, %v1762_v54  ;;  %5154 = vmatprep.mubr.f32.mxu1 %v10825_v56  ;;  %v9330_v54 = vld [vmem:[%s7569_s28 + $0xf8] sm:$0xff]  ;;  %v9333_v24 = vpop.f32.mrf.mxu0 }
 0x251   : > { %v2021_v7 = vsub.f32 1.0, %v1984_v60  ;;  %v1948_v3 = vsub.f32 %v7764_v47, %v1832_v33  ;;  %v9322_v59 = vpop.f32.mrf.mxu1  ;;  %4768 = vmatprep.mubr.f32.mxu0 %v10825_v56  ;;  %10938 = vst [vmem:[#allocation133_spill] sm:$0xff] %v9333_v24 }
 0x252   : > { %10936 = vst [vmem:[#allocation131_spill] sm:$0xff] %v9322_v59  ;;  %2495 = vperm.xlu0 %7337, %v9258_v35  }
 0x253   : > { %v2058_v62 = vmax.f32 %v2021_v7, 0.0  ;;  %v1985_v55 = vand.u32 2147483647, %v1948_v3  ;;  %v9326_v58 = vpop.f32.mrf.mxu1  ;;  %7084 = vmatmul.mubr.msk.f32.gmra.mxu1 %vm2718_vm0, %v2057_v6  ;;  %1915 = vperm.xlu1 %7304, %v9330_v54   ;;  %v1655_v6 = vsub.f32 %v7764_v47, %v1548_v19  ;;  %v2023_v7 = vsub.f32 1.0, %v1986_v27 }
 0x254   : > { %10937 = vst [vmem:[#allocation132_spill] sm:$0xff] %v9326_v58  ;;  %5160 = vmatprep.mubr.f32.mxu1 %v10825_v56  ;;  %7049 = vmatmul.mubr.msk.f32.gmra.mxu0 %vm2718_vm0, %v1763_v15 }
 0x255   : > { %v2022_v60 = vsub.f32 1.0, %v1985_v55  ;;  %v9337_v35 = vpop.f32.mrf.mxu1  ;;  %v1540_v20 = vpop.permute.xlu1 %1539  ;;  %4774 = vmatprep.mubr.f32.mxu0 %v10825_v56 }
 0x256   : > { %10939 = vst [vmem:[#allocation134_spill] sm:$0xff] %v9337_v35  ;;  %v1653_v33 = vsub.f32 %v7764_v47, %v1540_v20  ;;  %7340 = vset.pattern.permute.xlu0 %v10887_v50  ;;  %v7440_v35 = vld [vmem:[%s7569_s28 + $0x100] sm:$0xff] }
 0x257   : > { %v2059_v3 = vmax.f32 %v2022_v60, 0.0  ;;  %v9343_v24 = vpop.f32.mrf.mxu1  ;;  %7085 = vmatmul.mubr.msk.f32.gmra.mxu1 %vm2718_vm0, %v2058_v62  ;;  %7305 = vset.pattern.permute.xlu1 %v10836_v46  ;;  %v9347_v55 = vpop.f32.mrf.mxu0  ;;  %v1692_v62 = vand.u32 2147483647, %v1655_v6 }
 0x258   : > { %10940 = vst [vmem:[#allocation135_spill] sm:$0xff] %v9343_v24  ;;  %v1690_v15 = vand.u32 2147483647, %v1653_v33  ;;  %1623 = vperm.xlu1 %7305, %v7440_v35   ;;  %5166 = vmatprep.mubr.f32.mxu1 %v10825_v56  ;;  %v2060_v24 = vmax.f32 %v2023_v7, 0.0 }
 0x259   : > { %v9351_v20 = vpop.f32.mrf.mxu1  ;;  %v1544_v19 = vpop.permute.xlu1 %1543  ;;  %2195 = vperm.xlu0 %7340, %v9219_v43  }
 0x25a   : > { %10941 = vst [vmem:[#allocation136_spill] sm:$0xff] %v9351_v20  ;;  %v1727_v27 = vsub.f32 1.0, %v1690_v15  ;;  %v1654_v60 = vsub.f32 %v7764_v47, %v1544_v19  ;;  %v9355_v59 = vpop.f32.mrf.mxu0  ;;  %v9363_v20 = vld [vmem:[%s7569_s28 + $0x108] sm:$0xff]  ;;  %v1729_v15 = vsub.f32 1.0, %v1692_v62 }
 0x25b   : > { %10942 = vst [vmem:[#allocation137_spill] sm:$0xff] %v9355_v59  ;;  %v9357_v58 = vpop.f32.mrf.mxu1  ;;  %7086 = vmatmul.mubr.msk.f32.gmra.mxu1 %vm2718_vm0, %v2059_v3  ;;  %v9371_v3 = vpop.permute.xlu0 %1859  ;;  %v1952_v59 = vsub.f32 %v7764_v47, %v1848_v52  ;;  %v3516_v52 = vmul.f32 %v8734_v49, %v8458_v63  ;;  %v3517_v63 = vmul.f32 %v8742_v45, %v8475_v34 }
 0x25c   : > { %v1764_v35 = vmax.f32 %v1727_v27, 0.0  ;;  %v1691_v33 = vand.u32 2147483647, %v1654_v60  ;;  %v9360_v23 = vpop.f32.mrf.mxu0  ;;  %1627 = vperm.xlu1 %7305, %v9363_v20   ;;  %5172 = vmatprep.mubr.f32.mxu1 %v10825_v56  ;;  %v3519_v34 = vmul.f32 %v8760_v0, %v8504_v9 }
 0x25d   : > { %v9367_v43 = vpop.f32.mrf.mxu1  ;;  %2207 = vperm.xlu0 %7340, %v9294_v25   ;;  %v3515_v25 = vmul.f32 %v8726_v39, %v8439_v1 }
 0x25e   : > { %10943 = vst [vmem:[#allocation138_spill] sm:$0xff] %v9367_v43  ;;  %v1728_v6 = vsub.f32 1.0, %v1691_v33  ;;  %v1840_v7 = vpop.permute.xlu1 %1839  ;;  %7050 = vmatmul.mubr.msk.f32.gmra.mxu0 %vm2718_vm0, %v1764_v35  ;;  %v9373_v19 = vpop.f32.mrf.mxu0  ;;  %v1989_v43 = vand.u32 2147483647, %v1952_v59  ;;  %v3518_v59 = vmul.f32 %v8751_v30, %v8491_v14 }
 0x25f   : > { %10944 = vst [vmem:[#allocation139_spill] sm:$0xff] %v9373_v19  ;;  %v1950_v27 = vsub.f32 %v7764_v47, %v1840_v7  ;;  %v4164_v60 = vpop.f32.mrf.mxu1  ;;  %7087 = vmatmul.mubr.msk.f32.gmra.mxu1 %vm2718_vm0, %v2060_v24  ;;  %4780 = vmatprep.mubr.f32.mxu0 %v10825_v56 }
 0x260   : > { %v1765_v33 = vmax.f32 %v1728_v6, 0.0  ;;  %v4385_v35 = vmul.f32 %v4164_v60, %v8939_v61  ;;  %7306 = vset.pattern.permute.xlu1 %v10828_v42  ;;  %5178 = vmatprep.mubr.f32.mxu1 %v10825_v56  ;;  %v9385_v7 = vpop.f32.mrf.mxu0  ;;  %v1766_v61 = vmax.f32 %v1729_v15, 0.0 }
 0x261   : > { %v1987_v62 = vand.u32 2147483647, %v1950_v27  ;;  %v4166_v19 = vpop.f32.mrf.mxu1  ;;  %1923 = vperm.xlu1 %7306, %v9363_v20   ;;  %7343 = vset.pattern.permute.xlu0 %v10892_v53 }
 0x262   : > { %v9390_v24 = vadd.f32 %v4385_v35, %v3515_v25  ;;  %v4386_v1 = vmul.f32 %v4166_v19, %v8947_v13  ;;  %v1844_v39 = vpop.permute.xlu1 %1843  ;;  %7051 = vmatmul.mubr.msk.f32.gmra.mxu0 %vm2718_vm0, %v1765_v33  ;;  %2507 = vperm.xlu0 %7343, %v9330_v54   ;;  %v1560_v19 = vpop.permute.xlu0 %1559  ;;  %v7442_v35 = vld [vmem:[%s7569_s28 + $0x110] sm:$0xff] }
 0x263   : > { %v2024_v6 = vsub.f32 1.0, %v1987_v62  ;;  %v1951_v27 = vsub.f32 %v7764_v47, %v1844_v39  ;;  %v4170_v60 = vpop.f32.mrf.mxu1  ;;  %4786 = vmatprep.mubr.f32.mxu0 %v10825_v56  ;;  %v9403_v54 = vpop.f32.mrf.mxu0  ;;  %v1658_v14 = vsub.f32 %v7764_v47, %v1560_v19 }
 0x264   : > { %v9399_v49 = vadd.f32 %v4386_v1, %v3516_v52  ;;  %v4387_v13 = vmul.f32 %v4170_v60, %v8958_v2  ;;  %10946 = vst [vmem:[#allocation141_spill] sm:$0xff] %v9403_v54  ;;  %v2026_v1 = vsub.f32 1.0, %v1989_v43  ;;  %v10987_v54 = vld [vmem:[#allocation72_spill] sm:$0xff] }
 0x265   : > { %v2061_v25 = vmax.f32 %v2024_v6, 0.0  ;;  %v1988_v33 = vand.u32 2147483647, %v1951_v27  ;;  %v4172_v15 = vpop.f32.mrf.mxu1  ;;  %1927 = vperm.xlu1 %7306, %v7442_v35   ;;  %v3520_v6 = vmul.f32 %v8766_v41, %v8523_v29 }
 0x266   : > { %10945 = vst [vmem:[#allocation140_spill] sm:$0xff] %v9399_v49  ;;  %v9407_v62 = vadd.f32 %v4387_v13, %v3517_v63  ;;  %v4388_v39 = vmul.f32 %v4172_v15, %v8971_v8  ;;  %7052 = vmatmul.mubr.msk.f32.gmra.mxu0 %vm2718_vm0, %v1766_v61  ;;  %7345 = vset.pattern.permute.xlu0 %v10887_v50  ;;  %v7443_v63 = vld [vmem:[%s7569_s28 + $0x118] sm:$0xff] }
 0x267   : > { %v2025_v45 = vsub.f32 1.0, %v1988_v33  ;;  %v4176_v2 = vpop.f32.mrf.mxu1  ;;  %v1552_v52 = vpop.permute.xlu1 %1551  ;;  %7088 = vmatmul.mubr.msk.f32.gmra.mxu1 %vm2718_vm0, %v2061_v25  ;;  %4792 = vmatprep.mubr.f32.mxu0 %v10825_v56  ;;  %v3521_v13 = vmul.f32 %v8776_v51, %v8541_v32  ;;  %v3522_v32 = vmul.f32 %v8781_v36, %v8559_v48 }
 0x268   : > { %v9417_v30 = vadd.f32 %v4388_v39, %v3518_v59  ;;  %v4389_v8 = vmul.f32 %v4176_v2, %v8983_v28  ;;  %v1656_v61 = vsub.f32 %v7764_v47, %v1552_v52  ;;  %5184 = vmatprep.mubr.f32.mxu1 %v10825_v56  ;;  %2219 = vperm.xlu0 %7345, %v9363_v20   ;;  %v2063_v20 = vmax.f32 %v2026_v1, 0.0  ;;  %v7444_v2 = vld [vmem:[%s7569_s28 + $0x120] sm:$0x3f] }
 0x269   : > { %v2062_v0 = vmax.f32 %v2025_v45, 0.0  ;;  %v4178_v9 = vpop.f32.mrf.mxu1  ;;  %7308 = vset.pattern.permute.xlu1 %v10836_v46  ;;  %v9424_v43 = vpop.f32.mrf.mxu0  ;;  %v1695_v46 = vand.u32 2147483647, %v1658_v14  ;;  %v3523_v52 = vmul.f32 %v8788_v11, %v8581_v26  ;;  %v1955_v26 = vsub.f32 %v7764_v47, %v9371_v3  ;;  %v10950_v3 = vld [vmem:[#allocation29_spill] sm:$0xff] }
 0x26a   : > { %10947 = vst [vmem:[#allocation142_spill] sm:$0xff] %v9417_v30  ;;  %v9428_v27 = vadd.f32 %v4389_v8, %v3519_v34  ;;  %v1693_v60 = vand.u32 2147483647, %v1656_v61  ;;  %v4390_v28 = vmul.f32 %v4178_v9, %v9006_v18  ;;  %1635 = vperm.xlu1 %7308, %v7443_v63   ;;  %v3524_v11 = vmul.f32 %v8794_v10, %v8601_v16 }
 0x26b   : > { %v4182_v19 = vpop.f32.mrf.mxu1  ;;  %v1556_v25 = vpop.permute.xlu1 %1555  ;;  %7089 = vmatmul.mubr.msk.f32.gmra.mxu1 %vm2718_vm0, %v2062_v0  ;;  %v1732_v8 = vsub.f32 1.0, %v1695_v46 }
 0x26c   : > { %v1730_v33 = vsub.f32 1.0, %v1693_v60  ;;  %v9435_v15 = vadd.f32 %v4390_v28, %v3520_v6  ;;  %v4391_v41 = vmul.f32 %v4182_v19, %v9023_v57  ;;  %v1657_v29 = vsub.f32 %v7764_v47, %v1556_v25  ;;  %v9439_v18 = vpop.f32.mrf.mxu0  ;;  %5190 = vmatprep.mubr.f32.mxu1 %v10825_v56  ;;  %7347 = vset.pattern.permute.xlu0 %v10892_v53  ;;  %v10953_v25 = vld [vmem:[#allocation93_spill] sm:$0xff] }
 0x26d   : > { %v4184_v51 = vpop.f32.mrf.mxu1  ;;  %2519 = vperm.xlu0 %7347, %v7442_v35   ;;  %v1769_v46 = vmax.f32 %v1732_v8, 0.0  ;;  %v10958_v8 = vld [vmem:[#allocation59_spill] sm:$0xff] }
 0x26e   : > { %10948 = vst [vmem:[#allocation143_spill] sm:$0xff] %v9435_v15  ;;  %v1767_v59 = vmax.f32 %v1730_v33, 0.0  ;;  %v9445_v39 = vadd.f32 %v4391_v41, %v3521_v13  ;;  %v1694_v34 = vand.u32 2147483647, %v1657_v29  ;;  %v4392_v45 = vmul.f32 %v4184_v51, %v9037_v31  ;;  %v9448_v57 = vpop.f32.mrf.mxu0  ;;  %1639 = vperm.xlu1 %7308, %v7444_v2   ;;  %v10951_v13 = vld [vmem:[#allocation56_spill] sm:$0xff] }
 0x26f   : > { %v4188_v1 = vpop.f32.mrf.mxu1  ;;  %7090 = vmatmul.mubr.msk.f32.gmra.mxu1 %vm2718_vm0, %v2063_v20  ;;  %v3525_v20 = vmul.f32 %v10951_v13, %v10950_v3  ;;  %v1992_v33 = vand.u32 2147483647, %v1955_v26  ;;  %v10954_v29 = vld [vmem:[#allocation32_spill] sm:$0xff]  ;;  %v10960_v26 = vld [vmem:[#allocation99_spill] sm:$0xff] }
 0x270   : > { %v1731_v14 = vsub.f32 1.0, %v1694_v34  ;;  %v9454_v36 = vadd.f32 %v4392_v45, %v3522_v32  ;;  %v4393_v48 = vmul.f32 %v4188_v1, %v9046_v17  ;;  %v1852_v35 = vpop.permute.xlu1 %1851  ;;  %7053 = vmatmul.mubr.msk.f32.gmra.mxu0 %vm2718_vm0, %v1767_v59  ;;  %5196 = vmatprep.mubr.f32.mxu1 %v10825_v56  ;;  %v9459_v31 = vpop.f32.mrf.mxu0  ;;  %v10955_v32 = vld [vmem:[#allocation57_spill] sm:$0xff]  ;;  %v10956_v34 = vld [vmem:[#allocation96_spill] sm:$0xff] }
 0x271   : > { %v1953_v61 = vsub.f32 %v7764_v47, %v1852_v35  ;;  %v4190_v0 = vpop.f32.mrf.mxu1  ;;  %4798 = vmatprep.mubr.f32.mxu0 %v10825_v56  ;;  %7349 = vset.pattern.permute.xlu0 %v10887_v50  ;;  %v3526_v51 = vmul.f32 %v10955_v32, %v10954_v29  ;;  %v10957_v35 = vld [vmem:[#allocation35_spill] sm:$0xff]  ;;  %v10963_v29 = vld [vmem:[#allocation41_spill] sm:$0xff]  ;;  %v10964_v32 = vld [vmem:[#allocation62_spill] sm:$0xff] }
 0x272   : > { %10949 = vst [vmem:[#allocation144_spill] sm:$0xff] %v9454_v36  ;;  %v1768_v17 = vmax.f32 %v1731_v14, 0.0  ;;  %v9468_v9 = vadd.f32 %v4393_v48, %v3523_v52  ;;  %v4394_v6 = vmul.f32 %v4190_v0, %v9061_v22  ;;  %7309 = vset.pattern.permute.xlu1 %v10828_v42  ;;  %2231 = vperm.xlu0 %7349, %v7444_v2   ;;  %v9472_v63 = vpop.f32.mrf.mxu0 }
 0x273   : > { %v1990_v60 = vand.u32 2147483647, %v1953_v61  ;;  %v4194_v28 = vpop.f32.mrf.mxu1  ;;  %1935 = vperm.xlu1 %7309, %v7444_v2   ;;  %v1572_v2 = vpop.permute.xlu0 %1571  ;;  %v3527_v61 = vmul.f32 %v10958_v8, %v10957_v35 }
 0x274   : > { %v9476_v19 = vadd.f32 %v4394_v6, %v3524_v11  ;;  %v4395_v16 = vmul.f32 %v4194_v28, %v10953_v25  ;;  %v1856_v10 = vpop.permute.xlu1 %1855  ;;  %7054 = vmatmul.mubr.msk.f32.gmra.mxu0 %vm2718_vm0, %v1768_v17  ;;  %v9489_v48 = vpop.f32.mrf.mxu0  ;;  %v7445_v17 = vld [vmem:[%s7569_s28] sm:$0xff]  ;;  %v2029_v6 = vsub.f32 1.0, %v1992_v33  ;;  %v1661_v13 = vsub.f32 %v7764_v47, %v1572_v2  ;;  %v10962_v25 = vld [vmem:[#allocation60_spill] sm:$0xff]  ;;  %v10966_v2 = vld [vmem:[#allocation102_spill] sm:$0xff] }
 0x275   : > { %v2027_v22 = vsub.f32 1.0, %v1990_v60  ;;  %v1954_v42 = vsub.f32 %v7764_v47, %v1856_v10  ;;  %v4196_v41 = vpop.f32.mrf.mxu1  ;;  %4804 = vmatprep.mubr.f32.mxu0 %v10825_v56 }
 0x276   : > { %10952 = vst [vmem:[#allocation29_spill] sm:$0xff] %v9476_v19  ;;  %v9484_v59 = vadd.f32 %v4395_v16, %v3525_v20  ;;  %v4396_v45 = vmul.f32 %v4196_v41, %v10956_v34  ;;  %7350 = vset.pattern.permute.xlu0 %v10892_v53  ;;  %v10961_v20 = vld [vmem:[#allocation38_spill] sm:$0xff]  ;;  %v2066_v35 = vmax.f32 %v2029_v6, 0.0 }
 0x277   : > { %v2064_v52 = vmax.f32 %v2027_v22, 0.0  ;;  %v1991_v1 = vand.u32 2147483647, %v1954_v42  ;;  %v4200_v14 = vpop.f32.mrf.mxu1  ;;  %7311 = vset.pattern.permute.xlu1 %v10892_v53  ;;  %v3528_v16 = vmul.f32 %v10962_v25, %v10961_v20  ;;  %v1872_v6 = vpop.permute.xlu0 %1871  ;;  %v10969_v25 = vld [vmem:[#allocation47_spill] sm:$0xff] }
 0x278   : > { %v9493_v0 = vadd.f32 %v4396_v45, %v3526_v51  ;;  %v4397_v11 = vmul.f32 %v4200_v14, %v10960_v26  ;;  %2383 = vperm.xlu1 %7311, %v7445_v17   ;;  %7055 = vmatmul.mubr.msk.f32.gmra.mxu0 %vm2718_vm0, %v1769_v46  ;;  %v3529_v51 = vmul.f32 %v10964_v32, %v10963_v29 }
 0x279   : > { %v2028_v60 = vsub.f32 1.0, %v1991_v1  ;;  %v4202_v28 = vpop.f32.mrf.mxu1  ;;  %v1564_v3 = vpop.permute.xlu1 %1563  ;;  %7091 = vmatmul.mubr.msk.f32.gmra.mxu1 %vm2718_vm0, %v2064_v52  ;;  %4810 = vmatprep.mubr.f32.mxu0 %v10825_v56  ;;  %v10967_v1 = vld [vmem:[#allocation44_spill] sm:$0xff] }
 0x27a   : > { %10959 = vst [vmem:[#allocation56_spill] sm:$0xff] %v9493_v0  ;;  %v9503_v10 = vadd.f32 %v4397_v11, %v3527_v61  ;;  %v4398_v22 = vmul.f32 %v4202_v28, %v9126_v4  ;;  %v1659_v46 = vsub.f32 %v7764_v47, %v1564_v3  ;;  %5202 = vmatprep.mubr.f32.mxu1 %v10825_v56  ;;  %v10968_v4 = vld [vmem:[#allocation63_spill] sm:$0xff]  ;;  %v7446_v61 = vld [vmem:[%s7569_s28 + $0x8] sm:$0xff]  ;;  %v1698_v11 = vand.u32 2147483647, %v1661_v13 }
 0x27b   : > { %v2065_v33 = vmax.f32 %v2028_v60, 0.0  ;;  %v4206_v42 = vpop.f32.mrf.mxu1  ;;  %v9508_v41 = vpop.f32.mrf.mxu0  ;;  %v3530_v14 = vmul.f32 %v10968_v4, %v10967_v1 }
 0x27c   : > { %v9512_v34 = vadd.f32 %v4398_v22, %v3528_v16  ;;  %v1696_v45 = vand.u32 2147483647, %v1659_v46  ;;  %v4399_v52 = vmul.f32 %v4206_v42, %v10966_v2  ;;  %7312 = vset.pattern.permute.xlu1 %v10887_v50  ;;  %v10970_v16 = vld [vmem:[#allocation65_spill] sm:$0xff] }
 0x27d   : > { %v4208_v8 = vpop.f32.mrf.mxu1  ;;  %2091 = vperm.xlu1 %7312, %v7446_v61   ;;  %v1568_v26 = vpop.permute.xlu1 %1567  ;;  %7092 = vmatmul.mubr.msk.f32.gmra.mxu1 %vm2718_vm0, %v2065_v33  ;;  %v3531_v22 = vmul.f32 %v10970_v16, %v10969_v25  ;;  %v1735_v61 = vsub.f32 1.0, %v1698_v11  ;;  %v10976_v25 = vld [vmem:[#allocation68_spill] sm:$0xff]  ;;  %v10978_v11 = vld [vmem:[#allocation110_spill] sm:$0xff] }
 0x27e   : > { %10965 = vst [vmem:[#allocation93_spill] sm:$0xff] %v9512_v34  ;;  %v1733_v17 = vsub.f32 1.0, %v1696_v45  ;;  %v9520_v60 = vadd.f32 %v4399_v52, %v3529_v51  ;;  %v4400_v28 = vmul.f32 %v4208_v8, %v9149_v5  ;;  %v1660_v3 = vsub.f32 %v7764_v47, %v1568_v26  ;;  %v9524_v20 = vpop.f32.mrf.mxu0  ;;  %5208 = vmatprep.mubr.f32.mxu1 %v10825_v56  ;;  %v10972_v5 = vld [vmem:[#allocation50_spill] sm:$0xff]  ;;  %v7447_v52 = vld [vmem:[%s7569_s28 + $0x10] sm:$0xff]  ;;  %v7448_v34 = vld [vmem:[%s7569_s28 + $0x18] sm:$0xff] }
 0x27f   : > { %v4212_v46 = vpop.f32.mrf.mxu1  ;;  %v10973_v51 = vld [vmem:[#allocation66_spill] sm:$0xff] }
 0x280   : > { %v1770_v42 = vmax.f32 %v1733_v17, 0.0  ;;  %v9529_v33 = vadd.f32 %v4400_v28, %v3530_v14  ;;  %v1697_v13 = vand.u32 2147483647, %v1660_v3  ;;  %v4401_v29 = vmul.f32 %v4212_v46, %v9162_v40  ;;  %v9532_v32 = vpop.f32.mrf.mxu0  ;;  %v9543_v40 = vpop.permute.xlu0 %1883  ;;  %v10975_v3 = vld [vmem:[#allocation51_spill] sm:$0xff] }
 0x281   : > { %v3532_v45 = vmul.f32 %v10973_v51, %v10972_v5  ;;  %v4214_v2 = vpop.f32.mrf.mxu1  ;;  %2095 = vperm.xlu1 %7312, %v7447_v52   ;;  %7093 = vmatmul.mubr.msk.f32.gmra.mxu1 %vm2718_vm0, %v2066_v35  ;;  %v1958_v35 = vsub.f32 %v7764_v47, %v1872_v6  ;;  %v10979_v5 = vld [vmem:[#allocation52_spill] sm:$0xff]  ;;  %v10980_v51 = vld [vmem:[#allocation69_spill] sm:$0xff] }
 0x282   : > { %10971 = vst [vmem:[#allocation32_spill] sm:$0xff] %v9529_v33  ;;  %v1734_v1 = vsub.f32 1.0, %v1697_v13  ;;  %v9538_v4 = vadd.f32 %v4401_v29, %v3531_v22  ;;  %v4402_v8 = vmul.f32 %v4214_v2, %v9177_v38  ;;  %v1864_v14 = vpop.permute.xlu1 %1863  ;;  %7056 = vmatmul.mubr.msk.f32.gmra.mxu0 %vm2718_vm0, %v1770_v42  ;;  %5214 = vmatprep.mubr.f32.mxu1 %v10825_v56  ;;  %v9545_v26 = vpop.f32.mrf.mxu0 }
 0x283   : > { %10974 = vst [vmem:[#allocation57_spill] sm:$0xff] %v9545_v26  ;;  %v1956_v17 = vsub.f32 %v7764_v47, %v1864_v14  ;;  %v4218_v28 = vpop.f32.mrf.mxu1  ;;  %4816 = vmatprep.mubr.f32.mxu0 %v10825_v56  ;;  %v3533_v38 = vmul.f32 %v10976_v25, %v10975_v3  ;;  %v3534_v2 = vmul.f32 %v10980_v51, %v10979_v5  ;;  %v10981_v25 = vld [vmem:[#allocation53_spill] sm:$0xff] }
 0x284   : > { %v1771_v16 = vmax.f32 %v1734_v1, 0.0  ;;  %v9552_v22 = vadd.f32 %v4402_v8, %v3532_v45  ;;  %v4403_v46 = vmul.f32 %v4218_v28, %v10978_v11  ;;  %v9556_v29 = vpop.f32.mrf.mxu0  ;;  %v1772_v45 = vmax.f32 %v1735_v61, 0.0  ;;  %v10982_v11 = vld [vmem:[#allocation71_spill] sm:$0xff]  ;;  %v11034_v26 = vld [vmem:[#allocation105_spill] sm:$0xff] }
 0x285   : > { %v1993_v42 = vand.u32 2147483647, %v1956_v17  ;;  %v4220_v13 = vpop.f32.mrf.mxu1  ;;  %7314 = vset.pattern.permute.xlu1 %v10892_v53  ;;  %v1995_v28 = vand.u32 2147483647, %v1958_v35  ;;  %v3535_v5 = vmul.f32 %v10982_v11, %v10981_v25  ;;  %v10988_v35 = vld [vmem:[#allocation115_spill] sm:$0xff] }
 0x286   : > { %10977 = vst [vmem:[#allocation96_spill] sm:$0xff] %v9552_v22  ;;  %v9560_v14 = vadd.f32 %v4403_v46, %v3533_v38  ;;  %v4404_v6 = vmul.f32 %v4220_v13, %v9206_v12  ;;  %2391 = vperm.xlu1 %7314, %v7447_v52   ;;  %v1868_v3 = vpop.permute.xlu1 %1867  ;;  %7057 = vmatmul.mubr.msk.f32.gmra.mxu0 %vm2718_vm0, %v1771_v16  ;;  %v10984_v46 = vld [vmem:[#allocation113_spill] sm:$0xff]  ;;  %v1584_v52 = vpop.permute.xlu0 %1583 }
 0x287   : > { %v2030_v1 = vsub.f32 1.0, %v1993_v42  ;;  %v1957_v8 = vsub.f32 %v7764_v47, %v1868_v3  ;;  %v4224_v17 = vpop.f32.mrf.mxu1  ;;  %4822 = vmatprep.mubr.f32.mxu0 %v10825_v56  ;;  %v9571_v61 = vpop.f32.mrf.mxu0  ;;  %v10986_v42 = vld [vmem:[#allocation54_spill] sm:$0xff]  ;;  %v2032_v11 = vsub.f32 1.0, %v1995_v28 }
 0x288   : > { %v9568_v38 = vadd.f32 %v4404_v6, %v3534_v2  ;;  %v4405_v12 = vmul.f32 %v4224_v17, %v10984_v46  ;;  %10985 = vst [vmem:[#allocation59_spill] sm:$0xff] %v9571_v61  ;;  %v3536_v3 = vmul.f32 %v10987_v54, %v10986_v42  ;;  %v10989_v2 = vld [vmem:[#allocation55_spill] sm:$0xff]  ;;  %v10990_v6 = vld [vmem:[#allocation74_spill] sm:$0xff] }
 0x289   : > { %v2067_v13 = vmax.f32 %v2030_v1, 0.0  ;;  %v1994_v51 = vand.u32 2147483647, %v1957_v8  ;;  %v4226_v16 = vpop.f32.mrf.mxu1  ;;  %v3537_v17 = vmul.f32 %v10990_v6, %v10989_v2 }
 0x28a   : > { %10983 = vst [vmem:[#allocation35_spill] sm:$0xff] %v9568_v38  ;;  %v9575_v22 = vadd.f32 %v4405_v12, %v3535_v5  ;;  %v4406_v33 = vmul.f32 %v4226_v16, %v10988_v35  ;;  %2395 = vperm.xlu1 %7314, %v7448_v34   ;;  %7058 = vmatmul.mubr.msk.f32.gmra.mxu0 %vm2718_vm0, %v1772_v45  ;;  %v10992_v5 = vld [vmem:[#allocation118_spill] sm:$0xff] }
 0x28b   : > { %v2031_v25 = vsub.f32 1.0, %v1994_v51  ;;  %v4230_v1 = vpop.f32.mrf.mxu1  ;;  %v1576_v8 = vpop.permute.xlu1 %1575  ;;  %7094 = vmatmul.mubr.msk.f32.gmra.mxu1 %vm2718_vm0, %v2067_v13  ;;  %4828 = vmatprep.mubr.f32.mxu0 %v10825_v56  ;;  %v1664_v45 = vsub.f32 %v7764_v47, %v1584_v52  ;;  %v10994_v52 = vld [vmem:[#allocation124_spill] sm:$0xff] }
 0x28c   : > { %v9584_v54 = vadd.f32 %v4406_v33, %v3536_v3  ;;  %v4407_v46 = vmul.f32 %v4230_v1, %v10992_v5  ;;  %v1662_v34 = vsub.f32 %v7764_v47, %v1576_v8  ;;  %5220 = vmatprep.mubr.f32.mxu1 %v10825_v56  ;;  %v2069_v33 = vmax.f32 %v2032_v11, 0.0  ;;  %v7449_v3 = vld [vmem:[%s7569_s28 + $0x20] sm:$0xff] }
 0x28d   : > { %v2068_v12 = vmax.f32 %v2031_v25, 0.0  ;;  %v9590_v51 = vpop.f32.mrf.mxu1  ;;  %v9592_v16 = vpop.f32.mrf.mxu0  ;;  %v10997_v5 = vld [vmem:[#allocation77_spill] sm:$0xff] }
 0x28e   : > { %10991 = vst [vmem:[#allocation99_spill] sm:$0xff] %v9584_v54  ;;  %10993 = vst [vmem:[#allocation38_spill] sm:$0xff] %v9590_v51  ;;  %v9594_v13 = vadd.f32 %v4407_v46, %v3537_v17  ;;  %v1699_v28 = vand.u32 2147483647, %v1662_v34  ;;  %7315 = vset.pattern.permute.xlu1 %v10887_v50  ;;  %v1701_v17 = vand.u32 2147483647, %v1664_v45  ;;  %v1596_v51 = vpop.permute.xlu0 %1595 }
 0x28f   : > { %v4236_v42 = vpop.f32.mrf.mxu1  ;;  %2103 = vperm.xlu1 %7315, %v7449_v3   ;;  %v1580_v35 = vpop.permute.xlu1 %1579  ;;  %7095 = vmatmul.mubr.msk.f32.gmra.mxu1 %vm2718_vm0, %v2068_v12 }
 0x290   : > { %v1736_v2 = vsub.f32 1.0, %v1699_v28  ;;  %v4409_v6 = vmul.f32 %v4236_v42, %v10994_v52  ;;  %v1663_v25 = vsub.f32 %v7764_v47, %v1580_v35  ;;  %v9601_v1 = vpop.f32.mrf.mxu0  ;;  %5226 = vmatprep.mubr.f32.mxu1 %v10825_v56  ;;  %v7450_v28 = vld [vmem:[%s7569_s28 + $0x28] sm:$0xff]  ;;  %v1738_v45 = vsub.f32 1.0, %v1701_v17 }
 0x291   : > { %10995 = vst [vmem:[#allocation60_spill] sm:$0xff] %v9601_v1  ;;  %v9604_v8 = vpop.f32.mrf.mxu1 }
 0x292   : > { %10996 = vst [vmem:[#allocation41_spill] sm:$0xff] %v9604_v8  ;;  %v1773_v11 = vmax.f32 %v1736_v2, 0.0  ;;  %v9607_v46 = vadd.f32 %v4409_v6, %v10997_v5  ;;  %v1700_v34 = vand.u32 2147483647, %v1663_v25  ;;  %v9609_v3 = vpop.f32.mrf.mxu0  ;;  %v1961_v5 = vsub.f32 %v7764_v47, %v9543_v40 }
 0x293   : > { %v4242_v12 = vpop.f32.mrf.mxu1  ;;  %2107 = vperm.xlu1 %7315, %v7450_v28   ;;  %7096 = vmatmul.mubr.msk.f32.gmra.mxu1 %vm2718_vm0, %v2069_v33  ;;  %v1775_v40 = vmax.f32 %v1738_v45, 0.0  ;;  %v7451_v45 = vld [vmem:[%s7569_s28 + $0x30] sm:$0xff] }
 0x294   : > { %v1737_v42 = vsub.f32 1.0, %v1700_v34  ;;  %v4411_v35 = vmul.f32 %v4242_v12, %v9291_v21  ;;  %v1876_v52 = vpop.permute.xlu1 %1875  ;;  %7059 = vmatmul.mubr.msk.f32.gmra.mxu0 %vm2718_vm0, %v1773_v11  ;;  %5232 = vmatprep.mubr.f32.mxu1 %v10825_v56  ;;  %v9616_v2 = vpop.f32.mrf.mxu0  ;;  %v11000_v34 = vld [vmem:[#allocation79_spill] sm:$0xff]  ;;  %v1998_v54 = vand.u32 2147483647, %v1961_v5 }
 0x295   : > { %10998 = vst [vmem:[#allocation62_spill] sm:$0xff] %v9616_v2  ;;  %v1959_v6 = vsub.f32 %v7764_v47, %v1876_v52  ;;  %v9619_v25 = vpop.f32.mrf.mxu1  ;;  %4834 = vmatprep.mubr.f32.mxu0 %v10825_v56 }
 0x296   : > { %10999 = vst [vmem:[#allocation102_spill] sm:$0xff] %v9619_v25  ;;  %v1774_v33 = vmax.f32 %v1737_v42, 0.0  ;;  %v9625_v21 = vadd.f32 %v4411_v35, %v11000_v34  ;;  %v9628_v17 = vpop.f32.mrf.mxu0  ;;  %v2035_v5 = vsub.f32 1.0, %v1998_v54 }
 0x297   : > { %v1996_v12 = vand.u32 2147483647, %v1959_v6  ;;  %v4248_v11 = vpop.f32.mrf.mxu1  ;;  %7317 = vset.pattern.permute.xlu1 %v10892_v53  ;;  %v11002_v6 = vld [vmem:[#allocation81_spill] sm:$0xff] }
 0x298   : > { %v4413_v8 = vmul.f32 %v4248_v11, %v9317_v37  ;;  %2403 = vperm.xlu1 %7317, %v7450_v28   ;;  %v1880_v52 = vpop.permute.xlu1 %1879  ;;  %7060 = vmatmul.mubr.msk.f32.gmra.mxu0 %vm2718_vm0, %v1774_v33  ;;  %v9639_v11 = vpop.f32.mrf.mxu0 }
 0x299   : > { %v2033_v25 = vsub.f32 1.0, %v1996_v12  ;;  %v1960_v42 = vsub.f32 %v7764_v47, %v1880_v52  ;;  %v9633_v35 = vpop.f32.mrf.mxu1  ;;  %4840 = vmatprep.mubr.f32.mxu0 %v10825_v56  ;;  %11003 = vst [vmem:[#allocation63_spill] sm:$0xff] %v9639_v11 }
 0x29a   : > { %11001 = vst [vmem:[#allocation44_spill] sm:$0xff] %v9633_v35  ;;  %v9637_v34 = vadd.f32 %v4413_v8, %v11002_v6  ;;  %v11005_v8 = vld [vmem:[#allocation83_spill] sm:$0xff] }
 0x29b   : > { %v2070_v38 = vmax.f32 %v2033_v25, 0.0  ;;  %v1997_v37 = vand.u32 2147483647, %v1960_v42  ;;  %v4254_v28 = vpop.f32.mrf.mxu1 }
 0x29c   : > { %v4415_v33 = vmul.f32 %v4254_v28, %v9347_v55  ;;  %2407 = vperm.xlu1 %7317, %v7451_v45   ;;  %7061 = vmatmul.mubr.msk.f32.gmra.mxu0 %vm2718_vm0, %v1775_v40  ;;  %v1667_v55 = vsub.f32 %v7764_v47, %v1596_v51  ;;  %v11007_v51 = vld [vmem:[#allocation85_spill] sm:$0xff] }
 0x29d   : > { %v2034_v12 = vsub.f32 1.0, %v1997_v37  ;;  %v9644_v52 = vpop.f32.mrf.mxu1  ;;  %v1588_v35 = vpop.permute.xlu1 %1587  ;;  %7097 = vmatmul.mubr.msk.f32.gmra.mxu1 %vm2718_vm0, %v2070_v38  ;;  %4846 = vmatprep.mubr.f32.mxu0 %v10825_v56  ;;  %v2072_v38 = vmax.f32 %v2035_v5, 0.0 }
 0x29e   : > { %11004 = vst [vmem:[#allocation47_spill] sm:$0xff] %v9644_v52  ;;  %v9649_v25 = vadd.f32 %v4415_v33, %v11005_v8  ;;  %v1665_v42 = vsub.f32 %v7764_v47, %v1588_v35  ;;  %5238 = vmatprep.mubr.f32.mxu1 %v10825_v56  ;;  %v7452_v33 = vld [vmem:[%s7569_s28 + $0x38] sm:$0xff]  ;;  %v1896_v5 = vpop.permute.xlu0 %1895 }
 0x29f   : > { %v2071_v40 = vmax.f32 %v2034_v12, 0.0  ;;  %v4260_v54 = vpop.f32.mrf.mxu1  ;;  %v9654_v6 = vpop.f32.mrf.mxu0 }
 0x2a0   : > { %v1702_v37 = vand.u32 2147483647, %v1665_v42  ;;  %v4417_v28 = vmul.f32 %v4260_v54, %v9360_v23  ;;  %7318 = vset.pattern.permute.xlu1 %v10887_v50  ;;  %v1704_v23 = vand.u32 2147483647, %v1667_v55 }
 0x2a1   : > { %v9658_v45 = vpop.f32.mrf.mxu1  ;;  %2115 = vperm.xlu1 %7318, %v7452_v33   ;;  %v1592_v35 = vpop.permute.xlu1 %1591  ;;  %7098 = vmatmul.mubr.msk.f32.gmra.mxu1 %vm2718_vm0, %v2071_v40 }
 0x2a2   : > { %11006 = vst [vmem:[#allocation65_spill] sm:$0xff] %v9658_v45  ;;  %v1739_v8 = vsub.f32 1.0, %v1702_v37  ;;  %v9663_v12 = vadd.f32 %v4417_v28, %v11007_v51  ;;  %v1666_v52 = vsub.f32 %v7764_v47, %v1592_v35  ;;  %v9666_v42 = vpop.f32.mrf.mxu0  ;;  %5244 = vmatprep.mubr.f32.mxu1 %v10825_v56  ;;  %v7453_v37 = vld [vmem:[%s7569_s28 + $0x40] sm:$0xff]  ;;  %v11010_v35 = vld [vmem:[#allocation87_spill] sm:$0xff]  ;;  %v1741_v55 = vsub.f32 1.0, %v1704_v23 }
 0x2a3   : > { %11008 = vst [vmem:[#allocation50_spill] sm:$0xff] %v9666_v42  ;;  %v4266_v54 = vpop.f32.mrf.mxu1 }
 0x2a4   : > { %v1776_v45 = vmax.f32 %v1739_v8, 0.0  ;;  %v1703_v0 = vand.u32 2147483647, %v1666_v52  ;;  %v4419_v33 = vmul.f32 %v4266_v54, %v9385_v7  ;;  %v9670_v19 = vpop.f32.mrf.mxu0  ;;  %v9681_v52 = vpop.permute.xlu0 %1907 }
 0x2a5   : > { %v9672_v40 = vpop.f32.mrf.mxu1  ;;  %2119 = vperm.xlu1 %7318, %v7453_v37   ;;  %7099 = vmatmul.mubr.msk.f32.gmra.mxu1 %vm2718_vm0, %v2072_v38  ;;  %v11012_v38 = vld [vmem:[#allocation5_spill] sm:$0xff] }
 0x2a6   : > { %11009 = vst [vmem:[#allocation66_spill] sm:$0xff] %v9672_v40  ;;  %v1740_v28 = vsub.f32 1.0, %v1703_v0  ;;  %v9677_v51 = vadd.f32 %v4419_v33, %v11010_v35  ;;  %v1888_v36 = vpop.permute.xlu1 %1887  ;;  %7062 = vmatmul.mubr.msk.f32.gmra.mxu0 %vm2718_vm0, %v1776_v45  ;;  %5250 = vmatprep.mubr.f32.mxu1 %v10825_v56  ;;  %v9683_v7 = vpop.f32.mrf.mxu0  ;;  %v1964_v0 = vsub.f32 %v7764_v47, %v1896_v5  ;;  %v11013_v33 = vld [vmem:[#allocation89_spill] sm:$0xff]  ;;  %v1778_v5 = vmax.f32 %v1741_v55, 0.0  ;;  %v7454_v55 = vld [vmem:[%s7569_s28 + $0x48] sm:$0xff] }
 0x2a7   : > { %11011 = vst [vmem:[#allocation51_spill] sm:$0xff] %v9683_v7  ;;  %v1962_v8 = vsub.f32 %v7764_v47, %v1888_v36  ;;  %v4272_v54 = vpop.f32.mrf.mxu1  ;;  %4852 = vmatprep.mubr.f32.mxu0 %v10825_v56  ;;  %v3551_v35 = vmul.f32 %v11013_v33, %v11012_v38 }
 0x2a8   : > { %v1777_v40 = vmax.f32 %v1740_v28, 0.0  ;;  %v4421_v45 = vmul.f32 %v4272_v54, %v9424_v43  ;;  %v9694_v30 = vpop.f32.mrf.mxu0  ;;  %v2001_v43 = vand.u32 2147483647, %v1964_v0  ;;  %v11015_v54 = vld [vmem:[#allocation91_spill] sm:$0xff] }
 0x2a9   : > { %v1999_v23 = vand.u32 2147483647, %v1962_v8  ;;  %v9691_v15 = vpop.f32.mrf.mxu1  ;;  %7320 = vset.pattern.permute.xlu1 %v10892_v53  ;;  %v11014_v8 = vld [vmem:[#allocation7_spill] sm:$0xff] }
 0x2aa   : > { %v9696_v49 = vadd.f32 %v4421_v45, %v3551_v35  ;;  %2415 = vperm.xlu1 %7320, %v7453_v37   ;;  %v1892_v36 = vpop.permute.xlu1 %1891  ;;  %7063 = vmatmul.mubr.msk.f32.gmra.mxu0 %vm2718_vm0, %v1777_v40  ;;  %v3553_v33 = vmul.f32 %v11015_v54, %v11014_v8  ;;  %v1608_v35 = vpop.permute.xlu0 %1607  ;;  %v2038_v8 = vsub.f32 1.0, %v2001_v43 }
 0x2ab   : > { %v2036_v7 = vsub.f32 1.0, %v1999_v23  ;;  %v1963_v28 = vsub.f32 %v7764_v47, %v1892_v36  ;;  %v4278_v38 = vpop.f32.mrf.mxu1  ;;  %4858 = vmatprep.mubr.f32.mxu0 %v10825_v56  ;;  %v9706_v2 = vpop.f32.mrf.mxu0 }
 0x2ac   : > { %v4423_v42 = vmul.f32 %v4278_v38, %v9448_v57  ;;  %11016 = vst [vmem:[#allocation68_spill] sm:$0xff] %v9706_v2  ;;  %v11017_v57 = vld [vmem:[#allocation9_spill] sm:$0xff] }
 0x2ad   : > { %v2073_v45 = vmax.f32 %v2036_v7, 0.0  ;;  %v2000_v37 = vand.u32 2147483647, %v1963_v28  ;;  %v9704_v11 = vpop.f32.mrf.mxu1  ;;  %v11018_v7 = vld [vmem:[#allocation94_spill] sm:$0xff] }
 0x2ae   : > { %v9708_v40 = vadd.f32 %v4423_v42, %v3553_v33  ;;  %2419 = vperm.xlu1 %7320, %v7454_v55   ;;  %7064 = vmatmul.mubr.msk.f32.gmra.mxu0 %vm2718_vm0, %v1778_v5  ;;  %v3555_v28 = vmul.f32 %v11018_v7, %v11017_v57  ;;  %v1670_v5 = vsub.f32 %v7764_v47, %v1608_v35  ;;  %v11019_v55 = vld [vmem:[#allocation11_spill] sm:$0xff]  ;;  %v11020_v57 = vld [vmem:[#allocation97_spill] sm:$0xff] }
 0x2af   : > { %v2037_v0 = vsub.f32 1.0, %v2000_v37  ;;  %v4284_v23 = vpop.f32.mrf.mxu1  ;;  %v1600_v36 = vpop.permute.xlu1 %1599  ;;  %7100 = vmatmul.mubr.msk.f32.gmra.mxu1 %vm2718_vm0, %v2073_v45  ;;  %4864 = vmatprep.mubr.f32.mxu0 %v10825_v56  ;;  %v3557_v7 = vmul.f32 %v11020_v57, %v11019_v55 }
 0x2b0   : > { %v4425_v38 = vmul.f32 %v4284_v23, %v9472_v63  ;;  %v1668_v42 = vsub.f32 %v7764_v47, %v1600_v36  ;;  %5256 = vmatprep.mubr.f32.mxu1 %v10825_v56  ;;  %v2075_v63 = vmax.f32 %v2038_v8, 0.0  ;;  %v7455_v36 = vld [vmem:[%s7569_s28 + $0x50] sm:$0xff] }
 0x2b1   : > { %v2074_v54 = vmax.f32 %v2037_v0, 0.0  ;;  %v9720_v33 = vpop.f32.mrf.mxu1  ;;  %v9722_v37 = vpop.f32.mrf.mxu0 }
 0x2b2   : > { %v9724_v43 = vadd.f32 %v4425_v38, %v3555_v28  ;;  %v1705_v45 = vand.u32 2147483647, %v1668_v42  ;;  %7321 = vset.pattern.permute.xlu1 %v10887_v50  ;;  %v1707_v42 = vand.u32 2147483647, %v1670_v5 }
 0x2b3   : > { %v4290_v23 = vpop.f32.mrf.mxu1  ;;  %2127 = vperm.xlu1 %7321, %v7455_v36   ;;  %v1604_v2 = vpop.permute.xlu1 %1603  ;;  %7101 = vmatmul.mubr.msk.f32.gmra.mxu1 %vm2718_vm0, %v2074_v54  ;;  %v7456_v54 = vld [vmem:[%s7569_s28 + $0x58] sm:$0xff] }
 0x2b4   : > { %v1742_v35 = vsub.f32 1.0, %v1705_v45  ;;  %v4427_v0 = vmul.f32 %v4290_v23, %v9508_v41  ;;  %v1669_v28 = vsub.f32 %v7764_v47, %v1604_v2  ;;  %v9733_v38 = vpop.f32.mrf.mxu0  ;;  %5262 = vmatprep.mubr.f32.mxu1 %v10825_v56  ;;  %v11023_v41 = vld [vmem:[#allocation13_spill] sm:$0xff]  ;;  %v11024_v2 = vld [vmem:[#allocation100_spill] sm:$0xff] }
 0x2b5   : > { %11021 = vst [vmem:[#allocation110_spill] sm:$0xff] %v9733_v38  ;;  %v9736_v1 = vpop.f32.mrf.mxu1  ;;  %v3559_v45 = vmul.f32 %v11024_v2, %v11023_v41  ;;  %v11029_v2 = vld [vmem:[#allocation103_spill] sm:$0xff] }
 0x2b6   : > { %v1779_v8 = vmax.f32 %v1742_v35, 0.0  ;;  %v9738_v55 = vadd.f32 %v4427_v0, %v3557_v7  ;;  %v1706_v57 = vand.u32 2147483647, %v1669_v28  ;;  %v9740_v36 = vpop.f32.mrf.mxu0  ;;  %v1744_v35 = vsub.f32 1.0, %v1707_v42 }
 0x2b7   : > { %v4296_v61 = vpop.f32.mrf.mxu1  ;;  %2131 = vperm.xlu1 %7321, %v7456_v54   ;;  %7102 = vmatmul.mubr.msk.f32.gmra.mxu1 %vm2718_vm0, %v2075_v63  ;;  %v1967_v63 = vsub.f32 %v7764_v47, %v9681_v52 }
 0x2b8   : > { %11022 = vst [vmem:[#allocation52_spill] sm:$0xff] %v9738_v55  ;;  %v1743_v23 = vsub.f32 1.0, %v1706_v57  ;;  %v4429_v38 = vmul.f32 %v4296_v61, %v9532_v32  ;;  %v1900_v5 = vpop.permute.xlu1 %1899  ;;  %7065 = vmatmul.mubr.msk.f32.gmra.mxu0 %vm2718_vm0, %v1779_v8  ;;  %5268 = vmatprep.mubr.f32.mxu1 %v10825_v56  ;;  %v9749_v7 = vpop.f32.mrf.mxu0  ;;  %v11028_v8 = vld [vmem:[#allocation15_spill] sm:$0xff]  ;;  %v1781_v52 = vmax.f32 %v1744_v35, 0.0 }
 0x2b9   : > { %11025 = vst [vmem:[#allocation69_spill] sm:$0xff] %v9749_v7  ;;  %v1965_v0 = vsub.f32 %v7764_v47, %v1900_v5  ;;  %v9752_v28 = vpop.f32.mrf.mxu1  ;;  %4870 = vmatprep.mubr.f32.mxu0 %v10825_v56  ;;  %v3561_v7 = vmul.f32 %v11029_v2, %v11028_v8 }
 0x2ba   : > { %11026 = vst [vmem:[#allocation53_spill] sm:$0xff] %v9752_v28  ;;  %v1780_v57 = vmax.f32 %v1743_v23, 0.0  ;;  %v9757_v41 = vadd.f32 %v4429_v38, %v3559_v45  ;;  %v9760_v42 = vpop.f32.mrf.mxu0  ;;  %v1620_v23 = vpop.permute.xlu0 %1619  ;;  %v2004_v45 = vand.u32 2147483647, %v1967_v63 }
 0x2bb   : > { %v2002_v32 = vand.u32 2147483647, %v1965_v0  ;;  %v4302_v61 = vpop.f32.mrf.mxu1  ;;  %7323 = vset.pattern.permute.xlu1 %v10892_v53 }
 0x2bc   : > { %11027 = vst [vmem:[#allocation71_spill] sm:$0xff] %v9757_v41  ;;  %v4431_v5 = vmul.f32 %v4302_v61, %v9556_v29  ;;  %2427 = vperm.xlu1 %7323, %v7456_v54   ;;  %v1904_v55 = vpop.permute.xlu1 %1903  ;;  %7066 = vmatmul.mubr.msk.f32.gmra.mxu0 %vm2718_vm0, %v1780_v57  ;;  %v9772_v54 = vpop.f32.mrf.mxu0  ;;  %v11033_v61 = vld [vmem:[#allocation17_spill] sm:$0xff] }
 0x2bd   : > { %v2039_v38 = vsub.f32 1.0, %v2002_v32  ;;  %v1966_v0 = vsub.f32 %v7764_v47, %v1904_v55  ;;  %v9767_v41 = vpop.f32.mrf.mxu1  ;;  %4876 = vmatprep.mubr.f32.mxu0 %v10825_v56  ;;  %11032 = vst [vmem:[#allocation72_spill] sm:$0xff] %v9772_v54  ;;  %v3563_v57 = vmul.f32 %v11034_v26, %v11033_v61  ;;  %v7457_v32 = vld [vmem:[%s7569_s28 + $0x60] sm:$0xff]  ;;  %v2041_v55 = vsub.f32 1.0, %v2004_v45 }
 0x2be   : > { %11030 = vst [vmem:[#allocation113_spill] sm:$0xff] %v9767_v41  ;;  %v9770_v28 = vadd.f32 %v4431_v5, %v3561_v7 }
 0x2bf   : > { %v2076_v8 = vmax.f32 %v2039_v38, 0.0  ;;  %v2003_v2 = vand.u32 2147483647, %v1966_v0  ;;  %v4308_v29 = vpop.f32.mrf.mxu1  ;;  %v9788_v38 = vpop.permute.xlu0 %1631 }
 0x2c0   : > { %11031 = vst [vmem:[#allocation54_spill] sm:$0xff] %v9770_v28  ;;  %v4433_v35 = vmul.f32 %v4308_v29, %v9592_v16  ;;  %2431 = vperm.xlu1 %7323, %v7457_v32   ;;  %7067 = vmatmul.mubr.msk.f32.gmra.mxu0 %vm2718_vm0, %v1781_v52  ;;  %v1673_v16 = vsub.f32 %v7764_v47, %v1620_v23  ;;  %v11038_v29 = vld [vmem:[#allocation107_spill] sm:$0xff] }
 0x2c1   : > { %v2040_v63 = vsub.f32 1.0, %v2003_v2  ;;  %v9779_v41 = vpop.f32.mrf.mxu1  ;;  %v1612_v7 = vpop.permute.xlu1 %1611  ;;  %7103 = vmatmul.mubr.msk.f32.gmra.mxu1 %vm2718_vm0, %v2076_v8  ;;  %4882 = vmatprep.mubr.f32.mxu0 %v10825_v56  ;;  %v11037_v2 = vld [vmem:[#allocation19_spill] sm:$0xff] }
 0x2c2   : > { %11035 = vst [vmem:[#allocation115_spill] sm:$0xff] %v9779_v41  ;;  %v9783_v5 = vadd.f32 %v4433_v35, %v3563_v57  ;;  %v1671_v26 = vsub.f32 %v7764_v47, %v1612_v7  ;;  %5274 = vmatprep.mubr.f32.mxu1 %v10825_v56  ;;  %v3565_v8 = vmul.f32 %v11038_v29, %v11037_v2  ;;  %v2078_v57 = vmax.f32 %v2041_v55, 0.0  ;;  %v7458_v7 = vld [vmem:[%s7569_s28 + $0x68] sm:$0xff]  ;;  %v11041_v55 = vld [vmem:[#allocation21_spill] sm:$0xff] }
 0x2c3   : > { %v2077_v52 = vmax.f32 %v2040_v63, 0.0  ;;  %v4314_v45 = vpop.f32.mrf.mxu1  ;;  %v9790_v0 = vpop.f32.mrf.mxu0 }
 0x2c4   : > { %11036 = vst [vmem:[#allocation55_spill] sm:$0xff] %v9783_v5  ;;  %v1708_v61 = vand.u32 2147483647, %v1671_v26  ;;  %v4435_v32 = vmul.f32 %v4314_v45, %v9609_v3  ;;  %7324 = vset.pattern.permute.xlu1 %v10887_v50  ;;  %v1710_v3 = vand.u32 2147483647, %v1673_v16  ;;  %v11042_v45 = vld [vmem:[#allocation109_spill] sm:$0xff] }
 0x2c5   : > { %v9796_v35 = vpop.f32.mrf.mxu1  ;;  %2139 = vperm.xlu1 %7324, %v7458_v7   ;;  %v1616_v23 = vpop.permute.xlu1 %1615  ;;  %7104 = vmatmul.mubr.msk.f32.gmra.mxu1 %vm2718_vm0, %v2077_v52  ;;  %v3567_v29 = vmul.f32 %v11042_v45, %v11041_v55  ;;  %v11045_v45 = vld [vmem:[#allocation23_spill] sm:$0xff] }
 0x2c6   : > { %11039 = vst [vmem:[#allocation74_spill] sm:$0xff] %v9796_v35  ;;  %v1745_v63 = vsub.f32 1.0, %v1708_v61  ;;  %v9800_v54 = vadd.f32 %v4435_v32, %v3565_v8  ;;  %v1672_v5 = vsub.f32 %v7764_v47, %v1616_v23  ;;  %v9803_v2 = vpop.f32.mrf.mxu0  ;;  %5280 = vmatprep.mubr.f32.mxu1 %v10825_v56  ;;  %v1920_v52 = vpop.permute.xlu0 %1919  ;;  %v7459_v61 = vld [vmem:[%s7569_s28 + $0x70] sm:$0xff]  ;;  %v1747_v55 = vsub.f32 1.0, %v1710_v3 }
 0x2c7   : > { %11040 = vst [vmem:[#allocation118_spill] sm:$0xff] %v9803_v2  ;;  %v4320_v26 = vpop.f32.mrf.mxu1 }
 0x2c8   : > { %v1782_v35 = vmax.f32 %v1745_v63, 0.0  ;;  %v1709_v7 = vand.u32 2147483647, %v1672_v5  ;;  %v4437_v41 = vmul.f32 %v4320_v26, %v9628_v17  ;;  %v9809_v28 = vpop.f32.mrf.mxu0  ;;  %v1970_v26 = vsub.f32 %v7764_v47, %v1920_v52 }
 0x2c9   : > { %v9811_v8 = vpop.f32.mrf.mxu1  ;;  %2143 = vperm.xlu1 %7324, %v7459_v61   ;;  %7105 = vmatmul.mubr.msk.f32.gmra.mxu1 %vm2718_vm0, %v2078_v57  ;;  %v11046_v57 = vld [vmem:[#allocation112_spill] sm:$0xff] }
 0x2ca   : > { %v1746_v32 = vsub.f32 1.0, %v1709_v7  ;;  %v9815_v23 = vadd.f32 %v4437_v41, %v3567_v29  ;;  %v1912_v16 = vpop.permute.xlu1 %1911  ;;  %7068 = vmatmul.mubr.msk.f32.gmra.mxu0 %vm2718_vm0, %v1782_v35  ;;  %5286 = vmatprep.mubr.f32.mxu1 %v10825_v56  ;;  %v9819_v5 = vpop.f32.mrf.mxu0  ;;  %v3569_v7 = vmul.f32 %v11046_v57, %v11045_v45 }
 0x2cb   : > { %11044 = vst [vmem:[#allocation77_spill] sm:$0xff] %v9819_v5  ;;  %v1968_v17 = vsub.f32 %v7764_v47, %v1912_v16  ;;  %v4326_v63 = vpop.f32.mrf.mxu1  ;;  %4888 = vmatprep.mubr.f32.mxu0 %v10825_v56  ;;  %v1784_v16 = vmax.f32 %v1747_v55, 0.0 }
 0x2cc   : > { %11043 = vst [vmem:[#allocation124_spill] sm:$0xff] %v9815_v23  ;;  %v1783_v41 = vmax.f32 %v1746_v32, 0.0  ;;  %v4439_v29 = vmul.f32 %v4326_v63, %v9654_v6  ;;  %v9830_v3 = vpop.f32.mrf.mxu0  ;;  %v2007_v6 = vand.u32 2147483647, %v1970_v26  ;;  %v11050_v63 = vld [vmem:[#allocation116_spill] sm:$0xff] }
 0x2cd   : > { %v2005_v2 = vand.u32 2147483647, %v1968_v17  ;;  %v9827_v35 = vpop.f32.mrf.mxu1  ;;  %7326 = vset.pattern.permute.xlu1 %v10892_v53  ;;  %v11049_v17 = vld [vmem:[#allocation25_spill] sm:$0xff] }
 0x2ce   : > { %11047 = vst [vmem:[#allocation79_spill] sm:$0xff] %v9827_v35  ;;  %v9832_v5 = vadd.f32 %v4439_v29, %v3569_v7  ;;  %2439 = vperm.xlu1 %7326, %v7459_v61   ;;  %v1916_v23 = vpop.permute.xlu1 %1915  ;;  %7069 = vmatmul.mubr.msk.f32.gmra.mxu0 %vm2718_vm0, %v1783_v41  ;;  %v3571_v57 = vmul.f32 %v11050_v63, %v11049_v17  ;;  %v9842_v61 = vpop.f32.mrf.mxu0  ;;  %v2044_v17 = vsub.f32 1.0, %v2007_v6 }
 0x2cf   : > { %v2042_v52 = vsub.f32 1.0, %v2005_v2  ;;  %v1969_v32 = vsub.f32 %v7764_v47, %v1916_v23  ;;  %v4332_v45 = vpop.f32.mrf.mxu1  ;;  %4894 = vmatprep.mubr.f32.mxu0 %v10825_v56  ;;  %11051 = vst [vmem:[#allocation83_spill] sm:$0xff] %v9842_v61  ;;  %v7460_v2 = vld [vmem:[%s7569_s28 + $0x78] sm:$0xff] }
 0x2d0   : > { %11048 = vst [vmem:[#allocation81_spill] sm:$0xff] %v9832_v5  ;;  %v4441_v35 = vmul.f32 %v4332_v45, %v9670_v19  ;;  %v11053_v19 = vld [vmem:[#allocation27_spill] sm:$0xff] }
 0x2d1   : > { %v2079_v7 = vmax.f32 %v2042_v52, 0.0  ;;  %v2006_v29 = vand.u32 2147483647, %v1969_v32  ;;  %v9840_v55 = vpop.f32.mrf.mxu1  ;;  %v11054_v52 = vld [vmem:[#allocation119_spill] sm:$0xff] }
 0x2d2   : > { %v9844_v5 = vadd.f32 %v4441_v35, %v3571_v57  ;;  %2443 = vperm.xlu1 %7326, %v7460_v2   ;;  %7070 = vmatmul.mubr.msk.f32.gmra.mxu0 %vm2718_vm0, %v1784_v16  ;;  %v3573_v32 = vmul.f32 %v11054_v52, %v11053_v19  ;;  %v1676_v35 = vsub.f32 %v7764_v47, %v9788_v38  ;;  %v11057_v2 = vld [vmem:[#allocation30_spill] sm:$0xff]  ;;  %v2081_v38 = vmax.f32 %v2044_v17, 0.0 }
 0x2d3   : > { %v2043_v23 = vsub.f32 1.0, %v2006_v29  ;;  %v4338_v26 = vpop.f32.mrf.mxu1  ;;  %v1624_v41 = vpop.permute.xlu1 %1623  ;;  %7106 = vmatmul.mubr.msk.f32.gmra.mxu1 %vm2718_vm0, %v2079_v7  ;;  %4900 = vmatprep.mubr.f32.mxu0 %v10825_v56  ;;  %v11058_v19 = vld [vmem:[#allocation122_spill] sm:$0xff] }
 0x2d4   : > { %11052 = vst [vmem:[#allocation85_spill] sm:$0xff] %v9844_v5  ;;  %v4443_v45 = vmul.f32 %v4338_v26, %v9694_v30  ;;  %v1674_v63 = vsub.f32 %v7764_v47, %v1624_v41  ;;  %5292 = vmatprep.mubr.f32.mxu1 %v10825_v56  ;;  %v3575_v52 = vmul.f32 %v11058_v19, %v11057_v2  ;;  %v7461_v30 = vld [vmem:[%s7569_s28 + $0x80] sm:$0xff] }
 0x2d5   : > { %v2080_v16 = vmax.f32 %v2043_v23, 0.0  ;;  %v9857_v57 = vpop.f32.mrf.mxu1  ;;  %v9859_v7 = vpop.f32.mrf.mxu0  ;;  %v1713_v23 = vand.u32 2147483647, %v1676_v35  ;;  %v7462_v35 = vld [vmem:[%s7569_s28 + $0x88] sm:$0xff] }
 0x2d6   : > { %11055 = vst [vmem:[#allocation87_spill] sm:$0xff] %v9857_v57  ;;  %v9861_v6 = vadd.f32 %v4443_v45, %v3573_v32  ;;  %v1711_v29 = vand.u32 2147483647, %v1674_v63  ;;  %7327 = vset.pattern.permute.xlu1 %v10887_v50 }
 0x2d7   : > { %v4344_v61 = vpop.f32.mrf.mxu1  ;;  %2151 = vperm.xlu1 %7327, %v7461_v30   ;;  %v1628_v26 = vpop.permute.xlu1 %1627  ;;  %7107 = vmatmul.mubr.msk.f32.gmra.mxu1 %vm2718_vm0, %v2080_v16 }
 0x2d8   : > { %11056 = vst [vmem:[#allocation5_spill] sm:$0xff] %v9861_v6  ;;  %v1748_v41 = vsub.f32 1.0, %v1711_v29  ;;  %v4445_v5 = vmul.f32 %v4344_v61, %v9722_v37  ;;  %v1675_v32 = vsub.f32 %v7764_v47, %v1628_v26  ;;  %v9870_v45 = vpop.f32.mrf.mxu0  ;;  %5298 = vmatprep.mubr.f32.mxu1 %v10825_v56  ;;  %v1932_v6 = vpop.permute.xlu0 %1931  ;;  %v11062_v37 = vld [vmem:[#allocation33_spill] sm:$0xff]  ;;  %v1750_v26 = vsub.f32 1.0, %v1713_v23 }
 0x2d9   : > { %11059 = vst [vmem:[#allocation89_spill] sm:$0xff] %v9870_v45  ;;  %v9873_v63 = vpop.f32.mrf.mxu1  ;;  %v11063_v61 = vld [vmem:[#allocation125_spill] sm:$0xff] }
 0x2da   : > { %11060 = vst [vmem:[#allocation7_spill] sm:$0xff] %v9873_v63  ;;  %v1785_v17 = vmax.f32 %v1748_v41, 0.0  ;;  %v9875_v2 = vadd.f32 %v4445_v5, %v3575_v52  ;;  %v1712_v19 = vand.u32 2147483647, %v1675_v32  ;;  %v9877_v30 = vpop.f32.mrf.mxu0  ;;  %v3577_v29 = vmul.f32 %v11063_v61, %v11062_v37 }
 0x2db   : > { %v4350_v16 = vpop.f32.mrf.mxu1  ;;  %2155 = vperm.xlu1 %7327, %v7462_v35   ;;  %7108 = vmatmul.mubr.msk.f32.gmra.mxu1 %vm2718_vm0, %v2081_v38  ;;  %v1973_v38 = vsub.f32 %v7764_v47, %v1932_v6  ;;  %v1787_v37 = vmax.f32 %v1750_v26, 0.0 }
 0x2dc   : > { %11061 = vst [vmem:[#allocation91_spill] sm:$0xff] %v9875_v2  ;;  %v1749_v45 = vsub.f32 1.0, %v1712_v19  ;;  %v4447_v57 = vmul.f32 %v4350_v16, %v9740_v36  ;;  %v1924_v63 = vpop.permute.xlu1 %1923  ;;  %7071 = vmatmul.mubr.msk.f32.gmra.mxu0 %vm2718_vm0, %v1785_v17  ;;  %5304 = vmatprep.mubr.f32.mxu1 %v10825_v56  ;;  %v9893_v23 = vpop.f32.mrf.mxu0  ;;  %v11066_v17 = vld [vmem:[#allocation36_spill] sm:$0xff]  ;;  %v7463_v2 = vld [vmem:[%s7569_s28 + $0x90] sm:$0xff] }
 0x2dd   : > { %v1971_v5 = vsub.f32 %v7764_v47, %v1924_v63  ;;  %v9887_v52 = vpop.f32.mrf.mxu1  ;;  %4906 = vmatprep.mubr.f32.mxu0 %v10825_v56  ;;  %11065 = vst [vmem:[#allocation94_spill] sm:$0xff] %v9893_v23  ;;  %v3579_v16 = vmul.f32 %v9297_v44, %v11066_v17  ;;  %v11069_v17 = vld [vmem:[#allocation130_spill] sm:$0xff] }
 0x2de   : > { %v1786_v41 = vmax.f32 %v1749_v45, 0.0  ;;  %v9891_v32 = vadd.f32 %v4447_v57, %v3577_v29  ;;  %v9900_v6 = vpop.f32.mrf.mxu0 }
 0x2df   : > { %v2008_v19 = vand.u32 2147483647, %v1971_v5  ;;  %v4356_v36 = vpop.f32.mrf.mxu1  ;;  %7329 = vset.pattern.permute.xlu1 %v10892_v53  ;;  %v2010_v5 = vand.u32 2147483647, %v1973_v38 }
 0x2e0   : > { %11064 = vst [vmem:[#allocation9_spill] sm:$0xff] %v9891_v32  ;;  %v4449_v63 = vmul.f32 %v4356_v36, %v9760_v42  ;;  %2451 = vperm.xlu1 %7329, %v7462_v35   ;;  %v1928_v61 = vpop.permute.xlu1 %1927  ;;  %7072 = vmatmul.mubr.msk.f32.gmra.mxu0 %vm2718_vm0, %v1786_v41  ;;  %v2088_v35 = vpop.permute.xlu0 %2087  ;;  %v11068_v36 = vld [vmem:[#allocation39_spill] sm:$0xff] }
 0x2e1   : > { %v2045_v57 = vsub.f32 1.0, %v2008_v19  ;;  %v1972_v45 = vsub.f32 %v7764_v47, %v1928_v61  ;;  %v9903_v29 = vpop.f32.mrf.mxu1  ;;  %4912 = vmatprep.mubr.f32.mxu0 %v10825_v56  ;;  %v3581_v32 = vmul.f32 %v11069_v17, %v11068_v36  ;;  %v9912_v19 = vpop.f32.mrf.mxu0 }
 0x2e2   : > { %v9906_v23 = vadd.f32 %v4449_v63, %v3579_v16  ;;  %11070 = vst [vmem:[#allocation97_spill] sm:$0xff] %v9912_v19  ;;  %v2047_v63 = vsub.f32 1.0, %v2010_v5 }
 0x2e3   : > { %v2082_v44 = vmax.f32 %v2045_v57, 0.0  ;;  %v2009_v26 = vand.u32 2147483647, %v1972_v45  ;;  %v4362_v42 = vpop.f32.mrf.mxu1 }
 0x2e4   : > { %11067 = vst [vmem:[#allocation11_spill] sm:$0xff] %v9906_v23  ;;  %v4451_v41 = vmul.f32 %v4362_v42, %v9790_v0  ;;  %2455 = vperm.xlu1 %7329, %v7463_v2   ;;  %7073 = vmatmul.mubr.msk.f32.gmra.mxu0 %vm2718_vm0, %v1787_v37  ;;  %v2234_v2 = vsub.f32 %v7764_v47, %v2088_v35  ;;  %v11074_v42 = vld [vmem:[#allocation132_spill] sm:$0xff] }
 0x2e5   : > { %v2046_v38 = vsub.f32 1.0, %v2009_v26  ;;  %v9915_v61 = vpop.f32.mrf.mxu1  ;;  %v1636_v16 = vpop.permute.xlu1 %1635  ;;  %7109 = vmatmul.mubr.msk.f32.gmra.mxu1 %vm2718_vm0, %v2082_v44  ;;  %4918 = vmatprep.mubr.f32.mxu0 %v10825_v56  ;;  %v11073_v26 = vld [vmem:[#allocation42_spill] sm:$0xff] }
 0x2e6   : > { %11071 = vst [vmem:[#allocation13_spill] sm:$0xff] %v9915_v61  ;;  %v9919_v57 = vadd.f32 %v4451_v41, %v3581_v32  ;;  %v1677_v0 = vsub.f32 %v7764_v47, %v1636_v16  ;;  %5310 = vmatprep.mubr.f32.mxu1 %v10825_v56  ;;  %v3583_v36 = vmul.f32 %v11074_v42, %v11073_v26  ;;  %v2084_v32 = vmax.f32 %v2047_v63, 0.0  ;;  %v7464_v16 = vld [vmem:[%s7569_s28 + $0x98] sm:$0xff]  ;;  %v11077_v63 = vld [vmem:[#allocation45_spill] sm:$0xff]  ;;  %v11078_v42 = vld [vmem:[#allocation135_spill] sm:$0xff] }
 0x2e7   : > { %v2083_v45 = vmax.f32 %v2046_v38, 0.0  ;;  %v4368_v37 = vpop.f32.mrf.mxu1 }
 0x2e8   : > { %11072 = vst [vmem:[#allocation100_spill] sm:$0xff] %v9919_v57  ;;  %v1714_v17 = vand.u32 2147483647, %v1677_v0  ;;  %v4453_v44 = vmul.f32 %v4368_v37, %v9809_v28  ;;  %7330 = vset.pattern.permute.xlu1 %v10887_v50  ;;  %v9928_v5 = vpop.f32.mrf.mxu0  ;;  %v2271_v28 = vand.u32 2147483647, %v2234_v2  ;;  %v3585_v57 = vmul.f32 %v11078_v42, %v11077_v63 }
 0x2e9   : > { %v9930_v41 = vpop.f32.mrf.mxu1  ;;  %2163 = vperm.xlu1 %7330, %v7464_v16   ;;  %v1640_v19 = vpop.permute.xlu1 %1639  ;;  %7110 = vmatmul.mubr.msk.f32.gmra.mxu1 %vm2718_vm0, %v2083_v45 }
 0x2ea   : > { %11075 = vst [vmem:[#allocation15_spill] sm:$0xff] %v9930_v41  ;;  %v1751_v35 = vsub.f32 1.0, %v1714_v17  ;;  %v9934_v38 = vadd.f32 %v4453_v44, %v3583_v36  ;;  %v1678_v0 = vsub.f32 %v7764_v47, %v1640_v19  ;;  %v9937_v26 = vpop.f32.mrf.mxu0  ;;  %5316 = vmatprep.mubr.f32.mxu1 %v10825_v56  ;;  %v2388_v45 = vpop.permute.xlu0 %2387  ;;  %v7465_v17 = vld [vmem:[%s7569_s28 + $0xa0] sm:$0xff]  ;;  %v2308_v63 = vsub.f32 1.0, %v2271_v28 }
 0x2eb   : > { %11076 = vst [vmem:[#allocation103_spill] sm:$0xff] %v9937_v26  ;;  %v4374_v37 = vpop.f32.mrf.mxu1 }
 0x2ec   : > { %v1788_v41 = vmax.f32 %v1751_v35, 0.0  ;;  %v1715_v16 = vand.u32 2147483647, %v1678_v0  ;;  %v4455_v61 = vmul.f32 %v4374_v37, %v9830_v3  ;;  %v9943_v23 = vpop.f32.mrf.mxu0  ;;  %v11079_v0 = vld [vmem:[#allocation48_spill] sm:$0xff] }
 0x2ed   : > { %v9945_v36 = vpop.f32.mrf.mxu1  ;;  %2167 = vperm.xlu1 %7330, %v7465_v17   ;;  %7111 = vmatmul.mubr.msk.f32.gmra.mxu1 %vm2718_vm0, %v2084_v32  ;;  %v3587_v37 = vmul.f32 %v9357_v58, %v11079_v0  ;;  %v2345_v58 = vmax.f32 %v2308_v63, 0.0  ;;  %v7466_v63 = vld [vmem:[%s7569_s28 + $0xa8] sm:$0xff] }
 0x2ee   : > { %v1752_v19 = vsub.f32 1.0, %v1715_v16  ;;  %v9949_v44 = vadd.f32 %v4455_v61, %v3585_v57  ;;  %v1936_v2 = vpop.permute.xlu1 %1935  ;;  %7074 = vmatmul.mubr.msk.f32.gmra.mxu0 %vm2718_vm0, %v1788_v41  ;;  %5322 = vmatprep.mubr.f32.mxu1 %v10825_v56  ;;  %v9958_v16 = vpop.f32.mrf.mxu0  ;;  %v2531_v61 = vsub.f32 %v7764_v47, %v2388_v45 }
 0x2ef   : > { %v1974_v3 = vsub.f32 %v7764_v47, %v1936_v2  ;;  %v4380_v35 = vpop.f32.mrf.mxu1  ;;  %4924 = vmatprep.mubr.f32.mxu0 %v10825_v56  ;;  %11080 = vst [vmem:[#allocation17_spill] sm:$0xff] %v9958_v16  ;;  %v9961_v57 = vpop.permute.xlu0 %2399 }
 0x2f0   : > { %v1789_v42 = vmax.f32 %v1752_v19, 0.0  ;;  %v4457_v32 = vmul.f32 %v4380_v35, %v9859_v7  ;;  %v9969_v19 = vpop.f32.mrf.mxu0  ;;  %v2568_v16 = vand.u32 2147483647, %v2531_v61 }
 0x2f1   : > { %v2011_v41 = vand.u32 2147483647, %v1974_v3  ;;  %v9963_v28 = vpop.f32.mrf.mxu1  ;;  %7332 = vset.pattern.permute.xlu1 %v10892_v53 }
 0x2f2   : > { %v9966_v2 = vadd.f32 %v4457_v32, %v3587_v37  ;;  %2463 = vperm.xlu1 %7332, %v7465_v17   ;;  %7075 = vmatmul.mubr.msk.f32.gmra.mxu0 %vm2718_vm0, %v1789_v42  ;;  %v9980_v32 = vpop.f32.mrf.mxu0 }
 0x2f3   : > { %v2048_v7 = vsub.f32 1.0, %v2011_v41  ;;  %v5108_v35 = vpop.f32.mrf.mxu1  ;;  %v2384_v0 = vpop.permute.xlu1 %2383  ;;  %5652 = vmatprep.mubr.f32.mxu0 %v10825_v56  ;;  %11082 = vst [vmem:[#allocation19_spill] sm:$0xff] %v9980_v32 }
 0x2f4   : > { %11081 = vst [vmem:[#allocation105_spill] sm:$0xff] %v9966_v2  ;;  %v5329_v45 = vmul.f32 %v5108_v35, %v9877_v30  ;;  %v2530_v3 = vsub.f32 %v7764_v47, %v2384_v0  ;;  %v2100_v41 = vpop.permute.xlu0 %2099 }
 0x2f5   : > { %v2085_v26 = vmax.f32 %v2048_v7, 0.0  ;;  %v9974_v37 = vpop.f32.mrf.mxu1 }
 0x2f6   : > { %v9977_v17 = vadd.f32 %v5329_v45, %v9390_v24  ;;  %v2567_v42 = vand.u32 2147483647, %v2530_v3  ;;  %2467 = vperm.xlu1 %7332, %v7466_v63   ;;  %7113 = vmatmul.mubr.msk.f32.vlgmr.msra.gmra.mxu0 %vm2718_vm0, %v2345_v58  ;;  %v2605_v24 = vsub.f32 1.0, %v2568_v16  ;;  %v2237_v58 = vsub.f32 %v7764_v47, %v2100_v41 }
 0x2f7   : > { %v5114_v2 = vpop.f32.mrf.mxu1  ;;  %7112 = vmatmul.mubr.msk.f32.gmra.mxu1 %vm2718_vm0, %v2085_v26  ;;  %5658 = vmatprep.mubr.f32.mxu0 %v10825_v56 }
 0x2f8   : > { %v2604_v30 = vsub.f32 1.0, %v2567_v42  ;;  %v5331_v61 = vmul.f32 %v5114_v2, %v9900_v6  ;;  %v2092_v7 = vpop.permute.xlu1 %2091  ;;  %6050 = vmatprep.mubr.f32.mxu1 %v10825_v56  ;;  %v7467_v6 = vld [vmem:[%s7569_s28 + $0xb0] sm:$0xff]  ;;  %v2642_v16 = vmax.f32 %v2605_v24, 0.0 }
 0x2f9   : > { %v2235_v35 = vsub.f32 %v7764_v47, %v2092_v7  ;;  %v9988_v0 = vpop.f32.mrf.mxu1 }
 0x2fa   : > { %v2641_v45 = vmax.f32 %v2604_v30, 0.0  ;;  %v9992_v3 = vadd.f32 %v5331_v61, %v9407_v62  ;;  %7333 = vset.pattern.permute.xlu1 %v10887_v50  ;;  %v4740_v26 = vpop.f32.mrf.mxu0  ;;  %v2274_v61 = vand.u32 2147483647, %v2237_v58 }
 0x2fb   : > { %v2272_v42 = vand.u32 2147483647, %v2235_v35  ;;  %v5120_v63 = vpop.f32.mrf.mxu1  ;;  %2175 = vperm.xlu1 %7333, %v7467_v6   ;;  %v10007_v6 = vpop.permute.xlu0 %2111 }
 0x2fc   : > { %11083 = vst [vmem:[#allocation107_spill] sm:$0xff] %v9992_v3  ;;  %v5333_v2 = vmul.f32 %v5120_v63, %v9928_v5  ;;  %v2096_v7 = vpop.permute.xlu1 %2095  ;;  %v9997_v32 = vpop.f32.mrf.mxu0  ;;  %7150 = vmatmul.mubr.msk.f32.vlgmr.msra.gmra.mxu1 %vm2718_vm0, %v2641_v45  ;;  %v7468_v3 = vld [vmem:[%s7569_s28 + $0xb8] sm:$0xff] }
 0x2fd   : > { %11084 = vst [vmem:[#allocation21_spill] sm:$0xff] %v9997_v32  ;;  %v2309_v41 = vsub.f32 1.0, %v2272_v42  ;;  %v2236_v62 = vsub.f32 %v7764_v47, %v2096_v7  ;;  %v10001_v30 = vpop.f32.mrf.mxu1  ;;  %6056 = vmatprep.mubr.f32.mxu1 %v10825_v56 }
 0x2fe   : > { %v10005_v35 = vadd.f32 %v5333_v2, %v9428_v27  ;;  %v4746_v24 = vpop.f32.mrf.mxu0  ;;  %v2311_v27 = vsub.f32 1.0, %v2274_v61 }
 0x2ff   : > { %v2346_v5 = vmax.f32 %v2309_v41, 0.0  ;;  %v2273_v63 = vand.u32 2147483647, %v2236_v62  ;;  %v5126_v32 = vpop.f32.mrf.mxu1  ;;  %2179 = vperm.xlu1 %7333, %v7468_v3  }
 0x300   : > { %11085 = vst [vmem:[#allocation109_spill] sm:$0xff] %v10005_v35  ;;  %v5335_v45 = vmul.f32 %v5126_v32, %v9943_v23  ;;  %7151 = vmatmul.mubr.msk.f32.gmra.mxu1 %vm2718_vm0, %v2642_v16  ;;  %v10022_v41 = vpop.f32.mrf.mxu0  ;;  %v2534_v32 = vsub.f32 %v7764_v47, %v9961_v57  ;;  %v2348_v57 = vmax.f32 %v2311_v27, 0.0 }
 0x301   : > { %v2310_v42 = vsub.f32 1.0, %v2273_v63  ;;  %v10012_v7 = vpop.f32.mrf.mxu1  ;;  %v2392_v58 = vpop.permute.xlu1 %2391  ;;  %7114 = vmatmul.mubr.msk.f32.gmra.mxu0 %vm2718_vm0, %v2346_v5  ;;  %6062 = vmatprep.mubr.f32.mxu1 %v10825_v56  ;;  %11087 = vst [vmem:[#allocation112_spill] sm:$0xff] %v10022_v41 }
 0x302   : > { %v10020_v2 = vadd.f32 %v5335_v45, %v9445_v39  ;;  %v2532_v23 = vsub.f32 %v7764_v47, %v2392_v58  ;;  %5664 = vmatprep.mubr.f32.mxu0 %v10825_v56  ;;  %v4752_v39 = vpop.f32.mrf.mxu0  ;;  %v2412_v63 = vpop.permute.xlu0 %2411 }
 0x303   : > { %v2347_v16 = vmax.f32 %v2310_v42, 0.0  ;;  %v5132_v62 = vpop.f32.mrf.mxu1  ;;  %7335 = vset.pattern.permute.xlu1 %v10892_v53 }
 0x304   : > { %11086 = vst [vmem:[#allocation23_spill] sm:$0xff] %v10020_v2  ;;  %v2569_v61 = vand.u32 2147483647, %v2532_v23  ;;  %v5337_v5 = vmul.f32 %v5132_v62, %v9969_v19  ;;  %2475 = vperm.xlu1 %7335, %v7468_v3   ;;  %v2571_v2 = vand.u32 2147483647, %v2534_v32  ;;  %v2240_v3 = vsub.f32 %v7764_v47, %v10007_v6  ;;  %v10042_v27 = vpop.f32.mrf.mxu0 }
 0x305   : > { %v10030_v45 = vpop.f32.mrf.mxu1  ;;  %v2396_v58 = vpop.permute.xlu1 %2395  ;;  %7115 = vmatmul.mubr.msk.f32.gmra.mxu0 %vm2718_vm0, %v2347_v16  ;;  %v7469_v16 = vld [vmem:[%s7569_s28 + $0xc0] sm:$0xff]  ;;  %11089 = vst [vmem:[#allocation116_spill] sm:$0xff] %v10042_v27  ;;  %v2537_v32 = vsub.f32 %v7764_v47, %v2412_v63 }
 0x306   : > { %11088 = vst [vmem:[#allocation25_spill] sm:$0xff] %v10030_v45  ;;  %v2606_v41 = vsub.f32 1.0, %v2569_v61  ;;  %v10034_v42 = vadd.f32 %v5337_v5, %v9468_v9  ;;  %v2533_v23 = vsub.f32 %v7764_v47, %v2396_v58  ;;  %5670 = vmatprep.mubr.f32.mxu0 %v10825_v56  ;;  %v2608_v61 = vsub.f32 1.0, %v2571_v2 }
 0x307   : > { %v5138_v19 = vpop.f32.mrf.mxu1 }
 0x308   : > { %v2643_v62 = vmax.f32 %v2606_v41, 0.0  ;;  %v2570_v45 = vand.u32 2147483647, %v2533_v23  ;;  %v5339_v35 = vmul.f32 %v5138_v19, %v4740_v26  ;;  %2479 = vperm.xlu1 %7335, %v7469_v16   ;;  %v7470_v19 = vld [vmem:[%s7569_s28 + $0xc8] sm:$0xff] }
 0x309   : > { %v10045_v9 = vpop.f32.mrf.mxu1  ;;  %7116 = vmatmul.mubr.msk.f32.gmra.mxu0 %vm2718_vm0, %v2348_v57 }
 0x30a   : > { %v2607_v5 = vsub.f32 1.0, %v2570_v45  ;;  %v10050_v58 = vadd.f32 %v5339_v35, %v9484_v59  ;;  %v2104_v6 = vpop.permute.xlu1 %2103  ;;  %7152 = vmatmul.mubr.msk.f32.gmra.mxu1 %vm2718_vm0, %v2643_v62  ;;  %5676 = vmatprep.mubr.f32.mxu0 %v10825_v56  ;;  %v2277_v45 = vand.u32 2147483647, %v2240_v3  ;;  %v10057_v59 = vand.u32 2147483647, %v2537_v32  ;;  %v7351_v32 = vld [vmem:[%s10062_s9 + $0x38] sm:$0xff]  }
 0x30b   : > { %v2238_v26 = vsub.f32 %v7764_v47, %v2104_v6  ;;  %v5144_v41 = vpop.f32.mrf.mxu1  ;;  %6068 = vmatprep.mubr.f32.mxu1 %v10825_v56  ;;  %v2645_v62 = vmax.f32 %v2608_v61, 0.0  ;;  %6556 = vmatpush1.bf16.msra.mxu0 %v7351_v32  ;;  %v7352_v61 = vld [vmem:[%s10062_s9 + $0x30] sm:$0xff]  }
 0x30c   : > { %v2644_v63 = vmax.f32 %v2607_v5, 0.0  ;;  %v5341_v57 = vmul.f32 %v5144_v41, %v4746_v24  ;;  %7336 = vset.pattern.permute.xlu1 %v10887_v50  ;;  %v4758_v2 = vpop.f32.mrf.mxu0 }
 0x30d   : > { %v2275_v35 = vand.u32 2147483647, %v2238_v26  ;;  %v10064_v23 = vpop.f32.mrf.mxu1  ;;  %2187 = vperm.xlu1 %7336, %v7470_v19  }
 0x30e   : > { %11090 = vst [vmem:[#allocation27_spill] sm:$0xff] %v10064_v23  ;;  %v10068_v24 = vadd.f32 %v5341_v57, %v9503_v10  ;;  %v2108_v3 = vpop.permute.xlu1 %2107  ;;  %v10070_v16 = vpop.f32.mrf.mxu0  ;;  %7153 = vmatmul.mubr.msk.f32.gmra.mxu1 %vm2718_vm0, %v2644_v63  ;;  %v11093_v23 = vmov 0  }
 0x30f   : > { %11092 = vst [vmem:[#allocation30_spill] sm:$0xff] %v10070_v16  ;;  %v2312_v5 = vsub.f32 1.0, %v2275_v35  ;;  %v2239_v6 = vsub.f32 %v7764_v47, %v2108_v3  ;;  %v5150_v26 = vpop.f32.mrf.mxu1  ;;  %6074 = vmatprep.mubr.f32.mxu1 %v10825_v56  ;;  %v2314_v16 = vsub.f32 1.0, %v2277_v45  ;;  %6557 = vmatprep.subr.bf16.mxu0 %v11093_v23  ;;  %v10091_v45 = vpop.permute.xlu0 %2423 }
 0x310   : > { %11091 = vst [vmem:[#allocation119_spill] sm:$0xff] %v10068_v24  ;;  %v5343_v41 = vmul.f32 %v5150_v26, %v4752_v39  ;;  %v4764_v27 = vpop.f32.mrf.mxu0  ;;  %v7471_v24 = vld [vmem:[%s7569_s28 + $0xd0] sm:$0xff]  ;;  %6558 = vmatpush1.bf16.msra.mxu0 %v7352_v61 }
 0x311   : > { %v2349_v19 = vmax.f32 %v2312_v5, 0.0  ;;  %v2276_v10 = vand.u32 2147483647, %v2239_v6  ;;  %v10077_v57 = vpop.f32.mrf.mxu1  ;;  %2191 = vperm.xlu1 %7336, %v7471_v24   ;;  %v2351_v26 = vmax.f32 %v2314_v16, 0.0  ;;  %6559 = vmatprep.subr.bf16.mxu0 %v11093_v23  ;;  %v7353_v16 = vld [vmem:[%s10062_s9 + $0x28] sm:$0xff]  }
 0x312   : > { %v10082_v63 = vadd.f32 %v5343_v41, %v9520_v60  ;;  %7154 = vmatmul.mubr.msk.f32.gmra.mxu1 %vm2718_vm0, %v2645_v62  ;;  %v10087_v32 = vpop.f32.mrf.mxu0 }
 0x313   : > { %v2313_v35 = vsub.f32 1.0, %v2276_v10  ;;  %v5156_v3 = vpop.f32.mrf.mxu1  ;;  %v2404_v39 = vpop.permute.xlu1 %2403  ;;  %7117 = vmatmul.mubr.msk.f32.gmra.mxu0 %vm2718_vm0, %v2349_v19  ;;  %6080 = vmatprep.mubr.f32.mxu1 %v10825_v56  ;;  %11094 = vst [vmem:[#allocation122_spill] sm:$0xff] %v10087_v32 }
 0x314   : > { %v5345_v5 = vmul.f32 %v5156_v3, %v4758_v2  ;;  %v2535_v6 = vsub.f32 %v7764_v47, %v2404_v39  ;;  %5682 = vmatprep.mubr.f32.mxu0 %v10825_v56  ;;  %v4770_v19 = vpop.f32.mrf.mxu0  ;;  %6560 = vmatpush1.bf16.msra.mxu0 %v7353_v16 }
 0x315   : > { %v2350_v60 = vmax.f32 %v2313_v35, 0.0  ;;  %v10093_v62 = vpop.f32.mrf.mxu1  ;;  %7338 = vset.pattern.permute.xlu1 %v10892_v53  ;;  %6561 = vmatprep.subr.bf16.mxu0 %v11093_v23 }
 0x316   : > { %11095 = vst [vmem:[#allocation33_spill] sm:$0xff] %v10093_v62  ;;  %v10098_v41 = vadd.f32 %v5345_v5, %v9538_v4  ;;  %v2572_v2 = vand.u32 2147483647, %v2535_v6  ;;  %2487 = vperm.xlu1 %7338, %v7471_v24   ;;  %v7472_v24 = vld [vmem:[%s7569_s28 + $0xd8] sm:$0xff]  ;;  %v10110_v6 = vpop.f32.mrf.mxu0 }
 0x317   : > { %v5162_v10 = vpop.f32.mrf.mxu1  ;;  %v2408_v3 = vpop.permute.xlu1 %2407  ;;  %7118 = vmatmul.mubr.msk.f32.gmra.mxu0 %vm2718_vm0, %v2350_v60 }
 0x318   : > { %11096 = vst [vmem:[#allocation125_spill] sm:$0xff] %v10098_v41  ;;  %v2609_v61 = vsub.f32 1.0, %v2572_v2  ;;  %v5347_v35 = vmul.f32 %v5162_v10, %v4764_v27  ;;  %v2536_v39 = vsub.f32 %v7764_v47, %v2408_v3  ;;  %5688 = vmatprep.mubr.f32.mxu0 %v10825_v56  ;;  %v2124_v41 = vpop.permute.xlu0 %2123 }
 0x319   : > { %v10104_v32 = vpop.f32.mrf.mxu1 }
 0x31a   : > { %v2646_v62 = vmax.f32 %v2609_v61, 0.0  ;;  %v10107_v4 = vadd.f32 %v5347_v35, %v9560_v14  ;;  %v2573_v5 = vand.u32 2147483647, %v2536_v39  ;;  %2491 = vperm.xlu1 %7338, %v7472_v24   ;;  %v2611_v14 = vsub.f32 1.0, %v10057_v59  ;;  %v7473_v59 = vld [vmem:[%s7569_s28 + $0xe0] sm:$0xff] }
 0x31b   : > { %v5168_v60 = vpop.f32.mrf.mxu1  ;;  %7119 = vmatmul.mubr.msk.f32.gmra.mxu0 %vm2718_vm0, %v2351_v26  ;;  %v2243_v26 = vsub.f32 %v7764_v47, %v2124_v41 }
 0x31c   : > { %v2610_v27 = vsub.f32 1.0, %v2573_v5  ;;  %v5349_v2 = vmul.f32 %v5168_v60, %v4770_v19  ;;  %v2116_v10 = vpop.permute.xlu1 %2115  ;;  %7155 = vmatmul.mubr.msk.f32.gmra.mxu1 %vm2718_vm0, %v2646_v62  ;;  %5694 = vmatprep.mubr.f32.mxu0 %v10825_v56  ;;  %v7354_v5 = vld [vmem:[%s10062_s9 + $0x20] sm:$0xff]   ;;  %v2648_v24 = vmax.f32 %v2611_v14, 0.0 }
 0x31d   : > { %v2241_v3 = vsub.f32 %v7764_v47, %v2116_v10  ;;  %v10118_v61 = vpop.f32.mrf.mxu1  ;;  %6086 = vmatprep.mubr.f32.mxu1 %v10825_v56  ;;  %6562 = vmatpush1.bf16.msra.mxu0 %v7354_v5 }
 0x31e   : > { %11097 = vst [vmem:[#allocation36_spill] sm:$0xff] %v10118_v61  ;;  %v2647_v35 = vmax.f32 %v2610_v27, 0.0  ;;  %v10123_v39 = vadd.f32 %v5349_v2, %v9575_v22  ;;  %7339 = vset.pattern.permute.xlu1 %v10887_v50  ;;  %v4776_v19 = vpop.f32.mrf.mxu0  ;;  %v2280_v27 = vand.u32 2147483647, %v2243_v26  ;;  %6563 = vmatprep.subr.bf16.mxu0 %v11093_v23 }
 0x31f   : > { %v2278_v62 = vand.u32 2147483647, %v2241_v3  ;;  %v5174_v16 = vpop.f32.mrf.mxu1  ;;  %2199 = vperm.xlu1 %7339, %v7473_v59   ;;  %v7355_v59 = vld [vmem:[%s10062_s9 + $0x18] sm:$0xff]  }
 0x320   : > { %11098 = vst [vmem:[#allocation39_spill] sm:$0xff] %v10123_v39  ;;  %v5351_v60 = vmul.f32 %v5174_v16, %v4776_v19  ;;  %v2120_v10 = vpop.permute.xlu1 %2119  ;;  %v10128_v61 = vpop.f32.mrf.mxu0  ;;  %7156 = vmatmul.mubr.msk.f32.gmra.mxu1 %vm2718_vm0, %v2647_v35  ;;  %v7474_v16 = vld [vmem:[%s7569_s28 + $0xe8] sm:$0xff]  ;;  %v2317_v26 = vsub.f32 1.0, %v2280_v27 }
 0x321   : > { %v2315_v41 = vsub.f32 1.0, %v2278_v62  ;;  %v2242_v22 = vsub.f32 %v7764_v47, %v2120_v10  ;;  %6092 = vmatprep.mubr.f32.mxu1 %v10825_v56  ;;  %v10140_v62 = vpop.f32.mrf.mxu1  ;;  %6564 = vmatpush1.bf16.msra.mxu0 %v7355_v59 }
 0x322   : > { %v10134_v2 = vadd.f32 %v5351_v60, %v9594_v13  ;;  %v4782_v3 = vpop.f32.mrf.mxu0  ;;  %11100 = vst [vmem:[#allocation42_spill] sm:$0xff] %v10140_v62  ;;  %v2540_v60 = vsub.f32 %v7764_v47, %v10091_v45  ;;  %6565 = vmatprep.subr.bf16.mxu0 %v11093_v23  ;;  %v2354_v45 = vmax.f32 %v2317_v26, 0.0  ;;  %v7475_v62 = vld [vmem:[%s7569_s28 + $0xf0] sm:$0xff] }
 0x323   : > { %v2352_v14 = vmax.f32 %v2315_v41, 0.0  ;;  %v2279_v19 = vand.u32 2147483647, %v2242_v22  ;;  %2203 = vperm.xlu1 %7339, %v7474_v16   ;;  %v7356_v22 = vld [vmem:[%s10062_s9 + $0x10] sm:$0xff]  }
 0x324   : > { %11099 = vst [vmem:[#allocation130_spill] sm:$0xff] %v10134_v2  ;;  %7157 = vmatmul.mubr.msk.f32.gmra.mxu1 %vm2718_vm0, %v2648_v24  ;;  %v10144_v13 = vpop.f32.mrf.mxu0 }
 0x325   : > { %v2316_v35 = vsub.f32 1.0, %v2279_v19  ;;  %v2416_v10 = vpop.permute.xlu1 %2415  ;;  %7120 = vmatmul.mubr.msk.f32.gmra.mxu0 %vm2718_vm0, %v2352_v14  ;;  %6098 = vmatprep.mubr.f32.mxu1 %v10825_v56  ;;  %11101 = vst [vmem:[#allocation132_spill] sm:$0xff] %v10144_v13 }
 0x326   : > { %v2538_v5 = vsub.f32 %v7764_v47, %v2416_v10  ;;  %5700 = vmatprep.mubr.f32.mxu0 %v10825_v56  ;;  %v4788_v19 = vpop.f32.mrf.mxu0  ;;  %6566 = vmatpush1.bf16.msra.mxu0 %v7356_v22 }
 0x327   : > { %v2353_v24 = vmax.f32 %v2316_v35, 0.0  ;;  %7341 = vset.pattern.permute.xlu1 %v10892_v53  ;;  %v5180_v41 = vpop.f32.mrf.mxu1  ;;  %v2577_v35 = vand.u32 2147483647, %v2540_v60  ;;  %6567 = vmatprep.subr.bf16.mxu0 %v11093_v23  ;;  %v2136_v60 = vpop.permute.xlu0 %2135 }
 0x328   : > { %v2575_v27 = vand.u32 2147483647, %v2538_v5  ;;  %v5353_v14 = vmul.f32 %v5180_v41, %v4782_v3  ;;  %2499 = vperm.xlu1 %7341, %v7474_v16   ;;  %v7357_v16 = vld [vmem:[%s10062_s9 + $0x8] sm:$0xff]   ;;  %v10164_v26 = vpop.f32.mrf.mxu0 }
 0x329   : > { %v2420_v13 = vpop.permute.xlu1 %2419  ;;  %v10153_v10 = vpop.f32.mrf.mxu1  ;;  %7121 = vmatmul.mubr.msk.f32.gmra.mxu0 %vm2718_vm0, %v2353_v24 }
 0x32a   : > { %11102 = vst [vmem:[#allocation45_spill] sm:$0xff] %v10153_v10  ;;  %v2612_v59 = vsub.f32 1.0, %v2575_v27  ;;  %v10157_v2 = vadd.f32 %v5353_v14, %v9607_v46  ;;  %v2539_v39 = vsub.f32 %v7764_v47, %v2420_v13  ;;  %5706 = vmatprep.mubr.f32.mxu0 %v10825_v56  ;;  %v2614_v13 = vsub.f32 1.0, %v2577_v35  ;;  %6568 = vmatpush1.bf16.msra.mxu0 %v7357_v16  ;;  %v7476_v35 = vld [vmem:[%s7569_s28 + $0xf8] sm:$0xff] }
 0x32b   : > { %v5186_v3 = vpop.f32.mrf.mxu1  ;;  %v2246_v14 = vsub.f32 %v7764_v47, %v2136_v60  ;;  %6569 = vmatprep.subr.bf16.mxu0 %v11093_v23 }
 0x32c   : > { %11103 = vst [vmem:[#allocation135_spill] sm:$0xff] %v10157_v2  ;;  %v2649_v5 = vmax.f32 %v2612_v59, 0.0  ;;  %v2576_v41 = vand.u32 2147483647, %v2539_v39  ;;  %v5355_v10 = vmul.f32 %v5186_v3, %v4788_v19  ;;  %2503 = vperm.xlu1 %7341, %v7475_v62   ;;  %v7358_v19 = vld [vmem:[%s10062_s9] sm:$0xff]   ;;  %v2651_v3 = vmax.f32 %v2614_v13, 0.0 }
 0x32d   : > { %v10166_v46 = vpop.f32.mrf.mxu1  ;;  %7122 = vmatmul.mubr.msk.f32.gmra.mxu0 %vm2718_vm0, %v2354_v45  ;;  %v7359_v13 = vld [vmem:[%s10062_s9 + $0x78] sm:$0xff]   ;;  %v7478_v2 = vld [vmem:[%s7569_s28 + $0x108] sm:$0xff] }
 0x32e   : > { %v2613_v24 = vsub.f32 1.0, %v2576_v41  ;;  %v10170_v22 = vadd.f32 %v5355_v10, %v9625_v21  ;;  %v2128_v27 = vpop.permute.xlu1 %2127  ;;  %7158 = vmatmul.mubr.msk.f32.gmra.mxu1 %vm2718_vm0, %v2649_v5  ;;  %5712 = vmatprep.mubr.f32.mxu0 %v10825_v56 }
 0x32f   : > { %v2244_v39 = vsub.f32 %v7764_v47, %v2128_v27  ;;  %v5192_v62 = vpop.f32.mrf.mxu1  ;;  %6104 = vmatprep.mubr.f32.mxu1 %v10825_v56  ;;  %v2283_v27 = vand.u32 2147483647, %v2246_v14  ;;  %6570 = vmatpush1.bf16.msra.mxu0 %v7358_v19 }
 0x330   : > { %11104 = vst [vmem:[#allocation48_spill] sm:$0xff] %v10170_v22  ;;  %v2650_v45 = vmax.f32 %v2613_v24, 0.0  ;;  %7342 = vset.pattern.permute.xlu1 %v10887_v50  ;;  %v4794_v21 = vpop.f32.mrf.mxu0  ;;  %6571 = vmatprep.subr.bf16.mxu0 %v11093_v23 }
 0x331   : > { %v2281_v10 = vand.u32 2147483647, %v2244_v39  ;;  %v5357_v59 = vmul.f32 %v5192_v62, %v4794_v21  ;;  %2211 = vperm.xlu1 %7342, %v7476_v35   ;;  %v2436_v62 = vpop.permute.xlu0 %2435  ;;  %v2320_v14 = vsub.f32 1.0, %v2283_v27 }
 0x332   : > { %v2132_v5 = vpop.permute.xlu1 %2131  ;;  %v10181_v41 = vpop.f32.mrf.mxu0  ;;  %7159 = vmatmul.mubr.msk.f32.gmra.mxu1 %vm2718_vm0, %v2650_v45 }
 0x333   : > { %11105 = vst [vmem:[#allocation145_spill] sm:$0xff] %v10181_v41  ;;  %v2318_v16 = vsub.f32 1.0, %v2281_v10  ;;  %v10185_v60 = vadd.f32 %v5357_v59, %v9637_v34  ;;  %v2245_v24 = vsub.f32 %v7764_v47, %v2132_v5  ;;  %6110 = vmatprep.mubr.f32.mxu1 %v10825_v56  ;;  %v7477_v41 = vld [vmem:[%s7569_s28 + $0x100] sm:$0xff]  ;;  %v10193_v45 = vpop.f32.mrf.mxu1  ;;  %v2543_v5 = vsub.f32 %v7764_v47, %v2436_v62 }
 0x334   : > { %v4800_v39 = vpop.f32.mrf.mxu0  ;;  %11107 = vst [vmem:[#allocation147_spill] sm:$0xff] %v10193_v45  ;;  %6572 = vmatpush2.bf16.msra.mxu0 %v7359_v13  ;;  %v2357_v62 = vmax.f32 %v2320_v14, 0.0 }
 0x335   : > { %11106 = vst [vmem:[#allocation146_spill] sm:$0xff] %v10185_v60  ;;  %v2355_v21 = vmax.f32 %v2318_v16, 0.0  ;;  %v2282_v35 = vand.u32 2147483647, %v2245_v24  ;;  %2215 = vperm.xlu1 %7342, %v7477_v41   ;;  %v10202_v16 = vpop.permute.xlu0 %2447  ;;  %6573 = vmatprep.subr.bf16.mxu0 %v11093_v23  ;;  %v2580_v22 = vand.u32 2147483647, %v2543_v5 }
 0x336   : > { %7160 = vmatmul.mubr.msk.f32.gmra.mxu1 %vm2718_vm0, %v2651_v3  ;;  %v10197_v19 = vpop.f32.mrf.mxu0  ;;  %v7360_v3 = vld [vmem:[%s10062_s9 + $0x70] sm:$0xff]  }
 0x337   : > { %v2319_v34 = vsub.f32 1.0, %v2282_v35  ;;  %v2428_v10 = vpop.permute.xlu1 %2427  ;;  %7123 = vmatmul.mubr.msk.f32.gmra.mxu0 %vm2718_vm0, %v2355_v21  ;;  %6116 = vmatprep.mubr.f32.mxu1 %v10825_v56  ;;  %11108 = vst [vmem:[#allocation148_spill] sm:$0xff] %v10197_v19 }
 0x338   : > { %v2541_v59 = vsub.f32 %v7764_v47, %v2428_v10  ;;  %5718 = vmatprep.mubr.f32.mxu0 %v10825_v56  ;;  %v4806_v60 = vpop.f32.mrf.mxu0  ;;  %6574 = vmatpush2.bf16.msra.mxu0 %v7360_v3 }
 0x339   : > { %v2356_v24 = vmax.f32 %v2319_v34, 0.0  ;;  %7344 = vset.pattern.permute.xlu1 %v10892_v53  ;;  %v5198_v35 = vpop.f32.mrf.mxu1  ;;  %6575 = vmatprep.subr.bf16.mxu0 %v11093_v23 }
 0x33a   : > { %v2578_v27 = vand.u32 2147483647, %v2541_v59  ;;  %v5359_v21 = vmul.f32 %v5198_v35, %v4800_v39  ;;  %2511 = vperm.xlu1 %7344, %v7477_v41   ;;  %v7361_v41 = vld [vmem:[%s10062_s9 + $0x68] sm:$0xff]   ;;  %v10218_v14 = vpop.f32.mrf.mxu0 }
 0x33b   : > { %v2432_v10 = vpop.permute.xlu1 %2431  ;;  %v10207_v19 = vpop.f32.mrf.mxu1  ;;  %7124 = vmatmul.mubr.msk.f32.gmra.mxu0 %vm2718_vm0, %v2356_v24 }
 0x33c   : > { %11109 = vst [vmem:[#allocation149_spill] sm:$0xff] %v10207_v19  ;;  %v2615_v13 = vsub.f32 1.0, %v2578_v27  ;;  %v10211_v34 = vadd.f32 %v5359_v21, %v9649_v25  ;;  %v2542_v45 = vsub.f32 %v7764_v47, %v2432_v10  ;;  %5724 = vmatprep.mubr.f32.mxu0 %v10825_v56  ;;  %v2148_v25 = vpop.permute.xlu0 %2147  ;;  %6576 = vmatpush2.bf16.msra.mxu0 %v7361_v41  ;;  %v7362_v10 = vld [vmem:[%s10062_s9 + $0x60] sm:$0xff]  }
 0x33d   : > { %v5204_v39 = vpop.f32.mrf.mxu1  ;;  %v2249_v21 = vsub.f32 %v7764_v47, %v2148_v25  ;;  %6577 = vmatprep.subr.bf16.mxu0 %v11093_v23 }
 0x33e   : > { %v2652_v59 = vmax.f32 %v2615_v13, 0.0  ;;  %v2579_v35 = vand.u32 2147483647, %v2542_v45  ;;  %v5361_v19 = vmul.f32 %v5204_v39, %v4806_v60  ;;  %2515 = vperm.xlu1 %7344, %v7478_v2   ;;  %v2617_v45 = vsub.f32 1.0, %v2580_v22  ;;  %v7479_v13 = vld [vmem:[%s7569_s28 + $0x110] sm:$0xff] }
 0x33f   : > { %v10220_v24 = vpop.f32.mrf.mxu1  ;;  %7125 = vmatmul.mubr.msk.f32.gmra.mxu0 %vm2718_vm0, %v2357_v62 }
 0x340   : > { %v2616_v5 = vsub.f32 1.0, %v2579_v35  ;;  %v10224_v3 = vadd.f32 %v5361_v19, %v9663_v12  ;;  %v2140_v27 = vpop.permute.xlu1 %2139  ;;  %7161 = vmatmul.mubr.msk.f32.gmra.mxu1 %vm2718_vm0, %v2652_v59  ;;  %5730 = vmatprep.mubr.f32.mxu0 %v10825_v56  ;;  %v2654_v39 = vmax.f32 %v2617_v45, 0.0 }
 0x341   : > { %v2247_v2 = vsub.f32 %v7764_v47, %v2140_v27  ;;  %v5210_v60 = vpop.f32.mrf.mxu1  ;;  %6122 = vmatprep.mubr.f32.mxu1 %v10825_v56  ;;  %6578 = vmatpush2.bf16.msra.mxu0 %v7362_v10  ;;  %v2546_v10 = vsub.f32 %v7764_v47, %v10202_v16 }
 0x342   : > { %11110 = vst [vmem:[#allocation150_spill] sm:$0xff] %v10224_v3  ;;  %v2653_v62 = vmax.f32 %v2616_v5, 0.0  ;;  %7346 = vset.pattern.permute.xlu1 %v10887_v50  ;;  %v4812_v12 = vpop.f32.mrf.mxu0  ;;  %v2286_v5 = vand.u32 2147483647, %v2249_v21  ;;  %6579 = vmatprep.subr.bf16.mxu0 %v11093_v23 }
 0x343   : > { %v2284_v19 = vand.u32 2147483647, %v2247_v2  ;;  %v5363_v22 = vmul.f32 %v5210_v60, %v4812_v12  ;;  %2223 = vperm.xlu1 %7346, %v7479_v13   ;;  %v7363_v2 = vld [vmem:[%s10062_s9 + $0x58] sm:$0xff]   ;;  %v2583_v3 = vand.u32 2147483647, %v2546_v10 }
 0x344   : > { %v2144_v59 = vpop.permute.xlu1 %2143  ;;  %v10235_v35 = vpop.f32.mrf.mxu0  ;;  %7162 = vmatmul.mubr.msk.f32.gmra.mxu1 %vm2718_vm0, %v2653_v62  ;;  %v7480_v12 = vld [vmem:[%s7569_s28 + $0x118] sm:$0xff]  ;;  %v2323_v13 = vsub.f32 1.0, %v2286_v5 }
 0x345   : > { %v2321_v41 = vsub.f32 1.0, %v2284_v19  ;;  %v10239_v25 = vadd.f32 %v5363_v22, %v9677_v51  ;;  %v2248_v50 = vsub.f32 %v7764_v47, %v2144_v59  ;;  %6128 = vmatprep.mubr.f32.mxu1 %v10825_v56  ;;  %v10246_v62 = vpop.f32.mrf.mxu1  ;;  %v4422_v51 = vmul.f32 %v9691_v15, %v9439_v18  ;;  %6580 = vmatpush2.bf16.msra.mxu0 %v7363_v2 }
 0x346   : > { %v4818_v27 = vpop.f32.mrf.mxu0  ;;  %11112 = vst [vmem:[#allocation152_spill] sm:$0xff] %v10246_v62  ;;  %6581 = vmatprep.subr.bf16.mxu0 %v11093_v23 }
 0x347   : > { %11111 = vst [vmem:[#allocation151_spill] sm:$0xff] %v10239_v25  ;;  %v2358_v45 = vmax.f32 %v2321_v41, 0.0  ;;  %v2285_v60 = vand.u32 2147483647, %v2248_v50  ;;  %2227 = vperm.xlu1 %7346, %v7480_v12   ;;  %v11113_v41 = vld [vmem:[#allocation6_spill] sm:$0xff] }
 0x348   : > { %7163 = vmatmul.mubr.msk.f32.gmra.mxu1 %vm2718_vm0, %v2654_v39  ;;  %v4820_v22 = vpop.f32.mrf.mxu0  ;;  %v7364_v39 = vld [vmem:[%s10062_s9 + $0x50] sm:$0xff]   ;;  %v11114_v50 = vld [vmem:[#allocation90_spill] sm:$0xff] }
 0x349   : > { %v2322_v19 = vsub.f32 1.0, %v2285_v60  ;;  %v2440_v21 = vpop.permute.xlu1 %2439  ;;  %7126 = vmatmul.mubr.msk.f32.gmra.mxu0 %vm2718_vm0, %v2358_v45  ;;  %6134 = vmatprep.mubr.f32.mxu1 %v10825_v56  ;;  %v3552_v15 = vmul.f32 %v11114_v50, %v11113_v41 }
 0x34a   : > { %v2544_v59 = vsub.f32 %v7764_v47, %v2440_v21  ;;  %5736 = vmatprep.mubr.f32.mxu0 %v10825_v56  ;;  %v4824_v45 = vpop.f32.mrf.mxu0  ;;  %v4424_v21 = vmul.f32 %v9704_v11, %v9459_v31  ;;  %6582 = vmatpush2.bf16.msra.mxu0 %v7364_v39  ;;  %v11115_v31 = vld [vmem:[#allocation8_spill] sm:$0xff]  ;;  %v2620_v39 = vsub.f32 1.0, %v2583_v3  ;;  %v11118_v3 = vld [vmem:[#allocation95_spill] sm:$0xff] }
 0x34b   : > { %v2359_v18 = vmax.f32 %v2322_v19, 0.0  ;;  %7348 = vset.pattern.permute.xlu1 %v10892_v53  ;;  %v5216_v60 = vpop.f32.mrf.mxu1  ;;  %v4496_v25 = vadd.f32 %v4422_v51, %v3552_v15  ;;  %v2360_v19 = vmax.f32 %v2323_v13, 0.0  ;;  %v11116_v11 = vld [vmem:[#allocation92_spill] sm:$0xff]  ;;  %6583 = vmatprep.subr.bf16.mxu0 %v11093_v23  ;;  %v7365_v13 = vld [vmem:[%s10062_s9 + $0x48] sm:$0xff]  }
 0x34c   : > { %v2581_v16 = vand.u32 2147483647, %v2544_v59  ;;  %v5365_v5 = vmul.f32 %v5216_v60, %v4818_v27  ;;  %2523 = vperm.xlu1 %7348, %v7480_v12   ;;  %v2160_v12 = vpop.permute.xlu0 %2159  ;;  %v3554_v51 = vmul.f32 %v11116_v11, %v11115_v31  ;;  %v4826_v50 = vpop.f32.mrf.mxu0 }
 0x34d   : > { %v2444_v2 = vpop.permute.xlu1 %2443  ;;  %v5218_v62 = vpop.f32.mrf.mxu1  ;;  %7127 = vmatmul.mubr.msk.f32.gmra.mxu0 %vm2718_vm0, %v2359_v18 }
 0x34e   : > { %v2618_v41 = vsub.f32 1.0, %v2581_v16  ;;  %v10266_v53 = vadd.f32 %v5365_v5, %v9696_v49  ;;  %v2545_v59 = vsub.f32 %v7764_v47, %v2444_v2  ;;  %v5366_v27 = vmul.f32 %v5218_v62, %v4820_v22  ;;  %5742 = vmatprep.mubr.f32.mxu0 %v10825_v56  ;;  %v7481_v16 = vld [vmem:[%s7569_s28 + $0x120] sm:$0x3f]  ;;  %6584 = vmatpush2.bf16.msra.mxu0 %v7365_v13 }
 0x34f   : > { %v5222_v10 = vpop.f32.mrf.mxu1  ;;  %v4498_v62 = vadd.f32 %v4424_v21, %v3554_v51  ;;  %v4426_v22 = vmul.f32 %v9720_v33, %v9489_v48  ;;  %v7366_v48 = vld [vmem:[%s10062_s9 + $0x40] sm:$0xff]   ;;  %v11117_v33 = vld [vmem:[#allocation10_spill] sm:$0xff]  ;;  %6585 = vmatprep.subr.bf16.mxu0 %v11093_v23 }
 0x350   : > { %v2655_v15 = vmax.f32 %v2618_v41, 0.0  ;;  %v2582_v18 = vand.u32 2147483647, %v2545_v59  ;;  %v10274_v60 = vadd.f32 %v5366_v27, %v4496_v25  ;;  %v5367_v49 = vmul.f32 %v5222_v10, %v4824_v45  ;;  %2527 = vperm.xlu1 %7348, %v7481_v16  }
 0x351   : > { %v5224_v5 = vpop.f32.mrf.mxu1  ;;  %7128 = vmatmul.mubr.msk.f32.gmra.mxu0 %vm2718_vm0, %v2360_v19  ;;  %v2252_v25 = vsub.f32 %v7764_v47, %v2160_v12  ;;  %v3556_v19 = vmul.f32 %v11118_v3, %v11117_v33  ;;  %v2460_v12 = vpop.permute.xlu0 %2459 }
 0x352   : > { %v2619_v2 = vsub.f32 1.0, %v2582_v18  ;;  %v10281_v31 = vadd.f32 %v5367_v49, %v9708_v40  ;;  %v5368_v41 = vmul.f32 %v5224_v5, %v4826_v50  ;;  %v2152_v59 = vpop.permute.xlu1 %2151  ;;  %7164 = vmatmul.mubr.msk.f32.gmra.mxu1 %vm2718_vm0, %v2655_v15  ;;  %5748 = vmatprep.mubr.f32.mxu0 %v10825_v56  ;;  %v2657_v18 = vmax.f32 %v2620_v39, 0.0 }
 0x353   : > { %v2250_v45 = vsub.f32 %v7764_v47, %v2152_v59  ;;  %v5228_v21 = vpop.f32.mrf.mxu1  ;;  %6140 = vmatprep.mubr.f32.mxu1 %v10825_v56  ;;  %v4500_v15 = vadd.f32 %v4426_v22, %v3556_v19  ;;  %v2289_v13 = vand.u32 2147483647, %v2252_v25  ;;  %6586 = vmatpush2.bf16.msra.mxu0 %v7366_v48  ;;  %v4428_v25 = vmul.f32 %v9736_v1, %v9524_v20 }
 0x354   : > { %v2656_v40 = vmax.f32 %v2619_v2, 0.0  ;;  %v10291_v27 = vadd.f32 %v5368_v41, %v4498_v62  ;;  %v4830_v11 = vpop.f32.mrf.mxu0  ;;  %v2549_v48 = vsub.f32 %v7764_v47, %v2460_v12 }
 0x355   : > { %v2287_v51 = vand.u32 2147483647, %v2250_v45  ;;  %v5369_v10 = vmul.f32 %v5228_v21, %v4830_v11  ;;  %v5230_v50 = vpop.f32.mrf.mxu1  ;;  %v10303_v39 = vpop.permute.xlu0 %2471  ;;  %v2326_v3 = vsub.f32 1.0, %v2289_v13  ;;  %v11121_v11 = vld [vmem:[#allocation98_spill] sm:$0xff] }
 0x356   : > { %v2156_v49 = vpop.permute.xlu1 %2155  ;;  %v4832_v16 = vpop.f32.mrf.mxu0  ;;  %7165 = vmatmul.mubr.msk.f32.gmra.mxu1 %vm2718_vm0, %v2656_v40  ;;  %v11120_v40 = vld [vmem:[#allocation12_spill] sm:$0xff] }
 0x357   : > { %v2324_v5 = vsub.f32 1.0, %v2287_v51  ;;  %v10296_v59 = vadd.f32 %v5369_v10, %v9724_v43  ;;  %v2251_v62 = vsub.f32 %v7764_v47, %v2156_v49  ;;  %v5370_v2 = vmul.f32 %v5230_v50, %v4832_v16  ;;  %6146 = vmatprep.mubr.f32.mxu1 %v10825_v56  ;;  %v11122_v49 = vld [vmem:[#allocation57_spill] sm:$0xff] }
 0x358   : > { %v4836_v23 = vpop.f32.mrf.mxu0  ;;  %v3558_v51 = vmul.f32 %v11121_v11, %v11120_v40  ;;  %v11123_v16 = vld [vmem:[#allocation53_spill] sm:$0xff]  ;;  %v2363_v12 = vmax.f32 %v2326_v3, 0.0 }
 0x359   : > { %v2361_v41 = vmax.f32 %v2324_v5, 0.0  ;;  %v2288_v45 = vand.u32 2147483647, %v2251_v62  ;;  %v10300_v22 = vadd.f32 %v5370_v2, %v4500_v15  ;;  %v4430_v13 = vmul.f32 %v11123_v16, %v11122_v49 }
 0x35a   : > { %7166 = vmatmul.mubr.msk.f32.gmra.mxu1 %vm2718_vm0, %v2657_v18  ;;  %v4838_v21 = vpop.f32.mrf.mxu0  ;;  %v4502_v18 = vadd.f32 %v4428_v25, %v3558_v51  ;;  %v2586_v2 = vand.u32 2147483647, %v2549_v48  ;;  %v11126_v25 = vld [vmem:[#allocation14_spill] sm:$0xff] }
 0x35b   : > { %11119 = vst [vmem:[#allocation6_spill] sm:$0xff] %v10300_v22  ;;  %v2325_v43 = vsub.f32 1.0, %v2288_v45  ;;  %v2452_v33 = vpop.permute.xlu1 %2451  ;;  %7129 = vmatmul.mubr.msk.f32.gmra.mxu0 %vm2718_vm0, %v2361_v41  ;;  %6152 = vmatprep.mubr.f32.mxu1 %v10825_v56  ;;  %v11124_v45 = vld [vmem:[#allocation52_spill] sm:$0xff] }
 0x35c   : > { %v2547_v19 = vsub.f32 %v7764_v47, %v2452_v33  ;;  %5754 = vmatprep.mubr.f32.mxu0 %v10825_v56  ;;  %v4842_v20 = vpop.f32.mrf.mxu0 }
 0x35d   : > { %v2362_v10 = vmax.f32 %v2325_v43, 0.0  ;;  %v5234_v50 = vpop.f32.mrf.mxu1 }
 0x35e   : > { %v2584_v1 = vand.u32 2147483647, %v2547_v19  ;;  %v5371_v15 = vmul.f32 %v5234_v50, %v4836_v23  ;;  %v2172_v23 = vpop.permute.xlu0 %2171  ;;  %v11127_v19 = vld [vmem:[#allocation101_spill] sm:$0xff]  ;;  %v4844_v50 = vpop.f32.mrf.mxu0 }
 0x35f   : > { %v2456_v5 = vpop.permute.xlu1 %2455  ;;  %v5236_v62 = vpop.f32.mrf.mxu1  ;;  %7130 = vmatmul.mubr.msk.f32.gmra.mxu0 %vm2718_vm0, %v2362_v10  ;;  %v3560_v11 = vmul.f32 %v11127_v19, %v11126_v25 }
 0x360   : > { %v2621_v41 = vsub.f32 1.0, %v2584_v1  ;;  %v10318_v33 = vadd.f32 %v5371_v15, %v11124_v45  ;;  %v2548_v43 = vsub.f32 %v7764_v47, %v2456_v5  ;;  %v5372_v40 = vmul.f32 %v5236_v62, %v4838_v21  ;;  %5760 = vmatprep.mubr.f32.mxu0 %v10825_v56  ;;  %v11128_v1 = vld [vmem:[#allocation59_spill] sm:$0xff]  ;;  %v11129_v15 = vld [vmem:[#allocation113_spill] sm:$0xff] }
 0x361   : > { %v5240_v51 = vpop.f32.mrf.mxu1  ;;  %v4504_v48 = vadd.f32 %v4430_v13, %v3560_v11  ;;  %v4432_v45 = vmul.f32 %v11129_v15, %v11128_v1  ;;  %v2623_v5 = vsub.f32 1.0, %v2586_v2  ;;  %v11130_v62 = vld [vmem:[#allocation71_spill] sm:$0xff]  ;;  %v11131_v2 = vld [vmem:[#allocation16_spill] sm:$0xff] }
 0x362   : > { %11125 = vst [vmem:[#allocation90_spill] sm:$0xff] %v10318_v33  ;;  %v2658_v49 = vmax.f32 %v2621_v41, 0.0  ;;  %v2585_v16 = vand.u32 2147483647, %v2548_v43  ;;  %v10324_v10 = vadd.f32 %v5372_v40, %v4502_v18  ;;  %v5373_v3 = vmul.f32 %v5240_v51, %v4842_v20  ;;  %v11132_v41 = vld [vmem:[#allocation104_spill] sm:$0xff] }
 0x363   : > { %v5242_v22 = vpop.f32.mrf.mxu1  ;;  %7131 = vmatmul.mubr.msk.f32.gmra.mxu0 %vm2718_vm0, %v2363_v12  ;;  %v2255_v20 = vsub.f32 %v7764_v47, %v2172_v23  ;;  %v3562_v12 = vmul.f32 %v11132_v41, %v11131_v2 }
 0x364   : > { %v2622_v21 = vsub.f32 1.0, %v2585_v16  ;;  %v10330_v33 = vadd.f32 %v5373_v3, %v11130_v62  ;;  %v5374_v25 = vmul.f32 %v5242_v22, %v4844_v50  ;;  %v2164_v19 = vpop.permute.xlu1 %2163  ;;  %7167 = vmatmul.mubr.msk.f32.gmra.mxu1 %vm2718_vm0, %v2658_v49  ;;  %5766 = vmatprep.mubr.f32.mxu0 %v10825_v56  ;;  %v2660_v16 = vmax.f32 %v2623_v5, 0.0  ;;  %v11134_v62 = vld [vmem:[#allocation54_spill] sm:$0xff]  ;;  %v11138_v5 = vld [vmem:[#allocation115_spill] sm:$0xff] }
 0x365   : > { %v2253_v18 = vsub.f32 %v7764_v47, %v2164_v19  ;;  %v5246_v13 = vpop.f32.mrf.mxu1  ;;  %6158 = vmatprep.mubr.f32.mxu1 %v10825_v56  ;;  %v4506_v49 = vadd.f32 %v4432_v45, %v3562_v12  ;;  %v2292_v23 = vand.u32 2147483647, %v2255_v20  ;;  %v11137_v45 = vld [vmem:[#allocation60_spill] sm:$0xff] }
 0x366   : > { %v2659_v43 = vmax.f32 %v2622_v21, 0.0  ;;  %v10339_v40 = vadd.f32 %v5374_v25, %v4504_v48  ;;  %v4848_v11 = vpop.f32.mrf.mxu0  ;;  %v4434_v41 = vmul.f32 %v11138_v5, %v11137_v45 }
 0x367   : > { %v2290_v22 = vand.u32 2147483647, %v2253_v18  ;;  %v5375_v51 = vmul.f32 %v5246_v13, %v4848_v11  ;;  %v5248_v50 = vpop.f32.mrf.mxu1  ;;  %v2552_v11 = vsub.f32 %v7764_v47, %v10303_v39 }
 0x368   : > { %11133 = vst [vmem:[#allocation8_spill] sm:$0xff] %v10339_v40  ;;  %v2168_v3 = vpop.permute.xlu1 %2167  ;;  %v4850_v1 = vpop.f32.mrf.mxu0  ;;  %7168 = vmatmul.mubr.msk.f32.gmra.mxu1 %vm2718_vm0, %v2659_v43  ;;  %v11143_v40 = vld [vmem:[#allocation55_spill] sm:$0xff] }
 0x369   : > { %v2327_v15 = vsub.f32 1.0, %v2290_v22  ;;  %v10343_v19 = vadd.f32 %v5375_v51, %v11134_v62  ;;  %v2254_v2 = vsub.f32 %v7764_v47, %v2168_v3  ;;  %v5376_v21 = vmul.f32 %v5248_v50, %v4850_v1  ;;  %6164 = vmatprep.mubr.f32.mxu1 %v10825_v56  ;;  %v11139_v50 = vld [vmem:[#allocation18_spill] sm:$0xff] }
 0x36a   : > { %v4854_v48 = vpop.f32.mrf.mxu0  ;;  %v2329_v22 = vsub.f32 1.0, %v2292_v23  ;;  %v2589_v39 = vand.u32 2147483647, %v2552_v11 }
 0x36b   : > { %11135 = vst [vmem:[#allocation92_spill] sm:$0xff] %v10343_v19  ;;  %v2364_v25 = vmax.f32 %v2327_v15, 0.0  ;;  %v2291_v18 = vand.u32 2147483647, %v2254_v2  ;;  %v10347_v13 = vadd.f32 %v5376_v21, %v4506_v49  ;;  %v11140_v49 = vld [vmem:[#allocation106_spill] sm:$0xff] }
 0x36c   : > { %7169 = vmatmul.mubr.msk.f32.gmra.mxu1 %vm2718_vm0, %v2660_v16  ;;  %v4856_v12 = vpop.f32.mrf.mxu0  ;;  %v3564_v16 = vmul.f32 %v11140_v49, %v11139_v50 }
 0x36d   : > { %11136 = vst [vmem:[#allocation10_spill] sm:$0xff] %v10347_v13  ;;  %v2328_v20 = vsub.f32 1.0, %v2291_v18  ;;  %v2464_v43 = vpop.permute.xlu1 %2463  ;;  %7132 = vmatmul.mubr.msk.f32.gmra.mxu0 %vm2718_vm0, %v2364_v25  ;;  %6170 = vmatprep.mubr.f32.mxu1 %v10825_v56  ;;  %v11141_v25 = vld [vmem:[#allocation62_spill] sm:$0xff] }
 0x36e   : > { %v2550_v51 = vsub.f32 %v7764_v47, %v2464_v43  ;;  %5772 = vmatprep.mubr.f32.mxu0 %v10825_v56  ;;  %v4860_v15 = vpop.f32.mrf.mxu0  ;;  %v4508_v21 = vadd.f32 %v4434_v41, %v3564_v16  ;;  %v11142_v18 = vld [vmem:[#allocation74_spill] sm:$0xff]  ;;  %v2366_v43 = vmax.f32 %v2329_v22, 0.0  ;;  %v11144_v41 = vld [vmem:[#allocation20_spill] sm:$0xff] }
 0x36f   : > { %v2365_v3 = vmax.f32 %v2328_v20, 0.0  ;;  %v5252_v1 = vpop.f32.mrf.mxu1  ;;  %v4436_v45 = vmul.f32 %v11142_v18, %v11141_v25 }
 0x370   : > { %v2587_v62 = vand.u32 2147483647, %v2550_v51  ;;  %v5377_v2 = vmul.f32 %v5252_v1, %v4854_v48  ;;  %v2184_v48 = vpop.permute.xlu0 %2183  ;;  %v11145_v51 = vld [vmem:[#allocation108_spill] sm:$0xff]  ;;  %v4862_v11 = vpop.f32.mrf.mxu0 }
 0x371   : > { %v2468_v23 = vpop.permute.xlu1 %2467  ;;  %v5254_v5 = vpop.f32.mrf.mxu1  ;;  %7133 = vmatmul.mubr.msk.f32.gmra.mxu0 %vm2718_vm0, %v2365_v3  ;;  %v3566_v49 = vmul.f32 %v11145_v51, %v11144_v41 }
 0x372   : > { %v2624_v13 = vsub.f32 1.0, %v2587_v62  ;;  %v10364_v19 = vadd.f32 %v5377_v2, %v11143_v40  ;;  %v2551_v20 = vsub.f32 %v7764_v47, %v2468_v23  ;;  %v5378_v50 = vmul.f32 %v5254_v5, %v4856_v12  ;;  %5778 = vmatprep.mubr.f32.mxu0 %v10825_v56  ;;  %v11147_v62 = vld [vmem:[#allocation63_spill] sm:$0xff] }
 0x373   : > { %v5258_v16 = vpop.f32.mrf.mxu1  ;;  %v4510_v3 = vadd.f32 %v4436_v45, %v3566_v49  ;;  %v4438_v40 = vmul.f32 %v9811_v8, %v11147_v62  ;;  %v2626_v2 = vsub.f32 1.0, %v2589_v39  ;;  %v11149_v8 = vld [vmem:[#allocation22_spill] sm:$0xff]  ;;  %v11150_v45 = vld [vmem:[#allocation111_spill] sm:$0xff] }
 0x374   : > { %v2661_v1 = vmax.f32 %v2624_v13, 0.0  ;;  %v2588_v25 = vand.u32 2147483647, %v2551_v20  ;;  %v10370_v18 = vadd.f32 %v5378_v50, %v4508_v21  ;;  %v5379_v22 = vmul.f32 %v5258_v16, %v4860_v15 }
 0x375   : > { %v5260_v23 = vpop.f32.mrf.mxu1  ;;  %7134 = vmatmul.mubr.msk.f32.gmra.mxu0 %vm2718_vm0, %v2366_v43  ;;  %v2258_v13 = vsub.f32 %v7764_v47, %v2184_v48  ;;  %v3568_v39 = vmul.f32 %v11150_v45, %v11149_v8 }
 0x376   : > { %11146 = vst [vmem:[#allocation95_spill] sm:$0xff] %v10370_v18  ;;  %v2625_v12 = vsub.f32 1.0, %v2588_v25  ;;  %v10376_v5 = vadd.f32 %v5379_v22, %v9800_v54  ;;  %v5380_v41 = vmul.f32 %v5260_v23, %v4862_v11  ;;  %v2176_v51 = vpop.permute.xlu1 %2175  ;;  %7170 = vmatmul.mubr.msk.f32.gmra.mxu1 %vm2718_vm0, %v2661_v1  ;;  %5784 = vmatprep.mubr.f32.mxu0 %v10825_v56  ;;  %v2484_v11 = vpop.permute.xlu0 %2483  ;;  %v2663_v25 = vmax.f32 %v2626_v2, 0.0  ;;  %v11155_v2 = vld [vmem:[#allocation50_spill] sm:$0xff] }
 0x377   : > { %v2256_v15 = vsub.f32 %v7764_v47, %v2176_v51  ;;  %v5264_v21 = vpop.f32.mrf.mxu1  ;;  %6176 = vmatprep.mubr.f32.mxu1 %v10825_v56  ;;  %v4512_v1 = vadd.f32 %v4438_v40, %v3568_v39  ;;  %v2295_v62 = vand.u32 2147483647, %v2258_v13  ;;  %v11152_v51 = vld [vmem:[#allocation124_spill] sm:$0xff]  ;;  %v11156_v13 = vld [vmem:[#allocation79_spill] sm:$0xff] }
 0x378   : > { %11148 = vst [vmem:[#allocation12_spill] sm:$0xff] %v10376_v5  ;;  %v2662_v43 = vmax.f32 %v2625_v12, 0.0  ;;  %v10385_v20 = vadd.f32 %v5380_v41, %v4510_v3  ;;  %v4866_v54 = vpop.f32.mrf.mxu0  ;;  %v4440_v45 = vmul.f32 %v11156_v13, %v11155_v2  ;;  %v11159_v2 = vld [vmem:[#allocation51_spill] sm:$0xff] }
 0x379   : > { %v2293_v50 = vand.u32 2147483647, %v2256_v15  ;;  %v5381_v49 = vmul.f32 %v5264_v21, %v4866_v54  ;;  %v5266_v16 = vpop.f32.mrf.mxu1 }
 0x37a   : > { %11151 = vst [vmem:[#allocation98_spill] sm:$0xff] %v10385_v20  ;;  %v2180_v22 = vpop.permute.xlu1 %2179  ;;  %v4868_v48 = vpop.f32.mrf.mxu0  ;;  %7171 = vmatmul.mubr.msk.f32.gmra.mxu1 %vm2718_vm0, %v2662_v43 }
 0x37b   : > { %v2330_v23 = vsub.f32 1.0, %v2293_v50  ;;  %v10389_v18 = vadd.f32 %v5381_v49, %v11152_v51  ;;  %v2257_v12 = vsub.f32 %v7764_v47, %v2180_v22  ;;  %v5382_v3 = vmul.f32 %v5266_v16, %v4868_v48  ;;  %6182 = vmatprep.mubr.f32.mxu1 %v10825_v56  ;;  %v10396_v40 = vpop.permute.xlu0 %2495 }
 0x37c   : > { %v4872_v41 = vpop.f32.mrf.mxu0  ;;  %v2332_v50 = vsub.f32 1.0, %v2295_v62  ;;  %v2555_v49 = vsub.f32 %v7764_v47, %v2484_v11  ;;  %v4442_v62 = vmul.f32 %v9840_v55, %v11159_v2 }
 0x37d   : > { %11153 = vst [vmem:[#allocation57_spill] sm:$0xff] %v10389_v18  ;;  %v2367_v15 = vmax.f32 %v2330_v23, 0.0  ;;  %v2294_v21 = vand.u32 2147483647, %v2257_v12  ;;  %v10393_v8 = vadd.f32 %v5382_v3, %v4512_v1  ;;  %v11157_v1 = vld [vmem:[#allocation24_spill] sm:$0xff]  ;;  %v11160_v18 = vld [vmem:[#allocation81_spill] sm:$0xff] }
 0x37e   : > { %7172 = vmatmul.mubr.msk.f32.gmra.mxu1 %vm2718_vm0, %v2663_v25  ;;  %v4874_v43 = vpop.f32.mrf.mxu0  ;;  %v11158_v25 = vld [vmem:[#allocation114_spill] sm:$0xff]  ;;  %v2369_v11 = vmax.f32 %v2332_v50, 0.0 }
 0x37f   : > { %11154 = vst [vmem:[#allocation53_spill] sm:$0xff] %v10393_v8  ;;  %v2331_v39 = vsub.f32 1.0, %v2294_v21  ;;  %v2476_v54 = vpop.permute.xlu1 %2475  ;;  %7135 = vmatmul.mubr.msk.f32.gmra.mxu0 %vm2718_vm0, %v2367_v15  ;;  %6188 = vmatprep.mubr.f32.mxu1 %v10825_v56  ;;  %v3570_v22 = vmul.f32 %v11158_v25, %v11157_v1 }
 0x380   : > { %v2553_v16 = vsub.f32 %v7764_v47, %v2476_v54  ;;  %5790 = vmatprep.mubr.f32.mxu0 %v10825_v56  ;;  %v4878_v51 = vpop.f32.mrf.mxu0  ;;  %v2592_v54 = vand.u32 2147483647, %v2555_v49 }
 0x381   : > { %v2368_v48 = vmax.f32 %v2331_v39, 0.0  ;;  %v5270_v23 = vpop.f32.mrf.mxu1  ;;  %v4514_v21 = vadd.f32 %v4440_v45, %v3570_v22  ;;  %v11162_v45 = vld [vmem:[#allocation26_spill] sm:$0xff] }
 0x382   : > { %v2590_v12 = vand.u32 2147483647, %v2553_v16  ;;  %v5383_v3 = vmul.f32 %v5270_v23, %v4872_v41  ;;  %v2196_v41 = vpop.permute.xlu0 %2195  ;;  %v11163_v16 = vld [vmem:[#allocation117_spill] sm:$0xff]  ;;  %v4880_v22 = vpop.f32.mrf.mxu0 }
 0x383   : > { %v2480_v15 = vpop.permute.xlu1 %2479  ;;  %v5272_v13 = vpop.f32.mrf.mxu1  ;;  %7136 = vmatmul.mubr.msk.f32.gmra.mxu0 %vm2718_vm0, %v2368_v48  ;;  %v3572_v25 = vmul.f32 %v11163_v16, %v11162_v45 }
 0x384   : > { %v2627_v8 = vsub.f32 1.0, %v2590_v12  ;;  %v10411_v20 = vadd.f32 %v5383_v3, %v11160_v18  ;;  %v2554_v39 = vsub.f32 %v7764_v47, %v2480_v15  ;;  %v5384_v1 = vmul.f32 %v5272_v13, %v4874_v43  ;;  %5796 = vmatprep.mubr.f32.mxu0 %v10825_v56  ;;  %v11164_v12 = vld [vmem:[#allocation68_spill] sm:$0xff]  ;;  %v11165_v18 = vld [vmem:[#allocation87_spill] sm:$0xff]  ;;  %v11166_v13 = vld [vmem:[#allocation85_spill] sm:$0xff] }
 0x385   : > { %v5276_v55 = vpop.f32.mrf.mxu1  ;;  %v4516_v49 = vadd.f32 %v4442_v62, %v3572_v25  ;;  %v4444_v3 = vmul.f32 %v11165_v18, %v11164_v12  ;;  %v2629_v15 = vsub.f32 1.0, %v2592_v54  ;;  %v11167_v62 = vld [vmem:[#allocation28_spill] sm:$0xff] }
 0x386   : > { %11161 = vst [vmem:[#allocation52_spill] sm:$0xff] %v10411_v20  ;;  %v2664_v23 = vmax.f32 %v2627_v8, 0.0  ;;  %v2591_v2 = vand.u32 2147483647, %v2554_v39  ;;  %v10417_v48 = vadd.f32 %v5384_v1, %v4514_v21  ;;  %v5385_v50 = vmul.f32 %v5276_v55, %v4878_v51  ;;  %v11168_v54 = vld [vmem:[#allocation120_spill] sm:$0xff] }
 0x387   : > { %v5278_v20 = vpop.f32.mrf.mxu1  ;;  %7137 = vmatmul.mubr.msk.f32.gmra.mxu0 %vm2718_vm0, %v2369_v11  ;;  %v2261_v8 = vsub.f32 %v7764_v47, %v2196_v41  ;;  %v3574_v11 = vmul.f32 %v11168_v54, %v11167_v62 }
 0x388   : > { %v2628_v43 = vsub.f32 1.0, %v2591_v2  ;;  %v10423_v5 = vadd.f32 %v5385_v50, %v11166_v13  ;;  %v5386_v45 = vmul.f32 %v5278_v20, %v4880_v22  ;;  %v2188_v16 = vpop.permute.xlu1 %2187  ;;  %7173 = vmatmul.mubr.msk.f32.gmra.mxu1 %vm2718_vm0, %v2664_v23  ;;  %5802 = vmatprep.mubr.f32.mxu0 %v10825_v56  ;;  %v2666_v2 = vmax.f32 %v2629_v15, 0.0  ;;  %v11170_v13 = vld [vmem:[#allocation5_spill] sm:$0xff]  ;;  %v11173_v15 = vld [vmem:[#allocation7_spill] sm:$0xff] }
 0x389   : > { %v2259_v51 = vsub.f32 %v7764_v47, %v2188_v16  ;;  %v5282_v21 = vpop.f32.mrf.mxu1  ;;  %6194 = vmatprep.mubr.f32.mxu1 %v10825_v56  ;;  %v4518_v23 = vadd.f32 %v4444_v3, %v3574_v11  ;;  %v2298_v41 = vand.u32 2147483647, %v2261_v8  ;;  %v11172_v3 = vld [vmem:[#allocation110_spill] sm:$0xff] }
 0x38a   : > { %v2665_v39 = vmax.f32 %v2628_v43, 0.0  ;;  %v10432_v1 = vadd.f32 %v5386_v45, %v4516_v49  ;;  %v4884_v25 = vpop.f32.mrf.mxu0  ;;  %v4446_v54 = vmul.f32 %v11173_v15, %v11172_v3 }
 0x38b   : > { %v2296_v20 = vand.u32 2147483647, %v2259_v51  ;;  %v5387_v55 = vmul.f32 %v5282_v21, %v4884_v25  ;;  %v5284_v22 = vpop.f32.mrf.mxu1  ;;  %v2558_v25 = vsub.f32 %v7764_v47, %v10396_v40 }
 0x38c   : > { %11169 = vst [vmem:[#allocation14_spill] sm:$0xff] %v10432_v1  ;;  %v2192_v50 = vpop.permute.xlu1 %2191  ;;  %v4886_v12 = vpop.f32.mrf.mxu0  ;;  %7174 = vmatmul.mubr.msk.f32.gmra.mxu1 %vm2718_vm0, %v2665_v39 }
 0x38d   : > { %v2333_v18 = vsub.f32 1.0, %v2296_v20  ;;  %v10436_v16 = vadd.f32 %v5387_v55, %v11170_v13  ;;  %v2260_v62 = vsub.f32 %v7764_v47, %v2192_v50  ;;  %v5388_v43 = vmul.f32 %v5284_v22, %v4886_v12  ;;  %6200 = vmatprep.mubr.f32.mxu1 %v10825_v56  ;;  %v11174_v22 = vld [vmem:[#allocation31_spill] sm:$0xff] }
 0x38e   : > { %v4890_v49 = vpop.f32.mrf.mxu0  ;;  %v2335_v20 = vsub.f32 1.0, %v2298_v41  ;;  %v2595_v40 = vand.u32 2147483647, %v2558_v25 }
 0x38f   : > { %v2370_v45 = vmax.f32 %v2333_v18, 0.0  ;;  %v2297_v51 = vand.u32 2147483647, %v2260_v62  ;;  %v10440_v21 = vadd.f32 %v5388_v43, %v4518_v23  ;;  %v11175_v23 = vld [vmem:[#allocation123_spill] sm:$0xff] }
 0x390   : > { %7175 = vmatmul.mubr.msk.f32.gmra.mxu1 %vm2718_vm0, %v2666_v2  ;;  %v4892_v11 = vpop.f32.mrf.mxu0  ;;  %v3576_v2 = vmul.f32 %v11175_v23, %v11174_v22  ;;  %v2372_v15 = vmax.f32 %v2335_v20, 0.0 }
 0x391   : > { %11171 = vst [vmem:[#allocation101_spill] sm:$0xff] %v10440_v21  ;;  %v2334_v8 = vsub.f32 1.0, %v2297_v51  ;;  %v2488_v39 = vpop.permute.xlu1 %2487  ;;  %7138 = vmatmul.mubr.msk.f32.gmra.mxu0 %vm2718_vm0, %v2370_v45  ;;  %6206 = vmatprep.mubr.f32.mxu1 %v10825_v56  ;;  %v11176_v45 = vld [vmem:[#allocation69_spill] sm:$0xff]  ;;  %v11177_v21 = vld [vmem:[#allocation91_spill] sm:$0xff] }
 0x392   : > { %v2556_v55 = vsub.f32 %v7764_v47, %v2488_v39  ;;  %5808 = vmatprep.mubr.f32.mxu0 %v10825_v56  ;;  %v4896_v18 = vpop.f32.mrf.mxu0  ;;  %v4520_v43 = vadd.f32 %v4446_v54, %v3576_v2  ;;  %v4448_v51 = vmul.f32 %v9887_v52, %v11176_v45  ;;  %v11179_v54 = vld [vmem:[#allocation34_spill] sm:$0xff] }
 0x393   : > { %v2371_v50 = vmax.f32 %v2334_v8, 0.0  ;;  %v5288_v12 = vpop.f32.mrf.mxu1 }
 0x394   : > { %v2593_v13 = vand.u32 2147483647, %v2556_v55  ;;  %v5389_v62 = vmul.f32 %v5288_v12, %v4890_v49  ;;  %v2208_v49 = vpop.permute.xlu0 %2207  ;;  %v11180_v55 = vld [vmem:[#allocation127_spill] sm:$0xff]  ;;  %v4898_v25 = vpop.f32.mrf.mxu0 }
 0x395   : > { %v2492_v41 = vpop.permute.xlu1 %2491  ;;  %v5290_v3 = vpop.f32.mrf.mxu1  ;;  %7139 = vmatmul.mubr.msk.f32.gmra.mxu0 %vm2718_vm0, %v2371_v50  ;;  %v3578_v23 = vmul.f32 %v11180_v55, %v11179_v54 }
 0x396   : > { %v2630_v39 = vsub.f32 1.0, %v2593_v13  ;;  %v10457_v1 = vadd.f32 %v5389_v62, %v11177_v21  ;;  %v2557_v8 = vsub.f32 %v7764_v47, %v2492_v41  ;;  %v5390_v22 = vmul.f32 %v5290_v3, %v4892_v11  ;;  %5814 = vmatprep.mubr.f32.mxu0 %v10825_v56  ;;  %v11182_v13 = vld [vmem:[#allocation72_spill] sm:$0xff]  ;;  %v11183_v3 = vld [vmem:[#allocation9_spill] sm:$0xff] }
 0x397   : > { %v5294_v52 = vpop.f32.mrf.mxu1  ;;  %v4522_v50 = vadd.f32 %v4448_v51, %v3578_v23  ;;  %v4450_v21 = vmul.f32 %v9903_v29, %v11182_v13  ;;  %v2632_v62 = vsub.f32 1.0, %v2595_v40  ;;  %v11184_v29 = vld [vmem:[#allocation37_spill] sm:$0xff] }
 0x398   : > { %11178 = vst [vmem:[#allocation59_spill] sm:$0xff] %v10457_v1  ;;  %v2667_v2 = vmax.f32 %v2630_v39, 0.0  ;;  %v2594_v12 = vand.u32 2147483647, %v2557_v8  ;;  %v10463_v45 = vadd.f32 %v5390_v22, %v4520_v43  ;;  %v5391_v20 = vmul.f32 %v5294_v52, %v4896_v18  ;;  %v11185_v40 = vld [vmem:[#allocation129_spill] sm:$0xff] }
 0x399   : > { %v5296_v41 = vpop.f32.mrf.mxu1  ;;  %7140 = vmatmul.mubr.msk.f32.gmra.mxu0 %vm2718_vm0, %v2372_v15  ;;  %v2264_v18 = vsub.f32 %v7764_v47, %v2208_v49  ;;  %v3580_v15 = vmul.f32 %v11185_v40, %v11184_v29  ;;  %v11191_v40 = vld [vmem:[#allocation13_spill] sm:$0xff] }
 0x39a   : > { %11181 = vst [vmem:[#allocation113_spill] sm:$0xff] %v10463_v45  ;;  %v2631_v11 = vsub.f32 1.0, %v2594_v12  ;;  %v10469_v1 = vadd.f32 %v5391_v20, %v11183_v3  ;;  %v5392_v54 = vmul.f32 %v5296_v41, %v4898_v25  ;;  %v2200_v55 = vpop.permute.xlu1 %2199  ;;  %7176 = vmatmul.mubr.msk.f32.gmra.mxu1 %vm2718_vm0, %v2667_v2  ;;  %5820 = vmatprep.mubr.f32.mxu0 %v10825_v56  ;;  %v2669_v12 = vmax.f32 %v2632_v62, 0.0  ;;  %v11187_v3 = vld [vmem:[#allocation11_spill] sm:$0xff]  ;;  %v11190_v62 = vld [vmem:[#allocation118_spill] sm:$0xff] }
 0x39b   : > { %v2262_v43 = vsub.f32 %v7764_v47, %v2200_v55  ;;  %v5300_v51 = vpop.f32.mrf.mxu1  ;;  %6212 = vmatprep.mubr.f32.mxu1 %v10825_v56  ;;  %v4524_v2 = vadd.f32 %v4450_v21, %v3580_v15  ;;  %v2301_v49 = vand.u32 2147483647, %v2264_v18  ;;  %v4452_v18 = vmul.f32 %v11191_v40, %v11190_v62  ;;  %v11194_v62 = vld [vmem:[#allocation77_spill] sm:$0xff] }
 0x39c   : > { %v2668_v39 = vmax.f32 %v2631_v11, 0.0  ;;  %v10478_v8 = vadd.f32 %v5392_v54, %v4522_v50  ;;  %v4902_v22 = vpop.f32.mrf.mxu0  ;;  %v2508_v54 = vpop.permute.xlu0 %2507 }
 0x39d   : > { %v2299_v23 = vand.u32 2147483647, %v2262_v43  ;;  %v5393_v52 = vmul.f32 %v5300_v51, %v4902_v22  ;;  %v5302_v25 = vpop.f32.mrf.mxu1 }
 0x39e   : > { %11186 = vst [vmem:[#allocation71_spill] sm:$0xff] %v10478_v8  ;;  %v2204_v20 = vpop.permute.xlu1 %2203  ;;  %v4904_v13 = vpop.f32.mrf.mxu0  ;;  %7177 = vmatmul.mubr.msk.f32.gmra.mxu1 %vm2718_vm0, %v2668_v39  ;;  %v11196_v8 = vld [vmem:[#allocation100_spill] sm:$0xff] }
 0x39f   : > { %v2336_v41 = vsub.f32 1.0, %v2299_v23  ;;  %v10482_v55 = vadd.f32 %v5393_v52, %v11187_v3  ;;  %v2263_v29 = vsub.f32 %v7764_v47, %v2204_v20  ;;  %v5394_v11 = vmul.f32 %v5302_v25, %v4904_v13  ;;  %6218 = vmatprep.mubr.f32.mxu1 %v10825_v56  ;;  %v11193_v20 = vld [vmem:[#allocation131_spill] sm:$0xff] }
 0x3a0   : > { %v4908_v50 = vpop.f32.mrf.mxu0  ;;  %v2338_v23 = vsub.f32 1.0, %v2301_v49  ;;  %v2561_v52 = vsub.f32 %v7764_v47, %v2508_v54 }
 0x3a1   : > { %11188 = vst [vmem:[#allocation16_spill] sm:$0xff] %v10482_v55  ;;  %v2373_v43 = vmax.f32 %v2336_v41, 0.0  ;;  %v2300_v51 = vand.u32 2147483647, %v2263_v29  ;;  %v10486_v21 = vadd.f32 %v5394_v11, %v4524_v2  ;;  %v11192_v2 = vld [vmem:[#allocation40_spill] sm:$0xff] }
 0x3a2   : > { %7178 = vmatmul.mubr.msk.f32.gmra.mxu1 %vm2718_vm0, %v2669_v12  ;;  %v4910_v39 = vpop.f32.mrf.mxu0  ;;  %v3582_v12 = vmul.f32 %v11193_v20, %v11192_v2  ;;  %v2375_v40 = vmax.f32 %v2338_v23, 0.0  ;;  %v2598_v54 = vand.u32 2147483647, %v2561_v52 }
 0x3a3   : > { %11189 = vst [vmem:[#allocation104_spill] sm:$0xff] %v10486_v21  ;;  %v2337_v15 = vsub.f32 1.0, %v2300_v51  ;;  %v2500_v22 = vpop.permute.xlu1 %2499  ;;  %7141 = vmatmul.mubr.msk.f32.gmra.mxu0 %vm2718_vm0, %v2373_v43  ;;  %6224 = vmatprep.mubr.f32.mxu1 %v10825_v56  ;;  %v11195_v43 = vld [vmem:[#allocation15_spill] sm:$0xff] }
 0x3a4   : > { %v2559_v25 = vsub.f32 %v7764_v47, %v2500_v22  ;;  %5826 = vmatprep.mubr.f32.mxu0 %v10825_v56  ;;  %v4914_v3 = vpop.f32.mrf.mxu0  ;;  %v4526_v51 = vadd.f32 %v4452_v18, %v3582_v12  ;;  %v4454_v49 = vmul.f32 %v11195_v43, %v11194_v62  ;;  %v11197_v18 = vld [vmem:[#allocation43_spill] sm:$0xff] }
 0x3a5   : > { %v2374_v13 = vmax.f32 %v2337_v15, 0.0  ;;  %v5306_v41 = vpop.f32.mrf.mxu1 }
 0x3a6   : > { %v2596_v29 = vand.u32 2147483647, %v2559_v25  ;;  %v5395_v11 = vmul.f32 %v5306_v41, %v4908_v50  ;;  %v2220_v50 = vpop.permute.xlu0 %2219  ;;  %v11198_v25 = vld [vmem:[#allocation134_spill] sm:$0xff]  ;;  %v4916_v23 = vpop.f32.mrf.mxu0 }
 0x3a7   : > { %v2504_v21 = vpop.permute.xlu1 %2503  ;;  %v5308_v55 = vpop.f32.mrf.mxu1  ;;  %7142 = vmatmul.mubr.msk.f32.gmra.mxu0 %vm2718_vm0, %v2374_v13  ;;  %v3584_v20 = vmul.f32 %v11198_v25, %v11197_v18 }
 0x3a8   : > { %v2633_v22 = vsub.f32 1.0, %v2596_v29  ;;  %v10502_v45 = vadd.f32 %v5395_v11, %v11196_v8  ;;  %v2560_v15 = vsub.f32 %v7764_v47, %v2504_v21  ;;  %v5396_v2 = vmul.f32 %v5308_v55, %v4910_v39  ;;  %5832 = vmatprep.mubr.f32.mxu0 %v10825_v56  ;;  %v11199_v29 = vld [vmem:[#allocation83_spill] sm:$0xff] }
 0x3a9   : > { %v5312_v12 = vpop.f32.mrf.mxu1  ;;  %v4528_v13 = vadd.f32 %v4454_v49, %v3584_v20  ;;  %v4456_v8 = vmul.f32 %v9945_v36, %v11199_v29  ;;  %v2635_v21 = vsub.f32 1.0, %v2598_v54  ;;  %v11200_v36 = vld [vmem:[#allocation46_spill] sm:$0xff]  ;;  %v11201_v54 = vld [vmem:[#allocation136_spill] sm:$0xff] }
 0x3aa   : > { %v2670_v41 = vmax.f32 %v2633_v22, 0.0  ;;  %v2597_v62 = vand.u32 2147483647, %v2560_v15  ;;  %v10508_v43 = vadd.f32 %v5396_v2, %v4526_v51  ;;  %v5397_v52 = vmul.f32 %v5312_v12, %v4914_v3 }
 0x3ab   : > { %v5314_v11 = vpop.f32.mrf.mxu1  ;;  %7143 = vmatmul.mubr.msk.f32.gmra.mxu0 %vm2718_vm0, %v2375_v40  ;;  %v2267_v3 = vsub.f32 %v7764_v47, %v2220_v50  ;;  %v3586_v40 = vmul.f32 %v11201_v54, %v11200_v36 }
 0x3ac   : > { %v2634_v55 = vsub.f32 1.0, %v2597_v62  ;;  %v10514_v39 = vadd.f32 %v5397_v52, %v9934_v38  ;;  %v5398_v18 = vmul.f32 %v5314_v11, %v4916_v23  ;;  %v2212_v25 = vpop.permute.xlu1 %2211  ;;  %7179 = vmatmul.mubr.msk.f32.gmra.mxu1 %vm2718_vm0, %v2670_v41  ;;  %5838 = vmatprep.mubr.f32.mxu0 %v10825_v56  ;;  %v2672_v41 = vmax.f32 %v2635_v21, 0.0  ;;  %v11203_v21 = vld [vmem:[#allocation89_spill] sm:$0xff] }
 0x3ad   : > { %v2265_v51 = vsub.f32 %v7764_v47, %v2212_v25  ;;  %v5318_v49 = vpop.f32.mrf.mxu1  ;;  %6230 = vmatprep.mubr.f32.mxu1 %v10825_v56  ;;  %v4530_v23 = vadd.f32 %v4456_v8, %v3586_v40  ;;  %v2304_v50 = vand.u32 2147483647, %v2267_v3  ;;  %v4458_v3 = vmul.f32 %v9963_v28, %v11203_v21 }
 0x3ae   : > { %v2671_v22 = vmax.f32 %v2634_v55, 0.0  ;;  %v10523_v15 = vadd.f32 %v5398_v18, %v4528_v13  ;;  %v4920_v38 = vpop.f32.mrf.mxu0  ;;  %v2520_v18 = vpop.permute.xlu0 %2519 }
 0x3af   : > { %v2302_v2 = vand.u32 2147483647, %v2265_v51  ;;  %v5399_v20 = vmul.f32 %v5318_v49, %v4920_v38  ;;  %v5320_v12 = vpop.f32.mrf.mxu1  ;;  %v2564_v40 = vsub.f32 %v7764_v47, %v2520_v18 }
 0x3b0   : > { %v2216_v62 = vpop.permute.xlu1 %2215  ;;  %v4922_v52 = vpop.f32.mrf.mxu0  ;;  %7180 = vmatmul.mubr.msk.f32.gmra.mxu1 %vm2718_vm0, %v2671_v22 }
 0x3b1   : > { %v2339_v29 = vsub.f32 1.0, %v2302_v2  ;;  %v10527_v11 = vadd.f32 %v5399_v20, %v9949_v44  ;;  %v2266_v25 = vsub.f32 %v7764_v47, %v2216_v62  ;;  %v5400_v55 = vmul.f32 %v5320_v12, %v4922_v52  ;;  %6236 = vmatprep.mubr.f32.mxu1 %v10825_v56  ;;  %v11204_v2 = vld [vmem:[#allocation49_spill] sm:$0xff]  ;;  %v11205_v20 = vld [vmem:[#allocation138_spill] sm:$0xff] }
 0x3b2   : > { %v4926_v13 = vpop.f32.mrf.mxu0  ;;  %v2341_v44 = vsub.f32 1.0, %v2304_v50  ;;  %v3588_v12 = vmul.f32 %v11205_v20, %v11204_v2  ;;  %v2601_v18 = vand.u32 2147483647, %v2564_v40  ;;  %v2232_v2 = vpop.permute.xlu0 %2231 }
 0x3b3   : > { %v2376_v51 = vmax.f32 %v2339_v29, 0.0  ;;  %v2303_v49 = vand.u32 2147483647, %v2266_v25  ;;  %v10531_v8 = vadd.f32 %v5400_v55, %v4530_v23 }
 0x3b4   : > { %7181 = vmatmul.mubr.msk.f32.gmra.mxu1 %vm2718_vm0, %v2672_v41  ;;  %v4928_v22 = vpop.f32.mrf.mxu0  ;;  %v4532_v29 = vadd.f32 %v4458_v3, %v3588_v12  ;;  %v2378_v55 = vmax.f32 %v2341_v44, 0.0 }
 0x3b5   : > { %11202 = vst [vmem:[#allocation54_spill] sm:$0xff] %v10531_v8  ;;  %v2340_v36 = vsub.f32 1.0, %v2303_v49  ;;  %v2512_v54 = vpop.permute.xlu1 %2511  ;;  %7144 = vmatmul.mubr.msk.f32.gmra.mxu0 %vm2718_vm0, %v2376_v51  ;;  %6242 = vmatprep.mubr.f32.mxu1 %v10825_v56  ;;  %v11206_v49 = vld [vmem:[#allocation105_spill] sm:$0xff] }
 0x3b6   : > { %v2562_v38 = vsub.f32 %v7764_v47, %v2512_v54  ;;  %5844 = vmatprep.mubr.f32.mxu0 %v10825_v56  ;;  %v5654_v52 = vpop.f32.mrf.mxu0 }
 0x3b7   : > { %v2377_v23 = vmax.f32 %v2340_v36, 0.0  ;;  %v5324_v41 = vpop.f32.mrf.mxu1 }
 0x3b8   : > { %v2599_v28 = vand.u32 2147483647, %v2562_v38  ;;  %v5401_v62 = vmul.f32 %v5324_v41, %v4926_v13  ;;  %v5656_v20 = vpop.f32.mrf.mxu0 }
 0x3b9   : > { %v2516_v25 = vpop.permute.xlu1 %2515  ;;  %v5326_v50 = vpop.f32.mrf.mxu1  ;;  %7145 = vmatmul.mubr.msk.f32.gmra.mxu0 %vm2718_vm0, %v2377_v23  ;;  %v2638_v23 = vsub.f32 1.0, %v2601_v18 }
 0x3ba   : > { %v2636_v51 = vsub.f32 1.0, %v2599_v28  ;;  %v10545_v21 = vadd.f32 %v5401_v62, %v11206_v49  ;;  %v2563_v54 = vsub.f32 %v7764_v47, %v2516_v25  ;;  %v5402_v8 = vmul.f32 %v5326_v50, %v4928_v22  ;;  %5850 = vmatprep.mubr.f32.mxu0 %v10825_v56  ;;  %v11209_v22 = vld [vmem:[#allocation94_spill] sm:$0xff]  ;;  %v11210_v62 = vld [vmem:[#allocation97_spill] sm:$0xff] }
 0x3bb   : > { %v5330_v41 = vmul.f32 %v9974_v37, %v11209_v22 }
 0x3bc   : > { %11207 = vst [vmem:[#allocation60_spill] sm:$0xff] %v10545_v21  ;;  %v2673_v36 = vmax.f32 %v2636_v51, 0.0  ;;  %v2600_v38 = vand.u32 2147483647, %v2563_v54  ;;  %v10549_v13 = vadd.f32 %v5402_v8, %v4532_v29  ;;  %v6052_v3 = vpop.f32.mrf.mxu1  ;;  %v2270_v8 = vsub.f32 %v7764_v47, %v2232_v2 }
 0x3bd   : > { %7146 = vmatmul.mubr.msk.f32.gmra.mxu0 %vm2718_vm0, %v2378_v55  ;;  %v5332_v29 = vmul.f32 %v9988_v0, %v11210_v62  ;;  %v6273_v50 = vmul.f32 %v6052_v3, %v5654_v52  ;;  %v2675_v54 = vmax.f32 %v2638_v23, 0.0  ;;  %v11212_v52 = vld [vmem:[#allocation142_spill] sm:$0xff] }
 0x3be   : > { %11208 = vst [vmem:[#allocation115_spill] sm:$0xff] %v10549_v13  ;;  %v2637_v44 = vsub.f32 1.0, %v2600_v38  ;;  %v2224_v40 = vpop.permute.xlu1 %2223  ;;  %v6054_v12 = vpop.f32.mrf.mxu1  ;;  %7182 = vmatmul.mubr.msk.f32.gmra.mxu1 %vm2718_vm0, %v2673_v36  ;;  %5856 = vmatprep.mubr.f32.mxu0 %v10825_v56  ;;  %v2307_v0 = vand.u32 2147483647, %v2270_v8 }
 0x3bf   : > { %v2268_v28 = vsub.f32 %v7764_v47, %v2224_v40  ;;  %6248 = vmatprep.mubr.f32.mxu1 %v10825_v56  ;;  %v6274_v18 = vmul.f32 %v6054_v12, %v5656_v20  ;;  %v11211_v40 = vld [vmem:[#allocation140_spill] sm:$0xff]  ;;  %v5406_v3 = vadd.f32 %v5332_v29, %v11212_v52  ;;  %v11213_v20 = vld [vmem:[#allocation107_spill] sm:$0xff] }
 0x3c0   : > { %v2674_v25 = vmax.f32 %v2637_v44, 0.0  ;;  %v6058_v55 = vpop.f32.mrf.mxu1  ;;  %v5404_v22 = vadd.f32 %v5330_v41, %v11211_v40  ;;  %v6347_v44 = vadd.f32 %v6273_v50, %v9977_v17 }
 0x3c1   : > { %v2305_v51 = vand.u32 2147483647, %v2268_v28  ;;  %v5660_v49 = vpop.f32.mrf.mxu0 }
 0x3c2   : > { %v6275_v36 = vmul.f32 %v6058_v55, %v5660_v49  ;;  %v2228_v38 = vpop.permute.xlu1 %2227  ;;  %7183 = vmatmul.mubr.msk.f32.gmra.mxu1 %vm2718_vm0, %v2674_v25  ;;  %v6060_v37 = vpop.f32.mrf.mxu1  ;;  %v6348_v55 = vadd.f32 %v6274_v18, %v5404_v22 }
 0x3c3   : > { %v2342_v21 = vsub.f32 1.0, %v2305_v51  ;;  %v2269_v2 = vsub.f32 %v7764_v47, %v2228_v38  ;;  %v5662_v13 = vpop.f32.mrf.mxu0  ;;  %6254 = vmatprep.mubr.f32.mxu1 %v10825_v56  ;;  %v2344_v38 = vsub.f32 1.0, %v2307_v0 }
 0x3c4   : > { %v6349_v12 = vadd.f32 %v6275_v36, %v11213_v20  ;;  %v6276_v23 = vmul.f32 %v6060_v37, %v5662_v13 }
 0x3c5   : > { %v2379_v28 = vmax.f32 %v2342_v21, 0.0  ;;  %v2306_v62 = vand.u32 2147483647, %v2269_v2  ;;  %v5666_v25 = vpop.f32.mrf.mxu0  ;;  %v2381_v36 = vmax.f32 %v2344_v38, 0.0 }
 0x3c6   : > { %v6421_v49 = vpack.c.bf16 %v6349_v12, %v6347_v44  ;;  %v6350_v41 = vadd.f32 %v6276_v23, %v5406_v3  ;;  %7184 = vmatmul.mubr.msk.f32.gmra.mxu1 %vm2718_vm0, %v2675_v54  ;;  %v11214_v54 = vld [vmem:[#allocation103_spill] sm:$0xff]  ;;  %v11215_v3 = vld [vmem:[#allocation17_spill] sm:$0xff] }
 0x3c7   : > { %v2343_v51 = vsub.f32 1.0, %v2306_v62  ;;  %v2524_v40 = vpop.permute.xlu1 %2523  ;;  %7147 = vmatmul.mubr.msk.f32.gmra.mxu0 %vm2718_vm0, %v2379_v28  ;;  %6260 = vmatprep.mubr.f32.mxu1 %v10825_v56  ;;  %v5668_v8 = vpop.f32.mrf.mxu0  ;;  %v5334_v22 = vmul.f32 %v10001_v30, %v11214_v54  ;;  %v5336_v44 = vmul.f32 %v10012_v7, %v11215_v3  ;;  %v11221_v3 = vld [vmem:[#allocation25_spill] sm:$0xff] }
 0x3c8   : > { %v2565_v17 = vsub.f32 %v7764_v47, %v2524_v40  ;;  %5862 = vmatprep.mubr.f32.mxu0 %v10825_v56  ;;  %v6422_v21 = vpack.c.bf16 %v6350_v41, %v6348_v55 }
 0x3c9   : > { %v2380_v13 = vmax.f32 %v2343_v51, 0.0  ;;  %v5672_v18 = vpop.f32.mrf.mxu0  ;;  %v11216_v51 = vld [vmem:[#allocation143_spill] sm:$0xff] }
 0x3ca   : > { %v2602_v29 = vand.u32 2147483647, %v2565_v17  ;;  %v6064_v50 = vpop.f32.mrf.mxu1  ;;  %v5408_v30 = vadd.f32 %v5334_v22, %v11216_v51  ;;  %v11223_v51 = vld [vmem:[#allocation29_spill] sm:$0xff] }
 0x3cb   : > { %v2528_v37 = vpop.permute.xlu1 %2527  ;;  %7148 = vmatmul.mubr.msk.f32.gmra.mxu0 %vm2718_vm0, %v2380_v13  ;;  %v6277_v20 = vmul.f32 %v6064_v50, %v5666_v25  ;;  %v5674_v62 = vpop.f32.mrf.mxu0  ;;  %v11218_v13 = vld [vmem:[#allocation109_spill] sm:$0xff]  ;;  %v11219_v25 = vld [vmem:[#allocation23_spill] sm:$0xff] }
 0x3cc   : > { %v2639_v2 = vsub.f32 1.0, %v2602_v29  ;;  %v2566_v0 = vsub.f32 %v7764_v47, %v2528_v37  ;;  %v6066_v52 = vpop.f32.mrf.mxu1  ;;  %5868 = vmatprep.mubr.f32.mxu0 %v10825_v56  ;;  %v11217_v47 = vld [vmem:[#allocation144_spill] sm:$0xff] }
 0x3cd   : > { %v6278_v55 = vmul.f32 %v6066_v52, %v5668_v8  ;;  %v5410_v17 = vadd.f32 %v5336_v44, %v11217_v47  ;;  %v6351_v7 = vadd.f32 %v6277_v20, %v11218_v13  ;;  %v11220_v52 = vld [vmem:[#allocation19_spill] sm:$0xff] }
 0x3ce   : > { %v2676_v12 = vmax.f32 %v2639_v2, 0.0  ;;  %v2603_v23 = vand.u32 2147483647, %v2566_v0  ;;  %v6070_v28 = vpop.f32.mrf.mxu1  ;;  %v5338_v44 = vmul.f32 %v11221_v3, %v11220_v52 }
 0x3cf   : > { %v6279_v41 = vmul.f32 %v6070_v28, %v5672_v18  ;;  %7149 = vmatmul.mubr.msk.f32.gmra.mxu0 %vm2718_vm0, %v2381_v36  ;;  %v6352_v18 = vadd.f32 %v6278_v55, %v5408_v30 }
 0x3d0   : > { %v2640_v38 = vsub.f32 1.0, %v2603_v23  ;;  %v6072_v40 = vpop.f32.mrf.mxu1  ;;  %7185 = vmatmul.mubr.msk.f32.gmra.mxu1 %vm2718_vm0, %v2676_v12  ;;  %6587 = vmatprep.mubr.bf16.mxu0 %v6422_v21  ;;  %v11222_v12 = vld [vmem:[#allocation21_spill] sm:$0xff]  ;;  %v5412_v30 = vadd.f32 %v5338_v44, %v11223_v51 }
 0x3d1   : > { %v6353_v29 = vadd.f32 %v6279_v41, %v11219_v25  ;;  %v6280_v50 = vmul.f32 %v6072_v40, %v5674_v62  ;;  %6266 = vmatprep.mubr.f32.mxu1 %v10825_v56  ;;  %v5340_v56 = vmul.f32 %v10045_v9, %v11222_v12  ;;  %v11224_v40 = vld [vmem:[#allocation56_spill] sm:$0xff] }
 0x3d2   : > { %v2677_v8 = vmax.f32 %v2640_v38, 0.0  ;;  %v6076_v21 = vpop.f32.mrf.mxu1 }
 0x3d3   : > { %v6423_v37 = vpack.c.bf16 %v6353_v29, %v6351_v7  ;;  %v6354_v36 = vadd.f32 %v6280_v50, %v5410_v17  ;;  %v5678_v54 = vpop.f32.mrf.mxu0  ;;  %6588 = vmatmul.mubr.bf16.vlgmr.msra.gmra.mxu0 %v6421_v49  ;;  %v5414_v47 = vadd.f32 %v5340_v56, %v11224_v40 }
 0x3d4   : > { %7186 = vmatmul.mubr.msk.f32.gmra.mxu1 %vm2718_vm0, %v2677_v8  ;;  %v6078_v20 = vpop.f32.mrf.mxu1  ;;  %v6281_v23 = vmul.f32 %v6076_v21, %v5678_v54 }
 0x3d5   : > { %v5680_v22 = vpop.f32.mrf.mxu0  ;;  %v6424_v2 = vpack.c.bf16 %v6354_v36, %v6352_v18  ;;  %v11226_v36 = vld [vmem:[#allocation27_spill] sm:$0xff] }
 0x3d6   : > { %v6282_v55 = vmul.f32 %v6078_v20, %v5680_v22  ;;  %v6355_v17 = vadd.f32 %v6281_v23, %v10034_v42  ;;  %v11228_v20 = vld [vmem:[#allocation93_spill] sm:$0xff]  ;;  %v11229_v23 = vld [vmem:[#allocation32_spill] sm:$0xff] }
 0x3d7   : > { %v5684_v0 = vpop.f32.mrf.mxu0  ;;  %6595 = vmatprep.mubr.bf16.mxu0 %v6424_v2  ;;  %v11227_v2 = vld [vmem:[#allocation116_spill] sm:$0xff] }
 0x3d8   : > { %v6356_v29 = vadd.f32 %v6282_v55, %v5412_v30  ;;  %v5344_v21 = vmul.f32 %v10077_v57, %v11227_v2 }
 0x3d9   : > { %v5686_v28 = vpop.f32.mrf.mxu0 }
 0x3db   : > { %6596 = vmatmul.mubr.bf16.gmra.mxu0 %v6423_v37  ;;  %v5690_v41 = vpop.f32.mrf.mxu0  ;;  %v11225_v37 = vld [vmem:[#allocation112_spill] sm:$0xff] }
 0x3dc   : > { %v6082_v62 = vpop.f32.mrf.mxu1  ;;  %v5342_v54 = vmul.f32 %v11226_v36, %v11225_v37 }
 0x3dd   : > { %v6283_v49 = vmul.f32 %v6082_v62, %v5684_v0  ;;  %v5692_v8 = vpop.f32.mrf.mxu0  ;;  %v11230_v62 = vld [vmem:[#allocation119_spill] sm:$0xff] }
 0x3de   : > { %v6084_v38 = vpop.f32.mrf.mxu1  ;;  %v5416_v12 = vadd.f32 %v5342_v54, %v11228_v20 }
 0x3df   : > { %v6357_v13 = vadd.f32 %v6283_v49, %v10050_v58  ;;  %v6284_v7 = vmul.f32 %v6084_v38, %v5686_v28  ;;  %v5418_v28 = vadd.f32 %v5344_v21, %v11229_v23 }
 0x3e0   : > { %v6088_v25 = vpop.f32.mrf.mxu1 }
 0x3e1   : > { %v6425_v9 = vpack.c.bf16 %v6357_v13, %v6355_v17  ;;  %v6358_v50 = vadd.f32 %v6284_v7, %v5414_v47  ;;  %v6285_v0 = vmul.f32 %v6088_v25, %v5690_v41  ;;  %v11231_v7 = vld [vmem:[#allocation30_spill] sm:$0xff]  ;;  %v11232_v25 = vld [vmem:[#allocation33_spill] sm:$0xff] }
 0x3e2   : > { %v6090_v18 = vpop.f32.mrf.mxu1 }
 0x3e3   : > { %v6426_v22 = vpack.c.bf16 %v6358_v50, %v6356_v29  ;;  %v6286_v42 = vmul.f32 %v6090_v18, %v5692_v8  ;;  %v6359_v55 = vadd.f32 %v6285_v0, %v11230_v62  ;;  %v5346_v29 = vmul.f32 %v11232_v25, %v11231_v7  ;;  %v11233_v50 = vld [vmem:[#allocation122_spill] sm:$0xff]  ;;  %v11235_v0 = vld [vmem:[#allocation35_spill] sm:$0xff] }
 0x3e4   : > { %v6094_v52 = vpop.f32.mrf.mxu1  ;;  %v5348_v8 = vmul.f32 %v10104_v32, %v11233_v50 }
 0x3e5   : > { %v5696_v3 = vpop.f32.mrf.mxu0  ;;  %6603 = vmatprep.mubr.bf16.mxu0 %v6426_v22  ;;  %v6360_v57 = vadd.f32 %v6286_v42, %v5416_v12  ;;  %v11234_v22 = vld [vmem:[#allocation96_spill] sm:$0xff] }
 0x3e6   : > { %v6287_v58 = vmul.f32 %v6094_v52, %v5696_v3  ;;  %6604 = vmatmul.mubr.bf16.gmra.mxu0 %v6425_v9  ;;  %v6096_v44 = vpop.f32.mrf.mxu1  ;;  %v5420_v2 = vadd.f32 %v5346_v29, %v11234_v22  ;;  %v5422_v52 = vadd.f32 %v5348_v8, %v11235_v0  ;;  %v11236_v3 = vld [vmem:[#allocation125_spill] sm:$0xff]  ;;  %v11244_v22 = vld [vmem:[#allocation39_spill] sm:$0xff] }
 0x3e7   : > { %v5698_v56 = vpop.f32.mrf.mxu0 }
 0x3e8   : > { %v6361_v49 = vadd.f32 %v6287_v58, %v10082_v63  ;;  %v6288_v51 = vmul.f32 %v6096_v44, %v5698_v56 }
 0x3e9   : > { %v5702_v30 = vpop.f32.mrf.mxu0 }
 0x3ea   : > { %v6427_v41 = vpack.c.bf16 %v6361_v49, %v6359_v55  ;;  %v6362_v38 = vadd.f32 %v6288_v51, %v5418_v28  ;;  %v11237_v49 = vld [vmem:[#allocation121_spill] sm:$0xff]  ;;  %v11238_v51 = vld [vmem:[#allocation38_spill] sm:$0xff] }
 0x3eb   : > { %v5704_v40 = vpop.f32.mrf.mxu0 }
 0x3ec   : > { %v6428_v47 = vpack.c.bf16 %v6362_v38, %v6360_v57  ;;  %v11239_v57 = vld [vmem:[#allocation36_spill] sm:$0xff] }
 0x3ed   : > { %v5708_v13 = vpop.f32.mrf.mxu0 }
 0x3ee   : > { %v6100_v17 = vpop.f32.mrf.mxu1  ;;  %6611 = vmatprep.mubr.bf16.mxu0 %v6428_v47 }
 0x3ef   : > { %6612 = vmatmul.mubr.bf16.gmra.mxu0 %v6427_v41  ;;  %v6289_v18 = vmul.f32 %v6100_v17, %v5702_v30  ;;  %v5710_v37 = vpop.f32.mrf.mxu0  ;;  %v4408_v30 = vmul.f32 %v11238_v51, %v11237_v49  ;;  %v5350_v41 = vmul.f32 %v11239_v57, %v10110_v6  ;;  %v11242_v17 = vld [vmem:[#allocation42_spill] sm:$0xff]  ;;  %v11252_v51 = vld [vmem:[#allocation132_spill] sm:$0xff] }
 0x3f0   : > { %v6102_v9 = vpop.f32.mrf.mxu1 }
 0x3f1   : > { %v6290_v36 = vmul.f32 %v6102_v9, %v5704_v40  ;;  %v6363_v42 = vadd.f32 %v6289_v18, %v11236_v3  ;;  %v11240_v40 = vld [vmem:[#allocation58_spill] sm:$0xff] }
 0x3f2   : > { %v6106_v63 = vpop.f32.mrf.mxu1  ;;  %v11246_v3 = vld [vmem:[#allocation126_spill] sm:$0xff] }
 0x3f3   : > { %v6291_v54 = vmul.f32 %v6106_v63, %v5708_v13  ;;  %v6364_v20 = vadd.f32 %v6290_v36, %v5420_v2  ;;  %v5352_v13 = vmul.f32 %v11242_v17, %v10128_v61  ;;  %v11243_v63 = vld [vmem:[#allocation99_spill] sm:$0xff]  ;;  %v11245_v2 = vld [vmem:[#allocation130_spill] sm:$0xff] }
 0x3f4   : > { %v6108_v21 = vpop.f32.mrf.mxu1 }
 0x3f5   : > { %v6365_v58 = vadd.f32 %v6291_v54, %v10107_v4  ;;  %v6292_v44 = vmul.f32 %v6108_v21, %v5710_v37  ;;  %v11241_v4 = vld [vmem:[#allocation75_spill] sm:$0xff]  ;;  %v5424_v37 = vadd.f32 %v5350_v41, %v11243_v63 }
 0x3f6   : > { %v6112_v62 = vpop.f32.mrf.mxu1  ;;  %v3538_v47 = vmul.f32 %v11241_v4, %v11240_v40  ;;  %v11255_v40 = vld [vmem:[#allocation80_spill] sm:$0xff] }
 0x3f7   : > { %v6429_v12 = vpack.c.bf16 %v6365_v58, %v6363_v42  ;;  %v6366_v56 = vadd.f32 %v6292_v44, %v5422_v52  ;;  %v5714_v23 = vpop.f32.mrf.mxu0  ;;  %v11247_v42 = vld [vmem:[#allocation41_spill] sm:$0xff] }
 0x3f8   : > { %v6114_v38 = vpop.f32.mrf.mxu1  ;;  %v6293_v7 = vmul.f32 %v6112_v62, %v5714_v23  ;;  %v4482_v9 = vadd.f32 %v4408_v30, %v3538_v47  ;;  %v4410_v61 = vmul.f32 %v11247_v42, %v11246_v3  ;;  %v11249_v23 = vld [vmem:[#allocation102_spill] sm:$0xff]  ;;  %v11250_v62 = vld [vmem:[#allocation61_spill] sm:$0xff]  ;;  %v5356_v47 = vmul.f32 %v10166_v46, %v10164_v26 }
 0x3f9   : > { %v5716_v32 = vpop.f32.mrf.mxu0  ;;  %v6430_v28 = vpack.c.bf16 %v6366_v56, %v6364_v20  ;;  %v11248_v56 = vld [vmem:[#allocation128_spill] sm:$0xff]  ;;  %v11253_v30 = vld [vmem:[#allocation45_spill] sm:$0xff] }
 0x3fa   : > { %v6294_v50 = vmul.f32 %v6114_v38, %v5716_v32  ;;  %v5426_v54 = vadd.f32 %v5352_v13, %v4482_v9  ;;  %v6367_v6 = vadd.f32 %v6293_v7, %v11244_v22  ;;  %v4412_v32 = vmul.f32 %v11249_v23, %v11248_v56  ;;  %v11254_v38 = vld [vmem:[#allocation64_spill] sm:$0xff]  ;;  %v11258_v42 = vld [vmem:[#allocation133_spill] sm:$0xff]  ;;  %v11261_v56 = vld [vmem:[#allocation47_spill] sm:$0xff] }
 0x3fb   : > { %v5720_v55 = vpop.f32.mrf.mxu0  ;;  %6619 = vmatprep.mubr.bf16.mxu0 %v6430_v28  ;;  %v5354_v57 = vmul.f32 %v11253_v30, %v11252_v51  ;;  %v3542_v4 = vmul.f32 %v11255_v40, %v11254_v38  ;;  %v11268_v40 = vld [vmem:[#allocation148_spill] sm:$0xff] }
 0x3fc   : > { %6620 = vmatmul.mubr.bf16.gmra.mxu0 %v6429_v12  ;;  %v6368_v58 = vadd.f32 %v6294_v50, %v5424_v37 }
 0x3fd   : > { %v5722_v25 = vpop.f32.mrf.mxu0 }
 0x3ff   : > { %v5726_v18 = vpop.f32.mrf.mxu0 }
 0x400   : > { %v6118_v29 = vpop.f32.mrf.mxu1 }
 0x401   : > { %v6295_v8 = vmul.f32 %v6118_v29, %v5720_v55  ;;  %v5728_v12 = vpop.f32.mrf.mxu0  ;;  %v11251_v55 = vld [vmem:[#allocation78_spill] sm:$0xff]  ;;  %v4486_v29 = vadd.f32 %v4412_v32, %v3542_v4  ;;  %v11262_v32 = vld [vmem:[#allocation67_spill] sm:$0xff]  ;;  %v11269_v4 = vld [vmem:[#allocation149_spill] sm:$0xff] }
 0x402   : > { %v6120_v36 = vpop.f32.mrf.mxu1  ;;  %v3540_v49 = vmul.f32 %v11251_v55, %v11250_v62  ;;  %v11264_v55 = vld [vmem:[#allocation145_spill] sm:$0xff] }
 0x403   : > { %v6369_v21 = vadd.f32 %v6295_v8, %v11245_v2  ;;  %v6296_v0 = vmul.f32 %v6120_v36, %v5722_v25  ;;  %v5430_v36 = vadd.f32 %v5356_v47, %v4486_v29  ;;  %v5360_v47 = vmul.f32 %v11269_v4, %v11268_v40 }
 0x404   : > { %v6124_v52 = vpop.f32.mrf.mxu1  ;;  %v4484_v7 = vadd.f32 %v4410_v61, %v3540_v49  ;;  %v11259_v61 = vld [vmem:[#allocation44_spill] sm:$0xff]  ;;  %v11265_v49 = vld [vmem:[#allocation147_spill] sm:$0xff] }
 0x405   : > { %v6431_v44 = vpack.c.bf16 %v6369_v21, %v6367_v6  ;;  %v6370_v20 = vadd.f32 %v6296_v0, %v5426_v54  ;;  %v6297_v17 = vmul.f32 %v6124_v52, %v5726_v18  ;;  %v11256_v54 = vld [vmem:[#allocation135_spill] sm:$0xff]  ;;  %v11257_v6 = vld [vmem:[#allocation48_spill] sm:$0xff]  ;;  %v5358_v51 = vmul.f32 %v11265_v49, %v11264_v55 }
 0x406   : > { %v6126_v28 = vpop.f32.mrf.mxu1  ;;  %v5428_v63 = vadd.f32 %v5354_v57, %v4484_v7  ;;  %v11266_v57 = vld [vmem:[#allocation70_spill] sm:$0xff]  ;;  %v11278_v55 = vld [vmem:[#allocation88_spill] sm:$0xff] }
 0x407   : > { %v6432_v41 = vpack.c.bf16 %v6370_v20, %v6368_v58  ;;  %v6298_v9 = vmul.f32 %v6126_v28, %v5728_v12  ;;  %v6371_v22 = vadd.f32 %v6297_v17, %v11256_v54  ;;  %v4414_v58 = vmul.f32 %v11259_v61, %v11258_v42  ;;  %v11260_v12 = vld [vmem:[#allocation137_spill] sm:$0xff]  ;;  %v11263_v28 = vld [vmem:[#allocation82_spill] sm:$0xff]  ;;  %v11271_v61 = vld [vmem:[#allocation139_spill] sm:$0xff] }
 0x408   : > { %v6130_v13 = vpop.f32.mrf.mxu1  ;;  %v4416_v23 = vmul.f32 %v11261_v56, %v11260_v12  ;;  %v3544_v62 = vmul.f32 %v11263_v28, %v11262_v32  ;;  %v11275_v56 = vld [vmem:[#allocation73_spill] sm:$0xff]  ;;  %v5362_v32 = vmul.f32 %v10220_v24, %v10218_v14  ;;  %v11281_v24 = vld [vmem:[#allocation151_spill] sm:$0xff] }
 0x409   : > { %v5732_v25 = vpop.f32.mrf.mxu0  ;;  %6627 = vmatprep.mubr.bf16.mxu0 %v6432_v41  ;;  %v6372_v26 = vadd.f32 %v6298_v9, %v5428_v63  ;;  %v11267_v41 = vld [vmem:[#allocation84_spill] sm:$0xff] }
 0x40a   : > { %v6299_v50 = vmul.f32 %v6130_v13, %v5732_v25  ;;  %6628 = vmatmul.mubr.bf16.gmra.mxu0 %v6431_v44  ;;  %v6132_v8 = vpop.f32.mrf.mxu1  ;;  %v3546_v38 = vmul.f32 %v11267_v41, %v11266_v57  ;;  %v4488_v13 = vadd.f32 %v4414_v58, %v3544_v62  ;;  %v11277_v62 = vld [vmem:[#allocation76_spill] sm:$0xff] }
 0x40b   : > { %v5734_v37 = vpop.f32.mrf.mxu0  ;;  %v3550_v49 = vmul.f32 %v11278_v55, %v11277_v62 }
 0x40c   : > { %v6373_v2 = vadd.f32 %v6299_v50, %v11257_v6  ;;  %v6300_v21 = vmul.f32 %v6132_v8, %v5734_v37  ;;  %v4490_v29 = vadd.f32 %v4416_v23, %v3546_v38  ;;  %v5432_v8 = vadd.f32 %v5358_v51, %v4488_v13  ;;  %v11276_v23 = vld [vmem:[#allocation86_spill] sm:$0xff]  ;;  %v11279_v51 = vld [vmem:[#allocation152_spill] sm:$0xff] }
 0x40d   : > { %v5738_v0 = vpop.f32.mrf.mxu0 }
 0x40e   : > { %v6433_v46 = vpack.c.bf16 %v6373_v2, %v6371_v22  ;;  %v6374_v18 = vadd.f32 %v6300_v21, %v5430_v36  ;;  %v5434_v37 = vadd.f32 %v5360_v47, %v4490_v29  ;;  %v11270_v36 = vld [vmem:[#allocation146_spill] sm:$0xff] }
 0x40f   : > { %v5740_v52 = vpop.f32.mrf.mxu0 }
 0x410   : > { %v6434_v3 = vpack.c.bf16 %v6374_v18, %v6372_v26 }
 0x411   : > { %v5744_v44 = vpop.f32.mrf.mxu0 }
 0x412   : > { %v6136_v20 = vpop.f32.mrf.mxu1  ;;  %6635 = vmatprep.mubr.bf16.mxu0 %v6434_v3 }
 0x413   : > { %6636 = vmatmul.mubr.bf16.gmra.mxu0 %v6433_v46  ;;  %v6301_v17 = vmul.f32 %v6136_v20, %v5738_v0  ;;  %v5746_v25 = vpop.f32.mrf.mxu0  ;;  %v11273_v20 = vld [vmem:[#allocation141_spill] sm:$0xff] }
 0x414   : > { %v6138_v30 = vpop.f32.mrf.mxu1 }
 0x415   : > { %v6302_v9 = vmul.f32 %v6138_v30, %v5740_v52  ;;  %v6375_v54 = vadd.f32 %v6301_v17, %v11270_v36  ;;  %v11272_v52 = vld [vmem:[#allocation65_spill] sm:$0xff]  ;;  %v5364_v30 = vmul.f32 %v11279_v51, %v10235_v35 }
 0x416   : > { %v6142_v7 = vpop.f32.mrf.mxu1  ;;  %v4418_v58 = vmul.f32 %v11272_v52, %v11271_v61 }
 0x417   : > { %v6303_v50 = vmul.f32 %v6142_v7, %v5744_v44  ;;  %v6376_v2 = vadd.f32 %v6302_v9, %v5432_v8  ;;  %v11274_v44 = vld [vmem:[#allocation66_spill] sm:$0xff] }
 0x418   : > { %v6144_v63 = vpop.f32.mrf.mxu1  ;;  %v4420_v12 = vmul.f32 %v11274_v44, %v11273_v20  ;;  %v11280_v9 = vld [vmem:[#allocation150_spill] sm:$0xff] }
 0x419   : > { %v6377_v22 = vadd.f32 %v6303_v50, %v10211_v34  ;;  %v6304_v6 = vmul.f32 %v6144_v63, %v5746_v25  ;;  %v3548_v34 = vmul.f32 %v11276_v23, %v11275_v56 }
 0x41a   : > { %v6148_v3 = vpop.f32.mrf.mxu1  ;;  %v4494_v4 = vadd.f32 %v4420_v12, %v3550_v49 }
 0x41b   : > { %v6435_v21 = vpack.c.bf16 %v6377_v22, %v6375_v54  ;;  %v6378_v26 = vadd.f32 %v6304_v6, %v5434_v37  ;;  %v5750_v46 = vpop.f32.mrf.mxu0  ;;  %v4492_v38 = vadd.f32 %v4418_v58, %v3548_v34 }
 0x41c   : > { %v6150_v28 = vpop.f32.mrf.mxu1  ;;  %v6305_v57 = vmul.f32 %v6148_v3, %v5750_v46  ;;  %v5438_v29 = vadd.f32 %v5364_v30, %v4494_v4 }
 0x41d   : > { %v5752_v18 = vpop.f32.mrf.mxu0  ;;  %v6436_v0 = vpack.c.bf16 %v6378_v26, %v6376_v2  ;;  %v5436_v7 = vadd.f32 %v5362_v32, %v4492_v38  ;;  %v11283_v38 = vld [vmem:[#allocation6_spill] sm:$0xff] }
 0x41e   : > { %v6306_v47 = vmul.f32 %v6150_v28, %v5752_v18  ;;  %v6379_v14 = vadd.f32 %v6305_v57, %v11280_v9  ;;  %v11282_v57 = vld [vmem:[#allocation90_spill] sm:$0xff] }
 0x41f   : > { %v5756_v42 = vpop.f32.mrf.mxu0  ;;  %6643 = vmatprep.mubr.bf16.mxu0 %v6436_v0 }
 0x420   : > { %6644 = vmatmul.mubr.bf16.gmra.mxu0 %v6435_v21  ;;  %v6380_v37 = vadd.f32 %v6306_v47, %v5436_v7 }
 0x421   : > { %v5758_v41 = vpop.f32.mrf.mxu0 }
 0x423   : > { %v5762_v13 = vpop.f32.mrf.mxu0 }
 0x424   : > { %v6154_v40 = vpop.f32.mrf.mxu1 }
 0x425   : > { %v6307_v17 = vmul.f32 %v6154_v40, %v5756_v42  ;;  %v5764_v54 = vpop.f32.mrf.mxu0 }
 0x426   : > { %v6156_v25 = vpop.f32.mrf.mxu1 }
 0x427   : > { %v6381_v50 = vadd.f32 %v6307_v17, %v11281_v24  ;;  %v6308_v8 = vmul.f32 %v6156_v25, %v5758_v41 }
 0x428   : > { %v6160_v63 = vpop.f32.mrf.mxu1 }
 0x429   : > { %v6437_v36 = vpack.c.bf16 %v6381_v50, %v6379_v14  ;;  %v6382_v35 = vadd.f32 %v6308_v8, %v5438_v29  ;;  %v6309_v2 = vmul.f32 %v6160_v63, %v5762_v13 }
 0x42a   : > { %v6162_v22 = vpop.f32.mrf.mxu1 }
 0x42b   : > { %v6438_v6 = vpack.c.bf16 %v6382_v35, %v6380_v37  ;;  %v6310_v46 = vmul.f32 %v6162_v22, %v5764_v54  ;;  %v6383_v42 = vadd.f32 %v6309_v2, %v10266_v53  ;;  %v11285_v22 = vld [vmem:[#allocation8_spill] sm:$0xff] }
 0x42c   : > { %v6166_v21 = vpop.f32.mrf.mxu1 }
 0x42d   : > { %v5768_v26 = vpop.f32.mrf.mxu0  ;;  %6651 = vmatprep.mubr.bf16.mxu0 %v6438_v6  ;;  %v6384_v20 = vadd.f32 %v6310_v46, %v10274_v60 }
 0x42e   : > { %v6311_v18 = vmul.f32 %v6166_v21, %v5768_v26  ;;  %6652 = vmatmul.mubr.bf16.gmra.mxu0 %v6437_v36  ;;  %v6168_v0 = vpop.f32.mrf.mxu1  ;;  %v11284_v36 = vld [vmem:[#allocation92_spill] sm:$0xff]  ;;  %v11286_v21 = vld [vmem:[#allocation10_spill] sm:$0xff] }
 0x42f   : > { %v5770_v3 = vpop.f32.mrf.mxu0 }
 0x430   : > { %v6385_v61 = vadd.f32 %v6311_v18, %v10281_v31  ;;  %v6312_v52 = vmul.f32 %v6168_v0, %v5770_v3 }
 0x431   : > { %v5774_v58 = vpop.f32.mrf.mxu0 }
 0x432   : > { %v6439_v44 = vpack.c.bf16 %v6385_v61, %v6383_v42  ;;  %v6386_v12 = vadd.f32 %v6312_v52, %v10291_v27 }
 0x433   : > { %v5776_v56 = vpop.f32.mrf.mxu0 }
 0x434   : > { %v6440_v23 = vpack.c.bf16 %v6386_v12, %v6384_v20  ;;  %v11287_v12 = vld [vmem:[#allocation12_spill] sm:$0xff] }
 0x435   : > { %v5780_v32 = vpop.f32.mrf.mxu0 }
 0x436   : > { %v6172_v34 = vpop.f32.mrf.mxu1  ;;  %6659 = vmatprep.mubr.bf16.mxu0 %v6440_v23 }
 0x437   : > { %6660 = vmatmul.mubr.bf16.gmra.mxu0 %v6439_v44  ;;  %v6313_v62 = vmul.f32 %v6172_v34, %v5774_v58  ;;  %v5782_v49 = vpop.f32.mrf.mxu0 }
 0x438   : > { %v6174_v28 = vpop.f32.mrf.mxu1 }
 0x439   : > { %v6314_v53 = vmul.f32 %v6174_v28, %v5776_v56  ;;  %v6387_v30 = vadd.f32 %v6313_v62, %v10296_v59 }
 0x43a   : > { %v6178_v55 = vpop.f32.mrf.mxu1 }
 0x43b   : > { %v6315_v51 = vmul.f32 %v6178_v55, %v5780_v32  ;;  %v6388_v27 = vadd.f32 %v6314_v53, %v11283_v38  ;;  %v11288_v32 = vld [vmem:[#allocation95_spill] sm:$0xff]  ;;  %v11289_v55 = vld [vmem:[#allocation98_spill] sm:$0xff] }
 0x43c   : > { %v6180_v31 = vpop.f32.mrf.mxu1 }
 0x43d   : > { %v6389_v60 = vadd.f32 %v6315_v51, %v11282_v57  ;;  %v6316_v41 = vmul.f32 %v6180_v31, %v5782_v49 }
 0x43e   : > { %v6184_v7 = vpop.f32.mrf.mxu1 }
 0x43f   : > { %v6441_v40 = vpack.c.bf16 %v6389_v60, %v6387_v30  ;;  %v6390_v4 = vadd.f32 %v6316_v41, %v10324_v10  ;;  %v5786_v47 = vpop.f32.mrf.mxu0 }
 0x440   : > { %v6186_v29 = vpop.f32.mrf.mxu1  ;;  %v6317_v9 = vmul.f32 %v6184_v7, %v5786_v47 }
 0x441   : > { %v5788_v17 = vpop.f32.mrf.mxu0  ;;  %v6442_v13 = vpack.c.bf16 %v6390_v4, %v6388_v27  ;;  %v11290_v4 = vld [vmem:[#allocation57_spill] sm:$0xff] }
 0x442   : > { %v6318_v59 = vmul.f32 %v6186_v29, %v5788_v17  ;;  %v6391_v37 = vadd.f32 %v6317_v9, %v10330_v33  ;;  %v11291_v17 = vld [vmem:[#allocation52_spill] sm:$0xff] }
 0x443   : > { %v5792_v25 = vpop.f32.mrf.mxu0  ;;  %6667 = vmatprep.mubr.bf16.mxu0 %v6442_v13 }
 0x444   : > { %6668 = vmatmul.mubr.bf16.gmra.mxu0 %v6441_v40  ;;  %v6392_v6 = vadd.f32 %v6318_v59, %v11285_v22 }
 0x445   : > { %v5794_v14 = vpop.f32.mrf.mxu0 }
 0x447   : > { %v5798_v8 = vpop.f32.mrf.mxu0 }
 0x448   : > { %v6190_v24 = vpop.f32.mrf.mxu1 }
 0x449   : > { %v6319_v50 = vmul.f32 %v6190_v24, %v5792_v25  ;;  %v5800_v46 = vpop.f32.mrf.mxu0  ;;  %v11292_v25 = vld [vmem:[#allocation53_spill] sm:$0xff] }
 0x44a   : > { %v6192_v63 = vpop.f32.mrf.mxu1 }
 0x44b   : > { %v6393_v35 = vadd.f32 %v6319_v50, %v11284_v36  ;;  %v6320_v10 = vmul.f32 %v6192_v63, %v5794_v14 }
 0x44c   : > { %v6196_v54 = vpop.f32.mrf.mxu1 }
 0x44d   : > { %v6443_v2 = vpack.c.bf16 %v6393_v35, %v6391_v37  ;;  %v6394_v26 = vadd.f32 %v6320_v10, %v11286_v21  ;;  %v6321_v3 = vmul.f32 %v6196_v54, %v5798_v8 }
 0x44e   : > { %v6198_v18 = vpop.f32.mrf.mxu1 }
 0x44f   : > { %v6444_v0 = vpack.c.bf16 %v6394_v26, %v6392_v6  ;;  %v6322_v52 = vmul.f32 %v6198_v18, %v5800_v46  ;;  %v6395_v44 = vadd.f32 %v6321_v3, %v10364_v19  ;;  %v11293_v18 = vld [vmem:[#allocation14_spill] sm:$0xff] }
 0x450   : > { %v6202_v42 = vpop.f32.mrf.mxu1 }
 0x451   : > { %v5804_v61 = vpop.f32.mrf.mxu0  ;;  %6675 = vmatprep.mubr.bf16.mxu0 %v6444_v0  ;;  %v6396_v28 = vadd.f32 %v6322_v52, %v11288_v32 }
 0x452   : > { %v6323_v58 = vmul.f32 %v6202_v42, %v5804_v61  ;;  %6676 = vmatmul.mubr.bf16.gmra.mxu0 %v6443_v2  ;;  %v6204_v33 = vpop.f32.mrf.mxu1  ;;  %v11294_v42 = vld [vmem:[#allocation101_spill] sm:$0xff] }
 0x453   : > { %v5806_v20 = vpop.f32.mrf.mxu0 }
 0x454   : > { %v6397_v56 = vadd.f32 %v6323_v58, %v11287_v12  ;;  %v6324_v23 = vmul.f32 %v6204_v33, %v5806_v20 }
 0x455   : > { %v5810_v34 = vpop.f32.mrf.mxu0 }
 0x456   : > { %v6445_v62 = vpack.c.bf16 %v6397_v56, %v6395_v44  ;;  %v6398_v49 = vadd.f32 %v6324_v23, %v11289_v55 }
 0x457   : > { %v5812_v53 = vpop.f32.mrf.mxu0 }
 0x458   : > { %v6446_v51 = vpack.c.bf16 %v6398_v49, %v6396_v28  ;;  %v11296_v49 = vld [vmem:[#allocation113_spill] sm:$0xff] }
 0x459   : > { %v5816_v30 = vpop.f32.mrf.mxu0 }
 0x45a   : > { %v6208_v31 = vpop.f32.mrf.mxu1  ;;  %6683 = vmatprep.mubr.bf16.mxu0 %v6446_v51 }
 0x45b   : > { %6684 = vmatmul.mubr.bf16.gmra.mxu0 %v6445_v62  ;;  %v6325_v60 = vmul.f32 %v6208_v31, %v5810_v34  ;;  %v5818_v38 = vpop.f32.mrf.mxu0  ;;  %v11295_v34 = vld [vmem:[#allocation59_spill] sm:$0xff] }
 0x45c   : > { %v6210_v57 = vpop.f32.mrf.mxu1  ;;  %v11297_v31 = vld [vmem:[#allocation71_spill] sm:$0xff] }
 0x45d   : > { %v6326_v19 = vmul.f32 %v6210_v57, %v5812_v53  ;;  %v6399_v47 = vadd.f32 %v6325_v60, %v11290_v4 }
 0x45e   : > { %v6214_v41 = vpop.f32.mrf.mxu1 }
 0x45f   : > { %v6327_v27 = vmul.f32 %v6214_v41, %v5816_v30  ;;  %v6400_v29 = vadd.f32 %v6326_v19, %v11292_v25 }
 0x460   : > { %v6216_v40 = vpop.f32.mrf.mxu1 }
 0x461   : > { %v6401_v13 = vadd.f32 %v6327_v27, %v11291_v17  ;;  %v6328_v7 = vmul.f32 %v6216_v40, %v5818_v38 }
 0x462   : > { %v6220_v8 = vpop.f32.mrf.mxu1 }
 0x463   : > { %v6447_v9 = vpack.c.bf16 %v6401_v13, %v6399_v47  ;;  %v6402_v14 = vadd.f32 %v6328_v7, %v10417_v48  ;;  %v5822_v24 = vpop.f32.mrf.mxu0  ;;  %v11298_v13 = vld [vmem:[#allocation16_spill] sm:$0xff] }
 0x464   : > { %v6222_v37 = vpop.f32.mrf.mxu1  ;;  %v6329_v36 = vmul.f32 %v6220_v8, %v5822_v24 }
 0x465   : > { %v5824_v59 = vpop.f32.mrf.mxu0  ;;  %v6448_v50 = vpack.c.bf16 %v6402_v14, %v6400_v29 }
 0x466   : > { %v6330_v10 = vmul.f32 %v6222_v37, %v5824_v59  ;;  %v6403_v2 = vadd.f32 %v6329_v36, %v10423_v5 }
 0x467   : > { %6691 = vmatprep.mubr.bf16.mxu0 %v6448_v50  ;;  %v5828_v63 = vpop.f32.mrf.mxu0 }
 0x468   : > { %6692 = vmatmul.mubr.bf16.gmra.mxu0 %v6447_v9  ;;  %v6404_v0 = vadd.f32 %v6330_v10, %v11293_v18  ;;  %v11299_v9 = vld [vmem:[#allocation104_spill] sm:$0xff] }
 0x469   : > { %v5830_v54 = vpop.f32.mrf.mxu0 }
 0x46b   : > { %v5834_v26 = vpop.f32.mrf.mxu0 }
 0x46c   : > { %v6226_v35 = vpop.f32.mrf.mxu1 }
 0x46d   : > { %v6331_v22 = vmul.f32 %v6226_v35, %v5828_v63  ;;  %v5836_v58 = vpop.f32.mrf.mxu0 }
 0x46e   : > { %v6228_v6 = vpop.f32.mrf.mxu1 }
 0x46f   : > { %v6405_v21 = vadd.f32 %v6331_v22, %v10436_v16  ;;  %v6332_v48 = vmul.f32 %v6228_v6, %v5830_v54 }
 0x470   : > { %v6232_v46 = vpop.f32.mrf.mxu1 }
 0x471   : > { %v6449_v3 = vpack.c.bf16 %v6405_v21, %v6403_v2  ;;  %v6406_v61 = vadd.f32 %v6332_v48, %v11294_v42  ;;  %v6333_v20 = vmul.f32 %v6232_v46, %v5834_v26 }
 0x472   : > { %v6234_v52 = vpop.f32.mrf.mxu1 }
 0x473   : > { %v6450_v33 = vpack.c.bf16 %v6406_v61, %v6404_v0  ;;  %v6334_v56 = vmul.f32 %v6234_v52, %v5836_v58  ;;  %v6407_v32 = vadd.f32 %v6333_v20, %v11295_v34  ;;  %v11300_v52 = vld [vmem:[#allocation54_spill] sm:$0xff] }
 0x474   : > { %v6238_v44 = vpop.f32.mrf.mxu1 }
 0x475   : > { %v5840_v12 = vpop.f32.mrf.mxu0  ;;  %6699 = vmatprep.mubr.bf16.mxu0 %v6450_v33  ;;  %v6408_v53 = vadd.f32 %v6334_v56, %v11296_v49 }
 0x476   : > { %v6335_v23 = vmul.f32 %v6238_v44, %v5840_v12  ;;  %6700 = vmatmul.mubr.bf16.gmra.mxu0 %v6449_v3  ;;  %v6240_v5 = vpop.f32.mrf.mxu1 }
 0x477   : > { %v5842_v16 = vpop.f32.mrf.mxu0 }
 0x478   : > { %v6409_v28 = vadd.f32 %v6335_v23, %v10469_v1  ;;  %v6336_v62 = vmul.f32 %v6240_v5, %v5842_v16  ;;  %v11301_v23 = vld [vmem:[#allocation115_spill] sm:$0xff] }
 0x479   : > { %v5846_v55 = vpop.f32.mrf.mxu0 }
 0x47a   : > { %v6451_v51 = vpack.c.bf16 %v6409_v28, %v6407_v32  ;;  %v6410_v30 = vadd.f32 %v6336_v62, %v11297_v31  ;;  %v11302_v32 = vld [vmem:[#allocation60_spill] sm:$0xff] }
 0x47b   : > { %v5848_v57 = vpop.f32.mrf.mxu0 }
 0x47c   : > { %v6452_v60 = vpack.c.bf16 %v6410_v30, %v6408_v53 }
 0x47d   : > { %v5852_v38 = vpop.f32.mrf.mxu0 }
 0x47e   : > { %v6244_v41 = vpop.f32.mrf.mxu1  ;;  %6707 = vmatprep.mubr.bf16.mxu0 %v6452_v60 }
 0x47f   : > { %6708 = vmatmul.mubr.bf16.gmra.mxu0 %v6451_v51  ;;  %v6337_v27 = vmul.f32 %v6244_v41, %v5846_v55  ;;  %v5854_v4 = vpop.f32.mrf.mxu0 }
 0x480   : > { %v6246_v19 = vpop.f32.mrf.mxu1 }
 0x481   : > { %v6338_v47 = vmul.f32 %v6246_v19, %v5848_v57  ;;  %v6411_v7 = vadd.f32 %v6337_v27, %v11298_v13 }
 0x482   : > { %v6250_v40 = vpop.f32.mrf.mxu1 }
 0x483   : > { %v6339_v17 = vmul.f32 %v6250_v40, %v5852_v38  ;;  %v6412_v14 = vadd.f32 %v6338_v47, %v11299_v9 }
 0x484   : > { %v6252_v1 = vpop.f32.mrf.mxu1 }
 0x485   : > { %v6413_v25 = vadd.f32 %v6339_v17, %v10502_v45  ;;  %v6340_v29 = vmul.f32 %v6252_v1, %v5854_v4 }
 0x486   : > { %v6256_v37 = vpop.f32.mrf.mxu1 }
 0x487   : > { %v6453_v24 = vpack.c.bf16 %v6413_v25, %v6411_v7  ;;  %v6414_v59 = vadd.f32 %v6340_v29, %v10508_v43  ;;  %v5858_v50 = vpop.f32.mrf.mxu0 }
 0x488   : > { %v6258_v10 = vpop.f32.mrf.mxu1  ;;  %v6341_v54 = vmul.f32 %v6256_v37, %v5858_v50 }
 0x489   : > { %v5860_v8 = vpop.f32.mrf.mxu0  ;;  %v6454_v63 = vpack.c.bf16 %v6414_v59, %v6412_v14 }
 0x48a   : > { %v6342_v45 = vmul.f32 %v6258_v10, %v5860_v8  ;;  %v6415_v48 = vadd.f32 %v6341_v54, %v10514_v39 }
 0x48b   : > { %v5864_v36 = vpop.f32.mrf.mxu0  ;;  %6715 = vmatprep.mubr.bf16.mxu0 %v6454_v63 }
 0x48c   : > { %6716 = vmatmul.mubr.bf16.gmra.mxu0 %v6453_v24  ;;  %v6416_v42 = vadd.f32 %v6342_v45, %v10523_v15 }
 0x48d   : > { %v5866_v35 = vpop.f32.mrf.mxu0 }
 0x48f   : > { %v5870_v22 = vpop.f32.mrf.mxu0 }
 0x490   : > { %v6262_v6 = vpop.f32.mrf.mxu1 }
 0x491   : > { %v6343_v2 = vmul.f32 %v6262_v6, %v5864_v36  ;;  %v5872_v21 = vpop.f32.mrf.mxu0 }
 0x492   : > { %v6264_v26 = vpop.f32.mrf.mxu1 }
 0x493   : > { %v6417_v43 = vadd.f32 %v6343_v2, %v10527_v11  ;;  %v6344_v46 = vmul.f32 %v6264_v26, %v5866_v35  ;;  %v6589_v18 = vpop.f32.mrf.mxu0 }
 0x494   : > { %v6739_v0 = vmul.f32 0.25, %v6589_v18  ;;  %v6268_v3 = vpop.f32.mrf.mxu1 }
 0x495   : > { %v6455_v61 = vpack.c.bf16 %v6417_v43, %v6415_v48  ;;  %v6418_v39 = vadd.f32 %v6344_v46, %v11300_v52  ;;  %v6591_v58 = vpop.f32.mrf.mxu0  ;;  %v6345_v12 = vmul.f32 %v6268_v3, %v5870_v22 }
 0x496   : > { %6777 = vst.msk [vmem:[%s10704_s11] sm:$0xff] %vm6776_vm1, %v6739_v0  ;;  %v6270_v11 = vpop.f32.mrf.mxu1 }
 0x497   : > { %v6346_v33 = vmul.f32 %v6270_v11, %v5872_v21  ;;  %v6592_v20 = vpop.f32.mrf.mxu0  ;;  %v6456_v44 = vpack.c.bf16 %v6418_v39, %v6416_v42  ;;  %v6419_v28 = vadd.f32 %v6345_v12, %v11302_v32 }
 0x498   : > { %v6740_v56 = vmul.f32 0.25, %v6592_v20 }
 0x499   : > { %v6420_v5 = vadd.f32 %v6346_v33, %v11301_v23  ;;  %v6594_v16 = vpop.f32.mrf.mxu0  ;;  %6723 = vmatprep.mubr.bf16.mxu0 %v6456_v44  ;;  %v6457_v53 = vpack.c.bf16 %v6419_v28, %v6419_v28 }
 0x49a   : > { %6778 = vst.msk [vmem:[%s10704_s11 + $0x8] sm:$0xff] %vm6776_vm1, %v6740_v56  ;;  %6724 = vmatmul.mubr.bf16.gmra.mxu0 %v6455_v61 }
 0x49b   : > { %v6458_v15 = vpack.c.bf16 %v6420_v5, %v6420_v5  ;;  %v6597_v34 = vpop.f32.mrf.mxu0 }
 0x49c   : > { %v6741_v62 = vmul.f32 0.25, %v6597_v34 }
 0x49d   : > { %v6599_v55 = vpop.f32.mrf.mxu0  ;;  %6731 = vmatprep.mubr.bf16.mxu0 %v6458_v15 }
 0x49e   : > { %6779 = vst.msk [vmem:[%s10704_s11 + $0x10] sm:$0xff] %vm6776_vm1, %v6741_v62 }
 0x49f   : > { %v6600_v49 = vpop.f32.mrf.mxu0 }
 0x4a0   : > { %v6742_v51 = vmul.f32 0.25, %v6600_v49 }
 0x4a1   : > { %v6602_v31 = vpop.f32.mrf.mxu0 }
 0x4a2   : > { %6780 = vst.msk [vmem:[%s10704_s11 + $0x18] sm:$0xff] %vm6776_vm1, %v6742_v51  ;;  %6732 = vmatmul.mubr.bf16.gmra.mxu0 %v6457_v53 }
 0x4a6   : > { %v6605_v30 = vpop.f32.mrf.mxu0 }
 0x4a7   : > { %v6743_v57 = vmul.f32 0.25, %v6605_v30 }
 0x4a8   : > { %v6607_v60 = vpop.f32.mrf.mxu0 }
 0x4a9   : > { %6781 = vst.msk [vmem:[%s10704_s11 + $0x20] sm:$0xff] %vm6776_vm1, %v6743_v57 }
 0x4aa   : > { %v6608_v41 = vpop.f32.mrf.mxu0 }
 0x4ab   : > { %v6744_v38 = vmul.f32 0.25, %v6608_v41 }
 0x4ac   : > { %v6610_v19 = vpop.f32.mrf.mxu0 }
 0x4ad   : > { %6782 = vst.msk [vmem:[%s10704_s11 + $0x28] sm:$0xff] %vm6776_vm1, %v6744_v38 }
 0x4af   : > { %v6613_v27 = vpop.f32.mrf.mxu0 }
 0x4b0   : > { %v6745_v40 = vmul.f32 0.25, %v6613_v27 }
 0x4b1   : > { %v6615_v4 = vpop.f32.mrf.mxu0 }
 0x4b2   : > { %6783 = vst.msk [vmem:[%s10704_s11 + $0x30] sm:$0xff] %vm6776_vm1, %v6745_v40 }
 0x4b3   : > { %v6616_v47 = vpop.f32.mrf.mxu0 }
 0x4b4   : > { %v6746_v17 = vmul.f32 0.25, %v6616_v47 }
 0x4b5   : > { %v6618_v1 = vpop.f32.mrf.mxu0 }
 0x4b6   : > { %6784 = vst.msk [vmem:[%s10704_s11 + $0x38] sm:$0xff] %vm6776_vm1, %v6746_v17 }
 0x4bc   : > { %v6621_v13 = vpop.f32.mrf.mxu0 }
 0x4bd   : > { %v6747_v7 = vmul.f32 0.25, %v6621_v13 }
 0x4be   : > { %v6623_v25 = vpop.f32.mrf.mxu0 }
 0x4bf   : > { %6785 = vst.msk [vmem:[%s10704_s11 + $0x40] sm:$0xff] %vm6776_vm1, %v6747_v7 }
 0x4c0   : > { %v6624_v29 = vpop.f32.mrf.mxu0 }
 0x4c1   : > { %v6748_v9 = vmul.f32 0.25, %v6624_v29 }
 0x4c2   : > { %v6626_v14 = vpop.f32.mrf.mxu0 }
 0x4c3   : > { %6786 = vst.msk [vmem:[%s10704_s11 + $0x48] sm:$0xff] %vm6776_vm1, %v6748_v9 }
 0x4ca   : > { %v6629_v24 = vpop.f32.mrf.mxu0 }
 0x4cb   : > { %v6749_v59 = vmul.f32 0.25, %v6629_v24 }
 0x4cc   : > { %v6631_v50 = vpop.f32.mrf.mxu0 }
 0x4cd   : > { %6787 = vst.msk [vmem:[%s10704_s11 + $0x50] sm:$0xff] %vm6776_vm1, %v6749_v59 }
 0x4ce   : > { %v6632_v8 = vpop.f32.mrf.mxu0 }
 0x4cf   : > { %v6750_v63 = vmul.f32 0.25, %v6632_v8 }
 0x4d0   : > { %v6634_v37 = vpop.f32.mrf.mxu0 }
 0x4d1   : > { %6788 = vst.msk [vmem:[%s10704_s11 + $0x58] sm:$0xff] %vm6776_vm1, %v6750_v63 }
 0x4d3   : > { %v6637_v36 = vpop.f32.mrf.mxu0 }
 0x4d4   : > { %v6751_v35 = vmul.f32 0.25, %v6637_v36 }
 0x4d5   : > { %v6639_v10 = vpop.f32.mrf.mxu0 }
 0x4d6   : > { %6789 = vst.msk [vmem:[%s10704_s11 + $0x60] sm:$0xff] %vm6776_vm1, %v6751_v35 }
 0x4d7   : > { %v6640_v54 = vpop.f32.mrf.mxu0 }
 0x4d8   : > { %v6752_v22 = vmul.f32 0.25, %v6640_v54 }
 0x4d9   : > { %v6642_v6 = vpop.f32.mrf.mxu0 }
 0x4da   : > { %6790 = vst.msk [vmem:[%s10704_s11 + $0x68] sm:$0xff] %vm6776_vm1, %v6752_v22 }
 0x4e0   : > { %v6645_v45 = vpop.f32.mrf.mxu0 }
 0x4e1   : > { %v6753_v2 = vmul.f32 0.25, %v6645_v45 }
 0x4e2   : > { %v6647_v21 = vpop.f32.mrf.mxu0 }
 0x4e3   : > { %6791 = vst.msk [vmem:[%s10704_s11 + $0x70] sm:$0xff] %vm6776_vm1, %v6753_v2 }
 0x4e4   : > { %v6648_v26 = vpop.f32.mrf.mxu0 }
 0x4e5   : > { %v6754_v48 = vmul.f32 0.25, %v6648_v26 }
 0x4e6   : > { %v6650_v43 = vpop.f32.mrf.mxu0 }
 0x4e7   : > { %6792 = vst.msk [vmem:[%s10704_s11 + $0x78] sm:$0xff] %vm6776_vm1, %v6754_v48 }
 0x4ee   : > { %v6653_v46 = vpop.f32.mrf.mxu0 }
 0x4ef   : > { %v6755_v18 = vmul.f32 0.25, %v6653_v46 }
 0x4f0   : > { %v6655_v0 = vpop.f32.mrf.mxu0 }
 0x4f1   : > { %6793 = vst.msk [vmem:[%s10704_s11 + $0x80] sm:$0xff] %vm6776_vm1, %v6755_v18 }
 0x4f2   : > { %v6656_v3 = vpop.f32.mrf.mxu0 }
 0x4f3   : > { %v6756_v42 = vmul.f32 0.25, %v6656_v3 }
 0x4f4   : > { %v6658_v61 = vpop.f32.mrf.mxu0 }
 0x4f5   : > { %6794 = vst.msk [vmem:[%s10704_s11 + $0x88] sm:$0xff] %vm6776_vm1, %v6756_v42 }
 0x4f7   : > { %v6661_v52 = vpop.f32.mrf.mxu0 }
 0x4f8   : > { %v6757_v39 = vmul.f32 0.25, %v6661_v52 }
 0x4f9   : > { %v6663_v58 = vpop.f32.mrf.mxu0 }
 0x4fa   : > { %6795 = vst.msk [vmem:[%s10704_s11 + $0x90] sm:$0xff] %vm6776_vm1, %v6757_v39 }
 0x4fb   : > { %v6664_v11 = vpop.f32.mrf.mxu0 }
 0x4fc   : > { %v6758_v33 = vmul.f32 0.25, %v6664_v11 }
 0x4fd   : > { %v6666_v20 = vpop.f32.mrf.mxu0 }
 0x4fe   : > { %6796 = vst.msk [vmem:[%s10704_s11 + $0x98] sm:$0xff] %vm6776_vm1, %v6758_v33 }
 0x504   : > { %v6669_v44 = vpop.f32.mrf.mxu0 }
 0x505   : > { %v6759_v12 = vmul.f32 0.25, %v6669_v44 }
 0x506   : > { %v6671_v56 = vpop.f32.mrf.mxu0 }
 0x507   : > { %6797 = vst.msk [vmem:[%s10704_s11 + $0xa0] sm:$0xff] %vm6776_vm1, %v6759_v12 }
 0x508   : > { %v6672_v23 = vpop.f32.mrf.mxu0 }
 0x509   : > { %v6760_v5 = vmul.f32 0.25, %v6672_v23 }
 0x50a   : > { %v6674_v16 = vpop.f32.mrf.mxu0 }
 0x50b   : > { %6798 = vst.msk [vmem:[%s10704_s11 + $0xa8] sm:$0xff] %vm6776_vm1, %v6760_v5 }
 0x512   : > { %v6677_v15 = vpop.f32.mrf.mxu0 }
 0x513   : > { %v6761_v34 = vmul.f32 0.25, %v6677_v15 }
 0x514   : > { %v6679_v32 = vpop.f32.mrf.mxu0 }
 0x515   : > { %6799 = vst.msk [vmem:[%s10704_s11 + $0xb0] sm:$0xff] %vm6776_vm1, %v6761_v34 }
 0x516   : > { %v6680_v28 = vpop.f32.mrf.mxu0 }
 0x517   : > { %v6762_v62 = vmul.f32 0.25, %v6680_v28 }
 0x518   : > { %v6682_v55 = vpop.f32.mrf.mxu0 }
 0x519   : > { %6800 = vst.msk [vmem:[%s10704_s11 + $0xb8] sm:$0xff] %vm6776_vm1, %v6762_v62 }
 0x51b   : > { %v6685_v49 = vpop.f32.mrf.mxu0 }
 0x51c   : > { %v6763_v53 = vmul.f32 0.25, %v6685_v49 }
 0x51d   : > { %v6687_v51 = vpop.f32.mrf.mxu0 }
 0x51e   : > { %6801 = vst.msk [vmem:[%s10704_s11 + $0xc0] sm:$0xff] %vm6776_vm1, %v6763_v53 }
 0x51f   : > { %v6688_v31 = vpop.f32.mrf.mxu0 }
 0x520   : > { %v6764_v30 = vmul.f32 0.25, %v6688_v31 }
 0x521   : > { %v6690_v57 = vpop.f32.mrf.mxu0 }
 0x522   : > { %6802 = vst.msk [vmem:[%s10704_s11 + $0xc8] sm:$0xff] %vm6776_vm1, %v6764_v30 }
 0x528   : > { %v6693_v60 = vpop.f32.mrf.mxu0 }
 0x529   : > { %v6765_v41 = vmul.f32 0.25, %v6693_v60 }
 0x52a   : > { %v6695_v38 = vpop.f32.mrf.mxu0 }
 0x52b   : > { %6803 = vst.msk [vmem:[%s10704_s11 + $0xd0] sm:$0xff] %vm6776_vm1, %v6765_v41 }
 0x52c   : > { %v6696_v19 = vpop.f32.mrf.mxu0 }
 0x52d   : > { %v6766_v27 = vmul.f32 0.25, %v6696_v19 }
 0x52e   : > { %v6698_v40 = vpop.f32.mrf.mxu0 }
 0x52f   : > { %6804 = vst.msk [vmem:[%s10704_s11 + $0xd8] sm:$0xff] %vm6776_vm1, %v6766_v27 }
 0x536   : > { %v6701_v4 = vpop.f32.mrf.mxu0 }
 0x537   : > { %v6767_v47 = vmul.f32 0.25, %v6701_v4 }
 0x538   : > { %v6703_v17 = vpop.f32.mrf.mxu0 }
 0x539   : > { %6805 = vst.msk [vmem:[%s10704_s11 + $0xe0] sm:$0xff] %vm6776_vm1, %v6767_v47 }
 0x53a   : > { %v6704_v1 = vpop.f32.mrf.mxu0 }
 0x53b   : > { %v6768_v13 = vmul.f32 0.25, %v6704_v1 }
 0x53c   : > { %v6706_v7 = vpop.f32.mrf.mxu0 }
 0x53d   : > { %6806 = vst.msk [vmem:[%s10704_s11 + $0xe8] sm:$0xff] %vm6776_vm1, %v6768_v13 }
 0x53f   : > { %v6709_v25 = vpop.f32.mrf.mxu0 }
 0x540   : > { %v6769_v29 = vmul.f32 0.25, %v6709_v25 }
 0x541   : > { %v6711_v9 = vpop.f32.mrf.mxu0 }
 0x542   : > { %6807 = vst.msk [vmem:[%s10704_s11 + $0xf0] sm:$0xff] %vm6776_vm1, %v6769_v29 }
 0x543   : > { %v6712_v14 = vpop.f32.mrf.mxu0 }
 0x544   : > { %v6770_v24 = vmul.f32 0.25, %v6712_v14 }
 0x545   : > { %v6714_v59 = vpop.f32.mrf.mxu0 }
 0x546   : > { %6808 = vst.msk [vmem:[%s10704_s11 + $0xf8] sm:$0xff] %vm6776_vm1, %v6770_v24 }
 0x54c   : > { %v6717_v50 = vpop.f32.mrf.mxu0 }
 0x54d   : > { %v6771_v8 = vmul.f32 0.25, %v6717_v50 }
 0x54e   : > { %v6719_v63 = vpop.f32.mrf.mxu0 }
 0x54f   : > { %6809 = vst.msk [vmem:[%s10704_s11 + $0x100] sm:$0xff] %vm6776_vm1, %v6771_v8 }
 0x550   : > { %v6720_v37 = vpop.f32.mrf.mxu0 }
 0x551   : > { %v6772_v36 = vmul.f32 0.25, %v6720_v37 }
 0x552   : > { %v6722_v35 = vpop.f32.mrf.mxu0 }
 0x553   : > { %6810 = vst.msk [vmem:[%s10704_s11 + $0x108] sm:$0xff] %vm6776_vm1, %v6772_v36 }
 0x55a   : > { %v6725_v10 = vpop.f32.mrf.mxu0 }
 0x55b   : > { %v6773_v54 = vmul.f32 0.25, %v6725_v10 }
 0x55c   : > { %v6727_v22 = vpop.f32.mrf.mxu0 }
 0x55d   : > { %6811 = vst.msk [vmem:[%s10704_s11 + $0x110] sm:$0xff] %vm6776_vm1, %v6773_v54 }
 0x55e   : > { %v6728_v6 = vpop.f32.mrf.mxu0 }
 0x55f   : > { %v6774_v45 = vmul.f32 0.25, %v6728_v6 }
 0x560   : > { %v6730_v2 = vpop.f32.mrf.mxu0 }
 0x561   : > { %6812 = vst.msk [vmem:[%s10704_s11 + $0x118] sm:$0xff] %vm6776_vm1, %v6774_v45 }
 0x562   : > { %v6733_v21 = vpop.f32.mrf.mxu0 }
 0x563   : > { %v6775_v26 = vmul.f32 0.25, %v6733_v21 }
 0x564   : > { %v6735_v48 = vpop.f32.mrf.mxu0 }
 0x565   : > { %6814 = vst.msk [vmem:[%s10704_s11 + $0x120] sm:$0x3f] %vm6813_vm2, %v6775_v26 }
 0x566   : > { %v6736_v43 = vpop.f32.mrf.mxu0 }
 0x568   : > { %v6737_v46 = vpop.f32.mrf.mxu0 }
 0x569 PF: > { %s21_s23 = sadd.s32 1, %s7502_s23  }
 0x56a   : > { %p18_p10 = scmp.ge.s32.totalorder %s21_s23, 5  }
 0x56c   :  { %20 = sbr.rel (!%p18_p10) target bundleno = 16 (0x10), region = 69 }

</bundles_post_ra>
